<compile_context>
chip_gen: v6e
topology: v6e:2x2x1
jax: 0.10.0
libtpu: 0.0.40
codegen_flags: <defaults>
</compile_context>

<pallas_src>
import jax
import jax.numpy as jnp
from jax import lax
from jax.experimental import pallas as pl
from jax.experimental.pallas import tpu as pltpu

KH, KW = 5, 5
PAD = 2
EPS = 1e-5
LANE = 128
MAX_BLOCK_C = 896  # 7 * 128: keeps >=2 grid steps for large-C layers


def dwconv_bn_kernel(x_ref, w_ref, g_ref, b_ref, o_ref, xp_ref):
    # x_ref : (N, H, W, BC)       one channel block of the (unpadded) input
    # w_ref : (5, 5, BC)          depthwise taps for this channel block
    # g_ref, b_ref : (1, BC)      BatchNorm affine gamma / beta
    # o_ref : (N, H, W, BC)
    # xp_ref: (N, H+4, W+4, BC)   VMEM scratch for the zero-padded block
    N, H, W, BC = o_ref.shape

    # Fold the zero padding into the kernel: zero the scratch, then copy the
    # block into its interior.  Re-zeroing every grid step keeps the kernel
    # correct under megacore sharding of the channel-block axis and costs the
    # same number of (unmasked) vreg stores as a halo-only zero would.
    xp_ref[...] = jnp.zeros_like(xp_ref)
    xp_ref[:, PAD:PAD + H, PAD:PAD + W, :] = x_ref[...]

    # Depthwise 5x5 conv = 25 shifted multiply-accumulates.  The kw slice is a
    # sublane shift (XLU relayout) so it is hoisted out and done only 5 times;
    # the kh slice is along an untiled axis and only selects vregs.
    acc = jnp.zeros((N, H, W, BC), jnp.float32)
    for kw in range(KW):
        x_kw = xp_ref[:, :, kw:kw + W, :]                    # (N, H+4, W, BC)
        for kh in range(KH):
            tap = w_ref[kh, kw, :]                           # (BC,)
            acc = acc + (x_kw[:, kh:kh + H, :, :] * tap).astype(jnp.float32)

    # Training-mode BatchNorm over (N, H, W) per channel, single pass, with
    # normalization fused into one per-channel scale and shift.
    cnt = jnp.float32(N * H * W)
    s1 = jnp.sum(acc, axis=(0, 1, 2), keepdims=True)         # (1,1,1,BC)
    s2 = jnp.sum(acc * acc, axis=(0, 1, 2), keepdims=True)   # (1,1,1,BC)
    mean = s1 / cnt
    var = s2 / cnt - mean * mean
    inv = lax.rsqrt(var + EPS)
    gamma = g_ref[0, :].astype(jnp.float32)
    beta = b_ref[0, :].astype(jnp.float32)
    scale = inv * gamma                                      # (1,1,1,BC)
    shift = beta - mean * scale                              # (1,1,1,BC)
    o_ref[...] = (acc * scale + shift).astype(o_ref.dtype)


def _round_up(x, m):
    return (x + m - 1) // m * m


def _pick_block_c(N, C, H, W, itemsize):
    """Largest lane-aligned channel block under a conservative VMEM budget."""
    per_c = (2 * N * H * W * itemsize                      # input, 2 buffers
             + 2 * N * H * W * 4                           # f32 out, 2 buffers
             + N * (H + 2 * PAD) * (W + 2 * PAD) * itemsize  # padded scratch
             + N * H * W * 4)                              # f32 accumulator
    budget = 10 * 1024 * 1024                              # fits v5e default
    fit_c = max(LANE, (budget // max(per_c, 1)) // LANE * LANE)
    return min(_round_up(C, LANE), MAX_BLOCK_C, fit_c)


def dwconv_bn(x_nchw, w_dw, gamma, beta, *, block_c=None,
              compute_dtype=jnp.float32):
    """Fused depthwise conv(5x5, pad=2, no bias) + train-mode BatchNorm2d.

    x_nchw: (N, C, H, W); w_dw: (C, 1, 5, 5); gamma/beta: (C,).
    compute_dtype=jnp.float32 is safe everywhere; jnp.bfloat16 is a valid
    MAC-path speedup on v6e/v7x (stats/normalization stay in f32); keep f32
    on v5e (no bf16 VALU).
    """
    N, C, H, W = x_nchw.shape
    itemsize = jnp.dtype(compute_dtype).itemsize
    if block_c is None:
        block_c = _pick_block_c(N, C, H, W, itemsize)
    assert block_c % LANE == 0
    n_blocks = pl.cdiv(C, block_c)
    Cp = n_blocks * block_c
    c_pad = Cp - C

    # NCHW -> NHWC (channels on the 128-wide lane axis).  In a real pipeline
    # keep the surrounding graph in NHWC so these transposes disappear.
    x_nhwc = jnp.transpose(x_nchw, (0, 2, 3, 1)).astype(compute_dtype)
    w_hwc = jnp.transpose(w_dw[:, 0, :, :], (1, 2, 0)).astype(compute_dtype)
    g = gamma.astype(jnp.float32)
    b = beta.astype(jnp.float32)
    if c_pad:
        # Pad channels so every grid step is a full, lane-dense block.
        x_nhwc = jnp.pad(x_nhwc, ((0, 0), (0, 0), (0, 0), (0, c_pad)))
        w_hwc = jnp.pad(w_hwc, ((0, 0), (0, 0), (0, c_pad)))
        g = jnp.pad(g, (0, c_pad))
        b = jnp.pad(b, (0, c_pad))
    g2 = g.reshape(1, Cp)
    b2 = b.reshape(1, Cp)

    out_nhwc = pl.pallas_call(
        dwconv_bn_kernel,
        out_shape=jax.ShapeDtypeStruct((N, H, W, Cp), jnp.float32),
        grid_spec=pltpu.PrefetchScalarGridSpec(
            num_scalar_prefetch=0,
            grid=(n_blocks,),
            in_specs=[
                pl.BlockSpec((N, H, W, block_c), lambda c: (0, 0, 0, c)),
                pl.BlockSpec((KH, KW, block_c), lambda c: (0, 0, c)),
                pl.BlockSpec((1, block_c), lambda c: (0, c)),
                pl.BlockSpec((1, block_c), lambda c: (0, c)),
            ],
            out_specs=pl.BlockSpec((N, H, W, block_c),
                                   lambda c: (0, 0, 0, c)),
            scratch_shapes=[
                pltpu.VMEM((N, H + 2 * PAD, W + 2 * PAD, block_c),
                           compute_dtype),
            ],
        ),
        compiler_params=pltpu.CompilerParams(
            dimension_semantics=("parallel",),
        ),
    )(x_nhwc, w_hwc, g2, b2)

    if c_pad:
        out_nhwc = out_nhwc[..., :C]
    return jnp.transpose(out_nhwc, (0, 3, 1, 2))


def reference(x_nchw, w_dw, gamma, beta):
    """Pure-JAX reference: depthwise conv + train-mode BatchNorm."""
    C = x_nchw.shape[1]
    conv = lax.conv_general_dilated(
        x_nchw, w_dw,
        window_strides=(1, 1),
        padding=((PAD, PAD), (PAD, PAD)),
        feature_group_count=C,
        dimension_numbers=("NCHW", "OIHW", "NCHW"),
    )
    mean = jnp.mean(conv, axis=(0, 2, 3), keepdims=True)
    var = jnp.mean((conv - mean) ** 2, axis=(0, 2, 3), keepdims=True)
    return (conv - mean) * lax.rsqrt(var + EPS) * gamma.reshape(1, C, 1, 1) \
        + beta.reshape(1, C, 1, 1)


if __name__ == "__main__":
    # Small shapes consistent with the module (original: [1, 1632, 7, 7]).
    # C=160 exercises both full 128-blocks and a channel-padded remainder.
    N, C, H, W = 2, 160, 7, 7
    key = jax.random.PRNGKey(0)
    kx, kwt, kg, kb = jax.random.split(key, 4)

    x = jax.random.normal(kx, (N, C, H, W), dtype=jnp.float32)
    # Depthwise Conv2d weight shape: (C, 1, 5, 5), no bias.
    w = jax.random.normal(kwt, (C, 1, KH, KW), dtype=jnp.float32) * 0.1
    # BatchNorm affine parameters (deterministic, nontrivial).
    gamma = 1.0 + 0.1 * jax.random.normal(kg, (C,), dtype=jnp.float32)
    beta = 0.1 * jax.random.normal(kb, (C,), dtype=jnp.float32)

    ref = jax.block_until_ready(reference(x, w, gamma, beta))

    # Auto block size (single grid step for this small C).
    out = jax.block_until_ready(dwconv_bn(x, w, gamma, beta))
    assert out.shape == (N, C, H, W)
    err = float(jnp.max(jnp.abs(out - ref)))
    assert err < 1e-3, f"mismatch vs reference (auto block): {err}"

    # Multi-block path: 2 grid steps including a padded remainder block.
    out2 = jax.block_until_ready(dwconv_bn(x, w, gamma, beta, block_c=128))
    err2 = float(jnp.max(jnp.abs(out2 - ref)))
    assert err2 < 1e-3, f"mismatch vs reference (block_c=128): {err2}"

    print("KERNEL_OK")
</pallas_src>

<mosaic_0001>
module attributes {stable_mosaic.version = 11 : i64} {
  func.func @dwconv_bn_kernel(%arg0: i32, %arg1: memref<2x7x7x256xf32, #tpu.memory_space<vmem>>, %arg2: memref<5x5x256xf32, #tpu.memory_space<vmem>>, %arg3: memref<1x256xf32, #tpu.memory_space<vmem>>, %arg4: memref<1x256xf32, #tpu.memory_space<vmem>>, %arg5: memref<2x7x7x256xf32, #tpu.memory_space<vmem>>, %arg6: memref<2x11x11x256xf32, #tpu.memory_space<vmem>>) attributes {dimension_semantics = [#tpu.dimension_semantics<parallel>], iteration_bounds = array<i64: 1>, scalar_prefetch = 0 : i64, scratch_operands = 1 : i64, tpu.core_type = #tpu.core_type<tc>, window_params = [{transform_indices = @transform_0, window_bounds = array<i64: 2, 7, 7, 256>}, {transform_indices = @transform_1, window_bounds = array<i64: 5, 5, 256>}, {transform_indices = @transform_2, window_bounds = array<i64: 1, 256>}, {transform_indices = @transform_3, window_bounds = array<i64: 1, 256>}, {transform_indices = @transform_4, window_bounds = array<i64: 2, 7, 7, 256>}]} {
    %cst = arith.constant 0.000000e+00 : f32
    %0 = vector.broadcast %cst : f32 to vector<2x11x11x256xf32>
    %c0 = arith.constant 0 : index
    %c0_0 = arith.constant 0 : index
    %c0_1 = arith.constant 0 : index
    %c0_2 = arith.constant 0 : index
    %1 = vector.load %arg6[%c0, %c0_0, %c0_1, %c0_2] : memref<2x11x11x256xf32, #tpu.memory_space<vmem>>, vector<2x11x11x256xf32>
    tpu.vector_store %arg6[%c0, %c0_0, %c0_1, %c0_2], %0 {strides = array<i32>} : memref<2x11x11x256xf32, #tpu.memory_space<vmem>>, vector<2x11x11x256xf32>,
    %c0_3 = arith.constant 0 : index
    %c0_4 = arith.constant 0 : index
    %c0_5 = arith.constant 0 : index
    %c0_6 = arith.constant 0 : index
    %2 = vector.load %arg1[%c0_3, %c0_4, %c0_5, %c0_6] : memref<2x7x7x256xf32, #tpu.memory_space<vmem>>, vector<2x7x7x256xf32>
    %c0_7 = arith.constant 0 : index
    %c2 = arith.constant 2 : index
    %c2_8 = arith.constant 2 : index
    %c0_9 = arith.constant 0 : index
    %3 = vector.load %arg6[%c0_7, %c2, %c2_8, %c0_9] : memref<2x11x11x256xf32, #tpu.memory_space<vmem>>, vector<2x7x7x256xf32>
    tpu.vector_store %arg6[%c0_7, %c2, %c2_8, %c0_9], %2 {strides = array<i32>} : memref<2x11x11x256xf32, #tpu.memory_space<vmem>>, vector<2x7x7x256xf32>,
    %cst_10 = arith.constant 0.000000e+00 : f32
    %4 = vector.broadcast %cst_10 : f32 to vector<2x7x7x256xf32>
    %c0_11 = arith.constant 0 : index
    %c0_12 = arith.constant 0 : index
    %c0_13 = arith.constant 0 : index
    %c0_14 = arith.constant 0 : index
    %5 = vector.load %arg6[%c0_11, %c0_12, %c0_13, %c0_14] : memref<2x11x11x256xf32, #tpu.memory_space<vmem>>, vector<2x11x7x256xf32>
    %c0_15 = arith.constant 0 : index
    %c0_16 = arith.constant 0 : index
    %c0_17 = arith.constant 0 : index
    %6 = vector.load %arg2[%c0_15, %c0_16, %c0_17] : memref<5x5x256xf32, #tpu.memory_space<vmem>>, vector<1x1x256xf32>
    %7 = vector.shape_cast %6 : vector<1x1x256xf32> to vector<256xf32>
    %8 = vector.extract_strided_slice %5 {offsets = [0, 0, 0, 0], sizes = [2, 7, 7, 256], strides = [1, 1, 1, 1]} : vector<2x11x7x256xf32> to vector<2x7x7x256xf32>
    %9 = vector.shape_cast %7 : vector<256xf32> to vector<1x1x1x256xf32>
    %10 = vector.broadcast %9 : vector<1x1x1x256xf32> to vector<2x7x7x256xf32>
    %11 = arith.mulf %8, %10 : vector<2x7x7x256xf32>
    %12 = arith.addf %4, %11 : vector<2x7x7x256xf32>
    %c1 = arith.constant 1 : index
    %c0_18 = arith.constant 0 : index
    %c0_19 = arith.constant 0 : index
    %13 = vector.load %arg2[%c1, %c0_18, %c0_19] : memref<5x5x256xf32, #tpu.memory_space<vmem>>, vector<1x1x256xf32>
    %14 = vector.shape_cast %13 : vector<1x1x256xf32> to vector<256xf32>
    %15 = vector.extract_strided_slice %5 {offsets = [0, 1, 0, 0], sizes = [2, 7, 7, 256], strides = [1, 1, 1, 1]} : vector<2x11x7x256xf32> to vector<2x7x7x256xf32>
    %16 = vector.shape_cast %14 : vector<256xf32> to vector<1x1x1x256xf32>
    %17 = vector.broadcast %16 : vector<1x1x1x256xf32> to vector<2x7x7x256xf32>
    %18 = arith.mulf %15, %17 : vector<2x7x7x256xf32>
    %19 = arith.addf %12, %18 : vector<2x7x7x256xf32>
    %c2_20 = arith.constant 2 : index
    %c0_21 = arith.constant 0 : index
    %c0_22 = arith.constant 0 : index
    %20 = vector.load %arg2[%c2_20, %c0_21, %c0_22] : memref<5x5x256xf32, #tpu.memory_space<vmem>>, vector<1x1x256xf32>
    %21 = vector.shape_cast %20 : vector<1x1x256xf32> to vector<256xf32>
    %22 = vector.extract_strided_slice %5 {offsets = [0, 2, 0, 0], sizes = [2, 7, 7, 256], strides = [1, 1, 1, 1]} : vector<2x11x7x256xf32> to vector<2x7x7x256xf32>
    %23 = vector.shape_cast %21 : vector<256xf32> to vector<1x1x1x256xf32>
    %24 = vector.broadcast %23 : vector<1x1x1x256xf32> to vector<2x7x7x256xf32>
    %25 = arith.mulf %22, %24 : vector<2x7x7x256xf32>
    %26 = arith.addf %19, %25 : vector<2x7x7x256xf32>
    %c3 = arith.constant 3 : index
    %c0_23 = arith.constant 0 : index
    %c0_24 = arith.constant 0 : index
    %27 = vector.load %arg2[%c3, %c0_23, %c0_24] : memref<5x5x256xf32, #tpu.memory_space<vmem>>, vector<1x1x256xf32>
    %28 = vector.shape_cast %27 : vector<1x1x256xf32> to vector<256xf32>
    %29 = vector.extract_strided_slice %5 {offsets = [0, 3, 0, 0], sizes = [2, 7, 7, 256], strides = [1, 1, 1, 1]} : vector<2x11x7x256xf32> to vector<2x7x7x256xf32>
    %30 = vector.shape_cast %28 : vector<256xf32> to vector<1x1x1x256xf32>
    %31 = vector.broadcast %30 : vector<1x1x1x256xf32> to vector<2x7x7x256xf32>
    %32 = arith.mulf %29, %31 : vector<2x7x7x256xf32>
    %33 = arith.addf %26, %32 : vector<2x7x7x256xf32>
    %c4 = arith.constant 4 : index
    %c0_25 = arith.constant 0 : index
    %c0_26 = arith.constant 0 : index
    %34 = vector.load %arg2[%c4, %c0_25, %c0_26] : memref<5x5x256xf32, #tpu.memory_space<vmem>>, vector<1x1x256xf32>
    %35 = vector.shape_cast %34 : vector<1x1x256xf32> to vector<256xf32>
    %36 = vector.extract_strided_slice %5 {offsets = [0, 4, 0, 0], sizes = [2, 7, 7, 256], strides = [1, 1, 1, 1]} : vector<2x11x7x256xf32> to vector<2x7x7x256xf32>
    %37 = vector.shape_cast %35 : vector<256xf32> to vector<1x1x1x256xf32>
    %38 = vector.broadcast %37 : vector<1x1x1x256xf32> to vector<2x7x7x256xf32>
    %39 = arith.mulf %36, %38 : vector<2x7x7x256xf32>
    %40 = arith.addf %33, %39 : vector<2x7x7x256xf32>
    %c0_27 = arith.constant 0 : index
    %c0_28 = arith.constant 0 : index
    %c1_29 = arith.constant 1 : index
    %c0_30 = arith.constant 0 : index
    %41 = vector.load %arg6[%c0_27, %c0_28, %c1_29, %c0_30] : memref<2x11x11x256xf32, #tpu.memory_space<vmem>>, vector<2x11x7x256xf32>
    %c0_31 = arith.constant 0 : index
    %c1_32 = arith.constant 1 : index
    %c0_33 = arith.constant 0 : index
    %42 = vector.load %arg2[%c0_31, %c1_32, %c0_33] : memref<5x5x256xf32, #tpu.memory_space<vmem>>, vector<1x1x256xf32>
    %43 = vector.shape_cast %42 : vector<1x1x256xf32> to vector<256xf32>
    %44 = vector.extract_strided_slice %41 {offsets = [0, 0, 0, 0], sizes = [2, 7, 7, 256], strides = [1, 1, 1, 1]} : vector<2x11x7x256xf32> to vector<2x7x7x256xf32>
    %45 = vector.shape_cast %43 : vector<256xf32> to vector<1x1x1x256xf32>
    %46 = vector.broadcast %45 : vector<1x1x1x256xf32> to vector<2x7x7x256xf32>
    %47 = arith.mulf %44, %46 : vector<2x7x7x256xf32>
    %48 = arith.addf %40, %47 : vector<2x7x7x256xf32>
    %c1_34 = arith.constant 1 : index
    %c1_35 = arith.constant 1 : index
    %c0_36 = arith.constant 0 : index
    %49 = vector.load %arg2[%c1_34, %c1_35, %c0_36] : memref<5x5x256xf32, #tpu.memory_space<vmem>>, vector<1x1x256xf32>
    %50 = vector.shape_cast %49 : vector<1x1x256xf32> to vector<256xf32>
    %51 = vector.extract_strided_slice %41 {offsets = [0, 1, 0, 0], sizes = [2, 7, 7, 256], strides = [1, 1, 1, 1]} : vector<2x11x7x256xf32> to vector<2x7x7x256xf32>
    %52 = vector.shape_cast %50 : vector<256xf32> to vector<1x1x1x256xf32>
    %53 = vector.broadcast %52 : vector<1x1x1x256xf32> to vector<2x7x7x256xf32>
    %54 = arith.mulf %51, %53 : vector<2x7x7x256xf32>
    %55 = arith.addf %48, %54 : vector<2x7x7x256xf32>
    %c2_37 = arith.constant 2 : index
    %c1_38 = arith.constant 1 : index
    %c0_39 = arith.constant 0 : index
    %56 = vector.load %arg2[%c2_37, %c1_38, %c0_39] : memref<5x5x256xf32, #tpu.memory_space<vmem>>, vector<1x1x256xf32>
    %57 = vector.shape_cast %56 : vector<1x1x256xf32> to vector<256xf32>
    %58 = vector.extract_strided_slice %41 {offsets = [0, 2, 0, 0], sizes = [2, 7, 7, 256], strides = [1, 1, 1, 1]} : vector<2x11x7x256xf32> to vector<2x7x7x256xf32>
    %59 = vector.shape_cast %57 : vector<256xf32> to vector<1x1x1x256xf32>
    %60 = vector.broadcast %59 : vector<1x1x1x256xf32> to vector<2x7x7x256xf32>
    %61 = arith.mulf %58, %60 : vector<2x7x7x256xf32>
    %62 = arith.addf %55, %61 : vector<2x7x7x256xf32>
    %c3_40 = arith.constant 3 : index
    %c1_41 = arith.constant 1 : index
    %c0_42 = arith.constant 0 : index
    %63 = vector.load %arg2[%c3_40, %c1_41, %c0_42] : memref<5x5x256xf32, #tpu.memory_space<vmem>>, vector<1x1x256xf32>
    %64 = vector.shape_cast %63 : vector<1x1x256xf32> to vector<256xf32>
    %65 = vector.extract_strided_slice %41 {offsets = [0, 3, 0, 0], sizes = [2, 7, 7, 256], strides = [1, 1, 1, 1]} : vector<2x11x7x256xf32> to vector<2x7x7x256xf32>
    %66 = vector.shape_cast %64 : vector<256xf32> to vector<1x1x1x256xf32>
    %67 = vector.broadcast %66 : vector<1x1x1x256xf32> to vector<2x7x7x256xf32>
    %68 = arith.mulf %65, %67 : vector<2x7x7x256xf32>
    %69 = arith.addf %62, %68 : vector<2x7x7x256xf32>
    %c4_43 = arith.constant 4 : index
    %c1_44 = arith.constant 1 : index
    %c0_45 = arith.constant 0 : index
    %70 = vector.load %arg2[%c4_43, %c1_44, %c0_45] : memref<5x5x256xf32, #tpu.memory_space<vmem>>, vector<1x1x256xf32>
    %71 = vector.shape_cast %70 : vector<1x1x256xf32> to vector<256xf32>
    %72 = vector.extract_strided_slice %41 {offsets = [0, 4, 0, 0], sizes = [2, 7, 7, 256], strides = [1, 1, 1, 1]} : vector<2x11x7x256xf32> to vector<2x7x7x256xf32>
    %73 = vector.shape_cast %71 : vector<256xf32> to vector<1x1x1x256xf32>
    %74 = vector.broadcast %73 : vector<1x1x1x256xf32> to vector<2x7x7x256xf32>
    %75 = arith.mulf %72, %74 : vector<2x7x7x256xf32>
    %76 = arith.addf %69, %75 : vector<2x7x7x256xf32>
    %c0_46 = arith.constant 0 : index
    %c0_47 = arith.constant 0 : index
    %c2_48 = arith.constant 2 : index
    %c0_49 = arith.constant 0 : index
    %77 = vector.load %arg6[%c0_46, %c0_47, %c2_48, %c0_49] : memref<2x11x11x256xf32, #tpu.memory_space<vmem>>, vector<2x11x7x256xf32>
    %c0_50 = arith.constant 0 : index
    %c2_51 = arith.constant 2 : index
    %c0_52 = arith.constant 0 : index
    %78 = vector.load %arg2[%c0_50, %c2_51, %c0_52] : memref<5x5x256xf32, #tpu.memory_space<vmem>>, vector<1x1x256xf32>
    %79 = vector.shape_cast %78 : vector<1x1x256xf32> to vector<256xf32>
    %80 = vector.extract_strided_slice %77 {offsets = [0, 0, 0, 0], sizes = [2, 7, 7, 256], strides = [1, 1, 1, 1]} : vector<2x11x7x256xf32> to vector<2x7x7x256xf32>
    %81 = vector.shape_cast %79 : vector<256xf32> to vector<1x1x1x256xf32>
    %82 = vector.broadcast %81 : vector<1x1x1x256xf32> to vector<2x7x7x256xf32>
    %83 = arith.mulf %80, %82 : vector<2x7x7x256xf32>
    %84 = arith.addf %76, %83 : vector<2x7x7x256xf32>
    %c1_53 = arith.constant 1 : index
    %c2_54 = arith.constant 2 : index
    %c0_55 = arith.constant 0 : index
    %85 = vector.load %arg2[%c1_53, %c2_54, %c0_55] : memref<5x5x256xf32, #tpu.memory_space<vmem>>, vector<1x1x256xf32>
    %86 = vector.shape_cast %85 : vector<1x1x256xf32> to vector<256xf32>
    %87 = vector.extract_strided_slice %77 {offsets = [0, 1, 0, 0], sizes = [2, 7, 7, 256], strides = [1, 1, 1, 1]} : vector<2x11x7x256xf32> to vector<2x7x7x256xf32>
    %88 = vector.shape_cast %86 : vector<256xf32> to vector<1x1x1x256xf32>
    %89 = vector.broadcast %88 : vector<1x1x1x256xf32> to vector<2x7x7x256xf32>
    %90 = arith.mulf %87, %89 : vector<2x7x7x256xf32>
    %91 = arith.addf %84, %90 : vector<2x7x7x256xf32>
    %c2_56 = arith.constant 2 : index
    %c2_57 = arith.constant 2 : index
    %c0_58 = arith.constant 0 : index
    %92 = vector.load %arg2[%c2_56, %c2_57, %c0_58] : memref<5x5x256xf32, #tpu.memory_space<vmem>>, vector<1x1x256xf32>
    %93 = vector.shape_cast %92 : vector<1x1x256xf32> to vector<256xf32>
    %94 = vector.extract_strided_slice %77 {offsets = [0, 2, 0, 0], sizes = [2, 7, 7, 256], strides = [1, 1, 1, 1]} : vector<2x11x7x256xf32> to vector<2x7x7x256xf32>
    %95 = vector.shape_cast %93 : vector<256xf32> to vector<1x1x1x256xf32>
    %96 = vector.broadcast %95 : vector<1x1x1x256xf32> to vector<2x7x7x256xf32>
    %97 = arith.mulf %94, %96 : vector<2x7x7x256xf32>
    %98 = arith.addf %91, %97 : vector<2x7x7x256xf32>
    %c3_59 = arith.constant 3 : index
    %c2_60 = arith.constant 2 : index
    %c0_61 = arith.constant 0 : index
    %99 = vector.load %arg2[%c3_59, %c2_60, %c0_61] : memref<5x5x256xf32, #tpu.memory_space<vmem>>, vector<1x1x256xf32>
    %100 = vector.shape_cast %99 : vector<1x1x256xf32> to vector<256xf32>
    %101 = vector.extract_strided_slice %77 {offsets = [0, 3, 0, 0], sizes = [2, 7, 7, 256], strides = [1, 1, 1, 1]} : vector<2x11x7x256xf32> to vector<2x7x7x256xf32>
    %102 = vector.shape_cast %100 : vector<256xf32> to vector<1x1x1x256xf32>
    %103 = vector.broadcast %102 : vector<1x1x1x256xf32> to vector<2x7x7x256xf32>
    %104 = arith.mulf %101, %103 : vector<2x7x7x256xf32>
    %105 = arith.addf %98, %104 : vector<2x7x7x256xf32>
    %c4_62 = arith.constant 4 : index
    %c2_63 = arith.constant 2 : index
    %c0_64 = arith.constant 0 : index
    %106 = vector.load %arg2[%c4_62, %c2_63, %c0_64] : memref<5x5x256xf32, #tpu.memory_space<vmem>>, vector<1x1x256xf32>
    %107 = vector.shape_cast %106 : vector<1x1x256xf32> to vector<256xf32>
    %108 = vector.extract_strided_slice %77 {offsets = [0, 4, 0, 0], sizes = [2, 7, 7, 256], strides = [1, 1, 1, 1]} : vector<2x11x7x256xf32> to vector<2x7x7x256xf32>
    %109 = vector.shape_cast %107 : vector<256xf32> to vector<1x1x1x256xf32>
    %110 = vector.broadcast %109 : vector<1x1x1x256xf32> to vector<2x7x7x256xf32>
    %111 = arith.mulf %108, %110 : vector<2x7x7x256xf32>
    %112 = arith.addf %105, %111 : vector<2x7x7x256xf32>
    %c0_65 = arith.constant 0 : index
    %c0_66 = arith.constant 0 : index
    %c3_67 = arith.constant 3 : index
    %c0_68 = arith.constant 0 : index
    %113 = vector.load %arg6[%c0_65, %c0_66, %c3_67, %c0_68] : memref<2x11x11x256xf32, #tpu.memory_space<vmem>>, vector<2x11x7x256xf32>
    %c0_69 = arith.constant 0 : index
    %c3_70 = arith.constant 3 : index
    %c0_71 = arith.constant 0 : index
    %114 = vector.load %arg2[%c0_69, %c3_70, %c0_71] : memref<5x5x256xf32, #tpu.memory_space<vmem>>, vector<1x1x256xf32>
    %115 = vector.shape_cast %114 : vector<1x1x256xf32> to vector<256xf32>
    %116 = vector.extract_strided_slice %113 {offsets = [0, 0, 0, 0], sizes = [2, 7, 7, 256], strides = [1, 1, 1, 1]} : vector<2x11x7x256xf32> to vector<2x7x7x256xf32>
    %117 = vector.shape_cast %115 : vector<256xf32> to vector<1x1x1x256xf32>
    %118 = vector.broadcast %117 : vector<1x1x1x256xf32> to vector<2x7x7x256xf32>
    %119 = arith.mulf %116, %118 : vector<2x7x7x256xf32>
    %120 = arith.addf %112, %119 : vector<2x7x7x256xf32>
    %c1_72 = arith.constant 1 : index
    %c3_73 = arith.constant 3 : index
    %c0_74 = arith.constant 0 : index
    %121 = vector.load %arg2[%c1_72, %c3_73, %c0_74] : memref<5x5x256xf32, #tpu.memory_space<vmem>>, vector<1x1x256xf32>
    %122 = vector.shape_cast %121 : vector<1x1x256xf32> to vector<256xf32>
    %123 = vector.extract_strided_slice %113 {offsets = [0, 1, 0, 0], sizes = [2, 7, 7, 256], strides = [1, 1, 1, 1]} : vector<2x11x7x256xf32> to vector<2x7x7x256xf32>
    %124 = vector.shape_cast %122 : vector<256xf32> to vector<1x1x1x256xf32>
    %125 = vector.broadcast %124 : vector<1x1x1x256xf32> to vector<2x7x7x256xf32>
    %126 = arith.mulf %123, %125 : vector<2x7x7x256xf32>
    %127 = arith.addf %120, %126 : vector<2x7x7x256xf32>
    %c2_75 = arith.constant 2 : index
    %c3_76 = arith.constant 3 : index
    %c0_77 = arith.constant 0 : index
    %128 = vector.load %arg2[%c2_75, %c3_76, %c0_77] : memref<5x5x256xf32, #tpu.memory_space<vmem>>, vector<1x1x256xf32>
    %129 = vector.shape_cast %128 : vector<1x1x256xf32> to vector<256xf32>
    %130 = vector.extract_strided_slice %113 {offsets = [0, 2, 0, 0], sizes = [2, 7, 7, 256], strides = [1, 1, 1, 1]} : vector<2x11x7x256xf32> to vector<2x7x7x256xf32>
    %131 = vector.shape_cast %129 : vector<256xf32> to vector<1x1x1x256xf32>
    %132 = vector.broadcast %131 : vector<1x1x1x256xf32> to vector<2x7x7x256xf32>
    %133 = arith.mulf %130, %132 : vector<2x7x7x256xf32>
    %134 = arith.addf %127, %133 : vector<2x7x7x256xf32>
    %c3_78 = arith.constant 3 : index
    %c3_79 = arith.constant 3 : index
    %c0_80 = arith.constant 0 : index
    %135 = vector.load %arg2[%c3_78, %c3_79, %c0_80] : memref<5x5x256xf32, #tpu.memory_space<vmem>>, vector<1x1x256xf32>
    %136 = vector.shape_cast %135 : vector<1x1x256xf32> to vector<256xf32>
    %137 = vector.extract_strided_slice %113 {offsets = [0, 3, 0, 0], sizes = [2, 7, 7, 256], strides = [1, 1, 1, 1]} : vector<2x11x7x256xf32> to vector<2x7x7x256xf32>
    %138 = vector.shape_cast %136 : vector<256xf32> to vector<1x1x1x256xf32>
    %139 = vector.broadcast %138 : vector<1x1x1x256xf32> to vector<2x7x7x256xf32>
    %140 = arith.mulf %137, %139 : vector<2x7x7x256xf32>
    %141 = arith.addf %134, %140 : vector<2x7x7x256xf32>
    %c4_81 = arith.constant 4 : index
    %c3_82 = arith.constant 3 : index
    %c0_83 = arith.constant 0 : index
    %142 = vector.load %arg2[%c4_81, %c3_82, %c0_83] : memref<5x5x256xf32, #tpu.memory_space<vmem>>, vector<1x1x256xf32>
    %143 = vector.shape_cast %142 : vector<1x1x256xf32> to vector<256xf32>
    %144 = vector.extract_strided_slice %113 {offsets = [0, 4, 0, 0], sizes = [2, 7, 7, 256], strides = [1, 1, 1, 1]} : vector<2x11x7x256xf32> to vector<2x7x7x256xf32>
    %145 = vector.shape_cast %143 : vector<256xf32> to vector<1x1x1x256xf32>
    %146 = vector.broadcast %145 : vector<1x1x1x256xf32> to vector<2x7x7x256xf32>
    %147 = arith.mulf %144, %146 : vector<2x7x7x256xf32>
    %148 = arith.addf %141, %147 : vector<2x7x7x256xf32>
    %c0_84 = arith.constant 0 : index
    %c0_85 = arith.constant 0 : index
    %c4_86 = arith.constant 4 : index
    %c0_87 = arith.constant 0 : index
    %149 = vector.load %arg6[%c0_84, %c0_85, %c4_86, %c0_87] : memref<2x11x11x256xf32, #tpu.memory_space<vmem>>, vector<2x11x7x256xf32>
    %c0_88 = arith.constant 0 : index
    %c4_89 = arith.constant 4 : index
    %c0_90 = arith.constant 0 : index
    %150 = vector.load %arg2[%c0_88, %c4_89, %c0_90] : memref<5x5x256xf32, #tpu.memory_space<vmem>>, vector<1x1x256xf32>
    %151 = vector.shape_cast %150 : vector<1x1x256xf32> to vector<256xf32>
    %152 = vector.extract_strided_slice %149 {offsets = [0, 0, 0, 0], sizes = [2, 7, 7, 256], strides = [1, 1, 1, 1]} : vector<2x11x7x256xf32> to vector<2x7x7x256xf32>
    %153 = vector.shape_cast %151 : vector<256xf32> to vector<1x1x1x256xf32>
    %154 = vector.broadcast %153 : vector<1x1x1x256xf32> to vector<2x7x7x256xf32>
    %155 = arith.mulf %152, %154 : vector<2x7x7x256xf32>
    %156 = arith.addf %148, %155 : vector<2x7x7x256xf32>
    %c1_91 = arith.constant 1 : index
    %c4_92 = arith.constant 4 : index
    %c0_93 = arith.constant 0 : index
    %157 = vector.load %arg2[%c1_91, %c4_92, %c0_93] : memref<5x5x256xf32, #tpu.memory_space<vmem>>, vector<1x1x256xf32>
    %158 = vector.shape_cast %157 : vector<1x1x256xf32> to vector<256xf32>
    %159 = vector.extract_strided_slice %149 {offsets = [0, 1, 0, 0], sizes = [2, 7, 7, 256], strides = [1, 1, 1, 1]} : vector<2x11x7x256xf32> to vector<2x7x7x256xf32>
    %160 = vector.shape_cast %158 : vector<256xf32> to vector<1x1x1x256xf32>
    %161 = vector.broadcast %160 : vector<1x1x1x256xf32> to vector<2x7x7x256xf32>
    %162 = arith.mulf %159, %161 : vector<2x7x7x256xf32>
    %163 = arith.addf %156, %162 : vector<2x7x7x256xf32>
    %c2_94 = arith.constant 2 : index
    %c4_95 = arith.constant 4 : index
    %c0_96 = arith.constant 0 : index
    %164 = vector.load %arg2[%c2_94, %c4_95, %c0_96] : memref<5x5x256xf32, #tpu.memory_space<vmem>>, vector<1x1x256xf32>
    %165 = vector.shape_cast %164 : vector<1x1x256xf32> to vector<256xf32>
    %166 = vector.extract_strided_slice %149 {offsets = [0, 2, 0, 0], sizes = [2, 7, 7, 256], strides = [1, 1, 1, 1]} : vector<2x11x7x256xf32> to vector<2x7x7x256xf32>
    %167 = vector.shape_cast %165 : vector<256xf32> to vector<1x1x1x256xf32>
    %168 = vector.broadcast %167 : vector<1x1x1x256xf32> to vector<2x7x7x256xf32>
    %169 = arith.mulf %166, %168 : vector<2x7x7x256xf32>
    %170 = arith.addf %163, %169 : vector<2x7x7x256xf32>
    %c3_97 = arith.constant 3 : index
    %c4_98 = arith.constant 4 : index
    %c0_99 = arith.constant 0 : index
    %171 = vector.load %arg2[%c3_97, %c4_98, %c0_99] : memref<5x5x256xf32, #tpu.memory_space<vmem>>, vector<1x1x256xf32>
    %172 = vector.shape_cast %171 : vector<1x1x256xf32> to vector<256xf32>
    %173 = vector.extract_strided_slice %149 {offsets = [0, 3, 0, 0], sizes = [2, 7, 7, 256], strides = [1, 1, 1, 1]} : vector<2x11x7x256xf32> to vector<2x7x7x256xf32>
    %174 = vector.shape_cast %172 : vector<256xf32> to vector<1x1x1x256xf32>
    %175 = vector.broadcast %174 : vector<1x1x1x256xf32> to vector<2x7x7x256xf32>
    %176 = arith.mulf %173, %175 : vector<2x7x7x256xf32>
    %177 = arith.addf %170, %176 : vector<2x7x7x256xf32>
    %c4_100 = arith.constant 4 : index
    %c4_101 = arith.constant 4 : index
    %c0_102 = arith.constant 0 : index
    %178 = vector.load %arg2[%c4_100, %c4_101, %c0_102] : memref<5x5x256xf32, #tpu.memory_space<vmem>>, vector<1x1x256xf32>
    %179 = vector.shape_cast %178 : vector<1x1x256xf32> to vector<256xf32>
    %180 = vector.extract_strided_slice %149 {offsets = [0, 4, 0, 0], sizes = [2, 7, 7, 256], strides = [1, 1, 1, 1]} : vector<2x11x7x256xf32> to vector<2x7x7x256xf32>
    %181 = vector.shape_cast %179 : vector<256xf32> to vector<1x1x1x256xf32>
    %182 = vector.broadcast %181 : vector<1x1x1x256xf32> to vector<2x7x7x256xf32>
    %183 = arith.mulf %180, %182 : vector<2x7x7x256xf32>
    %184 = arith.addf %177, %183 : vector<2x7x7x256xf32>
    %cst_103 = arith.constant dense<0.000000e+00> : vector<256xf32>
    %185 = vector.multi_reduction <add>, %184, %cst_103 [0, 1, 2] : vector<2x7x7x256xf32> to vector<256xf32>
    %186 = vector.shape_cast %185 : vector<256xf32> to vector<1x1x1x256xf32>
    %187 = arith.mulf %184, %184 : vector<2x7x7x256xf32>
    %cst_104 = arith.constant dense<0.000000e+00> : vector<256xf32>
    %188 = vector.multi_reduction <add>, %187, %cst_104 [0, 1, 2] : vector<2x7x7x256xf32> to vector<256xf32>
    %189 = vector.shape_cast %188 : vector<256xf32> to vector<1x1x1x256xf32>
    %cst_105 = arith.constant 9.800000e+01 : f32
    %190 = vector.broadcast %cst_105 : f32 to vector<1x1x1x256xf32>
    %191 = arith.divf %186, %190 : vector<1x1x1x256xf32>
    %cst_106 = arith.constant 9.800000e+01 : f32
    %192 = vector.broadcast %cst_106 : f32 to vector<1x1x1x256xf32>
    %193 = arith.divf %189, %192 : vector<1x1x1x256xf32>
    %194 = arith.mulf %191, %191 : vector<1x1x1x256xf32>
    %195 = arith.subf %193, %194 : vector<1x1x1x256xf32>
    %cst_107 = arith.constant 9.99999974E-6 : f32
    %196 = vector.broadcast %cst_107 : f32 to vector<1x1x1x256xf32>
    %197 = arith.addf %195, %196 : vector<1x1x1x256xf32>
    %198 = math.rsqrt %197 : vector<1x1x1x256xf32>
    %c0_108 = arith.constant 0 : index
    %c0_109 = arith.constant 0 : index
    %199 = vector.load %arg3[%c0_108, %c0_109] : memref<1x256xf32, #tpu.memory_space<vmem>>, vector<1x256xf32>
    %200 = vector.shape_cast %199 : vector<1x256xf32> to vector<256xf32>
    %c0_110 = arith.constant 0 : index
    %c0_111 = arith.constant 0 : index
    %201 = vector.load %arg4[%c0_110, %c0_111] : memref<1x256xf32, #tpu.memory_space<vmem>>, vector<1x256xf32>
    %202 = vector.shape_cast %201 : vector<1x256xf32> to vector<256xf32>
    %203 = vector.shape_cast %200 : vector<256xf32> to vector<1x1x1x256xf32>
    %204 = arith.mulf %198, %203 : vector<1x1x1x256xf32>
    %205 = arith.mulf %191, %204 : vector<1x1x1x256xf32>
    %206 = vector.shape_cast %202 : vector<256xf32> to vector<1x1x1x256xf32>
    %207 = arith.subf %206, %205 : vector<1x1x1x256xf32>
    %208 = vector.broadcast %204 : vector<1x1x1x256xf32> to vector<2x7x7x256xf32>
    %209 = arith.mulf %184, %208 : vector<2x7x7x256xf32>
    %210 = vector.broadcast %207 : vector<1x1x1x256xf32> to vector<2x7x7x256xf32>
    %211 = arith.addf %209, %210 : vector<2x7x7x256xf32>
    %c0_112 = arith.constant 0 : index
    %c0_113 = arith.constant 0 : index
    %c0_114 = arith.constant 0 : index
    %c0_115 = arith.constant 0 : index
    %212 = vector.load %arg5[%c0_112, %c0_113, %c0_114, %c0_115] : memref<2x7x7x256xf32, #tpu.memory_space<vmem>>, vector<2x7x7x256xf32>
    tpu.vector_store %arg5[%c0_112, %c0_113, %c0_114, %c0_115], %211 {strides = array<i32>} : memref<2x7x7x256xf32, #tpu.memory_space<vmem>>, vector<2x7x7x256xf32>,
    return
  }
  func.func @transform_0(%arg0: i32) -> (i32, i32, i32, i32) {
    %c0_i32 = arith.constant 0 : i32
    %c0_i32_0 = arith.constant 0 : i32
    %c0_i32_1 = arith.constant 0 : i32
    %c0_i32_2 = arith.constant 0 : i32
    return %c0_i32, %c0_i32_0, %c0_i32_1, %arg0 : i32, i32, i32, i32
  }
  func.func @transform_1(%arg0: i32) -> (i32, i32, i32) {
    %c0_i32 = arith.constant 0 : i32
    %c0_i32_0 = arith.constant 0 : i32
    %c0_i32_1 = arith.constant 0 : i32
    return %c0_i32, %c0_i32_0, %arg0 : i32, i32, i32
  }
  func.func @transform_2(%arg0: i32) -> (i32, i32) {
    %c0_i32 = arith.constant 0 : i32
    %c0_i32_0 = arith.constant 0 : i32
    return %c0_i32, %arg0 : i32, i32
  }
  func.func @transform_3(%arg0: i32) -> (i32, i32) {
    %c0_i32 = arith.constant 0 : i32
    %c0_i32_0 = arith.constant 0 : i32
    return %c0_i32, %arg0 : i32, i32
  }
  func.func @transform_4(%arg0: i32) -> (i32, i32, i32, i32) {
    %c0_i32 = arith.constant 0 : i32
    %c0_i32_0 = arith.constant 0 : i32
    %c0_i32_1 = arith.constant 0 : i32
    %c0_i32_2 = arith.constant 0 : i32
    return %c0_i32, %c0_i32_0, %c0_i32_1, %arg0 : i32, i32, i32, i32
  }
}

</mosaic_0001>

<bundles_post_ra>
// kernel: tpu_custom_call.1
= control target key start
LH: loop header
LB: loop body
LE: loop exit
PB: predicated region body
PF: predicated region fallthrough
CT: control target
= control target key end

     0   :  { %v6110_v0 = vmov 0.0   ;;  %v320_v1 = vlaneseq  ;;  %vm1684_vm0 = vcmask 1045504   ;;  %vm3098_vm1 = vcmask 1044480   ;;  %s12908_s1 = inlined_call_operand.vmem [shape: f32[5,5,256], index: 1, kind: input, shape index: {}]   ;;  %s12909_s0 = inlined_call_operand.vmem [shape: f32[2,7,7,256], index: 0, kind: input, shape index: {}]   ;;  %s12910_s2 = inlined_call_operand.vmem [shape: f32[1,256], index: 2, kind: input, shape index: {}]   ;;  %s12911_s3 = inlined_call_operand.vmem [shape: f32[1,256], index: 3, kind: input, shape index: {}]   ;;  %s12912_s4 = inlined_call_operand.vmem [shape: f32[2,7,7,256], index: 4, kind: output, shape index: {}]  }
   0x1   :  { %17 = vst [vmem:[#allocation2 + $0x2b0] sm:$0xff] %v6110_v0  ;;  %18 = vst [vmem:[#allocation2 + $0xd0] sm:$0xff] %v6110_v0  ;;  %v6050_v3 = vld [vmem:[%s12908_s1 + $0x1] ss:$8 sm:$0x3]  ;;  %vm4512_vm2 = vcmask 1043456  }
   0x2   :  { %19 = vst [vmem:[#allocation2 + $0x10] sm:$0x7] %v6110_v0  ;;  %20 = vst [vmem:[#allocation2 + $0x48] sm:$0x7] %v6110_v0  ;;  %v6225_v2 = vshrl.u32 %v320_v1, 7  ;;  %vm5713_vm3 = vcmask 1046528  }
   0x3   :  { %21 = vst [vmem:[#allocation2 + $0x30] sm:$0xff] %v6110_v0  ;;  %22 = vst [vmem:[#allocation2 + $0xf0] sm:$0xff] %v6110_v0  ;;  %v6055_v5 = vld [vmem:[%s12908_s1 + $0x2] ss:$8 sm:$0x3] }
   0x4   :  { %23 = vst [vmem:[#allocation2 + $0xf8] sm:$0x7] %v6110_v0  ;;  %24 = vst [vmem:[#allocation2 + $0x78] sm:$0x7] %v6110_v0  ;;  %v6231_v4 = vsub.s32 0, %v6225_v2  ;;  %v6243_v8 = vsub.s32 1, %v6225_v2 }
   0x5   :  { %25 = vst [vmem:[#allocation2 + $0x128] sm:$0xff] %v6110_v0  ;;  %26 = vst [vmem:[#allocation2 + $0xe0] sm:$0xff] %v6110_v0  ;;  %v318_v6 = vld [vmem:[%s12908_s1] ss:$8 sm:$0x3] }
   0x6   :  { %27 = vst [vmem:[#allocation2] sm:$0x7] %v6110_v0  ;;  %28 = vst [vmem:[#allocation2 + $0x298] sm:$0x7] %v6110_v0  ;;  %v6246_v9 = vrot.slane %v6050_v3, %v6231_v4  ;;  %v6249_v10 = vrot.slane %v6055_v5, %v6231_v4  ;;  %v6255_v12 = vrot.slane %v318_v6, %v6231_v4 }
   0x7   :  { %29 = vst [vmem:[#allocation2 + $0x160] sm:$0xff] %v6110_v0  ;;  %30 = vst [vmem:[#allocation2 + $0x170] sm:$0xff] %v6110_v0  ;;  %v6046_v7 = vld [vmem:[%s12908_s1 + $0x10] ss:$8 sm:$0x3]  ;;  %v6261_v18 = vrot.slane %v318_v6, %v6243_v8  ;;  %v6281_v29 = vrot.slane %v6050_v3, %v6243_v8  ;;  %v6290_v35 = vrot.slane %v6055_v5, %v6243_v8 }
   0x8   :  { %31 = vst [vmem:[#allocation2 + $0x120] sm:$0x7] %v6110_v0  ;;  %32 = vst [vmem:[#allocation2 + $0x2a8] sm:$0x7] %v6110_v0  ;;  %v662_v13 = vld [vmem:[#allocation2 + $0x2b0] sm:$0xfe]  ;;  %v6258_v15 = vrot.slane %v6046_v7, %v6231_v4  ;;  %v6273_v23 = vrot.slane %v6046_v7, %v6243_v8 }
   0x9   :  { %33 = vst [vmem:[#allocation2 + $0x240] sm:$0xff] %v6110_v0  ;;  %34 = vst [vmem:[#allocation2 + $0x18] sm:$0xff] %v6110_v0  ;;  %v6051_v11 = vld [vmem:[%s12908_s1 + $0x11] ss:$8 sm:$0x3]  ;;  %v6267_v20 = vmul.f32 %v6246_v9, %v662_v13 }
   0xa   :  { %35 = vst [vmem:[#allocation2 + $0x60] sm:$0x7] %v6110_v0  ;;  %36 = vst [vmem:[#allocation2 + $0x220] sm:$0x7] %v6110_v0  ;;  %v1471_v14 = vld [vmem:[#allocation2 + $0x2b0] sm:$0xfc]  ;;  %v6284_v30 = vrot.slane %v6051_v11, %v6231_v4  ;;  %v6287_v34 = vrot.slane %v6051_v11, %v6243_v8 }
   0xb   :  { %37 = vst [vmem:[#allocation2 + $0xa0] sm:$0xff] %v6110_v0  ;;  %38 = vst [vmem:[#allocation2 + $0x28] sm:$0xff] %v6110_v0  ;;  %v274_v16 = vld [vmem:[#allocation2 + $0x2b0] sm:$0x7f]  ;;  %v6270_v21 = vmul.f32 %v6249_v10, %v1471_v14  ;;  %v1474_v46 = vld [vmem:[#allocation2 + $0x48] sm:$0x1] }
   0xc   :  { %39 = vst [vmem:[#allocation2 + $0x1a8] sm:$0x7] %v6110_v0  ;;  %40 = vst [vmem:[#allocation2 + $0x218] sm:$0x7] %v6110_v0  ;;  %v276_v17 = vld [vmem:[#allocation2 + $0x30] sm:$0x7f]  ;;  %v330_v25 = vmul.f32 %v6255_v12, %v274_v16 }
   0xd   :  { %41 = vst [vmem:[#allocation2 + $0x168] sm:$0xff] %v6110_v0  ;;  %42 = vst [vmem:[#allocation2 + $0x230] sm:$0xff] %v6110_v0  ;;  %v6056_v19 = vld [vmem:[%s12908_s1 + $0x12] ss:$8 sm:$0x3]  ;;  %v399_v27 = vmul.f32 %v6258_v15, %v276_v17  ;;  %v6300_v39 = vmul.f32 %v6255_v12, %v276_v17 }
   0xe   :  { %43 = vst [vmem:[#allocation2 + $0x1f8] sm:$0x7] %v6110_v0  ;;  %44 = vst [vmem:[#allocation2 + $0x248] sm:$0x7] %v6110_v0  ;;  %v275_v22 = vld [vmem:[#allocation2 + $0xd0] sm:$0x7f]  ;;  %v6293_v36 = vrot.slane %v6056_v19, %v6231_v4  ;;  %v6296_v37 = vrot.slane %v6056_v19, %v6243_v8 }
   0xf   :  { %45 = vst [vmem:[#allocation2 + $0x270] sm:$0xff] %v6110_v0  ;;  %46 = vst [vmem:[#allocation2 + $0x250] sm:$0xff] %v6110_v0  ;;  %v6060_v24 = vld [vmem:[%s12908_s1 + $0x3] ss:$8 sm:$0x3]  ;;  %v331_v38 = vmul.f32 %v6261_v18, %v275_v22  ;;  %v6317_v53 = vadd.f32 %v399_v27, %v330_v25 }
  0x10   :  { %47 = vst [vmem:[#allocation2 + $0x148] sm:$0x7] %v6110_v0  ;;  %48 = vst [vmem:[#allocation2 + $0x68] sm:$0x7] %v6110_v0  ;;  %v277_v26 = vld [vmem:[#allocation2 + $0xf0] sm:$0x7f]  ;;  %v6303_v43 = vrot.slane %v6060_v24, %v6231_v4  ;;  %v6306_v44 = vrot.slane %v6060_v24, %v6243_v8 }
  0x11   :  { %49 = vst [vmem:[#allocation2 + $0x180] sm:$0xff] %v6110_v0  ;;  %50 = vst [vmem:[#allocation2 + $0x2a0] sm:$0xff] %v6110_v0  ;;  %v663_v28 = vld [vmem:[#allocation2 + $0xd0] sm:$0xfe]  ;;  %v6311_v47 = vmul.f32 %v6261_v18, %v277_v26  ;;  %v400_v48 = vmul.f32 %v6273_v23, %v277_v26  ;;  %v1477_v19 = vld [vmem:[#allocation2 + $0xf8] sm:$0x1] }
  0x12   :  { %51 = vst [vmem:[#allocation2 + $0x1c0] sm:$0x7] %v6110_v0  ;;  %52 = vst [vmem:[#allocation2 + $0x1d0] sm:$0x7] %v6110_v0  ;;  %v664_v31 = vld [vmem:[#allocation2 + $0x30] sm:$0xfe]  ;;  %v6320_v54 = vmul.f32 %v6281_v29, %v663_v28 }
  0x13   :  { %53 = vst [vmem:[#allocation2 + $0x198] sm:$0xff] %v6110_v0  ;;  %54 = vst [vmem:[#allocation2 + $0xb8] sm:$0xff] %v6110_v0  ;;  %v665_v32 = vld [vmem:[#allocation2 + $0xf0] sm:$0xfe]  ;;  %v6323_v55 = vmul.f32 %v6246_v9, %v664_v31  ;;  %v6341_v62 = vmul.f32 %v6284_v30, %v664_v31 }
  0x14   :  { %55 = vst [vmem:[#allocation2 + $0x138] sm:$0x7] %v6110_v0  ;;  %56 = vst [vmem:[#allocation2 + $0x1a0] sm:$0x7] %v6110_v0  ;;  %v6326_v56 = vmul.f32 %v6281_v29, %v665_v32  ;;  %v6344_v63 = vmul.f32 %v6287_v34, %v665_v32  ;;  %v1472_v28 = vld [vmem:[#allocation2 + $0xd0] sm:$0xfc] }
  0x15   :  { %57 = vst [vmem:[#allocation2 + $0x228] sm:$0xff] %v6110_v0  ;;  %58 = vst [vmem:[#allocation2 + $0x260] sm:$0xff] %v6110_v0  ;;  %v6061_v49 = vld [vmem:[%s12908_s1 + $0x13] ss:$8 sm:$0x3] }
  0x16   :  { %59 = vst [vmem:[#allocation2 + $0x1d8] sm:$0x7] %v6110_v0  ;;  %60 = vst [vmem:[#allocation2 + $0x290] sm:$0x7] %v6110_v0  ;;  %v6359_v11 = vrot.slane %v6061_v49, %v6231_v4  ;;  %v1475_v27 = vld [vmem:[#allocation2 + $0x30] sm:$0xfc]  ;;  %v6393_v25 = vrot.slane %v6061_v49, %v6243_v8 }
  0x17   :  { %61 = vst [vmem:[#allocation2 + $0x1c8] sm:$0xff] %v6110_v0  ;;  %62 = vst [vmem:[#allocation2 + $0x110] sm:$0xff] %v6110_v0  ;;  %v6058_v7 = vld [vmem:[%s12908_s1 + $0x32] ss:$8 sm:$0x3] }
  0x18   :  { %63 = vst [vmem:[#allocation2 + $0x58] sm:$0x7] %v6110_v0  ;;  %64 = vst [vmem:[#allocation2 + $0x50] sm:$0x7] %v6110_v0  ;;  %v1476_v26 = vld [vmem:[#allocation2 + $0xf0] sm:$0xfc]  ;;  %v6409_v32 = vrot.slane %v6058_v7, %v6231_v4 }
  0x19   :  { %65 = vst [vmem:[#allocation2 + $0x98] sm:$0xff] %v6110_v0  ;;  %66 = vst [vmem:[#allocation2 + $0x1f0] sm:$0xff] %v6110_v0  ;;  %v6364_v13 = vld [vmem:[%s12908_s1 + $0x33] ss:$8 sm:$0x3] }
  0x1a   :  { %67 = vst [vmem:[#allocation2 + $0x188] sm:$0x7] %v6110_v0  ;;  %68 = vst [vmem:[#allocation2 + $0xd8] sm:$0x7] %v6110_v0  ;;  %v6397_v24 = vrot.slane %v6364_v13, %v6243_v8  ;;  %v6403_v17 = vld [vmem:[#allocation2 + $0x198] sm:$0xfc] }
  0x1b   :  { %69 = vst [vmem:[#allocation2 + $0xe8] sm:$0xff] %v6110_v0  ;;  %70 = vst [vmem:[#allocation2 + $0x178] sm:$0xff] %v6110_v0  ;;  %v6064_v22 = vld [vmem:[%s12908_s1 + $0x43] ss:$8 sm:$0x3] }
  0x1c   :  { %71 = vst [vmem:[#allocation2 + $0x1b8] sm:$0x7] %v6110_v0  ;;  %72 = vst [vmem:[#allocation2 + $0x158] sm:$0x7] %v6110_v0  ;;  %v1509_v45 = vld [vmem:[#allocation2 + $0x138] sm:$0x1] }
  0x1d   :  { %73 = vst [vmem:[#allocation2 + $0x288] sm:$0xff] %v6110_v0  ;;  %74 = vst [vmem:[#allocation2 + $0x8] sm:$0xff] %v6110_v0  ;;  %v6380_v31 = vld [vmem:[%s12908_s1 + $0x42] ss:$8 sm:$0x3] }
  0x1e   :  { %75 = vst [vmem:[#allocation2 + $0x2b8] sm:$0x7] %v6110_v0  ;;  %76 = vst [vmem:[#allocation2 + $0x190] sm:$0x7] %v6110_v0  ;;  %v684_v33 = vld [vmem:[#allocation2 + $0x1c8] sm:$0xfe] }
  0x1f   :  { %77 = vst [vmem:[#allocation2 + $0x70] sm:$0xff] %v6110_v0  ;;  %78 = vst [vmem:[#allocation2 + $0x1e0] sm:$0xff] %v6110_v0  ;;  %v685_v40 = vld [vmem:[#allocation2 + $0x110] sm:$0xfe]  ;;  %v296_v50 = vld [vmem:[#allocation2 + $0x1c8] sm:$0x7f]  ;;  %v6329_v58 = vmul.f32 %v6246_v9, %v684_v33 }
  0x20   :  { %79 = vst [vmem:[#allocation2 + $0x150] sm:$0x7] %v6110_v0  ;;  %80 = vst [vmem:[#allocation2 + $0x210] sm:$0x7] %v6110_v0  ;;  %v686_v41 = vld [vmem:[#allocation2 + $0x98] sm:$0xfe]  ;;  %v6332_v59 = vmul.f32 %v6281_v29, %v685_v40  ;;  %v344_v3 = vmul.f32 %v6255_v12, %v296_v50  ;;  %v6399_v40 = vadd.f32 %v400_v48, %v331_v38 }
  0x21   :  { %81 = vst [vmem:[#allocation2 + $0x20] sm:$0xff] %v6110_v0  ;;  %82 = vst [vmem:[#allocation2 + $0x278] sm:$0xff] %v6110_v0  ;;  %v687_v42 = vld [vmem:[#allocation2 + $0x1f0] sm:$0xfe]  ;;  %v298_v52 = vld [vmem:[#allocation2 + $0x98] sm:$0x7f]  ;;  %v6335_v60 = vmul.f32 %v6246_v9, %v686_v41  ;;  %v6418_v38 = vmul.f32 %v6290_v35, %v1472_v28  ;;  %v6435_v28 = vrot.slane %v6380_v31, %v6243_v8 }
  0x22   :  { %83 = vst [vmem:[#allocation2 + $0x280] sm:$0x7] %v6110_v0  ;;  %84 = vst [vmem:[#allocation2 + $0x100] sm:$0x7] %v6110_v0  ;;  %v297_v51 = vld [vmem:[#allocation2 + $0x110] sm:$0x7f]  ;;  %v6338_v61 = vmul.f32 %v6281_v29, %v687_v42  ;;  %v6350_v1 = vmul.f32 %v6287_v34, %v687_v42  ;;  %v413_v6 = vmul.f32 %v6258_v15, %v298_v52 }
  0x23   :  { %85 = vst [vmem:[#allocation2 + $0x80] sm:$0xff] %v6110_v0  ;;  %86 = vst [vmem:[#allocation2 + $0xa8] sm:$0xff] %v6110_v0  ;;  %v299_v57 = vld [vmem:[#allocation2 + $0x1f0] sm:$0x7f]  ;;  %v345_v5 = vmul.f32 %v6261_v18, %v297_v51  ;;  %v6387_v50 = vmul.f32 %v6255_v12, %v298_v52  ;;  %v1478_v52 = vld [vmem:[#allocation2 + $0x78] sm:$0x1] }
  0x24   :  { %87 = vst [vmem:[#allocation2 + $0x200] sm:$0x7] %v6110_v0  ;;  %88 = vst [vmem:[#allocation2 + $0x1b0] sm:$0x7] %v6110_v0  ;;  %v414_v14 = vmul.f32 %v6273_v23, %v299_v57  ;;  %v1473_v42 = vld [vmem:[#allocation2 + $0x10] sm:$0x1]  ;;  %v6390_v51 = vmul.f32 %v6261_v18, %v299_v57  ;;  %v6406_v57 = vrot.slane %v6064_v22, %v6243_v8 }
  0x25   :  { %89 = vst [vmem:[#allocation2 + $0x268] sm:$0xff] %v6110_v0  ;;  %90 = vst [vmem:[#allocation2 + $0x118] sm:$0xff] %v6110_v0  ;;  %v6413_v33 = vld [vmem:[#allocation2 + $0xb8] sm:$0xfc]  ;;  %v6415_v16 = vld [vmem:[#allocation2 + $0x1a0] sm:$0x1]  ;;  %v6421_v48 = vmul.f32 %v6249_v10, %v1473_v42 }
  0x26   :  { %91 = vst [vmem:[#allocation2 + $0x208] sm:$0x7] %v6110_v0  ;;  %92 = vst [vmem:[#allocation2 + $0x90] sm:$0x7] %v6110_v0  ;;  %v6411_v49 = vadd.f32 %v414_v14, %v345_v5  ;;  %v1516_v22 = vld [vmem:[#allocation2 + $0x110] sm:$0xfc]  ;;  %v1575_v5 = vmul.f32 %v6290_v35, %v1474_v46  ;;  %v6428_v14 = vmul.f32 %v6249_v10, %v1475_v27 }
  0x27   :  { %93 = vst [vmem:[#allocation2 + $0xb0] sm:$0xff] %v6110_v0  ;;  %94 = vst [vmem:[#allocation2 + $0x140] sm:$0xff] %v6110_v0  ;;  %v1518_v42 = vld [vmem:[#allocation2 + $0x50] sm:$0x1]  ;;  %v1579_v46 = vmul.f32 %v6290_v35, %v1478_v52 }
  0x28   :  { %95 = vst [vmem:[#allocation2 + $0x38] sm:$0x7] %v6110_v0  ;;  %96 = vst [vmem:[#allocation2 + $0x130] sm:$0x7] %v6110_v0 }
  0x29   :  { %97 = vst [vmem:[#allocation2 + $0x238] sm:$0xff] %v6110_v0  ;;  %98 = vst [vmem:[#allocation2 + $0x88] sm:$0xff] %v6110_v0 }
  0x2a   :  { %99 = vst [vmem:[#allocation2 + $0xc0] sm:$0x7] %v6110_v0  ;;  %100 = vst [vmem:[#allocation2 + $0x40] sm:$0x7] %v6110_v0 }
  0x2b   :  { %101 = vst [vmem:[#allocation2 + $0x108] sm:$0xff] %v6110_v0  ;;  %102 = vst [vmem:[#allocation2 + $0x1e8] sm:$0xff] %v6110_v0 }
  0x2c   :  { %103 = vst [vmem:[#allocation2 + $0x258] sm:$0x7] %v6110_v0  ;;  %104 = vst [vmem:[#allocation2 + $0xc8] sm:$0x7] %v6110_v0  ;;  %v6347_v0 = vmul.f32 %v6284_v30, %v686_v41  ;;  %v6401_v41 = vadd.f32 %v413_v6, %v344_v3  ;;  %v6424_v3 = vrot.slane %v6058_v7, %v6243_v8  ;;  %v1515_v6 = vld [vmem:[#allocation2 + $0x1c8] sm:$0xfc] }
  0x2d   :  { %13621 = vst [vmem:[#allocation3_spill] sm:$0xff] %v6225_v2  ;;  %13622 = vst [vmem:[#allocation4_spill] sm:$0xff] %v6231_v4  ;;  %v1517_v2 = vld [vmem:[#allocation2 + $0x58] sm:$0x1]  ;;  %v1520_v7 = vld [vmem:[#allocation2 + $0x1f0] sm:$0xfc] }
  0x2e   :  { %13623 = vst [vmem:[#allocation5_spill] sm:$0xff] %v6243_v8  ;;  %13624 = vst [vmem:[#allocation6_spill] sm:$0xff] %v6246_v9 }
  0x2f   :  { %13625 = vst [vmem:[#allocation7_spill] sm:$0xff] %v6249_v10  ;;  %13626 = vst [vmem:[#allocation8_spill] sm:$0xff] %v6255_v12 }
  0x30   :  { %13627 = vst [vmem:[#allocation9_spill] sm:$0xff] %v6258_v15  ;;  %13628 = vst [vmem:[#allocation10_spill] sm:$0xff] %v6261_v18 }
  0x31   :  { %13629 = vst [vmem:[#allocation11_spill] sm:$0xff] %v6267_v20  ;;  %13630 = vst [vmem:[#allocation12_spill] sm:$0xff] %v6270_v21  ;;  %v6431_v21 = vmul.f32 %v6293_v36, %v1475_v27  ;;  %v6444_v27 = vmul.f32 %v6293_v36, %v1477_v19 }
  0x32   :  { %13631 = vst [vmem:[#allocation13_spill] sm:$0xff] %v6273_v23  ;;  %13632 = vst [vmem:[#allocation14_spill] sm:$0xff] %v6281_v29  ;;  %v1689_v29 = vrot.slane %v1575_v5, 2  ;;  %v2886_v5 = vld [vmem:[#allocation2 + $0xd0] sm:$0xf8] }
  0x33   :  { %13633 = vst [vmem:[#allocation15_spill] sm:$0xff] %v6284_v30  ;;  %13634 = vst [vmem:[#allocation16_spill] sm:$0xff] %v6287_v34  ;;  %v1688_v34 = vrot.slane %v6418_v38, 2 }
  0x34   :  { %13635 = vst [vmem:[#allocation17_spill] sm:$0xff] %v6290_v35  ;;  %13636 = vst [vmem:[#allocation18_spill] sm:$0xff] %v6293_v36 }
  0x35   :  { %13637 = vst [vmem:[#allocation19_spill] sm:$0xff] %v6296_v37  ;;  %13638 = vst [vmem:[#allocation20_spill] sm:$0xff] %v6300_v39  ;;  %v6494_v39 = vsel %vm1684_vm0, %v1688_v34, %v1689_v29 }
  0x36   :  { %13639 = vst [vmem:[#allocation21_spill] sm:$0xff] %v6303_v43  ;;  %13640 = vst [vmem:[#allocation22_spill] sm:$0xff] %v6306_v44 }
  0x37   :  { %13641 = vst [vmem:[#allocation23_spill] sm:$0xff] %v6311_v47  ;;  %13642 = vst [vmem:[#allocation24_spill] sm:$0xff] %v6317_v53 }
  0x38   :  { %13643 = vst [vmem:[#allocation25_spill] sm:$0xff] %v6320_v54  ;;  %13644 = vst [vmem:[#allocation26_spill] sm:$0xff] %v6323_v55  ;;  %v1601_v55 = vmul.f32 %v6290_v35, %v1516_v22 }
  0x39   :  { %13645 = vst [vmem:[#allocation27_spill] sm:$0xff] %v6326_v56  ;;  %13646 = vst [vmem:[#allocation28_spill] sm:$0xff] %v6329_v58  ;;  %v1522_v58 = vld [vmem:[#allocation2 + $0xd8] sm:$0x1]  ;;  %v1553_v56 = vld [vmem:[#allocation2 + $0xc0] sm:$0x1] }
  0x3a   :  { %13647 = vst [vmem:[#allocation29_spill] sm:$0xff] %v6332_v59  ;;  %13648 = vst [vmem:[#allocation30_spill] sm:$0xff] %v6335_v60  ;;  %v1577_v60 = vmul.f32 %v6290_v35, %v1476_v26  ;;  %v6441_v59 = vmul.f32 %v6296_v37, %v1476_v26  ;;  %v1600_v26 = vmul.f32 %v6249_v10, %v1515_v6 }
  0x3b   :  { %13649 = vst [vmem:[#allocation31_spill] sm:$0xff] %v6338_v61  ;;  %13650 = vst [vmem:[#allocation32_spill] sm:$0xff] %v6341_v62  ;;  %v1519_v61 = vld [vmem:[#allocation2 + $0x98] sm:$0xfc]  ;;  %v6466_v62 = vld [vmem:[#allocation2 + $0x88] sm:$0xfc]  ;;  %v1605_v6 = vmul.f32 %v6290_v35, %v1520_v7  ;;  %v1607_v54 = vmul.f32 %v6290_v35, %v1522_v58  ;;  %v1869_v47 = vmul.f32 %v6296_v37, %v1522_v58 }
  0x3c   :  { %13651 = vst [vmem:[#allocation33_spill] sm:$0xff] %v6344_v63  ;;  %13652 = vst [vmem:[#allocation34_spill] sm:$0xff] %v6347_v0  ;;  %v1521_v0 = vld [vmem:[#allocation2 + $0x188] sm:$0x1]  ;;  %v1602_v63 = vmul.f32 %v6249_v10, %v1517_v2  ;;  %v1604_v20 = vmul.f32 %v6249_v10, %v1519_v61 }
  0x3d   :  { %13653 = vst [vmem:[#allocation35_spill] sm:$0xff] %v6350_v1  ;;  %13654 = vst [vmem:[#allocation36_spill] sm:$0xff] %v6359_v11  ;;  %v1578_v1 = vmul.f32 %v6249_v10, %v1477_v19  ;;  %v6460_v19 = vmul.f32 %v6424_v3, %v6413_v33  ;;  %v1606_v22 = vmul.f32 %v6249_v10, %v1521_v0  ;;  %v1737_v38 = vrot.slane %v1607_v54, 2 }
  0x3e   :  { %13655 = vst [vmem:[#allocation37_spill] sm:$0xff] %v6387_v50  ;;  %13656 = vst [vmem:[#allocation38_spill] sm:$0xff] %v6390_v51  ;;  %v6451_v51 = vmul.f32 %v6409_v32, %v6403_v17  ;;  %v1551_v50 = vld [vmem:[#allocation2 + $0x238] sm:$0xfc]  ;;  %v1728_v53 = vrot.slane %v1602_v63, 2  ;;  %v1733_v23 = vrot.slane %v1604_v20, 2 }
  0x3f   :  { %13657 = vst [vmem:[#allocation39_spill] sm:$0xff] %v6393_v25  ;;  %13658 = vst [vmem:[#allocation40_spill] sm:$0xff] %v6397_v24  ;;  %v6479_v2 = vmul.f32 %v6409_v32, %v1551_v50  ;;  %v1692_v58 = vrot.slane %v1578_v1, 2  ;;  %v1695_v50 = vrot.slane %v1579_v46, 2  ;;  %v1734_v18 = vrot.slane %v1606_v22, 2 }
  0x40   :  { %13659 = vst [vmem:[#allocation41_spill] sm:$0xff] %v6399_v40  ;;  %13660 = vst [vmem:[#allocation42_spill] sm:$0xff] %v6401_v41  ;;  %v6454_v41 = vmul.f32 %v6409_v32, %v1509_v45  ;;  %v1603_v45 = vmul.f32 %v6290_v35, %v1518_v42  ;;  %v1867_v40 = vmul.f32 %v6296_v37, %v1520_v7  ;;  %v6490_v7 = vld [vmem:[#allocation2 + $0x40] sm:$0x1]  ;;  %v1727_v35 = vrot.slane %v1600_v26, 2 }
  0x41   :  { %13661 = vst [vmem:[#allocation43_spill] sm:$0xff] %v6406_v57  ;;  %13662 = vst [vmem:[#allocation44_spill] sm:$0xff] %v6409_v32  ;;  %v6482_v42 = vmul.f32 %v6409_v32, %v1553_v56  ;;  %v1730_v56 = vrot.slane %v1601_v55, 2  ;;  %v2890_v1 = vld [vmem:[#allocation2 + $0xf0] sm:$0xf8]  ;;  %v1996_v46 = vrot.slane %v1869_v47, 2 }
  0x42   :  { %13663 = vst [vmem:[#allocation45_spill] sm:$0xff] %v6411_v49  ;;  %13664 = vst [vmem:[#allocation46_spill] sm:$0xff] %v6421_v48  ;;  %v6447_v49 = vmul.f32 %v6296_v37, %v1478_v52  ;;  %v6464_v52 = vmul.f32 %v6424_v3, %v6415_v16  ;;  %v1694_v37 = vrot.slane %v1577_v60, 2  ;;  %v1731_v32 = vrot.slane %v1603_v45, 2  ;;  %v2892_v26 = vld [vmem:[#allocation2 + $0x78] sm:$0x3] }
  0x43   :  { %13665 = vst [vmem:[#allocation47_spill] sm:$0xff] %v6424_v3  ;;  %13666 = vst [vmem:[#allocation48_spill] sm:$0xff] %v6431_v21  ;;  %v1736_v48 = vrot.slane %v1605_v6, 2  ;;  %v6500_v60 = vmul.f32 %v6424_v3, %v6490_v7  ;;  %v1995_v20 = vrot.slane %v1867_v40, 2  ;;  %v6509_v34 = vsel %vm1684_vm0, %v1727_v35, %v1728_v53  ;;  %v2929_v45 = vld [vmem:[#allocation2 + $0x1c8] sm:$0xf8] }
  0x44   :  { %13667 = vst [vmem:[#allocation49_spill] sm:$0xff] %v6435_v28  ;;  %13668 = vst [vmem:[#allocation50_spill] sm:$0xff] %v6444_v27  ;;  %v6506_v29 = vsel %vm1684_vm0, %v1694_v37, %v1695_v50  ;;  %v2930_v37 = vld [vmem:[#allocation2 + $0x110] sm:$0xf8]  ;;  %v2931_v6 = vld [vmem:[#allocation2 + $0x58] sm:$0x3] }
  0x45   :  { %13669 = vst [vmem:[#allocation51_spill] sm:$0xff] %v6460_v19  ;;  %13670 = vst [vmem:[#allocation52_spill] sm:$0xff] %v6464_v52  ;;  %v1866_v19 = vmul.f32 %v6293_v36, %v1519_v61  ;;  %v1868_v52 = vmul.f32 %v6293_v36, %v1521_v0  ;;  %v6488_v61 = vmul.f32 %v6424_v3, %v6466_v62  ;;  %v1691_v0 = vrot.slane %v6428_v14, 2  ;;  %v2888_v14 = vld [vmem:[#allocation2 + $0x48] sm:$0x3] }
  0x46   :  { %13671 = vst [vmem:[#allocation53_spill] sm:$0xff] %v6479_v2  ;;  %13672 = vst [vmem:[#allocation54_spill] sm:$0xff] %v6482_v42  ;;  %v1954_v36 = vrot.slane %v6447_v49, 2  ;;  %v2922_v49 = vld [vmem:[#allocation2 + $0xb8] sm:$0xf8]  ;;  %v6518_v47 = vsel %vm1684_vm0, %v1736_v48, %v1737_v38  ;;  %v6533_v50 = vsel %vm1684_vm0, %v1995_v20, %v1996_v46 }
  0x47   :  { %13673 = vst [vmem:[#allocation55_spill] sm:$0xff] %v6488_v61  ;;  %13674 = vst [vmem:[#allocation56_spill] sm:$0xff] %v6494_v39  ;;  %v1953_v61 = vrot.slane %v6441_v59, 2  ;;  %v1992_v55 = vrot.slane %v1866_v19, 2  ;;  %v1993_v63 = vrot.slane %v1868_v52, 2  ;;  %v6503_v54 = vsel %vm1684_vm0, %v1691_v0, %v1692_v58 }
  0x48   :  { %13675 = vst [vmem:[#allocation57_spill] sm:$0xff] %v6500_v60  ;;  %13676 = vst [vmem:[#allocation58_spill] sm:$0xff] %v6503_v54  ;;  %v6512_v59 = vsel %vm1684_vm0, %v1730_v56, %v1731_v32  ;;  %v6515_v19 = vsel %vm1684_vm0, %v1733_v23, %v1734_v18  ;;  %v2932_v22 = vld [vmem:[#allocation2 + $0x50] sm:$0x3]  ;;  %v2933_v35 = vld [vmem:[#allocation2 + $0x98] sm:$0xf8]  ;;  %v2987_v32 = vmul.f32 %v6306_v44, %v2886_v5 }
  0x49   :  { %13677 = vst [vmem:[#allocation59_spill] sm:$0xff] %v6506_v29  ;;  %13678 = vst [vmem:[#allocation60_spill] sm:$0xff] %v6509_v34  ;;  %v2934_v53 = vld [vmem:[#allocation2 + $0x1f0] sm:$0xf8]  ;;  %v2989_v0 = vmul.f32 %v6306_v44, %v2888_v14  ;;  %v2991_v58 = vmul.f32 %v6306_v44, %v2890_v1  ;;  %v2993_v18 = vmul.f32 %v6306_v44, %v2892_v26  ;;  %v2935_v38 = vld [vmem:[#allocation2 + $0x188] sm:$0x3] }
  0x4a   :  { %13679 = vst [vmem:[#allocation61_spill] sm:$0xff] %v6512_v59  ;;  %13680 = vst [vmem:[#allocation62_spill] sm:$0xff] %v6515_v19  ;;  %v6527_v23 = vsel %vm1684_vm0, %v1953_v61, %v1954_v36  ;;  %v6530_v48 = vsel %vm1684_vm0, %v1992_v55, %v1993_v63  ;;  %v3014_v56 = vmul.f32 %v6303_v43, %v2929_v45  ;;  %v2936_v40 = vld [vmem:[#allocation2 + $0xd8] sm:$0x3]  ;;  %v2924_v61 = vld [vmem:[#allocation2 + $0x1a0] sm:$0x3] }
  0x4b   :  { %13681 = vst [vmem:[#allocation63_spill] sm:$0xff] %v6518_v47  ;;  %13682 = vst [vmem:[#allocation64_spill] sm:$0xff] %v6527_v23  ;;  %v6537_v5 = vmul.f32 %v6306_v44, %v2930_v37  ;;  %v3016_v14 = vmul.f32 %v6303_v43, %v2931_v6  ;;  %v6541_v52 = vmul.f32 %v6393_v25, %v2890_v1  ;;  %v2966_v55 = vld [vmem:[#allocation2 + $0x88] sm:$0xf8]  ;;  %v2968_v37 = vld [vmem:[#allocation2 + $0x40] sm:$0x3] }
  0x4c   :  { %13683 = vst [vmem:[#allocation65_spill] sm:$0xff] %v6530_v48  ;;  %13684 = vst [vmem:[#allocation66_spill] sm:$0xff] %v6533_v50  ;;  %v6544_v36 = vmul.f32 %v6393_v25, %v2892_v26  ;;  %v3017_v63 = vmul.f32 %v6306_v44, %v2932_v22  ;;  %v3018_v20 = vmul.f32 %v6303_v43, %v2933_v35  ;;  %v3102_v6 = vrot.slane %v2987_v32, 3  ;;  %v2926_v32 = vld [vmem:[#allocation2 + $0x260] sm:$0xf8] }
  0x4d   :  { %v6549_v46 = vmul.f32 %v6306_v44, %v2934_v53  ;;  %v6552_v45 = vmul.f32 %v6397_v24, %v2922_v49  ;;  %v3103_v21 = vrot.slane %v2989_v0, 3  ;;  %v3108_v1 = vrot.slane %v2991_v58, 3  ;;  %v2928_v54 = vld [vmem:[#allocation2 + $0x290] sm:$0x3] }
  0x4e   :  { %v3109_v27 = vrot.slane %v2993_v18, 3  ;;  %v3020_v26 = vmul.f32 %v6303_v43, %v2935_v38  ;;  %v3021_v47 = vmul.f32 %v6306_v44, %v2936_v40  ;;  %v3280_v19 = vmul.f32 %v6359_v11, %v2933_v35  ;;  %v2970_v43 = vld [vmem:[#allocation2 + $0x1e8] sm:$0xf8] }
  0x4f   :  { %v3281_v22 = vmul.f32 %v6393_v25, %v2934_v53  ;;  %v3282_v50 = vmul.f32 %v6359_v11, %v2935_v38  ;;  %v3283_v59 = vmul.f32 %v6393_v25, %v2936_v40  ;;  %v3809_v48 = vmul.f32 %v6397_v24, %v2924_v61  ;;  %v2972_v11 = vld [vmem:[#allocation2 + $0xc8] sm:$0x3] }
  0x50   :  { %v3835_v34 = vmul.f32 %v6397_v24, %v2966_v55  ;;  %v3141_v0 = vrot.slane %v3014_v56, 3  ;;  %v3142_v58 = vrot.slane %v3016_v14, 3  ;;  %v3837_v18 = vmul.f32 %v6397_v24, %v2968_v37 }
  0x51   :  { %v4068_v29 = vmul.f32 %v6406_v57, %v2922_v49  ;;  %v6565_v35 = vsel %vm3098_vm1, %v3102_v6, %v3103_v21  ;;  %v6568_v53 = vsel %vm3098_vm1, %v3108_v1, %v3109_v27  ;;  %v3144_v40 = vrot.slane %v6537_v5, 3 }
  0x52   :  { %13685 = vst [vmem:[#allocation67_spill] sm:$0xff] %v6565_v35  ;;  %13686 = vst [vmem:[#allocation68_spill] sm:$0xff] %v6568_v53  ;;  %v3145_v38 = vrot.slane %v3017_v63, 3  ;;  %v3147_v23 = vrot.slane %v3018_v20, 3  ;;  %v3148_v39 = vrot.slane %v3020_v26, 3  ;;  %v3150_v56 = vrot.slane %v6549_v46, 3 }
  0x53   :  { %v3151_v14 = vrot.slane %v3021_v47, 3  ;;  %v3367_v60 = vrot.slane %v6541_v52, 3  ;;  %v3368_v49 = vrot.slane %v6544_v36, 3  ;;  %v3406_v24 = vrot.slane %v3280_v19, 3 }
  0x54   :  { %v4070_v21 = vmul.f32 %v6406_v57, %v2924_v61  ;;  %v4072_v6 = vmul.f32 %v6406_v57, %v2926_v32  ;;  %v4074_v27 = vmul.f32 %v6406_v57, %v2928_v54  ;;  %v4096_v5 = vmul.f32 %v6406_v57, %v2966_v55 }
  0x55   :  { %v4098_v63 = vmul.f32 %v6406_v57, %v2968_v37  ;;  %v3407_v20 = vrot.slane %v3282_v50, 3  ;;  %v3409_v1 = vrot.slane %v3281_v22, 3  ;;  %v4100_v46 = vmul.f32 %v6406_v57, %v2970_v43  ;;  %v6065_v50 = vld [vmem:[%s12908_s1 + $0x4] ss:$8 sm:$0x3] }
  0x56   :  { %v4102_v47 = vmul.f32 %v6406_v57, %v2972_v11  ;;  %v3410_v52 = vrot.slane %v3283_v59, 3  ;;  %v3933_v36 = vrot.slane %v6552_v45, 3  ;;  %v3934_v19 = vrot.slane %v3809_v48, 3  ;;  %v1512_v45 = vld [vmem:[#allocation2 + $0x260] sm:$0xfc] }
  0x57   :  { %v3975_v26 = vrot.slane %v3835_v34, 3  ;;  %v6583_v61 = vsel %vm3098_vm1, %v3141_v0, %v3142_v58  ;;  %v3976_v32 = vrot.slane %v3837_v18, 3  ;;  %v4192_v54 = vrot.slane %v4068_v29, 3  ;;  %v1514_v0 = vld [vmem:[#allocation2 + $0x290] sm:$0x1] }
  0x58   :  { %13687 = vst [vmem:[#allocation69_spill] sm:$0xff] %v6583_v61  ;;  %v4193_v53 = vrot.slane %v4070_v21, 3  ;;  %v4198_v55 = vrot.slane %v4072_v6, 3  ;;  %v4199_v37 = vrot.slane %v4074_v27, 3  ;;  %v4234_v43 = vrot.slane %v4096_v5, 3 }
  0x59   :  { %v4235_v22 = vrot.slane %v4098_v63, 3  ;;  %v6589_v11 = vsel %vm3098_vm1, %v3144_v40, %v3145_v38  ;;  %v6592_v59 = vsel %vm3098_vm1, %v3147_v23, %v3148_v39  ;;  %v4240_v34 = vrot.slane %v4100_v46, 3  ;;  %v1556_v29 = vld [vmem:[#allocation2 + $0x1e8] sm:$0xfc]  ;;  %v1558_v38 = vld [vmem:[#allocation2 + $0xc8] sm:$0x1] }
  0x5a   :  { %13688 = vst [vmem:[#allocation70_spill] sm:$0xff] %v6589_v11  ;;  %13689 = vst [vmem:[#allocation71_spill] sm:$0xff] %v6592_v59  ;;  %v4241_v48 = vrot.slane %v4102_v47, 3  ;;  %v6595_v58 = vsel %vm3098_vm1, %v3150_v56, %v3151_v14  ;;  %v6598_v18 = vsel %vm3098_vm1, %v3367_v60, %v3368_v49  ;;  %v6601_v21 = vsel %vm3098_vm1, %v3406_v24, %v3407_v20  ;;  %v4300_v60 = vld [vmem:[#allocation2 + $0xd0] sm:$0xf0] }
  0x5b   :  { %13690 = vst [vmem:[#allocation72_spill] sm:$0xff] %v6595_v58  ;;  %13691 = vst [vmem:[#allocation73_spill] sm:$0xff] %v6598_v18  ;;  %v6604_v40 = vrot.slane %v6065_v50, %v6243_v8  ;;  %v6607_v39 = vsel %vm3098_vm1, %v3409_v1, %v3410_v52  ;;  %v6610_v23 = vsel %vm3098_vm1, %v3933_v36, %v3934_v19  ;;  %v4302_v14 = vld [vmem:[#allocation2 + $0x48] sm:$0x7]  ;;  %v4304_v27 = vld [vmem:[#allocation2 + $0xf0] sm:$0xf0] }
  0x5c   :  { %13692 = vst [vmem:[#allocation74_spill] sm:$0xff] %v6601_v21  ;;  %13694 = vst [vmem:[#allocation76_spill] sm:$0xff] %v6607_v39  ;;  %v6613_v6 = vsel %vm3098_vm1, %v3975_v26, %v3976_v32  ;;  %v6616_v56 = vsel %vm3098_vm1, %v4192_v54, %v4193_v53  ;;  %v6619_v24 = vsel %vm3098_vm1, %v4198_v55, %v4199_v37  ;;  %v4306_v5 = vld [vmem:[#allocation2 + $0x78] sm:$0x7]  ;;  %v4343_v63 = vld [vmem:[#allocation2 + $0x1c8] sm:$0xf0] }
  0x5d   :  { %13693 = vst [vmem:[#allocation75_spill] sm:$0xff] %v6604_v40  ;;  %13695 = vst [vmem:[#allocation77_spill] sm:$0xff] %v6610_v23  ;;  %v6622_v49 = vsel %vm3098_vm1, %v4234_v43, %v4235_v22  ;;  %v6626_v20 = vmul.f32 %v6435_v28, %v6413_v33  ;;  %v6630_v53 = vmul.f32 %v6435_v28, %v6415_v16  ;;  %v4345_v46 = vld [vmem:[#allocation2 + $0x58] sm:$0x7]  ;;  %v4346_v37 = vld [vmem:[#allocation2 + $0x50] sm:$0x7] }
  0x5e   :  { %13696 = vst [vmem:[#allocation78_spill] sm:$0xff] %v6613_v6  ;;  %13697 = vst [vmem:[#allocation79_spill] sm:$0xff] %v6616_v56  ;;  %v6633_v1 = vsel %vm3098_vm1, %v4240_v34, %v4241_v48  ;;  %v6066_v47 = vld [vmem:[%s12908_s1 + $0x14] ss:$8 sm:$0x3]  ;;  %v6639_v52 = vmul.f32 %v6435_v28, %v1512_v45  ;;  %v6642_v36 = vmul.f32 %v6435_v28, %v1514_v0 }
  0x5f   :  { %13698 = vst [vmem:[#allocation80_spill] sm:$0xff] %v6619_v24  ;;  %13699 = vst [vmem:[#allocation81_spill] sm:$0xff] %v6622_v49  ;;  %v6646_v33 = vmul.f32 %v6435_v28, %v6466_v62  ;;  %v4401_v16 = vmul.f32 %v6604_v40, %v4300_v60  ;;  %v4403_v19 = vmul.f32 %v6604_v40, %v4302_v14  ;;  %v6068_v26 = vld [vmem:[%s12908_s1 + $0x34] ss:$8 sm:$0x3] }
  0x60   :  { %13700 = vst [vmem:[#allocation82_spill] sm:$0xff] %v6626_v20  ;;  %13701 = vst [vmem:[#allocation83_spill] sm:$0xff] %v6630_v53  ;;  %v6069_v32 = vld [vmem:[%s12908_s1 + $0x44] ss:$8 sm:$0x3]  ;;  %v6658_v54 = vmul.f32 %v6435_v28, %v6490_v7  ;;  %v6661_v55 = vmul.f32 %v6435_v28, %v1556_v29  ;;  %v6664_v43 = vrot.slane %v6065_v50, %v6231_v4  ;;  %v13772_v53 = vld [vmem:[#allocation18_spill] sm:$0xff] }
  0x61   :  { %13702 = vst [vmem:[#allocation84_spill] sm:$0xff] %v6633_v1  ;;  %13703 = vst [vmem:[#allocation85_spill] sm:$0xff] %v6639_v52  ;;  %v4344_v62 = vld [vmem:[#allocation2 + $0x110] sm:$0xf0]  ;;  %v4405_v22 = vmul.f32 %v6604_v40, %v4304_v27  ;;  %v4407_v34 = vmul.f32 %v6604_v40, %v4306_v5  ;;  %v6669_v48 = vmul.f32 %v6435_v28, %v1558_v38  ;;  %v4347_v45 = vld [vmem:[#allocation2 + $0x98] sm:$0xf0] }
  0x62   :  { %13704 = vst [vmem:[#allocation86_spill] sm:$0xff] %v6642_v36  ;;  %13705 = vst [vmem:[#allocation87_spill] sm:$0xff] %v6646_v33  ;;  %v4349_v0 = vld [vmem:[#allocation2 + $0x188] sm:$0x7]  ;;  %v6672_v7 = vrot.slane %v6066_v47, %v6231_v4  ;;  %v6675_v29 = vrot.slane %v6066_v47, %v6243_v8  ;;  %v6679_v60 = vrot.slane %v6380_v31, %v6231_v4  ;;  %v4348_v14 = vld [vmem:[#allocation2 + $0x1f0] sm:$0xf0] }
  0x63   :  { %13706 = vst [vmem:[#allocation88_spill] sm:$0xff] %v6658_v54  ;;  %13707 = vst [vmem:[#allocation89_spill] sm:$0xff] %v6661_v55  ;;  %v6683_v50 = vrot.slane %v6364_v13, %v6231_v4  ;;  %v4350_v21 = vld [vmem:[#allocation2 + $0xd8] sm:$0x7]  ;;  %v6686_v38 = vmul.f32 %v6664_v43, %v4343_v63  ;;  %v6689_v1 = vmul.f32 %v6664_v43, %v4345_v46  ;;  %v4516_v6 = vrot.slane %v4401_v16, 4 }
  0x64   :  { %13708 = vst [vmem:[#allocation90_spill] sm:$0xff] %v6664_v43  ;;  %13709 = vst [vmem:[#allocation91_spill] sm:$0xff] %v6669_v48  ;;  %v6692_v49 = vrot.slane %v6068_v26, %v6243_v8  ;;  %v6695_v47 = vrot.slane %v6069_v32, %v6243_v8  ;;  %v6698_v31 = vmul.f32 %v6604_v40, %v4344_v62  ;;  %v4517_v24 = vrot.slane %v4403_v19, 4  ;;  %v105_v63 = vld [vmem:[%s12909_s0] sm:$0x7f] }
  0x65   :  { %13710 = vst [vmem:[#allocation92_spill] sm:$0xff] %v6672_v7  ;;  %13711 = vst [vmem:[#allocation93_spill] sm:$0xff] %v6675_v29  ;;  %v6701_v13 = vmul.f32 %v6604_v40, %v4346_v37  ;;  %v6707_v46 = vmul.f32 %v6664_v43, %v4347_v45  ;;  %v6710_v26 = vmul.f32 %v6664_v43, %v4349_v0  ;;  %v4522_v32 = vrot.slane %v4405_v22, 4  ;;  %v106_v16 = vld [vmem:[%s12909_s0 + $0x8] sm:$0x7f] }
  0x66   :  { %13712 = vst [vmem:[#allocation94_spill] sm:$0xff] %v6679_v60  ;;  %13713 = vst [vmem:[#allocation95_spill] sm:$0xff] %v6683_v50  ;;  %v4523_v56 = vrot.slane %v4407_v34, 4  ;;  %v6713_v62 = vmul.f32 %v6604_v40, %v4348_v14  ;;  %v6716_v37 = vmul.f32 %v6604_v40, %v4350_v21  ;;  %v6724_v23 = vmul.f32 %v6679_v60, %v6403_v17  ;;  %v4336_v39 = vld [vmem:[#allocation2 + $0xb8] sm:$0xf0] }
  0x67   :  { %13714 = vst [vmem:[#allocation96_spill] sm:$0xff] %v6692_v49  ;;  %13715 = vst [vmem:[#allocation97_spill] sm:$0xff] %v6695_v47  ;;  %v6729_v18 = vmul.f32 %v6675_v29, %v4304_v27  ;;  %v161_v58 = vrot.slane %v105_v63, 6  ;;  %v4338_v59 = vld [vmem:[#allocation2 + $0x1a0] sm:$0x7]  ;;  %v6732_v11 = vsel %vm4512_vm2, %v4516_v6, %v4517_v24  ;;  %v4558_v61 = vrot.slane %v6698_v31, 4 }
  0x68   :  { %13716 = vst [vmem:[#allocation98_spill] sm:$0xff] %v6724_v23  ;;  %13717 = vst [vmem:[#allocation99_spill] sm:$0xff] %v6732_v11  ;;  %v4559_v19 = vrot.slane %v6701_v13, 4  ;;  %v6737_v17 = vmul.f32 %v6675_v29, %v4306_v5  ;;  %v107_v22 = vld [vmem:[%s12909_s0 + $0x10] sm:$0x7f]  ;;  %v6743_v34 = vsel %vm4512_vm2, %v4522_v32, %v4523_v56  ;;  %v4562_v63 = vrot.slane %v6710_v26, 4 }
  0x69   :  { %13718 = vst [vmem:[#allocation100_spill] sm:$0xff] %v6743_v34  ;;  %218 = vst [vmem:[#allocation2 + $0x128] sm:$0xfc] %v161_v58  ;;  %v162_v6 = vrot.slane %v106_v16, 6  ;;  %v108_v24 = vld [vmem:[%s12909_s0 + $0x18] sm:$0x7f]  ;;  %v4694_v56 = vmul.f32 %v6672_v7, %v4347_v45  ;;  %v4696_v32 = vmul.f32 %v6672_v7, %v4349_v0  ;;  %v4695_v26 = vmul.f32 %v6675_v29, %v4348_v14 }
  0x6a   :  { %220 = vst [vmem:[#allocation2] sm:$0x1] %v161_v58  ;;  %v4380_v5 = vld [vmem:[#allocation2 + $0x88] sm:$0xf0]  ;;  %v4382_v31 = vld [vmem:[#allocation2 + $0x40] sm:$0x7]  ;;  %v4697_v58 = vmul.f32 %v6675_v29, %v4350_v21  ;;  %v5223_v45 = vmul.f32 %v6692_v49, %v4338_v59  ;;  %v5482_v21 = vmul.f32 %v6695_v47, %v4336_v39 }
  0x6b   :  { %v4564_v13 = vrot.slane %v6713_v62, 4  ;;  %v4565_v11 = vrot.slane %v6716_v37, 4  ;;  %v4340_v27 = vld [vmem:[#allocation2 + $0x260] sm:$0xf0]  ;;  %v4342_v34 = vld [vmem:[#allocation2 + $0x290] sm:$0x7]  ;;  %v5221_v37 = vmul.f32 %v6692_v49, %v4336_v39  ;;  %v5249_v7 = vmul.f32 %v6692_v49, %v4380_v5 }
  0x6c   :  { %v4781_v16 = vrot.slane %v6729_v18, 4  ;;  %219 = vst [vmem:[#allocation2 + $0xe0] sm:$0xfc] %v162_v6  ;;  %221 = vst [vmem:[#allocation2 + $0x298] sm:$0x1] %v162_v6  ;;  %v163_v35 = vrot.slane %v107_v22, 6  ;;  %v5251_v14 = vmul.f32 %v6692_v49, %v4382_v31  ;;  %v5484_v18 = vmul.f32 %v6695_v47, %v4338_v59 }
  0x6d   :  { %v4384_v43 = vld [vmem:[#allocation2 + $0x1e8] sm:$0xf0]  ;;  %v4386_v50 = vld [vmem:[#allocation2 + $0xc8] sm:$0x7]  ;;  %v4782_v62 = vrot.slane %v6737_v17, 4  ;;  %v164_v0 = vrot.slane %v108_v24, 6  ;;  %v5486_v23 = vmul.f32 %v6695_v47, %v4340_v27  ;;  %v5488_v17 = vmul.f32 %v6695_v47, %v4342_v34 }
  0x6e   :  { %222 = vst [vmem:[#allocation2 + $0x160] sm:$0xfc] %v163_v35  ;;  %224 = vst [vmem:[#allocation2 + $0x120] sm:$0x1] %v163_v35  ;;  %v4820_v22 = vrot.slane %v4694_v56, 4  ;;  %v4821_v6 = vrot.slane %v4696_v32, 4  ;;  %v5510_v24 = vmul.f32 %v6695_v47, %v4380_v5  ;;  %v5512_v48 = vmul.f32 %v6695_v47, %v4382_v31 }
  0x6f   :  { %223 = vst [vmem:[#allocation2 + $0x170] sm:$0xfc] %v164_v0  ;;  %225 = vst [vmem:[#allocation2 + $0x2a8] sm:$0x1] %v164_v0  ;;  %v5514_v55 = vmul.f32 %v6695_v47, %v4384_v43  ;;  %v5516_v39 = vmul.f32 %v6695_v47, %v4386_v50  ;;  %v4823_v54 = vrot.slane %v4695_v26, 4  ;;  %v4824_v59 = vrot.slane %v4697_v58, 4 }
  0x70   :  { %v5347_v33 = vrot.slane %v5221_v37, 4  ;;  %v5348_v35 = vrot.slane %v5223_v45, 4  ;;  %v5389_v56 = vrot.slane %v5249_v7, 4  ;;  %v5390_v32 = vrot.slane %v5251_v14, 4 }
  0x71   :  { %v5606_v36 = vrot.slane %v5482_v21, 4  ;;  %v5607_v27 = vrot.slane %v5484_v18, 4  ;;  %v6047_v34 = vld [vmem:[%s12908_s1 + $0x20] ss:$8 sm:$0x3]  ;;  %v13719_v43 = vrot.slane %v6689_v1, 4  ;;  %v6784_v7 = vsel %vm4512_vm2, %v4558_v61, %v4559_v19 }
  0x72   :  { %v6052_v5 = vld [vmem:[%s12908_s1 + $0x21] ss:$8 sm:$0x3]  ;;  %v13720_v50 = vrot.slane %v6686_v38, 4  ;;  %13722 = vst [vmem:[#allocation102_spill] sm:$0xff] %v6784_v7  ;;  %v5612_v26 = vrot.slane %v5486_v23, 4  ;;  %v6797_v61 = vsel %vm4512_vm2, %v4564_v13, %v4565_v11  ;;  %v6800_v23 = vsel %vm4512_vm2, %v4781_v16, %v4782_v62 }
  0x73   :  { %v5613_v58 = vrot.slane %v5488_v17, 4  ;;  %v6053_v37 = vld [vmem:[%s12908_s1 + $0x31] ss:$8 sm:$0x3]  ;;  %v5648_v45 = vrot.slane %v5510_v24, 4  ;;  %v5649_v0 = vrot.slane %v5512_v48, 4  ;;  %v6803_v19 = vsel %vm4512_vm2, %v4820_v22, %v4821_v6 }
  0x74   :  { %v6781_v31 = vsel %vm4512_vm2, %v13720_v50, %v13719_v43  ;;  %v5654_v14 = vrot.slane %v5514_v55, 4  ;;  %v5655_v21 = vrot.slane %v5516_v39, 4  ;;  %v6789_v18 = vld [vmem:[#allocation2 + $0x198] sm:$0xfe]  ;;  %v13724_v1 = vrot.slane %v6707_v46, 4  ;;  %13726 = vst [vmem:[#allocation105_spill] sm:$0xff] %v6797_v61 }
  0x75   :  { %13721 = vst [vmem:[#allocation101_spill] sm:$0xff] %v6781_v31  ;;  %13723 = vst [vmem:[#allocation103_spill] sm:$0xff] %v6789_v18  ;;  %v6057_v55 = vld [vmem:[%s12908_s1 + $0x22] ss:$8 sm:$0x3]  ;;  %v6813_v46 = vsel %vm4512_vm2, %v4823_v54, %v4824_v59  ;;  %v6816_v11 = vsel %vm4512_vm2, %v5347_v33, %v5348_v35  ;;  %v6822_v13 = vsel %vm4512_vm2, %v5606_v36, %v5607_v27 }
  0x76   :  { %v6794_v38 = vsel %vm4512_vm2, %v13724_v1, %v4562_v63  ;;  %13727 = vst [vmem:[#allocation106_spill] sm:$0xff] %v6800_v23  ;;  %13728 = vst [vmem:[#allocation107_spill] sm:$0xff] %v6803_v19  ;;  %v6808_v48 = vld [vmem:[#allocation2 + $0x198] sm:$0x7f]  ;;  %v6819_v63 = vsel %vm4512_vm2, %v5389_v56, %v5390_v32  ;;  %v6830_v22 = vsel %vm4512_vm2, %v5612_v26, %v5613_v58  ;;  %v6863_v27 = vld [vmem:[#allocation2 + $0x88] sm:$0x7f] }
  0x77   :  { %13725 = vst [vmem:[#allocation104_spill] sm:$0xff] %v6794_v38  ;;  %13729 = vst [vmem:[#allocation108_spill] sm:$0xff] %v6808_v48  ;;  %v6810_v17 = vld [vmem:[#allocation2 + $0x238] sm:$0xfe]  ;;  %v6833_v54 = vrot.slane %v6047_v34, %v6231_v4  ;;  %v6836_v33 = vrot.slane %v6052_v5, %v6231_v4  ;;  %v6844_v6 = vrot.slane %v6053_v37, %v6231_v4  ;;  %v6867_v50 = vld [vmem:[#allocation2 + $0x88] sm:$0xfe] }
  0x78   :  { %13730 = vst [vmem:[#allocation109_spill] sm:$0xff] %v6810_v17  ;;  %13731 = vst [vmem:[#allocation110_spill] sm:$0xff] %v6813_v46  ;;  %v6048_v16 = vld [vmem:[%s12908_s1 + $0x30] ss:$8 sm:$0x3]  ;;  %v6849_v39 = vsel %vm4512_vm2, %v5648_v45, %v5649_v0  ;;  %v6852_v59 = vsel %vm4512_vm2, %v5654_v14, %v5655_v21  ;;  %v6855_v35 = vrot.slane %v6057_v55, %v6231_v4 }
  0x79   :  { %13732 = vst [vmem:[#allocation111_spill] sm:$0xff] %v6816_v11  ;;  %13733 = vst [vmem:[#allocation112_spill] sm:$0xff] %v6819_v63  ;;  %v6827_v62 = vld [vmem:[#allocation2 + $0xb8] sm:$0x7f]  ;;  %v6858_v56 = vrot.slane %v6047_v34, %v6243_v8  ;;  %v6870_v26 = vrot.slane %v6052_v5, %v6243_v8  ;;  %v6873_v58 = vrot.slane %v6048_v16, %v6231_v4  ;;  %v278_v0 = vld [vmem:[#allocation2 + $0x128] sm:$0x7f] }
  0x7a   :  { %13734 = vst [vmem:[#allocation113_spill] sm:$0xff] %v6822_v13  ;;  %13735 = vst [vmem:[#allocation114_spill] sm:$0xff] %v6827_v62  ;;  %v6841_v36 = vld [vmem:[%s12908_s1 + $0x23] ss:$8 sm:$0x3]  ;;  %v6877_v34 = vmul.f32 %v6844_v6, %v6789_v18  ;;  %v6881_v45 = vmul.f32 %v6844_v6, %v6810_v17  ;;  %v6884_v14 = vrot.slane %v6057_v55, %v6243_v8 }
  0x7b   :  { %13736 = vst [vmem:[#allocation115_spill] sm:$0xff] %v6830_v22  ;;  %13737 = vst [vmem:[#allocation116_spill] sm:$0xff] %v6833_v54  ;;  %v6846_v24 = vld [vmem:[#allocation2 + $0x238] sm:$0x7f]  ;;  %v6888_v21 = vrot.slane %v6841_v36, %v6243_v8  ;;  %v6891_v5 = vrot.slane %v6048_v16, %v6243_v8  ;;  %v6894_v1 = vrot.slane %v6053_v37, %v6243_v8  ;;  %v2517_v16 = vrot.slane %v6454_v41, 2 }
  0x7c   :  { %13738 = vst [vmem:[#allocation117_spill] sm:$0xff] %v6836_v33  ;;  %13739 = vst [vmem:[#allocation118_spill] sm:$0xff] %v6841_v36  ;;  %v6067_v32 = vld [vmem:[%s12908_s1 + $0x24] ss:$8 sm:$0x3]  ;;  %v6904_v55 = vmul.f32 %v6873_v58, %v6808_v48  ;;  %v6908_v31 = vmul.f32 %v6873_v58, %v6846_v24  ;;  %v401_v22 = vmul.f32 %v6258_v15, %v278_v0  ;;  %v13778_v36 = vld [vmem:[#allocation14_spill] sm:$0xff] }
  0x7d   :  { %13740 = vst [vmem:[#allocation119_spill] sm:$0xff] %v6844_v6  ;;  %13741 = vst [vmem:[#allocation120_spill] sm:$0xff] %v6846_v24  ;;  %v6865_v43 = vld [vmem:[#allocation2 + $0xb8] sm:$0xfe]  ;;  %v6900_v38 = vrot.slane %v6067_v32, %v6243_v8  ;;  %v6918_v32 = vmul.f32 %v6891_v5, %v6827_v62  ;;  %v6930_v41 = vmul.f32 %v6894_v1, %v6867_v50  ;;  %v1479_v13 = vld [vmem:[#allocation2 + $0x128] sm:$0xfc] }
  0x7e   :  { %13742 = vst [vmem:[#allocation121_spill] sm:$0xff] %v6849_v39  ;;  %13743 = vst [vmem:[#allocation122_spill] sm:$0xff] %v6852_v59  ;;  %v6049_v19 = vld [vmem:[%s12908_s1 + $0x40] ss:$8 sm:$0x3]  ;;  %v6922_v39 = vmul.f32 %v6891_v5, %v6863_v27  ;;  %v6926_v63 = vmul.f32 %v6894_v1, %v6865_v43  ;;  %v6963_v52 = vmul.f32 %v6249_v10, %v1479_v13 }
  0x7f   :  { %13744 = vst [vmem:[#allocation123_spill] sm:$0xff] %v6855_v35  ;;  %13745 = vst [vmem:[#allocation124_spill] sm:$0xff] %v6858_v56  ;;  %v6914_v37 = vld [vmem:[%s12908_s1 + $0x41] ss:$8 sm:$0x3]  ;;  %v6939_v23 = vrot.slane %v6049_v19, %v6231_v4  ;;  %v6966_v20 = vmul.f32 %v13772_v53, %v1479_v13  ;;  %v6969_v57 = vrot.slane %v6049_v19, %v6243_v8 }
  0x80   :  { %13746 = vst [vmem:[#allocation125_spill] sm:$0xff] %v6863_v27  ;;  %13747 = vst [vmem:[#allocation126_spill] sm:$0xff] %v6865_v43  ;;  %v666_v59 = vld [vmem:[#allocation2 + $0x128] sm:$0xfe]  ;;  %v6943_v61 = vrot.slane %v6914_v37, %v6231_v4  ;;  %v1480_v47 = vld [vmem:[#allocation2 + $0xe0] sm:$0xfc] }
  0x81   :  { %13748 = vst [vmem:[#allocation127_spill] sm:$0xff] %v6867_v50  ;;  %13749 = vst [vmem:[#allocation128_spill] sm:$0xff] %v6870_v26  ;;  %v6946_v7 = vmul.f32 %v6246_v9, %v666_v59  ;;  %v6949_v11 = vmul.f32 %v6284_v30, %v666_v59  ;;  %v13780_v50 = vld [vmem:[#allocation16_spill] sm:$0xff]  ;;  %v13783_v27 = vld [vmem:[#allocation17_spill] sm:$0xff]  ;;  %v2104_v2 = vmul.f32 %v6884_v14, %v1480_v47 }
  0x82   :  { %13750 = vst [vmem:[#allocation129_spill] sm:$0xff] %v6873_v58  ;;  %13751 = vst [vmem:[#allocation130_spill] sm:$0xff] %v6877_v34  ;;  %v6960_v34 = vmul.f32 %v6255_v12, %v278_v0  ;;  %v1581_v62 = vmul.f32 %v13783_v27, %v1480_v47  ;;  %v13784_v8 = vld [vmem:[#allocation19_spill] sm:$0xff] }
  0x83   :  { %13752 = vst [vmem:[#allocation131_spill] sm:$0xff] %v6881_v45  ;;  %13753 = vst [vmem:[#allocation132_spill] sm:$0xff] %v6884_v14  ;;  %v13770_v45 = vrot.slane %v6451_v51, 2  ;;  %v6975_v51 = vmul.f32 %v6855_v35, %v1479_v13  ;;  %v1481_v42 = vld [vmem:[#allocation2] sm:$0x1] }
  0x84   :  { %13754 = vst [vmem:[#allocation133_spill] sm:$0xff] %v6888_v21  ;;  %13755 = vst [vmem:[#allocation134_spill] sm:$0xff] %v6891_v5  ;;  %v13786_v13 = vld [vmem:[#allocation23_spill] sm:$0xff]  ;;  %v1700_v17 = vrot.slane %v1581_v62, 2  ;;  %v7027_v3 = vmul.f32 %v6855_v35, %v1481_v42 }
  0x85   :  { %13756 = vst [vmem:[#allocation135_spill] sm:$0xff] %v6894_v1  ;;  %13757 = vst [vmem:[#allocation136_spill] sm:$0xff] %v6900_v38  ;;  %v6957_v46 = vsel %vm1684_vm0, %v13770_v45, %v2517_v16  ;;  %v13776_v45 = vld [vmem:[#allocation13_spill] sm:$0xff] }
  0x86   :  { %13758 = vst [vmem:[#allocation137_spill] sm:$0xff] %v6904_v55  ;;  %13759 = vst [vmem:[#allocation138_spill] sm:$0xff] %v6908_v31  ;;  %v468_v55 = vmul.f32 %v6833_v54, %v278_v0  ;;  %v6952_v31 = vmul.f32 %v6836_v33, %v666_v59  ;;  %v13774_v59 = vld [vmem:[#allocation20_spill] sm:$0xff] }
  0x87   :  { %13760 = vst [vmem:[#allocation139_spill] sm:$0xff] %v6914_v37  ;;  %13761 = vst [vmem:[#allocation140_spill] sm:$0xff] %v6918_v32  ;;  %v667_v32 = vld [vmem:[#allocation2 + $0xe0] sm:$0xfe]  ;;  %v6972_v28 = vadd.f32 %v401_v22, %v13774_v59  ;;  %v13785_v22 = vld [vmem:[#allocation10_spill] sm:$0xff] }
  0x88   :  { %13762 = vst [vmem:[#allocation141_spill] sm:$0xff] %v6922_v39  ;;  %13763 = vst [vmem:[#allocation142_spill] sm:$0xff] %v6926_v63  ;;  %v279_v39 = vld [vmem:[#allocation2 + $0xe0] sm:$0x7f]  ;;  %v6983_v4 = vmul.f32 %v13778_v36, %v667_v32  ;;  %v6986_v43 = vmul.f32 %v13780_v50, %v667_v32  ;;  %v6989_v19 = vmul.f32 %v6870_v26, %v667_v32  ;;  %v1482_v32 = vld [vmem:[#allocation2 + $0x298] sm:$0x1] }
  0x89   :  { %13764 = vst [vmem:[#allocation143_spill] sm:$0xff] %v6930_v41  ;;  %13765 = vst [vmem:[#allocation144_spill] sm:$0xff] %v6939_v23  ;;  %v402_v16 = vmul.f32 %v13776_v45, %v279_v39  ;;  %v469_v0 = vmul.f32 %v6858_v56, %v279_v39  ;;  %v2894_v37 = vld [vmem:[#allocation2 + $0xe0] sm:$0xf8]  ;;  %v2896_v41 = vld [vmem:[#allocation2 + $0x298] sm:$0x3] }
  0x8a   :  { %13766 = vst [vmem:[#allocation145_spill] sm:$0xff] %v6943_v61  ;;  %13767 = vst [vmem:[#allocation146_spill] sm:$0xff] %v6946_v7  ;;  %v7001_v7 = vmul.f32 %v13785_v22, %v279_v39  ;;  %v2995_v18 = vmul.f32 %v6306_v44, %v2894_v37  ;;  %v3257_v39 = vmul.f32 %v6393_v25, %v2894_v37 }
  0x8b   :  { %13768 = vst [vmem:[#allocation147_spill] sm:$0xff] %v6949_v11  ;;  %13769 = vst [vmem:[#allocation148_spill] sm:$0xff] %v6952_v31  ;;  %v7004_v59 = vadd.f32 %v402_v16, %v13786_v13  ;;  %v13787_v31 = vld [vmem:[#allocation41_spill] sm:$0xff]  ;;  %v1583_v16 = vmul.f32 %v13783_v27, %v1482_v32  ;;  %v2997_v62 = vmul.f32 %v6306_v44, %v2896_v41 }
  0x8c   :  { %13771 = vst [vmem:[#allocation149_spill] sm:$0xff] %v6957_v46  ;;  %13773 = vst [vmem:[#allocation150_spill] sm:$0xff] %v6969_v57  ;;  %v13777_v46 = vld [vmem:[#allocation24_spill] sm:$0xff]  ;;  %v1843_v57 = vmul.f32 %v13784_v8, %v1480_v47  ;;  %v7007_v11 = vadd.f32 %v469_v0, %v13787_v31  ;;  %v2218_v31 = vrot.slane %v2104_v2, 2  ;;  %v3518_v0 = vmul.f32 %v6888_v21, %v2894_v37 }
  0x8d   :  { %13775 = vst [vmem:[#allocation20_spill] sm:$0xff] %v6975_v51  ;;  %v6980_v60 = vadd.f32 %v468_v55, %v13777_v46  ;;  %13779 = vst [vmem:[#allocation24_spill] sm:$0xff] %v6983_v4  ;;  %v1697_v46 = vrot.slane %v6963_v52, 2  ;;  %v1956_v55 = vrot.slane %v6966_v20, 2  ;;  %v4308_v52 = vld [vmem:[#allocation2 + $0xe0] sm:$0xf0]  ;;  %v1582_v51 = vmul.f32 %v6249_v10, %v1481_v42 }
  0x8e   :  { %13781 = vst [vmem:[#allocation16_spill] sm:$0xff] %v6986_v43  ;;  %13782 = vst [vmem:[#allocation151_spill] sm:$0xff] %v6989_v19  ;;  %v1959_v13 = vrot.slane %v1843_v57, 2  ;;  %v1844_v20 = vmul.f32 %v13772_v53, %v1481_v42  ;;  %v4409_v61 = vmul.f32 %v6604_v40, %v4308_v52  ;;  %v1845_v47 = vmul.f32 %v13784_v8, %v1482_v32  ;;  %v4310_v43 = vld [vmem:[#allocation2 + $0x298] sm:$0x7] }
  0x8f   :  { %13788 = vst [vmem:[#allocation23_spill] sm:$0xff] %v7007_v11  ;;  %v2106_v4 = vmul.f32 %v6884_v14, %v1482_v32  ;;  %v3114_v19 = vrot.slane %v2995_v18, 3  ;;  %v4671_v63 = vmul.f32 %v6675_v29, %v4308_v52  ;;  %v4932_v24 = vmul.f32 %v6900_v38, %v4308_v52  ;;  %13789 = vst [vmem:[#allocation41_spill] sm:$0xff] %v7027_v3 }
  0x90   :  { %v3259_v57 = vmul.f32 %v6393_v25, %v2896_v41  ;;  %v3373_v2 = vrot.slane %v3257_v39, 3  ;;  %v1698_v37 = vrot.slane %v1582_v51, 2  ;;  %v1701_v23 = vrot.slane %v1583_v16, 2  ;;  %v280_v39 = vld [vmem:[#allocation2 + $0x160] sm:$0x7f] }
  0x91   :  { %v3520_v48 = vmul.f32 %v6888_v21, %v2896_v41  ;;  %v1957_v49 = vrot.slane %v1844_v20, 2  ;;  %v4411_v32 = vmul.f32 %v6604_v40, %v4310_v43  ;;  %v4673_v44 = vmul.f32 %v6675_v29, %v4310_v43 }
  0x92   :  { %v3632_v18 = vrot.slane %v3518_v0, 3  ;;  %v1960_v14 = vrot.slane %v1845_v47, 2  ;;  %v2219_v8 = vrot.slane %v2106_v4, 2  ;;  %v3115_v11 = vrot.slane %v2997_v62, 3  ;;  %v281_v62 = vld [vmem:[#allocation2 + $0x170] sm:$0x7f] }
  0x93   :  { %v4528_v52 = vrot.slane %v4409_v61, 4  ;;  %v4787_v27 = vrot.slane %v4671_v63, 4  ;;  %v3374_v25 = vrot.slane %v3259_v57, 3  ;;  %v4934_v51 = vmul.f32 %v6900_v38, %v4310_v43  ;;  %v668_v63 = vld [vmem:[#allocation2 + $0x160] sm:$0xfe] }
  0x94   :  { %v5046_v16 = vrot.slane %v4932_v24, 4  ;;  %v7033_v41 = vsel %vm1684_vm0, %v1697_v46, %v1698_v37  ;;  %v7036_v42 = vsel %vm1684_vm0, %v1700_v17, %v1701_v23  ;;  %v3633_v20 = vrot.slane %v3520_v48, 3  ;;  %v1483_v46 = vld [vmem:[#allocation2 + $0x160] sm:$0xfc] }
  0x95   :  { %13790 = vst [vmem:[#allocation152_spill] sm:$0xff] %v7033_v41  ;;  %13791 = vst [vmem:[#allocation153_spill] sm:$0xff] %v7036_v42  ;;  %v7039_v29 = vsel %vm1684_vm0, %v1956_v55, %v1957_v49  ;;  %v4529_v47 = vrot.slane %v4411_v32, 4  ;;  %v4788_v61 = vrot.slane %v4673_v44, 4  ;;  %v7043_v0 = vsel %vm1684_vm0, %v1959_v13, %v1960_v14  ;;  %v109_v49 = vld [vmem:[%s12909_s0 + $0x20] sm:$0x7f] }
  0x96   :  { %13792 = vst [vmem:[#allocation154_spill] sm:$0xff] %v7039_v29  ;;  %13793 = vst [vmem:[#allocation155_spill] sm:$0xff] %v7043_v0  ;;  %v7046_v24 = vsel %vm1684_vm0, %v2218_v31, %v2219_v8  ;;  %v7049_v43 = vsel %vm3098_vm1, %v3114_v19, %v3115_v11  ;;  %v403_v23 = vmul.f32 %v6258_v15, %v280_v39  ;;  %v5047_v44 = vrot.slane %v4934_v51, 4  ;;  %v294_v29 = vld [vmem:[#allocation2 + $0x228] sm:$0x7f] }
  0x97   :  { %13794 = vst [vmem:[#allocation156_spill] sm:$0xff] %v7046_v24  ;;  %13795 = vst [vmem:[#allocation157_spill] sm:$0xff] %v7049_v43  ;;  %v7056_v48 = vsel %vm3098_vm1, %v3373_v2, %v3374_v25  ;;  %v470_v17 = vmul.f32 %v6833_v54, %v280_v39  ;;  %v537_v14 = vmul.f32 %v6873_v58, %v280_v39  ;;  %v165_v57 = vrot.slane %v109_v49, 6  ;;  %v316_v24 = vld [vmem:[#allocation2 + $0x108] sm:$0x7f] }
  0x98   :  { %13796 = vst [vmem:[#allocation158_spill] sm:$0xff] %v7056_v48  ;;  %v7061_v8 = vsel %vm3098_vm1, %v3632_v18, %v3633_v20  ;;  %v7064_v11 = vmul.f32 %v6255_v12, %v280_v39  ;;  %v7067_v19 = vmul.f32 %v6246_v9, %v668_v63  ;;  %v7070_v55 = vmul.f32 %v6284_v30, %v668_v63  ;;  %v110_v39 = vld [vmem:[%s12909_s0 + $0x28] sm:$0x7f]  ;;  %v13824_v48 = vld [vmem:[#allocation39_spill] sm:$0xff] }
  0x99   :  { %13797 = vst [vmem:[#allocation159_spill] sm:$0xff] %v7061_v8  ;;  %v7073_v25 = vsel %vm4512_vm2, %v4528_v52, %v4529_v47  ;;  %v7076_v13 = vsel %vm4512_vm2, %v4787_v27, %v4788_v61  ;;  %v7079_v31 = vmul.f32 %v6836_v33, %v668_v63  ;;  %v7082_v2 = vadd.f32 %v403_v23, %v6960_v34  ;;  %v669_v61 = vld [vmem:[#allocation2 + $0x170] sm:$0xfe] }
  0x9a   :  { %13798 = vst [vmem:[#allocation160_spill] sm:$0xff] %v7067_v19  ;;  %13799 = vst [vmem:[#allocation161_spill] sm:$0xff] %v7070_v55  ;;  %v7085_v37 = vmul.f32 %v6844_v6, %v668_v63  ;;  %v7088_v32 = vmul.f32 %v6249_v10, %v1483_v46  ;;  %v7091_v18 = vmul.f32 %v13772_v53, %v1483_v46  ;;  %v13808_v63 = vld [vmem:[#allocation44_spill] sm:$0xff]  ;;  %v166_v20 = vrot.slane %v110_v39, 6 }
  0x9b   :  { %13800 = vst [vmem:[#allocation162_spill] sm:$0xff] %v7073_v25  ;;  %13801 = vst [vmem:[#allocation163_spill] sm:$0xff] %v7076_v13  ;;  %v7094_v27 = vsel %vm4512_vm2, %v5046_v16, %v5047_v44  ;;  %v7097_v52 = vadd.f32 %v470_v17, %v6972_v28  ;;  %v7100_v51 = vadd.f32 %v537_v14, %v6980_v60  ;;  %v1484_v17 = vld [vmem:[#allocation2 + $0x170] sm:$0xfc]  ;;  %v13816_v13 = vld [vmem:[#allocation19_spill] sm:$0xff] }
  0x9c   :  { %13802 = vst [vmem:[#allocation164_spill] sm:$0xff] %v7079_v31  ;;  %13803 = vst [vmem:[#allocation165_spill] sm:$0xff] %v7085_v37  ;;  %v7103_v34 = vmul.f32 %v6855_v35, %v1483_v46  ;;  %v404_v47 = vmul.f32 %v13776_v45, %v281_v62  ;;  %v471_v28 = vmul.f32 %v6858_v56, %v281_v62  ;;  %v13813_v16 = vld [vmem:[#allocation17_spill] sm:$0xff]  ;;  %v13815_v37 = vld [vmem:[#allocation23_spill] sm:$0xff] }
  0x9d   :  { %13804 = vst [vmem:[#allocation166_spill] sm:$0xff] %v7088_v32  ;;  %13805 = vst [vmem:[#allocation167_spill] sm:$0xff] %v7091_v18  ;;  %v7114_v23 = vmul.f32 %v13808_v63, %v1483_v46  ;;  %v7117_v49 = vmul.f32 %v13785_v22, %v281_v62  ;;  %v538_v44 = vmul.f32 %v6891_v5, %v281_v62  ;;  %v2898_v62 = vld [vmem:[#allocation2 + $0x170] sm:$0xf8]  ;;  %v682_v55 = vld [vmem:[#allocation2 + $0x228] sm:$0xfe] }
  0x9e   :  { %13806 = vst [vmem:[#allocation168_spill] sm:$0xff] %v7094_v27  ;;  %13807 = vst [vmem:[#allocation169_spill] sm:$0xff] %v7103_v34  ;;  %v7125_v60 = vmul.f32 %v13778_v36, %v669_v61  ;;  %v7128_v46 = vmul.f32 %v13780_v50, %v669_v61  ;;  %v7131_v3 = vmul.f32 %v6870_v26, %v669_v61  ;;  %v13830_v32 = vld [vmem:[#allocation93_spill] sm:$0xff]  ;;  %v13836_v34 = vld [vmem:[#allocation144_spill] sm:$0xff] }
  0x9f   :  { %226 = vst [vmem:[#allocation2 + $0x240] sm:$0xfc] %v165_v57  ;;  %228 = vst [vmem:[#allocation2 + $0x60] sm:$0x1] %v165_v57  ;;  %v7137_v14 = vadd.f32 %v471_v28, %v7004_v59  ;;  %v7140_v39 = vmul.f32 %v6894_v1, %v669_v61  ;;  %v7143_v4 = vmul.f32 %v13813_v16, %v1484_v17  ;;  %v4312_v57 = vld [vmem:[#allocation2 + $0x170] sm:$0xf0] }
  0xa0   :  { %13809 = vst [vmem:[#allocation170_spill] sm:$0xff] %v7114_v23  ;;  %13810 = vst [vmem:[#allocation171_spill] sm:$0xff] %v7125_v60  ;;  %v7134_v23 = vadd.f32 %v404_v47, %v7001_v7  ;;  %v7146_v27 = vadd.f32 %v538_v44, %v13815_v37  ;;  %v7149_v25 = vmul.f32 %v13816_v13, %v1484_v17  ;;  %v13818_v7 = vld [vmem:[#allocation132_spill] sm:$0xff]  ;;  %v13820_v59 = vld [vmem:[#allocation47_spill] sm:$0xff] }
  0xa1   :  { %13811 = vst [vmem:[#allocation172_spill] sm:$0xff] %v7128_v46  ;;  %13812 = vst [vmem:[#allocation173_spill] sm:$0xff] %v7131_v3  ;;  %v7152_v47 = vmul.f32 %v13818_v7, %v1484_v17  ;;  %v7155_v28 = vmul.f32 %v13820_v59, %v1484_v17  ;;  %v13822_v61 = vld [vmem:[#allocation22_spill] sm:$0xff]  ;;  %v7161_v43 = vmul.f32 %v13824_v48, %v2898_v62  ;;  %v13827_v37 = vld [vmem:[#allocation40_spill] sm:$0xff] }
  0xa2   :  { %13814 = vst [vmem:[#allocation174_spill] sm:$0xff] %v7143_v4  ;;  %227 = vst [vmem:[#allocation2 + $0x18] sm:$0xfc] %v166_v20  ;;  %v7158_v8 = vmul.f32 %v13822_v61, %v2898_v62  ;;  %v7167_v44 = vmul.f32 %v13827_v37, %v2898_v62  ;;  %v7173_v17 = vmul.f32 %v6604_v40, %v4312_v57  ;;  %v13839_v46 = vld [vmem:[#allocation120_spill] sm:$0xff]  ;;  %v683_v3 = vld [vmem:[#allocation2 + $0x260] sm:$0xfe] }
  0xa3   :  { %229 = vst [vmem:[#allocation2 + $0x220] sm:$0x1] %v166_v20  ;;  %13817 = vst [vmem:[#allocation23_spill] sm:$0xff] %v7149_v25  ;;  %v7164_v20 = vmul.f32 %v6888_v21, %v2898_v62  ;;  %v7177_v42 = vmul.f32 %v13830_v32, %v4312_v57  ;;  %v7180_v19 = vmul.f32 %v6900_v38, %v4312_v57  ;;  %v13833_v62 = vld [vmem:[#allocation96_spill] sm:$0xff]  ;;  %v13848_v31 = vld [vmem:[#allocation109_spill] sm:$0xff] }
  0xa4   :  { %13819 = vst [vmem:[#allocation175_spill] sm:$0xff] %v7152_v47  ;;  %13821 = vst [vmem:[#allocation176_spill] sm:$0xff] %v7155_v28  ;;  %v7183_v41 = vmul.f32 %v13833_v62, %v4312_v57  ;;  %v704_v57 = vld [vmem:[#allocation2 + $0x108] sm:$0xfe]  ;;  %v7199_v60 = vmul.f32 %v13836_v34, %v294_v29  ;;  %v7203_v0 = vmul.f32 %v13836_v34, %v13839_v46  ;;  %v295_v62 = vld [vmem:[#allocation2 + $0x260] sm:$0x7f] }
  0xa5   :  { %13823 = vst [vmem:[#allocation177_spill] sm:$0xff] %v7158_v8  ;;  %13825 = vst [vmem:[#allocation178_spill] sm:$0xff] %v7161_v43  ;;  %v13835_v32 = vld [vmem:[#allocation108_spill] sm:$0xff]  ;;  %v7209_v18 = vmul.f32 %v13836_v34, %v316_v24  ;;  %v13858_v8 = vld [vmem:[#allocation55_spill] sm:$0xff] }
  0xa6   :  { %13826 = vst [vmem:[#allocation179_spill] sm:$0xff] %v7164_v20  ;;  %13828 = vst [vmem:[#allocation180_spill] sm:$0xff] %v7167_v44  ;;  %v7196_v4 = vmul.f32 %v13836_v34, %v13835_v32  ;;  %v13845_v20 = vld [vmem:[#allocation145_spill] sm:$0xff]  ;;  %v705_v44 = vld [vmem:[#allocation2 + $0x1e8] sm:$0xfe]  ;;  %v2561_v28 = vrot.slane %v13858_v8, 2 }
  0xa7   :  { %13829 = vst [vmem:[#allocation181_spill] sm:$0xff] %v7173_v17  ;;  %13831 = vst [vmem:[#allocation182_spill] sm:$0xff] %v7177_v42  ;;  %v317_v17 = vld [vmem:[#allocation2 + $0x1e8] sm:$0x7f]  ;;  %v7218_v46 = vmul.f32 %v13845_v20, %v682_v55  ;;  %v7222_v38 = vmul.f32 %v13845_v20, %v13848_v31  ;;  %v7225_v24 = vmul.f32 %v13845_v20, %v704_v57  ;;  %v13859_v31 = vld [vmem:[#allocation150_spill] sm:$0xff] }
  0xa8   :  { %13832 = vst [vmem:[#allocation183_spill] sm:$0xff] %v7180_v19  ;;  %13834 = vst [vmem:[#allocation184_spill] sm:$0xff] %v7183_v41  ;;  %v13853_v41 = vld [vmem:[#allocation54_spill] sm:$0xff]  ;;  %v13855_v19 = vld [vmem:[#allocation53_spill] sm:$0xff] }
  0xa9   :  { %13837 = vst [vmem:[#allocation108_spill] sm:$0xff] %v7196_v4  ;;  %13838 = vst [vmem:[#allocation185_spill] sm:$0xff] %v7199_v60  ;;  %v13844_v60 = vld [vmem:[#allocation103_spill] sm:$0xff]  ;;  %v13852_v4 = vld [vmem:[#allocation52_spill] sm:$0xff]  ;;  %v13856_v42 = vrot.slane %v13855_v19, 2 }
  0xaa   :  { %13840 = vst [vmem:[#allocation120_spill] sm:$0xff] %v7203_v0  ;;  %13841 = vst [vmem:[#allocation186_spill] sm:$0xff] %v7209_v18  ;;  %v7215_v43 = vmul.f32 %v13845_v20, %v13844_v60  ;;  %v13851_v18 = vld [vmem:[#allocation51_spill] sm:$0xff]  ;;  %v2520_v32 = vrot.slane %v13852_v4, 2  ;;  %v283_v29 = vld [vmem:[#allocation2 + $0x18] sm:$0x7f] }
  0xab   :  { %13847 = vst [vmem:[#allocation187_spill] sm:$0xff] %v7218_v46  ;;  %13849 = vst [vmem:[#allocation109_spill] sm:$0xff] %v7222_v38  ;;  %v2519_v0 = vrot.slane %v13851_v18, 2  ;;  %v13854_v60 = vrot.slane %v13853_v41, 2  ;;  %v607_v47 = vmul.f32 %v13859_v31, %v283_v29  ;;  %v13860_v25 = vld [vmem:[#allocation5_spill] sm:$0xff]  ;;  %v13861_v57 = vld [vmem:[#allocation139_spill] sm:$0xff]  ;;  %v7248_v41 = vmul.f32 %v13859_v31, %v295_v62 }
  0xac   :  { %13846 = vst [vmem:[#allocation103_spill] sm:$0xff] %v7215_v43  ;;  %13850 = vst [vmem:[#allocation188_spill] sm:$0xff] %v7225_v24  ;;  %v7240_v40 = vrot.slane %v13861_v57, %v13860_v25  ;;  %v282_v18 = vld [vmem:[#allocation2 + $0x240] sm:$0x7f]  ;;  %v13863_v37 = vld [vmem:[#allocation57_spill] sm:$0xff]  ;;  %v7256_v57 = vmul.f32 %v13859_v31, %v317_v17 }
  0xad   :  { %v7234_v55 = vsel %vm1684_vm0, %v13856_v42, %v13854_v60  ;;  %v2562_v4 = vrot.slane %v13863_v37, 2  ;;  %v13864_v21 = vld [vmem:[#allocation114_spill] sm:$0xff]  ;;  %13866 = vst [vmem:[#allocation53_spill] sm:$0xff] %v7248_v41  ;;  %v13867_v42 = vld [vmem:[#allocation125_spill] sm:$0xff]  ;;  %v606_v8 = vmul.f32 %v13836_v34, %v282_v18  ;;  %v670_v60 = vld [vmem:[#allocation2 + $0x240] sm:$0xfe]  ;;  %v635_v62 = vadd.f32 %v607_v47, %v7146_v27 }
  0xae   :  { %13857 = vst [vmem:[#allocation51_spill] sm:$0xff] %v7234_v55  ;;  %13862 = vst [vmem:[#allocation52_spill] sm:$0xff] %v7240_v40  ;;  %v7245_v48 = vmul.f32 %v13859_v31, %v13864_v21  ;;  %v7252_v19 = vmul.f32 %v13859_v31, %v13867_v42  ;;  %v13870_v25 = vld [vmem:[#allocation126_spill] sm:$0xff]  ;;  %v7263_v21 = vmul.f32 %v7240_v40, %v683_v3  ;;  %v13873_v55 = vld [vmem:[#allocation127_spill] sm:$0xff] }
  0xaf   :  { %13869 = vst [vmem:[#allocation139_spill] sm:$0xff] %v7256_v57  ;;  %v7260_v37 = vmul.f32 %v7240_v40, %v13870_v25  ;;  %v7268_v41 = vmul.f32 %v7240_v40, %v13873_v55  ;;  %v7271_v42 = vmul.f32 %v7240_v40, %v705_v44  ;;  %v405_v17 = vmul.f32 %v6258_v15, %v282_v18  ;;  %v1487_v46 = vld [vmem:[#allocation2 + $0x240] sm:$0xfc]  ;;  %v13884_v15 = vld [vmem:[#allocation118_spill] sm:$0xff] }
  0xb0   :  { %13865 = vst [vmem:[#allocation54_spill] sm:$0xff] %v7245_v48  ;;  %13868 = vst [vmem:[#allocation55_spill] sm:$0xff] %v7252_v19  ;;  %v472_v57 = vmul.f32 %v6833_v54, %v282_v18  ;;  %v539_v25 = vmul.f32 %v6873_v58, %v282_v18  ;;  %v7279_v48 = vmul.f32 %v6246_v9, %v670_v60  ;;  %v13880_v9 = vld [vmem:[#allocation25_spill] sm:$0xff]  ;;  %v6076_v31 = vld [vmem:[#allocation2 + $0x138] sm:$0x1] }
  0xb1   :  { %13871 = vst [vmem:[#allocation57_spill] sm:$0xff] %v7260_v37  ;;  %13872 = vst [vmem:[#allocation114_spill] sm:$0xff] %v7263_v21  ;;  %v7282_v27 = vmul.f32 %v6284_v30, %v670_v60  ;;  %v7285_v47 = vmul.f32 %v6836_v33, %v670_v60  ;;  %v7288_v44 = vmul.f32 %v6844_v6, %v670_v60  ;;  %v13881_v58 = vrot.slane %v13880_v9, 1  ;;  %v13883_v33 = vld [vmem:[#allocation4_spill] sm:$0xff]  ;;  %v7488_v21 = vld [vmem:[#allocation2 + $0xc0] sm:$0x3] }
  0xb2   :  { %13874 = vst [vmem:[#allocation125_spill] sm:$0xff] %v7268_v41  ;;  %13875 = vst [vmem:[#allocation126_spill] sm:$0xff] %v7271_v42  ;;  %v634_v55 = vadd.f32 %v606_v8, %v7100_v51  ;;  %v7294_v3 = vsel %vm1684_vm0, %v2519_v0, %v2520_v32  ;;  %v7299_v54 = vsel %vm1684_vm0, %v2561_v28, %v2562_v4  ;;  %v13886_v51 = vld [vmem:[#allocation94_spill] sm:$0xff]  ;;  %v13937_v41 = vld [vmem:[#allocation85_spill] sm:$0xff] }
  0xb3   :  { %13876 = vst [vmem:[#allocation127_spill] sm:$0xff] %v7279_v48  ;;  %13877 = vst [vmem:[#allocation189_spill] sm:$0xff] %v7282_v27  ;;  %v832_v30 = vadd.f32 %v13881_v58, %v635_v62  ;;  %v7303_v6 = vrot.slane %v13884_v15, %v13883_v33  ;;  %v7306_v8 = vmul.f32 %v6076_v31, %v13886_v51  ;;  %v13939_v37 = vld [vmem:[#allocation86_spill] sm:$0xff] }
  0xb4   :  { %13878 = vst [vmem:[#allocation190_spill] sm:$0xff] %v7285_v47  ;;  %13879 = vst [vmem:[#allocation191_spill] sm:$0xff] %v7294_v3  ;;  %v7309_v43 = vmul.f32 %v6255_v12, %v282_v18  ;;  %v7312_v0 = vadd.f32 %v405_v17, %v7064_v11  ;;  %v7315_v9 = vadd.f32 %v472_v57, %v7082_v2  ;;  %v111_v18 = vld [vmem:[%s12909_s0 + $0x30] sm:$0x7f]  ;;  %v13887_v11 = vld [vmem:[#allocation11_spill] sm:$0xff] }
  0xb5   :  { %13882 = vst [vmem:[#allocation25_spill] sm:$0xff] %v7299_v54  ;;  %13885 = vst [vmem:[#allocation118_spill] sm:$0xff] %v7303_v6  ;;  %v7318_v58 = vadd.f32 %v539_v25, %v7097_v52  ;;  %v13888_v4 = vrot.slane %v13887_v11, 1  ;;  %v7330_v2 = vmul.f32 %v13845_v20, %v670_v60  ;;  %v7333_v52 = vmul.f32 %v6249_v10, %v1487_v46  ;;  %v671_v17 = vld [vmem:[#allocation2 + $0x18] sm:$0xfe] }
  0xb6   :  { %v7336_v57 = vmul.f32 %v13772_v53, %v1487_v46  ;;  %v7339_v25 = vmul.f32 %v6855_v35, %v1487_v46  ;;  %v7342_v19 = vmul.f32 %v13808_v63, %v1487_v46  ;;  %v7345_v28 = vmul.f32 %v13785_v22, %v283_v29 }
  0xb7   :  { %v831_v62 = vadd.f32 %v13888_v4, %v634_v55  ;;  %13889 = vst [vmem:[#allocation11_spill] sm:$0xff] %v7330_v2  ;;  %13890 = vst [vmem:[#allocation192_spill] sm:$0xff] %v7333_v52  ;;  %v13895_v55 = vld [vmem:[#allocation33_spill] sm:$0xff]  ;;  %v1488_v4 = vld [vmem:[#allocation2 + $0x18] sm:$0xfc]  ;;  %v406_v15 = vmul.f32 %v13776_v45, %v283_v29  ;;  %v473_v32 = vmul.f32 %v6858_v56, %v283_v29  ;;  %v167_v54 = vrot.slane %v111_v18, 6 }
  0xb8   :  { %13891 = vst [vmem:[#allocation193_spill] sm:$0xff] %v7336_v57  ;;  %13892 = vst [vmem:[#allocation194_spill] sm:$0xff] %v7339_v25  ;;  %v13896_v11 = vrot.slane %v13895_v55, 1  ;;  %v540_v31 = vmul.f32 %v6891_v5, %v283_v29  ;;  %v7353_v3 = vmul.f32 %v13778_v36, %v671_v17  ;;  %v7356_v46 = vmul.f32 %v13780_v50, %v671_v17  ;;  %v13902_v18 = vld [vmem:[#allocation32_spill] sm:$0xff] }
  0xb9   :  { %13893 = vst [vmem:[#allocation195_spill] sm:$0xff] %v7342_v19  ;;  %13894 = vst [vmem:[#allocation196_spill] sm:$0xff] %v7345_v28  ;;  %v7359_v24 = vmul.f32 %v6870_v26, %v671_v17  ;;  %v7362_v55 = vmul.f32 %v6894_v1, %v671_v17  ;;  %v1332_v38 = vmul.f32 %v7240_v40, %v671_v17  ;;  %v13903_v48 = vrot.slane %v13902_v18, 1  ;;  %v13905_v1 = vld [vmem:[#allocation151_spill] sm:$0xff]  ;;  %v13911_v28 = vld [vmem:[#allocation49_spill] sm:$0xff] }
  0xba   :  { %v985_v60 = vadd.f32 %v13896_v11, %v832_v30  ;;  %13897 = vst [vmem:[#allocation33_spill] sm:$0xff] %v7353_v3  ;;  %13898 = vst [vmem:[#allocation197_spill] sm:$0xff] %v7356_v46  ;;  %v7368_v29 = vmul.f32 %v13813_v16, %v1488_v4  ;;  %v13906_v26 = vrot.slane %v13905_v1, 1  ;;  %v7380_v17 = vadd.f32 %v406_v15, %v7117_v49  ;;  %v2902_v49 = vld [vmem:[#allocation2 + $0x18] sm:$0xf8]  ;;  %v13918_v19 = vld [vmem:[#allocation40_spill] sm:$0xff] }
  0xbb   :  { %13899 = vst [vmem:[#allocation198_spill] sm:$0xff] %v7359_v24  ;;  %13900 = vst [vmem:[#allocation199_spill] sm:$0xff] %v7362_v55  ;;  %v7372_v27 = vadd.f32 %v13903_v48, %v831_v62  ;;  %v7383_v2 = vadd.f32 %v473_v32, %v7134_v23  ;;  %v112_v48 = vld [vmem:[%s12909_s0 + $0x38] sm:$0x7f]  ;;  %v1388_v15 = vrot.slane %v1332_v38, 1  ;;  %v7397_v32 = vmul.f32 %v13816_v13, %v1488_v4  ;;  %v13914_v23 = vld [vmem:[#allocation39_spill] sm:$0xff] }
  0xbc   :  { %13901 = vst [vmem:[#allocation200_spill] sm:$0xff] %v7368_v29  ;;  %230 = vst [vmem:[#allocation2 + $0xa0] sm:$0xfc] %v167_v54  ;;  %v1138_v30 = vadd.f32 %v13906_v26, %v985_v60  ;;  %v13909_v18 = vrot.slane %v7140_v39, 1  ;;  %v7405_v11 = vmul.f32 %v13820_v59, %v1488_v4  ;;  %v7408_v47 = vmul.f32 %v13911_v28, %v1488_v4  ;;  %v13916_v60 = vld [vmem:[#allocation133_spill] sm:$0xff]  ;;  %v13920_v39 = vld [vmem:[#allocation43_spill] sm:$0xff] }
  0xbd   :  { %232 = vst [vmem:[#allocation2 + $0x1a8] sm:$0x1] %v167_v54  ;;  %13904 = vst [vmem:[#allocation32_spill] sm:$0xff] %v7372_v27  ;;  %v7386_v54 = vadd.f32 %v540_v31, %v7137_v14  ;;  %v7400_v14 = vmul.f32 %v13818_v7, %v1488_v4  ;;  %v4316_v31 = vld [vmem:[#allocation2 + $0x18] sm:$0xf0]  ;;  %v168_v1 = vrot.slane %v112_v48, 6  ;;  %v7411_v38 = vmul.f32 %v13822_v61, %v2902_v49 }
  0xbe   :  { %13907 = vst [vmem:[#allocation151_spill] sm:$0xff] %v7397_v32  ;;  %v1291_v62 = vadd.f32 %v13909_v18, %v1138_v30  ;;  %13910 = vst [vmem:[#allocation202_spill] sm:$0xff] %v7405_v11  ;;  %v7414_v26 = vmul.f32 %v13914_v23, %v2902_v49  ;;  %v7417_v3 = vmul.f32 %v13916_v60, %v2902_v49  ;;  %v13922_v18 = vld [vmem:[#allocation75_spill] sm:$0xff]  ;;  %v13924_v4 = vld [vmem:[#allocation93_spill] sm:$0xff] }
  0xbf   :  { %13908 = vst [vmem:[#allocation201_spill] sm:$0xff] %v7400_v14  ;;  %13912 = vst [vmem:[#allocation203_spill] sm:$0xff] %v7408_v47  ;;  %v7420_v27 = vmul.f32 %v13918_v19, %v2902_v49  ;;  %v7423_v30 = vmul.f32 %v13920_v39, %v2902_v49  ;;  %v7426_v25 = vmul.f32 %v13922_v18, %v4316_v31  ;;  %v13926_v57 = vld [vmem:[#allocation136_spill] sm:$0xff]  ;;  %v13930_v49 = vld [vmem:[#allocation97_spill] sm:$0xff] }
  0xc0   :  { %13913 = vst [vmem:[#allocation204_spill] sm:$0xff] %v7411_v38  ;;  %13915 = vst [vmem:[#allocation205_spill] sm:$0xff] %v7414_v26  ;;  %v7429_v48 = vmul.f32 %v13924_v4, %v4316_v31  ;;  %v7432_v29 = vmul.f32 %v13926_v57, %v4316_v31  ;;  %v13928_v24 = vld [vmem:[#allocation96_spill] sm:$0xff]  ;;  %v7440_v39 = vmul.f32 %v13930_v49, %v4316_v31  ;;  %v1513_v32 = vld [vmem:[#allocation2 + $0x1d8] sm:$0x1] }
  0xc1   :  { %13917 = vst [vmem:[#allocation206_spill] sm:$0xff] %v7417_v3  ;;  %13919 = vst [vmem:[#allocation207_spill] sm:$0xff] %v7420_v27  ;;  %v7437_v19 = vmul.f32 %v13928_v24, %v4316_v31  ;;  %v1444_v60 = vadd.f32 %v1388_v15, %v1291_v62  ;;  %v1511_v55 = vld [vmem:[#allocation2 + $0x228] sm:$0xfc]  ;;  %v1557_v15 = vld [vmem:[#allocation2 + $0x258] sm:$0x1]  ;;  %v7472_v46 = vmul.f32 %v13886_v51, %v1513_v32 }
  0xc2   :  { %13921 = vst [vmem:[#allocation208_spill] sm:$0xff] %v7423_v30  ;;  %13923 = vst [vmem:[#allocation209_spill] sm:$0xff] %v7426_v25  ;;  %v1555_v4 = vld [vmem:[#allocation2 + $0x108] sm:$0xfc]  ;;  %v7464_v25 = vld [vmem:[#allocation2 + $0x198] sm:$0xf8]  ;;  %v7469_v47 = vmul.f32 %v13886_v51, %v1511_v55 }
  0xc3   :  { %13925 = vst [vmem:[#allocation210_spill] sm:$0xff] %v7429_v48  ;;  %13927 = vst [vmem:[#allocation211_spill] sm:$0xff] %v7432_v29  ;;  %v7442_v18 = vld [vmem:[#allocation2 + $0xa0] sm:$0x7f]  ;;  %v13932_v38 = vld [vmem:[#allocation56_spill] sm:$0xff]  ;;  %v7483_v62 = vmul.f32 %v13886_v51, %v1555_v4  ;;  %v2784_v32 = vrot.slane %v13937_v41, 2 }
  0xc4   :  { %231 = vst [vmem:[#allocation2 + $0x28] sm:$0xfc] %v168_v1  ;;  %233 = vst [vmem:[#allocation2 + $0x218] sm:$0x1] %v168_v1  ;;  %v608_v1 = vmul.f32 %v13836_v34, %v7442_v18  ;;  %v1798_v31 = vadd.f32 %v13932_v38, %v1444_v60  ;;  %v7466_v57 = vld [vmem:[#allocation2 + $0x138] sm:$0x3] }
  0xc5   :  { %13929 = vst [vmem:[#allocation212_spill] sm:$0xff] %v7437_v19  ;;  %13931 = vst [vmem:[#allocation213_spill] sm:$0xff] %v7440_v39  ;;  %v6077_v14 = vld [vmem:[#allocation2 + $0x238] sm:$0xfc]  ;;  %v13936_v55 = vld [vmem:[#allocation83_spill] sm:$0xff] }
  0xc6   :  { %v636_v27 = vadd.f32 %v608_v1, %v7318_v58  ;;  %v7475_v60 = vmul.f32 %v6077_v14, %v13886_v51  ;;  %v6078_v58 = vld [vmem:[#allocation2 + $0xc0] sm:$0x1]  ;;  %v7480_v1 = vld [vmem:[#allocation2 + $0x238] sm:$0xf8]  ;;  %13934 = vst [vmem:[#allocation214_spill] sm:$0xff] %v7483_v62  ;;  %v2779_v42 = vrot.slane %v13936_v55, 2 }
  0xc7   :  { %v7478_v38 = vmul.f32 %v6078_v58, %v13886_v51  ;;  %v13935_v49 = vld [vmem:[#allocation82_spill] sm:$0xff]  ;;  %v2785_v14 = vrot.slane %v13939_v37, 2  ;;  %v13940_v39 = vld [vmem:[#allocation87_spill] sm:$0xff]  ;;  %v13941_v29 = vld [vmem:[#allocation88_spill] sm:$0xff]  ;;  %v2776_v55 = vrot.slane %v7306_v8, 2  ;;  %v7503_v37 = vmul.f32 %v13886_v51, %v1557_v15 }
  0xc8   :  { %v2778_v52 = vrot.slane %v13935_v49, 2  ;;  %13938 = vst [vmem:[#allocation82_spill] sm:$0xff] %v7488_v21  ;;  %v2820_v19 = vrot.slane %v13940_v39, 2  ;;  %v2821_v58 = vrot.slane %v13941_v29, 2  ;;  %v13942_v48 = vld [vmem:[#allocation89_spill] sm:$0xff]  ;;  %v13943_v3 = vld [vmem:[#allocation26_spill] sm:$0xff] }
  0xc9   :  { %13933 = vst [vmem:[#allocation56_spill] sm:$0xff] %v7478_v38  ;;  %v2826_v30 = vrot.slane %v13942_v48, 2  ;;  %v13944_v26 = vrot.slane %v13943_v3, 1  ;;  %v13945_v11 = vld [vmem:[#allocation91_spill] sm:$0xff]  ;;  %v13946_v49 = vld [vmem:[#allocation98_spill] sm:$0xff]  ;;  %v13947_v41 = vld [vmem:[#allocation64_spill] sm:$0xff]  ;;  %v7544_v48 = vmul.f32 %v6255_v12, %v7442_v18 }
  0xca   :  { %v2827_v62 = vrot.slane %v13945_v11, 2  ;;  %v2775_v38 = vrot.slane %v13946_v49, 2  ;;  %v7500_v34 = vadd.f32 %v13947_v41, %v1798_v31  ;;  %13949 = vst [vmem:[#allocation85_spill] sm:$0xff] %v7503_v37  ;;  %v13950_v39 = vld [vmem:[#allocation95_spill] sm:$0xff]  ;;  %v13956_v15 = vld [vmem:[#allocation150_spill] sm:$0xff]  ;;  %v13972_v41 = vld [vmem:[#allocation117_spill] sm:$0xff] }
  0xcb   :  { %v833_v4 = vadd.f32 %v13944_v26, %v636_v27  ;;  %v7507_v29 = vmul.f32 %v13950_v39, %v7464_v25  ;;  %v7511_v3 = vmul.f32 %v13950_v39, %v7466_v57  ;;  %v7515_v27 = vmul.f32 %v13950_v39, %v7480_v1  ;;  %v285_v11 = vld [vmem:[#allocation2 + $0x28] sm:$0x7f]  ;;  %v672_v31 = vld [vmem:[#allocation2 + $0xa0] sm:$0xfe]  ;;  %13963 = vst [vmem:[#allocation215_spill] sm:$0xff] %v7544_v48 }
  0xcc   :  { %13948 = vst [vmem:[#allocation83_spill] sm:$0xff] %v7500_v34  ;;  %v7519_v8 = vmul.f32 %v13950_v39, %v7488_v21  ;;  %v7522_v26 = vsel %vm1684_vm0, %v2778_v52, %v2779_v42  ;;  %v609_v49 = vmul.f32 %v13956_v15, %v285_v11  ;;  %v7528_v34 = vsel %vm1684_vm0, %v2784_v32, %v2785_v14  ;;  %v13964_v32 = vld [vmem:[#allocation9_spill] sm:$0xff]  ;;  %v13976_v48 = vld [vmem:[#allocation164_spill] sm:$0xff] }
  0xcd   :  { %13951 = vst [vmem:[#allocation86_spill] sm:$0xff] %v7507_v29  ;;  %13952 = vst [vmem:[#allocation87_spill] sm:$0xff] %v7511_v3  ;;  %v13958_v3 = vld [vmem:[#allocation147_spill] sm:$0xff]  ;;  %v7534_v21 = vsel %vm1684_vm0, %v2820_v19, %v2821_v58  ;;  %v7537_v42 = vsel %vm1684_vm0, %v2826_v30, %v2827_v62  ;;  %v7540_v52 = vsel %vm1684_vm0, %v2775_v38, %v2776_v55  ;;  %v13967_v62 = vld [vmem:[#allocation129_spill] sm:$0xff] }
  0xce   :  { %13953 = vst [vmem:[#allocation88_spill] sm:$0xff] %v7515_v27  ;;  %13954 = vst [vmem:[#allocation89_spill] sm:$0xff] %v7519_v8  ;;  %v13959_v29 = vrot.slane %v13958_v3, 1  ;;  %v1491_v8 = vld [vmem:[#allocation2 + $0xa0] sm:$0xfc]  ;;  %v407_v14 = vmul.f32 %v13964_v32, %v7442_v18  ;;  %v13965_v3 = vld [vmem:[#allocation116_spill] sm:$0xff]  ;;  %v541_v38 = vmul.f32 %v13967_v62, %v7442_v18 }
  0xcf   :  { %13955 = vst [vmem:[#allocation26_spill] sm:$0xff] %v7522_v26  ;;  %13957 = vst [vmem:[#allocation91_spill] sm:$0xff] %v7528_v34  ;;  %v6079_v19 = vld [vmem:[%s12908_s1 + $0x43] ss:$8 sm:$0x3]  ;;  %v13968_v58 = vld [vmem:[#allocation6_spill] sm:$0xff]  ;;  %v1333_v26 = vmul.f32 %v13845_v20, %v672_v31  ;;  %v7578_v32 = vmul.f32 %v13772_v53, %v1491_v8  ;;  %v7584_v12 = vmul.f32 %v13808_v63, %v1491_v8 }
  0xd0   :  { %v986_v37 = vadd.f32 %v13959_v29, %v833_v4  ;;  %13960 = vst [vmem:[#allocation98_spill] sm:$0xff] %v7534_v21  ;;  %13961 = vst [vmem:[#allocation64_spill] sm:$0xff] %v7537_v42  ;;  %v474_v4 = vmul.f32 %v13965_v3, %v7442_v18  ;;  %v7554_v30 = vrot.slane %v6079_v19, %v13883_v33  ;;  %v13970_v29 = vld [vmem:[#allocation15_spill] sm:$0xff]  ;;  %v13977_v62 = vrot.slane %v13976_v48, 1  ;;  %v13984_v48 = vld [vmem:[#allocation21_spill] sm:$0xff] }
  0xd1   :  { %13962 = vst [vmem:[#allocation147_spill] sm:$0xff] %v7540_v52  ;;  %v7559_v55 = vmul.f32 %v13968_v58, %v672_v31  ;;  %v7562_v27 = vmul.f32 %v13970_v29, %v672_v31  ;;  %v7565_v52 = vmul.f32 %v13972_v41, %v672_v31  ;;  %v2905_v42 = vld [vmem:[#allocation2 + $0xa0] sm:$0xf8]  ;;  %v7572_v19 = vmul.f32 %v6249_v10, %v1491_v8  ;;  %v673_v63 = vld [vmem:[#allocation2 + $0x28] sm:$0xfe] }
  0xd2   :  { %13966 = vst [vmem:[#allocation216_spill] sm:$0xff] %v7554_v30  ;;  %v13974_v21 = vld [vmem:[#allocation119_spill] sm:$0xff]  ;;  %v637_v18 = vadd.f32 %v609_v49, %v7386_v54  ;;  %v1139_v3 = vadd.f32 %v13977_v62, %v986_v37  ;;  %13978 = vst [vmem:[#allocation164_spill] sm:$0xff] %v7578_v32  ;;  %v7581_v41 = vmul.f32 %v6855_v35, %v1491_v8 }
  0xd3   :  { %13969 = vst [vmem:[#allocation217_spill] sm:$0xff] %v7559_v55  ;;  %13971 = vst [vmem:[#allocation15_spill] sm:$0xff] %v7562_v27  ;;  %v7568_v34 = vmul.f32 %v13974_v21, %v672_v31  ;;  %v7587_v21 = vadd.f32 %v407_v14, %v7309_v43  ;;  %v7590_v31 = vadd.f32 %v474_v4, %v7312_v0  ;;  %v1389_v14 = vrot.slane %v1333_v26, 1  ;;  %v13986_v4 = vld [vmem:[#allocation27_spill] sm:$0xff]  ;;  %v13989_v26 = vld [vmem:[#allocation36_spill] sm:$0xff] }
  0xd4   :  { %13973 = vst [vmem:[#allocation218_spill] sm:$0xff] %v7565_v52  ;;  %13975 = vst [vmem:[#allocation219_spill] sm:$0xff] %v7572_v19  ;;  %v7593_v54 = vmul.f32 %v13886_v51, %v1491_v8  ;;  %v7596_v37 = vmul.f32 %v13984_v48, %v2905_v42  ;;  %v7599_v49 = vadd.f32 %v541_v38, %v7315_v9  ;;  %v13987_v8 = vrot.slane %v13986_v4, 1  ;;  %v113_v35 = vld [vmem:[%s12909_s0 + $0x40] sm:$0x7f]  ;;  %v13996_v38 = vld [vmem:[#allocation16_spill] sm:$0xff] }
  0xd5   :  { %13979 = vst [vmem:[#allocation220_spill] sm:$0xff] %v7581_v41  ;;  %13980 = vst [vmem:[#allocation221_spill] sm:$0xff] %v7584_v12  ;;  %v7616_v55 = vmul.f32 %v13989_v26, %v2905_v42  ;;  %v7619_v4 = vmul.f32 %v7303_v6, %v2905_v42  ;;  %v542_v43 = vmul.f32 %v6891_v5, %v285_v11  ;;  %v13997_v9 = vrot.slane %v13996_v38, 1  ;;  %v115_v27 = vld [vmem:[%s12909_s0 + $0x50] sm:$0x7f]  ;;  %v14000_v12 = vld [vmem:[#allocation135_spill] sm:$0xff] }
  0xd6   :  { %13981 = vst [vmem:[#allocation222_spill] sm:$0xff] %v7587_v21  ;;  %13982 = vst [vmem:[#allocation223_spill] sm:$0xff] %v7590_v31  ;;  %v834_v21 = vadd.f32 %v13987_v8, %v637_v18  ;;  %v13988_v31 = vrot.slane %v7288_v44, 1  ;;  %v7622_v44 = vmul.f32 %v13950_v39, %v2905_v42  ;;  %v408_v18 = vmul.f32 %v13776_v45, %v285_v11  ;;  %v1492_v8 = vld [vmem:[#allocation2 + $0x28] sm:$0xfc] }
  0xd7   :  { %13983 = vst [vmem:[#allocation224_spill] sm:$0xff] %v7593_v54  ;;  %13985 = vst [vmem:[#allocation225_spill] sm:$0xff] %v7596_v37  ;;  %v7634_v62 = vmul.f32 %v13778_v36, %v673_v63  ;;  %v7637_v42 = vmul.f32 %v13780_v50, %v673_v63  ;;  %v13998_v37 = vld [vmem:[#allocation128_spill] sm:$0xff]  ;;  %v7651_v41 = vmul.f32 %v14000_v12, %v673_v63  ;;  %v169_v19 = vrot.slane %v113_v35, 6  ;;  %v14006_v35 = vld [vmem:[#allocation173_spill] sm:$0xff] }
  0xd8   :  { %v1292_v48 = vadd.f32 %v13988_v31, %v1139_v3  ;;  %13990 = vst [vmem:[#allocation27_spill] sm:$0xff] %v7616_v55  ;;  %13991 = vst [vmem:[#allocation226_spill] sm:$0xff] %v7619_v4  ;;  %v7625_v3 = vmul.f32 %v13785_v22, %v285_v11  ;;  %v475_v31 = vmul.f32 %v6858_v56, %v285_v11  ;;  %v171_v12 = vrot.slane %v115_v27, 6  ;;  %v14008_v27 = vld [vmem:[#allocation58_spill] sm:$0xff] }
  0xd9   :  { %13992 = vst [vmem:[#allocation227_spill] sm:$0xff] %v7622_v44  ;;  %13994 = vst [vmem:[#allocation229_spill] sm:$0xff] %v7634_v62  ;;  %v987_v0 = vadd.f32 %v13997_v9, %v834_v21  ;;  %v114_v44 = vld [vmem:[%s12909_s0 + $0x48] sm:$0x7f]  ;;  %v7648_v11 = vmul.f32 %v13998_v37, %v673_v63  ;;  %v7654_v32 = vmul.f32 %v7240_v40, %v673_v63  ;;  %v116_v63 = vld [vmem:[%s12909_s0 + $0x58] sm:$0x7f] }
  0xda   :  { %13993 = vst [vmem:[#allocation228_spill] sm:$0xff] %v7625_v3  ;;  %13995 = vst [vmem:[#allocation230_spill] sm:$0xff] %v7637_v42  ;;  %v1445_v54 = vadd.f32 %v1389_v14, %v1292_v48  ;;  %v7659_v38 = vmul.f32 %v13813_v16, %v1492_v8  ;;  %v14003_v3 = vld [vmem:[#allocation196_spill] sm:$0xff]  ;;  %v7665_v48 = vadd.f32 %v475_v31, %v7380_v17  ;;  %v170_v14 = vrot.slane %v114_v44, 6  ;;  %v119_v17 = vld [vmem:[%s12909_s0 + $0x70] sm:$0x7f] }
  0xdb   :  { %13999 = vst [vmem:[#allocation16_spill] sm:$0xff] %v7648_v11  ;;  %14001 = vst [vmem:[#allocation231_spill] sm:$0xff] %v7651_v41  ;;  %v7662_v52 = vadd.f32 %v408_v18, %v14003_v3  ;;  %v7671_v21 = vadd.f32 %v542_v43, %v7383_v2  ;;  %v14007_v55 = vrot.slane %v14006_v35, 1  ;;  %v2906_v18 = vld [vmem:[#allocation2 + $0x28] sm:$0xf8]  ;;  %v1390_v31 = vrot.slane %v7654_v32, 1 }
  0xdc   :  { %14002 = vst [vmem:[#allocation232_spill] sm:$0xff] %v7659_v38  ;;  %14005 = vst [vmem:[#allocation233_spill] sm:$0xff] %v7665_v48  ;;  %v7681_v44 = vadd.f32 %v14008_v27, %v1445_v54  ;;  %v7694_v54 = vmul.f32 %v13818_v7, %v1492_v8  ;;  %v4320_v35 = vld [vmem:[#allocation2 + $0x28] sm:$0xf0]  ;;  %v172_v27 = vrot.slane %v116_v63, 6  ;;  %v7706_v9 = vmul.f32 %v13822_v61, %v2906_v18  ;;  %v14016_v2 = vld [vmem:[#allocation199_spill] sm:$0xff] }
  0xdd   :  { %14004 = vst [vmem:[#allocation196_spill] sm:$0xff] %v7662_v52  ;;  %v1140_v3 = vadd.f32 %v14007_v55, %v987_v0  ;;  %234 = vst [vmem:[#allocation2 + $0x168] sm:$0xfc] %v169_v19  ;;  %v120_v55 = vld [vmem:[%s12909_s0 + $0x78] sm:$0x7f]  ;;  %v7691_v0 = vmul.f32 %v13816_v13, %v1492_v8  ;;  %v7709_v4 = vmul.f32 %v13914_v23, %v2906_v18  ;;  %v14017_v43 = vrot.slane %v14016_v2, 1 }
  0xde   :  { %236 = vst [vmem:[#allocation2 + $0x1f8] sm:$0x1] %v169_v19  ;;  %14009 = vst [vmem:[#allocation173_spill] sm:$0xff] %v7681_v44  ;;  %v121_v32 = vld [vmem:[%s12909_s0 + $0x80] sm:$0x7f]  ;;  %v14018_v42 = vld [vmem:[#allocation133_spill] sm:$0xff] }
  0xdf   :  { %235 = vst [vmem:[#allocation2 + $0x230] sm:$0xfc] %v170_v14  ;;  %237 = vst [vmem:[#allocation2 + $0x248] sm:$0x1] %v170_v14  ;;  %v7703_v14 = vmul.f32 %v13911_v28, %v1492_v8  ;;  %v122_v63 = vld [vmem:[%s12909_s0 + $0x88] sm:$0x7f]  ;;  %v1293_v62 = vadd.f32 %v14017_v43, %v1140_v3 }
  0xe0   :  { %238 = vst [vmem:[#allocation2 + $0x270] sm:$0xfc] %v171_v12  ;;  %240 = vst [vmem:[#allocation2 + $0x148] sm:$0x1] %v171_v12  ;;  %v7700_v12 = vmul.f32 %v13820_v59, %v1492_v8  ;;  %v123_v19 = vld [vmem:[%s12909_s0 + $0x90] sm:$0x7f]  ;;  %v7720_v8 = vmul.f32 %v14018_v42, %v2906_v18 }
  0xe1   :  { %14010 = vst [vmem:[#allocation58_spill] sm:$0xff] %v7691_v0  ;;  %14011 = vst [vmem:[#allocation234_spill] sm:$0xff] %v7694_v54  ;;  %v14020_v44 = vld [vmem:[#allocation40_spill] sm:$0xff]  ;;  %v175_v11 = vrot.slane %v119_v17, 6  ;;  %v14022_v52 = vld [vmem:[#allocation43_spill] sm:$0xff]  ;;  %v176_v61 = vrot.slane %v120_v55, 6 }
  0xe2   :  { %14012 = vst [vmem:[#allocation235_spill] sm:$0xff] %v7700_v12  ;;  %14013 = vst [vmem:[#allocation236_spill] sm:$0xff] %v7703_v14  ;;  %v7723_v38 = vmul.f32 %v14020_v44, %v2906_v18  ;;  %v7726_v48 = vmul.f32 %v14022_v52, %v2906_v18  ;;  %v14024_v41 = vld [vmem:[#allocation75_spill] sm:$0xff]  ;;  %v177_v28 = vrot.slane %v121_v32, 6  ;;  %v2925_v59 = vld [vmem:[#allocation2 + $0x228] sm:$0xf8]  ;;  %v1446_v52 = vadd.f32 %v1390_v31, %v1293_v62 }
  0xe3   :  { %14014 = vst [vmem:[#allocation237_spill] sm:$0xff] %v7706_v9  ;;  %14015 = vst [vmem:[#allocation238_spill] sm:$0xff] %v7709_v4  ;;  %v7729_v23 = vmul.f32 %v14024_v41, %v4320_v35  ;;  %v14026_v2 = vld [vmem:[#allocation93_spill] sm:$0xff]  ;;  %v14028_v43 = vld [vmem:[#allocation136_spill] sm:$0xff]  ;;  %v178_v44 = vrot.slane %v122_v63, 6  ;;  %v4067_v62 = vmul.f32 %v7554_v30, %v7464_v25  ;;  %v4069_v31 = vmul.f32 %v7554_v30, %v7466_v57 }
  0xe4   :  { %14019 = vst [vmem:[#allocation199_spill] sm:$0xff] %v7720_v8  ;;  %14021 = vst [vmem:[#allocation239_spill] sm:$0xff] %v7723_v38  ;;  %v7732_v3 = vmul.f32 %v14026_v2, %v4320_v35  ;;  %v7735_v42 = vmul.f32 %v14028_v43, %v4320_v35  ;;  %v2927_v17 = vld [vmem:[#allocation2 + $0x1d8] sm:$0x3]  ;;  %v7745_v63 = vld [vmem:[#allocation2 + $0x168] sm:$0x7f] }
  0xe5   :  { %239 = vst [vmem:[#allocation2 + $0x250] sm:$0xfc] %v172_v27  ;;  %241 = vst [vmem:[#allocation2 + $0x68] sm:$0x1] %v172_v27  ;;  %v179_v27 = vrot.slane %v123_v19, 6  ;;  %v14031_v43 = vld [vmem:[#allocation144_spill] sm:$0xff] }
  0xe6   :  { %14023 = vst [vmem:[#allocation240_spill] sm:$0xff] %v7726_v48  ;;  %14025 = vst [vmem:[#allocation241_spill] sm:$0xff] %v7729_v23  ;;  %v2969_v41 = vld [vmem:[#allocation2 + $0x108] sm:$0xf8]  ;;  %v2971_v55 = vld [vmem:[#allocation2 + $0x258] sm:$0x3]  ;;  %v610_v32 = vmul.f32 %v14031_v43, %v7745_v63 }
  0xe7   :  { %14027 = vst [vmem:[#allocation242_spill] sm:$0xff] %v7732_v3  ;;  %14029 = vst [vmem:[#allocation243_spill] sm:$0xff] %v7735_v42  ;;  %v14034_v23 = vld [vmem:[#allocation82_spill] sm:$0xff]  ;;  %v4099_v18 = vmul.f32 %v7554_v30, %v2969_v41  ;;  %v14035_v42 = vld [vmem:[#allocation56_spill] sm:$0xff]  ;;  %v4189_v0 = vrot.slane %v4067_v62, 3  ;;  %v4190_v41 = vrot.slane %v4069_v31, 3 }
  0xe8   :  { %246 = vst [vmem:[#allocation2 + $0xe8] sm:$0xfc] %v175_v11  ;;  %248 = vst [vmem:[#allocation2 + $0x1b8] sm:$0x1] %v175_v11  ;;  %v4095_v11 = vmul.f32 %v7554_v30, %v7480_v1  ;;  %v4097_v19 = vmul.f32 %v7554_v30, %v14034_v23  ;;  %v2818_v3 = vrot.slane %v14035_v42, 2  ;;  %v14036_v25 = vld [vmem:[#allocation214_spill] sm:$0xff] }
  0xe9   :  { %247 = vst [vmem:[#allocation2 + $0x178] sm:$0xfc] %v176_v61  ;;  %249 = vst [vmem:[#allocation2 + $0x158] sm:$0x1] %v176_v61  ;;  %v4073_v61 = vmul.f32 %v7554_v30, %v2927_v17  ;;  %v2823_v48 = vrot.slane %v14036_v25, 2  ;;  %v14037_v8 = vld [vmem:[#allocation85_spill] sm:$0xff] }
  0xea   :  { %250 = vst [vmem:[#allocation2 + $0x288] sm:$0xfc] %v177_v28  ;;  %252 = vst [vmem:[#allocation2 + $0x2b8] sm:$0x1] %v177_v28  ;;  %v7749_v28 = vmul.f32 %v13928_v24, %v4320_v35  ;;  %v2824_v57 = vrot.slane %v14037_v8, 2  ;;  %v14038_v4 = vld [vmem:[#allocation86_spill] sm:$0xff] }
  0xeb   :  { %251 = vst [vmem:[#allocation2 + $0x8] sm:$0xfc] %v178_v44  ;;  %253 = vst [vmem:[#allocation2 + $0x190] sm:$0x1] %v178_v44  ;;  %v14032_v44 = vld [vmem:[#allocation97_spill] sm:$0xff]  ;;  %v3930_v17 = vrot.slane %v14038_v4, 3 }
  0xec   :  { %254 = vst [vmem:[#allocation2 + $0x70] sm:$0xfc] %v179_v27  ;;  %256 = vst [vmem:[#allocation2 + $0x150] sm:$0x1] %v179_v27  ;;  %v7757_v38 = vmul.f32 %v14032_v44, %v4320_v35  ;;  %v4071_v27 = vmul.f32 %v7554_v30, %v2925_v59  ;;  %v4101_v35 = vmul.f32 %v7554_v30, %v2971_v55  ;;  %v14039_v9 = vld [vmem:[#allocation87_spill] sm:$0xff]  ;;  %v14040_v1 = vld [vmem:[#allocation88_spill] sm:$0xff] }
  0xed   :  { %14030 = vst [vmem:[#allocation244_spill] sm:$0xff] %v7749_v28  ;;  %v638_v59 = vadd.f32 %v610_v32, %v7599_v49  ;;  %v3931_v14 = vrot.slane %v14039_v9, 3  ;;  %v3972_v12 = vrot.slane %v14040_v1, 3  ;;  %v14041_v54 = vld [vmem:[#allocation89_spill] sm:$0xff]  ;;  %v4196_v55 = vrot.slane %v4073_v61, 3  ;;  %v14042_v2 = vld [vmem:[#allocation59_spill] sm:$0xff] }
  0xee   :  { %14033 = vst [vmem:[#allocation245_spill] sm:$0xff] %v7757_v38  ;;  %v3973_v23 = vrot.slane %v14041_v54, 3  ;;  %v4195_v44 = vrot.slane %v4071_v27, 3  ;;  %v4231_v30 = vrot.slane %v4095_v11, 3  ;;  %v4232_v42 = vrot.slane %v4097_v19, 3  ;;  %v14044_v32 = vld [vmem:[#allocation146_spill] sm:$0xff] }
  0xef   :  { %v4237_v24 = vrot.slane %v4099_v18, 3  ;;  %v4238_v25 = vrot.slane %v4101_v35, 3  ;;  %v7780_v8 = vadd.f32 %v14042_v2, %v1446_v52  ;;  %v674_v9 = vld [vmem:[#allocation2 + $0x168] sm:$0xfe]  ;;  %v14045_v1 = vrot.slane %v14044_v32, 1 }
  0xf0   :  { %v14046_v54 = vrot.slane %v7472_v46, 2  ;;  %v14047_v62 = vrot.slane %v7469_v47, 2  ;;  %v14049_v18 = vrot.slane %v7475_v60, 2  ;;  %v7799_v2 = vsel %vm1684_vm0, %v2823_v48, %v2824_v57  ;;  %v7804_v61 = vld [vmem:[#allocation2 + $0x230] sm:$0x7f] }
  0xf1   :  { %14043 = vst [vmem:[#allocation82_spill] sm:$0xff] %v7780_v8  ;;  %v835_v7 = vadd.f32 %v14045_v1, %v638_v59  ;;  %14051 = vst [vmem:[#allocation85_spill] sm:$0xff] %v7799_v2  ;;  %v7802_v19 = vsel %vm3098_vm1, %v3930_v17, %v3931_v14  ;;  %v7807_v46 = vsel %vm3098_vm1, %v3972_v12, %v3973_v23  ;;  %v6080_v60 = vld [vmem:[%s12908_s1 + $0x24] ss:$8 sm:$0x3]  ;;  %v14061_v57 = vld [vmem:[#allocation161_spill] sm:$0xff] }
  0xf2   :  { %v7791_v11 = vsel %vm1684_vm0, %v14047_v62, %v14046_v54  ;;  %v7796_v52 = vsel %vm1684_vm0, %v14049_v18, %v2818_v3  ;;  %14052 = vst [vmem:[#allocation86_spill] sm:$0xff] %v7802_v19  ;;  %14053 = vst [vmem:[#allocation87_spill] sm:$0xff] %v7807_v46  ;;  %v611_v47 = vmul.f32 %v13956_v15, %v7804_v61  ;;  %v14062_v59 = vrot.slane %v14061_v57, 1  ;;  %v6081_v23 = vld [vmem:[%s12908_s1 + $0x34] ss:$8 sm:$0x3] }
  0xf3   :  { %14048 = vst [vmem:[#allocation56_spill] sm:$0xff] %v7791_v11  ;;  %14050 = vst [vmem:[#allocation214_spill] sm:$0xff] %v7796_v52  ;;  %v7815_v3 = vrot.slane %v6080_v60, %v13883_v33  ;;  %v7818_v48 = vsel %vm3098_vm1, %v4189_v0, %v4190_v41  ;;  %v7821_v14 = vmul.f32 %v13968_v58, %v674_v9  ;;  %v1495_v0 = vld [vmem:[#allocation2 + $0x168] sm:$0xfc]  ;;  %v14068_v1 = vld [vmem:[#allocation117_spill] sm:$0xff] }
  0xf4   :  { %14055 = vst [vmem:[#allocation89_spill] sm:$0xff] %v7818_v48  ;;  %v7824_v31 = vsel %vm3098_vm1, %v4195_v44, %v4196_v55  ;;  %v7827_v12 = vsel %vm3098_vm1, %v4231_v30, %v4232_v42  ;;  %v7830_v27 = vsel %vm3098_vm1, %v4237_v24, %v4238_v25  ;;  %v7833_v35 = vmul.f32 %v13970_v29, %v674_v9  ;;  %v6082_v30 = vld [vmem:[%s12908_s1 + $0x44] ss:$8 sm:$0x3]  ;;  %v14070_v62 = vld [vmem:[#allocation129_spill] sm:$0xff]  ;;  %v14076_v19 = vld [vmem:[#allocation190_spill] sm:$0xff] }
  0xf5   :  { %14054 = vst [vmem:[#allocation88_spill] sm:$0xff] %v7815_v3  ;;  %14056 = vst [vmem:[#allocation59_spill] sm:$0xff] %v7821_v14  ;;  %v988_v17 = vadd.f32 %v14062_v59, %v835_v7  ;;  %v7841_v44 = vrot.slane %v6081_v23, %v13883_v33  ;;  %v7847_v24 = vrot.slane %v6082_v30, %v13883_v33  ;;  %v14065_v41 = vld [vmem:[#allocation8_spill] sm:$0xff]  ;;  %v14066_v7 = vld [vmem:[#allocation9_spill] sm:$0xff] }
  0xf6   :  { %14057 = vst [vmem:[#allocation146_spill] sm:$0xff] %v7824_v31  ;;  %14058 = vst [vmem:[#allocation246_spill] sm:$0xff] %v7827_v12  ;;  %v7851_v55 = vmul.f32 %v14065_v41, %v7745_v63  ;;  %v7855_v42 = vmul.f32 %v14066_v7, %v7745_v63  ;;  %v14067_v25 = vld [vmem:[#allocation116_spill] sm:$0xff]  ;;  %v7862_v54 = vmul.f32 %v14068_v1, %v674_v9  ;;  %v14071_v60 = vld [vmem:[#allocation119_spill] sm:$0xff] }
  0xf7   :  { %14059 = vst [vmem:[#allocation247_spill] sm:$0xff] %v7830_v27  ;;  %14060 = vst [vmem:[#allocation248_spill] sm:$0xff] %v7833_v35  ;;  %v7859_v32 = vmul.f32 %v14067_v25, %v7745_v63  ;;  %v543_v18 = vmul.f32 %v14070_v62, %v7745_v63  ;;  %v7867_v57 = vmul.f32 %v14071_v60, %v674_v9  ;;  %v2909_v23 = vld [vmem:[#allocation2 + $0x168] sm:$0xf8]  ;;  %v14074_v48 = vld [vmem:[#allocation123_spill] sm:$0xff]  ;;  %v14077_v27 = vrot.slane %v14076_v19, 1 }
  0xf8   :  { %14063 = vst [vmem:[#allocation161_spill] sm:$0xff] %v7841_v44  ;;  %14064 = vst [vmem:[#allocation249_spill] sm:$0xff] %v7847_v24  ;;  %v1335_v59 = vmul.f32 %v13845_v20, %v674_v9  ;;  %v639_v30 = vadd.f32 %v611_v47, %v7671_v21  ;;  %v7873_v49 = vmul.f32 %v6249_v10, %v1495_v0  ;;  %v14078_v9 = vld [vmem:[#allocation44_spill] sm:$0xff]  ;;  %v14081_v2 = vld [vmem:[#allocation21_spill] sm:$0xff]  ;;  %v14090_v44 = vrot.slane %v7568_v34, 1 }
  0xf9   :  { %14069 = vst [vmem:[#allocation9_spill] sm:$0xff] %v7862_v54  ;;  %v7876_v33 = vmul.f32 %v13772_v53, %v1495_v0  ;;  %v7879_v31 = vmul.f32 %v14074_v48, %v1495_v0  ;;  %v1141_v12 = vadd.f32 %v14077_v27, %v988_v17  ;;  %v7885_v46 = vmul.f32 %v14078_v9, %v1495_v0  ;;  %v4323_v47 = vld [vmem:[#allocation2 + $0x168] sm:$0xf0]  ;;  %v14088_v8 = vld [vmem:[#allocation90_spill] sm:$0xff]  ;;  %v4324_v41 = vld [vmem:[#allocation2 + $0x230] sm:$0xf0] }
  0xfa   :  { %14072 = vst [vmem:[#allocation250_spill] sm:$0xff] %v7873_v49  ;;  %v7888_v21 = vmul.f32 %v13886_v51, %v1495_v0  ;;  %v7892_v52 = vmul.f32 %v14081_v2, %v2909_v23  ;;  %v7895_v11 = vmul.f32 %v13989_v26, %v2909_v23  ;;  %v7898_v63 = vmul.f32 %v7303_v6, %v2909_v23  ;;  %v675_v0 = vld [vmem:[#allocation2 + $0x230] sm:$0xfe]  ;;  %v14086_v35 = vld [vmem:[#allocation24_spill] sm:$0xff] }
  0xfb   :  { %14073 = vst [vmem:[#allocation251_spill] sm:$0xff] %v7876_v33  ;;  %14075 = vst [vmem:[#allocation252_spill] sm:$0xff] %v7879_v31  ;;  %v1391_v27 = vrot.slane %v1335_v59, 1  ;;  %v7902_v17 = vmul.f32 %v13950_v39, %v2909_v23  ;;  %v14087_v14 = vrot.slane %v14086_v35, 1  ;;  %v7910_v24 = vmul.f32 %v14088_v8, %v4323_v47  ;;  %v14091_v2 = vld [vmem:[#allocation92_spill] sm:$0xff] }
  0xfc   :  { %14079 = vst [vmem:[#allocation190_spill] sm:$0xff] %v7885_v46  ;;  %14080 = vst [vmem:[#allocation253_spill] sm:$0xff] %v7888_v21  ;;  %v1294_v19 = vadd.f32 %v14090_v44, %v1141_v12  ;;  %v7917_v10 = vmul.f32 %v14091_v2, %v4323_v47  ;;  %v7923_v28 = vmul.f32 %v13778_v36, %v675_v0  ;;  %v14095_v44 = vld [vmem:[#allocation172_spill] sm:$0xff]  ;;  %v1496_v59 = vld [vmem:[#allocation2 + $0x230] sm:$0xfc] }
  0xfd   :  { %14082 = vst [vmem:[#allocation254_spill] sm:$0xff] %v7892_v52  ;;  %14083 = vst [vmem:[#allocation255_spill] sm:$0xff] %v7895_v11  ;;  %v836_v38 = vadd.f32 %v14087_v14, %v639_v30  ;;  %v7928_v34 = vmul.f32 %v13785_v22, %v7804_v61  ;;  %v7931_v12 = vmul.f32 %v13780_v50, %v675_v0  ;;  %v14096_v47 = vrot.slane %v14095_v44, 1  ;;  %v2910_v14 = vld [vmem:[#allocation2 + $0x230] sm:$0xf8]  ;;  %v14100_v11 = vld [vmem:[#allocation223_spill] sm:$0xff] }
  0xfe   :  { %14084 = vst [vmem:[#allocation256_spill] sm:$0xff] %v7898_v63  ;;  %14085 = vst [vmem:[#allocation257_spill] sm:$0xff] %v7902_v17  ;;  %v7938_v30 = vmul.f32 %v13776_v45, %v7804_v61  ;;  %v7942_v35 = vmul.f32 %v6858_v56, %v7804_v61  ;;  %v544_v54 = vmul.f32 %v6891_v5, %v7804_v61  ;;  %v14105_v33 = vld [vmem:[#allocation132_spill] sm:$0xff]  ;;  %v14107_v63 = vld [vmem:[#allocation47_spill] sm:$0xff] }
  0xff   :  { %14089 = vst [vmem:[#allocation24_spill] sm:$0xff] %v7910_v24  ;;  %14092 = vst [vmem:[#allocation258_spill] sm:$0xff] %v7917_v10  ;;  %v989_v23 = vadd.f32 %v14096_v47, %v836_v38  ;;  %v1447_v4 = vadd.f32 %v1391_v27, %v1294_v19  ;;  %v7948_v44 = vmul.f32 %v13998_v37, %v675_v0  ;;  %v14098_v38 = vld [vmem:[#allocation135_spill] sm:$0xff]  ;;  %v288_v24 = vld [vmem:[#allocation2 + $0x270] sm:$0x7f] }
 0x100   :  { %14093 = vst [vmem:[#allocation259_spill] sm:$0xff] %v7923_v28  ;;  %14094 = vst [vmem:[#allocation260_spill] sm:$0xff] %v7931_v12  ;;  %v7951_v47 = vmul.f32 %v14098_v38, %v675_v0  ;;  %v1336_v21 = vmul.f32 %v7240_v40, %v675_v0  ;;  %v571_v52 = vadd.f32 %v543_v18, %v14100_v11  ;;  %v14101_v27 = vld [vmem:[#allocation198_spill] sm:$0xff]  ;;  %v14109_v11 = vld [vmem:[#allocation49_spill] sm:$0xff] }
 0x101   :  { %14097 = vst [vmem:[#allocation172_spill] sm:$0xff] %v7948_v44  ;;  %v612_v61 = vmul.f32 %v14031_v43, %v288_v24  ;;  %v14102_v17 = vrot.slane %v14101_v27, 1  ;;  %v7961_v46 = vmul.f32 %v13813_v16, %v1496_v59  ;;  %v7964_v31 = vmul.f32 %v13816_v13, %v1496_v59  ;;  %v14111_v28 = vld [vmem:[#allocation22_spill] sm:$0xff]  ;;  %v14113_v27 = vld [vmem:[#allocation39_spill] sm:$0xff]  ;;  %v14115_v43 = vld [vmem:[#allocation133_spill] sm:$0xff] }
 0x102   :  { %14099 = vst [vmem:[#allocation261_spill] sm:$0xff] %v7951_v47  ;;  %v7967_v49 = vmul.f32 %v14105_v33, %v1496_v59  ;;  %v7970_v0 = vmul.f32 %v14107_v63, %v1496_v59  ;;  %v7973_v18 = vmul.f32 %v14109_v11, %v1496_v59  ;;  %v7976_v19 = vmul.f32 %v14111_v28, %v2910_v14  ;;  %v14117_v36 = vld [vmem:[#allocation152_spill] sm:$0xff]  ;;  %v14121_v11 = vld [vmem:[#allocation231_spill] sm:$0xff] }
 0x103   :  { %v1142_v10 = vadd.f32 %v14102_v17, %v989_v23  ;;  %14103 = vst [vmem:[#allocation223_spill] sm:$0xff] %v7961_v46  ;;  %14104 = vst [vmem:[#allocation198_spill] sm:$0xff] %v7964_v31  ;;  %v7981_v12 = vmul.f32 %v14113_v27, %v2910_v14  ;;  %v7984_v16 = vmul.f32 %v14115_v43, %v2910_v14  ;;  %v1392_v8 = vrot.slane %v1336_v21, 1  ;;  %v14119_v58 = vld [vmem:[#allocation40_spill] sm:$0xff]  ;;  %v14123_v47 = vld [vmem:[#allocation43_spill] sm:$0xff] }
 0x104   :  { %14106 = vst [vmem:[#allocation262_spill] sm:$0xff] %v7967_v49  ;;  %14108 = vst [vmem:[#allocation263_spill] sm:$0xff] %v7970_v0  ;;  %v7987_v22 = vadd.f32 %v14117_v36, %v1447_v4  ;;  %v7990_v59 = vmul.f32 %v14119_v58, %v2910_v14  ;;  %v640_v28 = vadd.f32 %v612_v61, %v571_v52  ;;  %v14122_v63 = vrot.slane %v14121_v11, 1  ;;  %v14127_v11 = vld [vmem:[#allocation93_spill] sm:$0xff]  ;;  %v14129_v23 = vld [vmem:[#allocation136_spill] sm:$0xff] }
 0x105   :  { %14110 = vst [vmem:[#allocation264_spill] sm:$0xff] %v7973_v18  ;;  %14112 = vst [vmem:[#allocation265_spill] sm:$0xff] %v7976_v19  ;;  %v7997_v27 = vmul.f32 %v14123_v47, %v2910_v14  ;;  %v8009_v44 = vmul.f32 %v14127_v11, %v4324_v41  ;;  %v8013_v43 = vmul.f32 %v14129_v23, %v4324_v41  ;;  %v14131_v36 = vld [vmem:[#allocation96_spill] sm:$0xff]  ;;  %v676_v4 = vld [vmem:[#allocation2 + $0x270] sm:$0xfe] }
 0x106   :  { %14114 = vst [vmem:[#allocation266_spill] sm:$0xff] %v7981_v12  ;;  %14116 = vst [vmem:[#allocation267_spill] sm:$0xff] %v7984_v16  ;;  %v1295_v17 = vadd.f32 %v14122_v63, %v1142_v10  ;;  %v14125_v10 = vld [vmem:[#allocation75_spill] sm:$0xff]  ;;  %v8016_v0 = vmul.f32 %v14131_v36, %v4324_v41  ;;  %v14133_v21 = vld [vmem:[#allocation160_spill] sm:$0xff]  ;;  %v411_v49 = vmul.f32 %v14066_v7, %v288_v24 }
 0x107   :  { %14118 = vst [vmem:[#allocation152_spill] sm:$0xff] %v7987_v22  ;;  %14120 = vst [vmem:[#allocation268_spill] sm:$0xff] %v7990_v59  ;;  %v8006_v63 = vmul.f32 %v14125_v10, %v4324_v41  ;;  %v14134_v19 = vrot.slane %v14133_v21, 1  ;;  %v14135_v16 = vld [vmem:[#allocation97_spill] sm:$0xff]  ;;  %v14137_v22 = vld [vmem:[#allocation215_spill] sm:$0xff]  ;;  %v478_v59 = vmul.f32 %v14067_v25, %v288_v24  ;;  %v545_v10 = vmul.f32 %v14070_v62, %v288_v24 }
 0x108   :  { %14124 = vst [vmem:[#allocation231_spill] sm:$0xff] %v7997_v27  ;;  %14128 = vst [vmem:[#allocation270_spill] sm:$0xff] %v8009_v44  ;;  %v1448_v12 = vadd.f32 %v1392_v8, %v1295_v17  ;;  %v8022_v18 = vmul.f32 %v14135_v16, %v4324_v41  ;;  %v437_v14 = vadd.f32 %v7855_v42, %v14137_v22  ;;  %v14138_v31 = vld [vmem:[#allocation222_spill] sm:$0xff]  ;;  %v289_v21 = vld [vmem:[#allocation2 + $0x250] sm:$0x7f] }
 0x109   :  { %14126 = vst [vmem:[#allocation269_spill] sm:$0xff] %v8006_v63  ;;  %14130 = vst [vmem:[#allocation271_spill] sm:$0xff] %v8013_v43  ;;  %v837_v52 = vadd.f32 %v14134_v19, %v640_v28  ;;  %v504_v46 = vadd.f32 %v7859_v32, %v14138_v31  ;;  %v8033_v8 = vmul.f32 %v13970_v29, %v676_v4  ;;  %v14140_v41 = vld [vmem:[#allocation233_spill] sm:$0xff] }
 0x10a   :  { %14132 = vst [vmem:[#allocation272_spill] sm:$0xff] %v8016_v0  ;;  %14136 = vst [vmem:[#allocation160_spill] sm:$0xff] %v8022_v18  ;;  %v572_v19 = vadd.f32 %v544_v54, %v14140_v41  ;;  %v613_v17 = vmul.f32 %v13956_v15, %v289_v21  ;;  %v14141_v22 = vld [vmem:[#allocation189_spill] sm:$0xff]  ;;  %v8041_v25 = vmul.f32 %v14068_v1, %v676_v4 }
 0x10b   :  { %14139 = vst [vmem:[#allocation215_spill] sm:$0xff] %v8033_v8  ;;  %v14142_v42 = vrot.slane %v14141_v22, 1  ;;  %v8044_v31 = vmul.f32 %v14071_v60, %v676_v4  ;;  %v1499_v24 = vld [vmem:[#allocation2 + $0x270] sm:$0xfc]  ;;  %v8053_v61 = vadd.f32 %v411_v49, %v7851_v55  ;;  %v8057_v22 = vadd.f32 %v545_v10, %v504_v46  ;;  %v14152_v55 = vld [vmem:[#allocation218_spill] sm:$0xff]  ;;  %v14163_v8 = vld [vmem:[#allocation171_spill] sm:$0xff] }
 0x10c   :  { %14143 = vst [vmem:[#allocation222_spill] sm:$0xff] %v8041_v25  ;;  %v14145_v32 = vld [vmem:[#allocation153_spill] sm:$0xff]  ;;  %v641_v41 = vadd.f32 %v613_v17, %v572_v19  ;;  %v8075_v10 = vmul.f32 %v13886_v51, %v1499_v24  ;;  %v412_v25 = vmul.f32 %v13776_v45, %v289_v21 }
 0x10d   :  { %v990_v27 = vadd.f32 %v14142_v42, %v837_v52  ;;  %14144 = vst [vmem:[#allocation233_spill] sm:$0xff] %v8044_v31  ;;  %v8047_v28 = vadd.f32 %v14145_v32, %v1448_v12  ;;  %14147 = vst [vmem:[#allocation153_spill] sm:$0xff] %v8053_v61  ;;  %v8055_v52 = vadd.f32 %v478_v59, %v437_v14  ;;  %v2913_v44 = vld [vmem:[#allocation2 + $0x270] sm:$0xf8]  ;;  %v14153_v59 = vrot.slane %v14152_v55, 1  ;;  %v14159_v55 = vld [vmem:[#allocation216_spill] sm:$0xff] }
 0x10e   :  { %14149 = vst [vmem:[#allocation274_spill] sm:$0xff] %v8057_v22  ;;  %v1337_v42 = vmul.f32 %v13845_v20, %v676_v4  ;;  %v8062_v12 = vmul.f32 %v13772_v53, %v1499_v24  ;;  %v8065_v32 = vmul.f32 %v14074_v48, %v1499_v24  ;;  %v4327_v54 = vld [vmem:[#allocation2 + $0x270] sm:$0xf0]  ;;  %v8072_v4 = vmul.f32 %v14078_v9, %v1499_v24  ;;  %v14166_v22 = vld [vmem:[#allocation228_spill] sm:$0xff] }
 0x10f   :  { %14146 = vst [vmem:[#allocation189_spill] sm:$0xff] %v8047_v28  ;;  %14148 = vst [vmem:[#allocation273_spill] sm:$0xff] %v8055_v52  ;;  %v1143_v14 = vadd.f32 %v14153_v59, %v990_v27  ;;  %v8078_v15 = vmul.f32 %v13989_v26, %v2913_v44  ;;  %v8081_v63 = vmul.f32 %v7303_v6, %v2913_v44  ;;  %v14164_v31 = vrot.slane %v14163_v8, 1  ;;  %v677_v0 = vld [vmem:[#allocation2 + $0x250] sm:$0xfe] }
 0x110   :  { %14150 = vst [vmem:[#allocation275_spill] sm:$0xff] %v8062_v12  ;;  %14151 = vst [vmem:[#allocation276_spill] sm:$0xff] %v8065_v32  ;;  %v8084_v19 = vmul.f32 %v13950_v39, %v2913_v44  ;;  %v1393_v17 = vrot.slane %v1337_v42, 1  ;;  %v8087_v27 = vmul.f32 %v14159_v55, %v2913_v44  ;;  %v8090_v59 = vmul.f32 %v14091_v2, %v4327_v54  ;;  %v14170_v43 = vld [vmem:[#allocation197_spill] sm:$0xff] }
 0x111   :  { %14154 = vst [vmem:[#allocation218_spill] sm:$0xff] %v8072_v4  ;;  %14155 = vst [vmem:[#allocation277_spill] sm:$0xff] %v8075_v10  ;;  %v8093_v49 = vmul.f32 %v7815_v3, %v4327_v54  ;;  %v838_v52 = vadd.f32 %v14164_v31, %v641_v41  ;;  %v14165_v42 = vrot.slane %v7867_v57, 1  ;;  %v438_v18 = vadd.f32 %v7938_v30, %v14166_v22  ;;  %v1500_v22 = vld [vmem:[#allocation2 + $0x250] sm:$0xfc] }
 0x112   :  { %14156 = vst [vmem:[#allocation278_spill] sm:$0xff] %v8078_v15  ;;  %14157 = vst [vmem:[#allocation279_spill] sm:$0xff] %v8081_v63  ;;  %v479_v54 = vmul.f32 %v6858_v56, %v289_v21  ;;  %v546_v24 = vmul.f32 %v6891_v5, %v289_v21  ;;  %v8120_v46 = vmul.f32 %v13780_v50, %v677_v0  ;;  %v14171_v8 = vrot.slane %v14170_v43, 1  ;;  %v2914_v31 = vld [vmem:[#allocation2 + $0x250] sm:$0xf8]  ;;  %v14178_v43 = vld [vmem:[#allocation47_spill] sm:$0xff] }
 0x113   :  { %14158 = vst [vmem:[#allocation280_spill] sm:$0xff] %v8084_v19  ;;  %14160 = vst [vmem:[#allocation281_spill] sm:$0xff] %v8087_v27  ;;  %v1296_v61 = vadd.f32 %v14165_v42, %v1143_v14  ;;  %v14167_v14 = vld [vmem:[#allocation196_spill] sm:$0xff]  ;;  %v8116_v42 = vadd.f32 %v412_v25, %v7928_v34  ;;  %v8129_v41 = vmul.f32 %v13998_v37, %v677_v0  ;;  %v14231_v55 = vld [vmem:[#allocation45_spill] sm:$0xff] }
 0x114   :  { %14161 = vst [vmem:[#allocation282_spill] sm:$0xff] %v8090_v59  ;;  %14162 = vst [vmem:[#allocation283_spill] sm:$0xff] %v8093_v49  ;;  %v505_v30 = vadd.f32 %v7942_v35, %v14167_v14  ;;  %v991_v44 = vadd.f32 %v14171_v8, %v838_v52  ;;  %v8126_v57 = vadd.f32 %v479_v54, %v438_v18  ;;  %v14180_v18 = vld [vmem:[#allocation49_spill] sm:$0xff]  ;;  %v14182_v54 = vld [vmem:[#allocation39_spill] sm:$0xff] }
 0x115   :  { %14168 = vst [vmem:[#allocation171_spill] sm:$0xff] %v8116_v42  ;;  %14169 = vst [vmem:[#allocation228_spill] sm:$0xff] %v8120_v46  ;;  %v8124_v27 = vadd.f32 %v1393_v17, %v1296_v61  ;;  %v8132_v35 = vmul.f32 %v14098_v38, %v677_v0  ;;  %v1338_v25 = vmul.f32 %v7240_v40, %v677_v0  ;;  %v4328_v61 = vld [vmem:[#allocation2 + $0x250] sm:$0xf0]  ;;  %v1523_v19 = vld [vmem:[#allocation2 + $0xe8] sm:$0xfc] }
 0x116   :  { %14173 = vst [vmem:[#allocation197_spill] sm:$0xff] %v8126_v57  ;;  %14174 = vst [vmem:[#allocation284_spill] sm:$0xff] %v8129_v41  ;;  %v8136_v34 = vmul.f32 %v13816_v13, %v1500_v22  ;;  %v8139_v21 = vmul.f32 %v14105_v33, %v1500_v22  ;;  %v8142_v52 = vmul.f32 %v14178_v43, %v1500_v22  ;;  %v14184_v14 = vld [vmem:[#allocation133_spill] sm:$0xff]  ;;  %v14188_v57 = vld [vmem:[#allocation16_spill] sm:$0xff] }
 0x117   :  { %14172 = vst [vmem:[#allocation196_spill] sm:$0xff] %v8124_v27  ;;  %14175 = vst [vmem:[#allocation285_spill] sm:$0xff] %v8132_v35  ;;  %v8145_v17 = vmul.f32 %v14180_v18, %v1500_v22  ;;  %v8148_v8 = vmul.f32 %v14182_v54, %v2914_v31  ;;  %v8151_v49 = vmul.f32 %v14184_v14, %v2914_v31  ;;  %v14189_v42 = vrot.slane %v14188_v57, 1  ;;  %v300_v57 = vld [vmem:[#allocation2 + $0xe8] sm:$0x7f]  ;;  %v14193_v46 = vld [vmem:[#allocation261_spill] sm:$0xff] }
 0x118   :  { %14176 = vst [vmem:[#allocation286_spill] sm:$0xff] %v8136_v34  ;;  %14177 = vst [vmem:[#allocation287_spill] sm:$0xff] %v8139_v21  ;;  %v8154_v0 = vmul.f32 %v14119_v58, %v2914_v31  ;;  %v8156_v59 = vadd.f32 %v546_v24, %v505_v30  ;;  %v8162_v15 = vmul.f32 %v14123_v47, %v2914_v31  ;;  %v1394_v24 = vrot.slane %v1338_v25, 1  ;;  %v688_v41 = vld [vmem:[#allocation2 + $0xe8] sm:$0xfe]  ;;  %v14211_v34 = vld [vmem:[#allocation37_spill] sm:$0xff] }
 0x119   :  { %14179 = vst [vmem:[#allocation288_spill] sm:$0xff] %v8142_v52  ;;  %14181 = vst [vmem:[#allocation289_spill] sm:$0xff] %v8145_v17  ;;  %v1144_v63 = vadd.f32 %v14189_v42, %v991_v44  ;;  %v8167_v4 = vmul.f32 %v14127_v11, %v4328_v61  ;;  %v8170_v32 = vmul.f32 %v14129_v23, %v4328_v61  ;;  %v14194_v35 = vrot.slane %v14193_v46, 1  ;;  %v2937_v31 = vld [vmem:[#allocation2 + $0xe8] sm:$0xf8]  ;;  %v14203_v42 = vld [vmem:[#allocation7_spill] sm:$0xff] }
 0x11a   :  { %14183 = vst [vmem:[#allocation290_spill] sm:$0xff] %v8148_v8  ;;  %14185 = vst [vmem:[#allocation291_spill] sm:$0xff] %v8151_v49  ;;  %v8183_v30 = vmul.f32 %v14131_v36, %v4328_v61  ;;  %v8186_v44 = vmul.f32 %v14135_v16, %v4328_v61  ;;  %v415_v10 = vmul.f32 %v14066_v7, %v300_v57  ;;  %v14198_v46 = vld [vmem:[#allocation8_spill] sm:$0xff]  ;;  %v14212_v27 = vld [vmem:[#allocation42_spill] sm:$0xff] }
 0x11b   :  { %14186 = vst [vmem:[#allocation292_spill] sm:$0xff] %v8154_v0  ;;  %14187 = vst [vmem:[#allocation293_spill] sm:$0xff] %v8156_v59  ;;  %v1297_v59 = vadd.f32 %v14194_v35, %v1144_v63  ;;  %v14197_v0 = vld [vmem:[#allocation116_spill] sm:$0xff]  ;;  %v8193_v63 = vmul.f32 %v14198_v46, %v300_v57  ;;  %v14199_v35 = vld [vmem:[#allocation6_spill] sm:$0xff]  ;;  %v8202_v61 = vmul.f32 %v14068_v1, %v688_v41 }
 0x11c   :  { %14190 = vst [vmem:[#allocation16_spill] sm:$0xff] %v8162_v15  ;;  %14191 = vst [vmem:[#allocation294_spill] sm:$0xff] %v8167_v4  ;;  %v482_v49 = vmul.f32 %v14197_v0, %v300_v57  ;;  %v8196_v25 = vmul.f32 %v14199_v35, %v688_v41  ;;  %v8199_v15 = vmul.f32 %v13970_v29, %v688_v41  ;;  %v4351_v8 = vld [vmem:[#allocation2 + $0xe8] sm:$0xf0]  ;;  %v14207_v57 = vld [vmem:[#allocation21_spill] sm:$0xff] }
 0x11d   :  { %14192 = vst [vmem:[#allocation295_spill] sm:$0xff] %v8170_v32  ;;  %14195 = vst [vmem:[#allocation261_spill] sm:$0xff] %v8183_v30  ;;  %v8205_v4 = vmul.f32 %v14203_v42, %v1523_v19  ;;  %v8208_v22 = vmul.f32 %v13772_v53, %v1523_v19  ;;  %v8211_v32 = vmul.f32 %v14074_v48, %v1523_v19  ;;  %v14214_v47 = vld [vmem:[#allocation90_spill] sm:$0xff] }
 0x11e   :  { %14196 = vst [vmem:[#allocation296_spill] sm:$0xff] %v8186_v44  ;;  %14200 = vst [vmem:[#allocation8_spill] sm:$0xff] %v8196_v25  ;;  %v8214_v17 = vmul.f32 %v14207_v57, %v2937_v31  ;;  %v8216_v52 = vadd.f32 %v1394_v24, %v1297_v59  ;;  %v8221_v28 = vmul.f32 %v13989_v26, %v2937_v31  ;;  %v301_v59 = vld [vmem:[#allocation2 + $0x178] sm:$0x7f] }
 0x11f   :  { %14201 = vst [vmem:[#allocation6_spill] sm:$0xff] %v8199_v15  ;;  %14202 = vst [vmem:[#allocation297_spill] sm:$0xff] %v8202_v61  ;;  %v8224_v12 = vadd.f32 %v415_v10, %v14211_v34  ;;  %v8227_v16 = vadd.f32 %v482_v49, %v14212_v27  ;;  %v8230_v19 = vmul.f32 %v7303_v6, %v2937_v31  ;;  %v689_v10 = vld [vmem:[#allocation2 + $0x178] sm:$0xfe]  ;;  %v14233_v61 = vld [vmem:[#allocation75_spill] sm:$0xff] }
 0x120   :  { %14204 = vst [vmem:[#allocation298_spill] sm:$0xff] %v8205_v4  ;;  %14205 = vst [vmem:[#allocation299_spill] sm:$0xff] %v8208_v22  ;;  %v8233_v18 = vmul.f32 %v14214_v47, %v4351_v8  ;;  %v8239_v44 = vmul.f32 %v14091_v2, %v4351_v8  ;;  %v1524_v30 = vld [vmem:[#allocation2 + $0x178] sm:$0xfc]  ;;  %v8247_v24 = vmul.f32 %v7815_v3, %v4351_v8 }
 0x121   :  { %14206 = vst [vmem:[#allocation300_spill] sm:$0xff] %v8211_v32  ;;  %14208 = vst [vmem:[#allocation301_spill] sm:$0xff] %v8214_v17  ;;  %v416_v41 = vmul.f32 %v13776_v45, %v301_v59  ;;  %v483_v21 = vmul.f32 %v6858_v56, %v301_v59  ;;  %v2938_v25 = vld [vmem:[#allocation2 + $0x178] sm:$0xf8]  ;;  %v8261_v8 = vmul.f32 %v13780_v50, %v689_v10  ;;  %v14223_v17 = vld [vmem:[#allocation17_spill] sm:$0xff] }
 0x122   :  { %14209 = vst [vmem:[#allocation302_spill] sm:$0xff] %v8216_v52  ;;  %14210 = vst [vmem:[#allocation303_spill] sm:$0xff] %v8221_v28  ;;  %v14218_v27 = vld [vmem:[#allocation10_spill] sm:$0xff]  ;;  %v8264_v28 = vmul.f32 %v13998_v37, %v689_v10  ;;  %v8267_v32 = vmul.f32 %v14223_v17, %v1524_v30  ;;  %v8270_v49 = vmul.f32 %v13816_v13, %v1524_v30 }
 0x123   :  { %14213 = vst [vmem:[#allocation37_spill] sm:$0xff] %v8230_v19  ;;  %14215 = vst [vmem:[#allocation42_spill] sm:$0xff] %v8233_v18  ;;  %v8254_v22 = vmul.f32 %v14218_v27, %v301_v59  ;;  %v14219_v34 = vld [vmem:[#allocation14_spill] sm:$0xff]  ;;  %v8273_v59 = vmul.f32 %v14105_v33, %v1524_v30  ;;  %v8279_v52 = vmul.f32 %v14182_v54, %v2938_v25 }
 0x124   :  { %14216 = vst [vmem:[#allocation304_spill] sm:$0xff] %v8239_v44  ;;  %14217 = vst [vmem:[#allocation305_spill] sm:$0xff] %v8247_v24  ;;  %v8257_v31 = vmul.f32 %v14219_v34, %v689_v10  ;;  %v4352_v15 = vld [vmem:[#allocation2 + $0x178] sm:$0xf0]  ;;  %v302_v44 = vld [vmem:[#allocation2 + $0x288] sm:$0x7f]  ;;  %v8286_v51 = vadd.f32 %v483_v21, %v14231_v55  ;;  %v8289_v20 = vmul.f32 %v14184_v14, %v2938_v25 }
 0x125   :  { %14221 = vst [vmem:[#allocation14_spill] sm:$0xff] %v8261_v8  ;;  %14222 = vst [vmem:[#allocation306_spill] sm:$0xff] %v8264_v28  ;;  %v14227_v18 = vld [vmem:[#allocation22_spill] sm:$0xff]  ;;  %v8293_v36 = vmul.f32 %v14233_v61, %v4352_v15  ;;  %v8296_v58 = vmul.f32 %v14127_v11, %v4352_v15  ;;  %v8299_v54 = vmul.f32 %v14129_v23, %v4352_v15 }
 0x126   :  { %14220 = vst [vmem:[#allocation10_spill] sm:$0xff] %v8257_v31  ;;  %14224 = vst [vmem:[#allocation307_spill] sm:$0xff] %v8267_v32  ;;  %v8276_v19 = vmul.f32 %v14227_v18, %v2938_v25  ;;  %v14230_v4 = vld [vmem:[#allocation38_spill] sm:$0xff]  ;;  %v417_v21 = vmul.f32 %v14066_v7, %v302_v44  ;;  %v690_v25 = vld [vmem:[#allocation2 + $0x288] sm:$0xfe]  ;;  %v8311_v23 = vmul.f32 %v14198_v46, %v302_v44 }
 0x127   :  { %14225 = vst [vmem:[#allocation308_spill] sm:$0xff] %v8270_v49  ;;  %14226 = vst [vmem:[#allocation309_spill] sm:$0xff] %v8273_v59  ;;  %v8283_v40 = vadd.f32 %v416_v41, %v14230_v4  ;;  %v484_v4 = vmul.f32 %v14197_v0, %v302_v44  ;;  %v551_v55 = vmul.f32 %v14070_v62, %v302_v44  ;;  %v1527_v41 = vld [vmem:[#allocation2 + $0x288] sm:$0xfc]  ;;  %v8357_v59 = vld [vmem:[#allocation2 + $0x138] sm:$0x7] }
 0x128   :  { %14228 = vst [vmem:[#allocation310_spill] sm:$0xff] %v8276_v19  ;;  %14229 = vst [vmem:[#allocation311_spill] sm:$0xff] %v8279_v52  ;;  %v8319_v24 = vmul.f32 %v14199_v35, %v690_v25  ;;  %v2941_v31 = vld [vmem:[#allocation2 + $0x288] sm:$0xf8]  ;;  %v8322_v15 = vadd.f32 %v417_v21, %v8193_v63  ;;  %v8328_v52 = vmul.f32 %v14068_v1, %v690_v25  ;;  %v8355_v19 = vld [vmem:[#allocation2 + $0x198] sm:$0xf0] }
 0x129   :  { %14232 = vst [vmem:[#allocation38_spill] sm:$0xff] %v8289_v20  ;;  %14234 = vst [vmem:[#allocation45_spill] sm:$0xff] %v8293_v36  ;;  %v8325_v20 = vmul.f32 %v13970_v29, %v690_v25  ;;  %v8331_v44 = vmul.f32 %v14071_v60, %v690_v25  ;;  %v4355_v32 = vld [vmem:[#allocation2 + $0x288] sm:$0xf0]  ;;  %v8334_v10 = vmul.f32 %v14203_v42, %v1527_v41  ;;  %v8375_v49 = vld [vmem:[#allocation2 + $0x238] sm:$0xf0] }
 0x12a   :  { %14235 = vst [vmem:[#allocation312_spill] sm:$0xff] %v8296_v58  ;;  %14236 = vst [vmem:[#allocation313_spill] sm:$0xff] %v8299_v54  ;;  %v8337_v30 = vmul.f32 %v13772_v53, %v1527_v41  ;;  %v8340_v54 = vmul.f32 %v14074_v48, %v1527_v41  ;;  %v8343_v63 = vmul.f32 %v14078_v9, %v1527_v41 }
 0x12b   :  { %14237 = vst [vmem:[#allocation314_spill] sm:$0xff] %v8319_v24  ;;  %14238 = vst [vmem:[#allocation315_spill] sm:$0xff] %v8325_v20  ;;  %v8346_v21 = vadd.f32 %v484_v4, %v8224_v12  ;;  %v579_v58 = vadd.f32 %v551_v55, %v8227_v16  ;;  %v8350_v25 = vmul.f32 %v14207_v57, %v2941_v31  ;;  %v14251_v20 = vld [vmem:[#allocation161_spill] sm:$0xff] }
 0x12c   :  { %14239 = vst [vmem:[#allocation316_spill] sm:$0xff] %v8328_v52  ;;  %14240 = vst [vmem:[#allocation317_spill] sm:$0xff] %v8334_v10  ;;  %v8353_v36 = vmul.f32 %v13989_v26, %v2941_v31  ;;  %v8361_v41 = vmul.f32 %v7303_v6, %v2941_v31  ;;  %v8364_v12 = vmul.f32 %v13950_v39, %v2941_v31  ;;  %v303_v26 = vld [vmem:[#allocation2 + $0x8] sm:$0x7f]  ;;  %v8381_v6 = vld [vmem:[#allocation2 + $0xc0] sm:$0x7] }
 0x12d   :  { %14241 = vst [vmem:[#allocation318_spill] sm:$0xff] %v8337_v30  ;;  %14242 = vst [vmem:[#allocation319_spill] sm:$0xff] %v8340_v54  ;;  %v8367_v16 = vmul.f32 %v14214_v47, %v4355_v32  ;;  %v8373_v28 = vmul.f32 %v14091_v2, %v4355_v32  ;;  %v8386_v8 = vmul.f32 %v7815_v3, %v4355_v32  ;;  %v304_v31 = vld [vmem:[#allocation2 + $0x70] sm:$0x7f]  ;;  %v2942_v10 = vld [vmem:[#allocation2 + $0x8] sm:$0xf8] }
 0x12e   :  { %14243 = vst [vmem:[#allocation320_spill] sm:$0xff] %v8343_v63  ;;  %14244 = vst [vmem:[#allocation321_spill] sm:$0xff] %v8350_v25  ;;  %v8389_v52 = vmul.f32 %v14251_v20, %v4355_v32  ;;  %v418_v47 = vmul.f32 %v13776_v45, %v303_v26  ;;  %v691_v63 = vld [vmem:[#allocation2 + $0x8] sm:$0xfe]  ;;  %v8398_v55 = vmul.f32 %v14251_v20, %v8355_v19 }
 0x12f   :  { %14245 = vst [vmem:[#allocation322_spill] sm:$0xff] %v8353_v36  ;;  %14246 = vst [vmem:[#allocation323_spill] sm:$0xff] %v8361_v41  ;;  %v8402_v4 = vmul.f32 %v14251_v20, %v8357_v59  ;;  %v8406_v32 = vmul.f32 %v14251_v20, %v8375_v49  ;;  %v8410_v39 = vmul.f32 %v14251_v20, %v8381_v6 }
 0x130   :  { %14247 = vst [vmem:[#allocation324_spill] sm:$0xff] %v8364_v12  ;;  %14248 = vst [vmem:[#allocation325_spill] sm:$0xff] %v8367_v16  ;;  %v485_v24 = vmul.f32 %v6858_v56, %v303_v26  ;;  %v552_v54 = vmul.f32 %v6891_v5, %v303_v26  ;;  %v14255_v16 = vld [vmem:[#allocation144_spill] sm:$0xff]  ;;  %v8418_v25 = vmul.f32 %v14218_v27, %v303_v26 }
 0x131   :  { %14249 = vst [vmem:[#allocation326_spill] sm:$0xff] %v8373_v28  ;;  %14250 = vst [vmem:[#allocation327_spill] sm:$0xff] %v8386_v8  ;;  %v1528_v28 = vld [vmem:[#allocation2 + $0x8] sm:$0xfc]  ;;  %v620_v12 = vmul.f32 %v14255_v16, %v304_v31  ;;  %v8421_v30 = vmul.f32 %v14219_v34, %v691_v63  ;;  %v8424_v45 = vadd.f32 %v418_v47, %v8254_v22 }
 0x132   :  { %14252 = vst [vmem:[#allocation328_spill] sm:$0xff] %v8389_v52  ;;  %14253 = vst [vmem:[#allocation329_spill] sm:$0xff] %v8398_v55  ;;  %v8427_v56 = vmul.f32 %v13780_v50, %v691_v63  ;;  %v8430_v5 = vmul.f32 %v13998_v37, %v691_v63  ;;  %v8433_v41 = vmul.f32 %v14098_v38, %v691_v63  ;;  %v4356_v47 = vld [vmem:[#allocation2 + $0x8] sm:$0xf0] }
 0x133   :  { %14254 = vst [vmem:[#allocation330_spill] sm:$0xff] %v8402_v4  ;;  %14256 = vst [vmem:[#allocation331_spill] sm:$0xff] %v8418_v25  ;;  %v648_v16 = vadd.f32 %v620_v12, %v579_v58  ;;  %v8436_v26 = vmul.f32 %v14223_v17, %v1528_v28  ;;  %v8439_v36 = vmul.f32 %v13816_v13, %v1528_v28  ;;  %v14266_v13 = vld [vmem:[#allocation39_spill] sm:$0xff]  ;;  %v14269_v25 = vld [vmem:[#allocation40_spill] sm:$0xff] }
 0x134   :  { %14257 = vst [vmem:[#allocation332_spill] sm:$0xff] %v8421_v30  ;;  %14258 = vst [vmem:[#allocation333_spill] sm:$0xff] %v8424_v45  ;;  %v8442_v52 = vmul.f32 %v14105_v33, %v1528_v28  ;;  %v8445_v22 = vadd.f32 %v485_v24, %v8283_v40  ;;  %v8448_v8 = vadd.f32 %v552_v54, %v8286_v51  ;;  %v14272_v24 = vld [vmem:[#allocation28_spill] sm:$0xff]  ;;  %v125_v51 = vld [vmem:[%s12909_s0 + $0xa0] sm:$0x7f] }
 0x135   :  { %14259 = vst [vmem:[#allocation334_spill] sm:$0xff] %v8427_v56  ;;  %14260 = vst [vmem:[#allocation335_spill] sm:$0xff] %v8430_v5  ;;  %v8451_v58 = vmul.f32 %v14178_v43, %v1528_v28  ;;  %v8454_v63 = vmul.f32 %v14227_v18, %v2942_v10  ;;  %v8458_v45 = vmul.f32 %v14266_v13, %v2942_v10  ;;  %v14273_v18 = vrot.slane %v14272_v24, 1  ;;  %v14275_v56 = vld [vmem:[#allocation136_spill] sm:$0xff]  ;;  %v14284_v24 = vld [vmem:[#allocation297_spill] sm:$0xff] }
 0x136   :  { %14261 = vst [vmem:[#allocation336_spill] sm:$0xff] %v8436_v26  ;;  %14262 = vst [vmem:[#allocation337_spill] sm:$0xff] %v8439_v36  ;;  %v8461_v33 = vmul.f32 %v14184_v14, %v2942_v10  ;;  %v8464_v40 = vmul.f32 %v14269_v25, %v2942_v10  ;;  %v8469_v28 = vmul.f32 %v14233_v61, %v4356_v47  ;;  %v14277_v14 = vld [vmem:[#allocation96_spill] sm:$0xff]  ;;  %v181_v12 = vrot.slane %v125_v51, 6  ;;  %v127_v51 = vld [vmem:[%s12909_s0 + $0xb0] sm:$0x7f] }
 0x137   :  { %14263 = vst [vmem:[#allocation338_spill] sm:$0xff] %v8442_v52  ;;  %14264 = vst [vmem:[#allocation339_spill] sm:$0xff] %v8451_v58  ;;  %v845_v43 = vadd.f32 %v14273_v18, %v648_v16  ;;  %v8480_v54 = vmul.f32 %v14127_v11, %v4356_v47  ;;  %v8483_v5 = vmul.f32 %v14275_v56, %v4356_v47  ;;  %v124_v18 = vld [vmem:[%s12909_s0 + $0x98] sm:$0x7f]  ;;  %v692_v58 = vld [vmem:[#allocation2 + $0x70] sm:$0xfe] }
 0x138   :  { %14265 = vst [vmem:[#allocation340_spill] sm:$0xff] %v8454_v63  ;;  %14267 = vst [vmem:[#allocation341_spill] sm:$0xff] %v8458_v45  ;;  %v8492_v10 = vmul.f32 %v14277_v14, %v4356_v47  ;;  %v14279_v52 = vld [vmem:[#allocation34_spill] sm:$0xff]  ;;  %v419_v13 = vmul.f32 %v14066_v7, %v304_v31  ;;  %v486_v47 = vmul.f32 %v14197_v0, %v304_v31  ;;  %v126_v63 = vld [vmem:[%s12909_s0 + $0xa8] sm:$0x7f]  ;;  %v14285_v30 = vrot.slane %v14284_v24, 1 }
 0x139   :  { %14268 = vst [vmem:[#allocation342_spill] sm:$0xff] %v8461_v33  ;;  %14270 = vst [vmem:[#allocation343_spill] sm:$0xff] %v8464_v40  ;;  %v14280_v16 = vrot.slane %v14279_v52, 1  ;;  %v180_v40 = vrot.slane %v124_v18, 6  ;;  %v8513_v52 = vmul.f32 %v14198_v46, %v304_v31  ;;  %v8517_v18 = vmul.f32 %v14199_v35, %v692_v58  ;;  %v1531_v33 = vld [vmem:[#allocation2 + $0x70] sm:$0xfc] }
 0x13a   :  { %14271 = vst [vmem:[#allocation344_spill] sm:$0xff] %v8469_v28  ;;  %14274 = vst [vmem:[#allocation28_spill] sm:$0xff] %v8480_v54  ;;  %v8523_v36 = vmul.f32 %v13970_v29, %v692_v58  ;;  %v8541_v54 = vadd.f32 %v419_v13, %v8311_v23  ;;  %v182_v24 = vrot.slane %v126_v63, 6  ;;  %v8550_v28 = vmul.f32 %v14203_v42, %v1531_v33 }
 0x13b   :  { %14276 = vst [vmem:[#allocation345_spill] sm:$0xff] %v8483_v5  ;;  %14278 = vst [vmem:[#allocation346_spill] sm:$0xff] %v8492_v10  ;;  %v998_v45 = vadd.f32 %v14280_v16, %v845_v43  ;;  %v553_v16 = vmul.f32 %v14070_v62, %v304_v31  ;;  %v8526_v43 = vmul.f32 %v14068_v1, %v692_v58  ;;  %v14286_v31 = vld [vmem:[#allocation145_spill] sm:$0xff]  ;;  %v129_v10 = vld [vmem:[%s12909_s0 + $0xc0] sm:$0x7f]  ;;  %v183_v23 = vrot.slane %v127_v51, 6 }
 0x13c   :  { %14281 = vst [vmem:[#allocation34_spill] sm:$0xff] %v8517_v18  ;;  %255 = vst [vmem:[#allocation2 + $0x1e0] sm:$0xfc] %v180_v40  ;;  %v1345_v4 = vmul.f32 %v14286_v31, %v692_v58  ;;  %v130_v5 = vld [vmem:[%s12909_s0 + $0xc8] sm:$0x7f]  ;;  %v8553_v26 = vmul.f32 %v13772_v53, %v1531_v33  ;;  %v8556_v31 = vmul.f32 %v14074_v48, %v1531_v33  ;;  %v14293_v63 = vrot.slane %v8331_v44, 1 }
 0x13d   :  { %257 = vst [vmem:[#allocation2 + $0x210] sm:$0x1] %v180_v40  ;;  %14282 = vst [vmem:[#allocation347_spill] sm:$0xff] %v8523_v36  ;;  %v1151_v55 = vadd.f32 %v14285_v30, %v998_v45  ;;  %v128_v40 = vld [vmem:[%s12909_s0 + $0xb8] sm:$0x7f]  ;;  %v8544_v45 = vadd.f32 %v486_v47, %v8322_v15  ;;  %v8547_v30 = vmul.f32 %v14071_v60, %v692_v58  ;;  %v185_v58 = vrot.slane %v129_v10, 6 }
 0x13e   :  { %14283 = vst [vmem:[#allocation348_spill] sm:$0xff] %v8526_v43  ;;  %258 = vst [vmem:[#allocation2 + $0x20] sm:$0xfc] %v181_v12  ;;  %v8559_v13 = vmul.f32 %v14078_v9, %v1531_v33  ;;  %v184_v15 = vrot.slane %v128_v40, 6  ;;  %v186_v47 = vrot.slane %v130_v5, 6  ;;  %v14294_v1 = vld [vmem:[#allocation94_spill] sm:$0xff]  ;;  %v8570_v48 = vadd.f32 %v553_v16, %v8346_v21 }
 0x13f   :  { %260 = vst [vmem:[#allocation2 + $0x280] sm:$0x1] %v181_v12  ;;  %14287 = vst [vmem:[#allocation297_spill] sm:$0xff] %v8541_v54  ;;  %v2945_v12 = vld [vmem:[#allocation2 + $0x70] sm:$0xf8]  ;;  %v1304_v60 = vadd.f32 %v14293_v63, %v1151_v55  ;;  %v8564_v54 = vmul.f32 %v14294_v1, %v1531_v33  ;;  %v14297_v5 = vld [vmem:[#allocation36_spill] sm:$0xff] }
 0x140   :  { %14288 = vst [vmem:[#allocation349_spill] sm:$0xff] %v8544_v45  ;;  %14289 = vst [vmem:[#allocation350_spill] sm:$0xff] %v8550_v28  ;;  %v1401_v45 = vrot.slane %v1345_v4, 1  ;;  %v8567_v53 = vmul.f32 %v14207_v57, %v2945_v12  ;;  %v8577_v44 = vmul.f32 %v14297_v5, %v2945_v12  ;;  %v14299_v21 = vld [vmem:[#allocation118_spill] sm:$0xff]  ;;  %v14301_v55 = vld [vmem:[#allocation95_spill] sm:$0xff]  ;;  %v14323_v33 = vrot.slane %v8406_v32, 4 }
 0x141   :  { %14290 = vst [vmem:[#allocation351_spill] sm:$0xff] %v8553_v26  ;;  %14291 = vst [vmem:[#allocation352_spill] sm:$0xff] %v8556_v31  ;;  %v8580_v4 = vmul.f32 %v14299_v21, %v2945_v12  ;;  %v8583_v16 = vmul.f32 %v14301_v55, %v2945_v12  ;;  %v4359_v40 = vld [vmem:[#allocation2 + $0x70] sm:$0xf0]  ;;  %v4339_v63 = vld [vmem:[#allocation2 + $0x228] sm:$0xf0] }
 0x142   :  { %14292 = vst [vmem:[#allocation353_spill] sm:$0xff] %v8559_v13  ;;  %259 = vst [vmem:[#allocation2 + $0x278] sm:$0xfc] %v182_v24  ;;  %v4341_v9 = vld [vmem:[#allocation2 + $0x1d8] sm:$0x7]  ;;  %v1457_v51 = vadd.f32 %v1401_v45, %v1304_v60  ;;  %v14304_v28 = vld [vmem:[#allocation216_spill] sm:$0xff]  ;;  %v8605_v60 = vmul.f32 %v7815_v3, %v4359_v40 }
 0x143   :  { %261 = vst [vmem:[#allocation2 + $0x100] sm:$0x1] %v182_v24  ;;  %14295 = vst [vmem:[#allocation354_spill] sm:$0xff] %v8564_v54  ;;  %v14303_v18 = vld [vmem:[#allocation150_spill] sm:$0xff]  ;;  %v4383_v43 = vld [vmem:[#allocation2 + $0x108] sm:$0xf0] }
 0x144   :  { %14296 = vst [vmem:[#allocation355_spill] sm:$0xff] %v8567_v53  ;;  %262 = vst [vmem:[#allocation2 + $0x80] sm:$0xfc] %v183_v23  ;;  %v4385_v24 = vld [vmem:[#allocation2 + $0x258] sm:$0x7]  ;;  %v14311_v54 = vld [vmem:[#allocation249_spill] sm:$0xff] }
 0x145   :  { %264 = vst [vmem:[#allocation2 + $0x200] sm:$0x1] %v183_v23  ;;  %263 = vst [vmem:[#allocation2 + $0xa8] sm:$0xfc] %v184_v15  ;;  %v8596_v23 = vmul.f32 %v14304_v28, %v2945_v12  ;;  %v8612_v12 = vmul.f32 %v14251_v20, %v4359_v40  ;;  %v8615_v13 = vmul.f32 %v14311_v54, %v4339_v63  ;;  %v14315_v45 = vld [vmem:[#allocation60_spill] sm:$0xff] }
 0x146   :  { %265 = vst [vmem:[#allocation2 + $0x1b0] sm:$0x1] %v184_v15  ;;  %266 = vst [vmem:[#allocation2 + $0x268] sm:$0xfc] %v185_v58  ;;  %v14306_v15 = vld [vmem:[#allocation90_spill] sm:$0xff]  ;;  %v8618_v26 = vmul.f32 %v14311_v54, %v4341_v9  ;;  %v8622_v3 = vmul.f32 %v14311_v54, %v8375_v49  ;;  %v8627_v10 = vmul.f32 %v14311_v54, %v8381_v6 }
 0x147   :  { %268 = vst [vmem:[#allocation2 + $0x208] sm:$0x1] %v185_v58  ;;  %267 = vst [vmem:[#allocation2 + $0x118] sm:$0xfc] %v186_v47  ;;  %v8599_v31 = vmul.f32 %v14306_v15, %v4359_v40  ;;  %v8602_v58 = vmul.f32 %v14091_v2, %v4359_v40  ;;  %v8635_v40 = vld [vmem:[#allocation2 + $0x120] sm:$0x1]  ;;  %v8656_v63 = vmul.f32 %v14311_v54, %v8355_v19 }
 0x148   :  { %269 = vst [vmem:[#allocation2 + $0x90] sm:$0x1] %v186_v47  ;;  %14298 = vst [vmem:[#allocation356_spill] sm:$0xff] %v8577_v44  ;;  %v8589_v47 = vld [vmem:[#allocation2 + $0x1e0] sm:$0x7f]  ;;  %v1811_v44 = vadd.f32 %v14315_v45, %v1457_v51  ;;  %v8660_v49 = vmul.f32 %v14311_v54, %v8357_v59 }
 0x149   :  { %14300 = vst [vmem:[#allocation357_spill] sm:$0xff] %v8580_v4  ;;  %14302 = vst [vmem:[#allocation358_spill] sm:$0xff] %v8583_v16  ;;  %v621_v36 = vmul.f32 %v14303_v18, %v8589_v47  ;;  %v8637_v9 = vld [vmem:[#allocation2 + $0x2a8] sm:$0x1]  ;;  %v8643_v6 = vld [vmem:[#allocation2 + $0x60] sm:$0x1] }
 0x14a   :  { %14305 = vst [vmem:[#allocation359_spill] sm:$0xff] %v8596_v23  ;;  %14307 = vst [vmem:[#allocation360_spill] sm:$0xff] %v8599_v31  ;;  %v14325_v16 = vld [vmem:[#allocation29_spill] sm:$0xff]  ;;  %v8662_v45 = vld [vmem:[#allocation2 + $0x220] sm:$0x1] }
 0x14b   :  { %14308 = vst [vmem:[#allocation361_spill] sm:$0xff] %v8602_v58  ;;  %14309 = vst [vmem:[#allocation362_spill] sm:$0xff] %v8605_v60  ;;  %v649_v53 = vadd.f32 %v621_v36, %v8448_v8  ;;  %v8630_v36 = vmul.f32 %v14311_v54, %v4383_v43  ;;  %v8633_v8 = vmul.f32 %v14311_v54, %v4385_v24  ;;  %v14322_v43 = vrot.slane %v8410_v39, 4  ;;  %v8664_v51 = vld [vmem:[#allocation2 + $0x1a8] sm:$0x1]  ;;  %v14348_v23 = vld [vmem:[#allocation134_spill] sm:$0xff] }
 0x14c   :  { %14310 = vst [vmem:[#allocation363_spill] sm:$0xff] %v8612_v12  ;;  %14312 = vst [vmem:[#allocation364_spill] sm:$0xff] %v8615_v13  ;;  %v14326_v4 = vrot.slane %v14325_v16, 1  ;;  %v8666_v39 = vld [vmem:[#allocation2 + $0x218] sm:$0x1]  ;;  %v14333_v16 = vld [vmem:[#allocation65_spill] sm:$0xff] }
 0x14d   :  { %14313 = vst [vmem:[#allocation365_spill] sm:$0xff] %v8618_v26  ;;  %14314 = vst [vmem:[#allocation366_spill] sm:$0xff] %v8622_v3  ;;  %v8650_v24 = vsel %vm4512_vm2, %v14323_v33, %v14322_v43  ;;  %v8672_v19 = vld [vmem:[#allocation2 + $0x1f8] sm:$0x1]  ;;  %v8675_v43 = vadd.f32 %v14333_v16, %v1811_v44  ;;  %v8680_v60 = vld [vmem:[#allocation2 + $0x248] sm:$0x1]  ;;  %v8692_v44 = vmul.f32 %v14223_v17, %v8637_v9 }
 0x14e   :  { %14316 = vst [vmem:[#allocation60_spill] sm:$0xff] %v8627_v10  ;;  %14317 = vst [vmem:[#allocation367_spill] sm:$0xff] %v8630_v36  ;;  %v846_v20 = vadd.f32 %v14326_v4, %v649_v53  ;;  %v693_v32 = vld [vmem:[#allocation2 + $0x1e0] sm:$0xfe]  ;;  %v8682_v12 = vld [vmem:[#allocation2 + $0x1b8] sm:$0x1]  ;;  %v8688_v4 = vmul.f32 %v14203_v42, %v8635_v40  ;;  %v8696_v16 = vmul.f32 %v14203_v42, %v8643_v6 }
 0x14f   :  { %14318 = vst [vmem:[#allocation368_spill] sm:$0xff] %v8633_v8  ;;  %14319 = vst [vmem:[#allocation369_spill] sm:$0xff] %v8635_v40  ;;  %v8684_v33 = vld [vmem:[#allocation2 + $0x158] sm:$0x1]  ;;  %v14343_v53 = vld [vmem:[#allocation35_spill] sm:$0xff]  ;;  %v8708_v3 = vmul.f32 %v14203_v42, %v8664_v51  ;;  %v8712_v10 = vmul.f32 %v14223_v17, %v8666_v39  ;;  %v8720_v58 = vmul.f32 %v14203_v42, %v8672_v19 }
 0x150   :  { %14320 = vst [vmem:[#allocation370_spill] sm:$0xff] %v8637_v9  ;;  %14321 = vst [vmem:[#allocation371_spill] sm:$0xff] %v8643_v6  ;;  %v14344_v36 = vrot.slane %v14343_v53, 1  ;;  %v14347_v13 = vld [vmem:[#allocation124_spill] sm:$0xff]  ;;  %v1532_v31 = vld [vmem:[#allocation2 + $0x1e0] sm:$0xfc]  ;;  %v8730_v53 = vmul.f32 %v13780_v50, %v693_v32 }
 0x151   :  { %14324 = vst [vmem:[#allocation372_spill] sm:$0xff] %v8650_v24  ;;  %14327 = vst [vmem:[#allocation29_spill] sm:$0xff] %v8656_v63  ;;  %v14342_v63 = vld [vmem:[#allocation13_spill] sm:$0xff]  ;;  %v487_v26 = vmul.f32 %v14347_v13, %v8589_v47  ;;  %v554_v24 = vmul.f32 %v14348_v23, %v8589_v47  ;;  %v14357_v6 = vld [vmem:[#allocation144_spill] sm:$0xff] }
 0x152   :  { %14328 = vst [vmem:[#allocation373_spill] sm:$0xff] %v8660_v49  ;;  %14329 = vst [vmem:[#allocation374_spill] sm:$0xff] %v8662_v45  ;;  %v8700_v49 = vmul.f32 %v14223_v17, %v8662_v45  ;;  %v420_v59 = vmul.f32 %v14342_v63, %v8589_v47  ;;  %v999_v8 = vadd.f32 %v14344_v36, %v846_v20  ;;  %v14358_v40 = vld [vmem:[#allocation331_spill] sm:$0xff] }
 0x153   :  { %14330 = vst [vmem:[#allocation375_spill] sm:$0xff] %v8664_v51  ;;  %14331 = vst [vmem:[#allocation376_spill] sm:$0xff] %v8666_v39  ;;  %v8724_v20 = vmul.f32 %v14223_v17, %v8680_v60  ;;  %v8727_v36 = vmul.f32 %v14219_v34, %v693_v32  ;;  %v8734_v39 = vmul.f32 %v14203_v42, %v8682_v12 }
 0x154   :  { %14332 = vst [vmem:[#allocation377_spill] sm:$0xff] %v8672_v19  ;;  %14334 = vst [vmem:[#allocation65_spill] sm:$0xff] %v8675_v43  ;;  %v306_v43 = vld [vmem:[#allocation2 + $0x20] sm:$0x7f]  ;;  %v8738_v51 = vmul.f32 %v14223_v17, %v8684_v33  ;;  %v8742_v19 = vmul.f32 %v14218_v27, %v8589_v47  ;;  %v8748_v45 = vmul.f32 %v14098_v38, %v693_v32 }
 0x155   :  { %14335 = vst [vmem:[#allocation378_spill] sm:$0xff] %v8680_v60  ;;  %14336 = vst [vmem:[#allocation379_spill] sm:$0xff] %v8682_v12  ;;  %v8745_v60 = vmul.f32 %v13998_v37, %v693_v32  ;;  %v622_v9 = vmul.f32 %v14357_v6, %v306_v43  ;;  %v14359_v12 = vld [vmem:[#allocation306_spill] sm:$0xff]  ;;  %v2946_v47 = vld [vmem:[#allocation2 + $0x1e0] sm:$0xf8] }
 0x156   :  { %14337 = vst [vmem:[#allocation380_spill] sm:$0xff] %v8684_v33  ;;  %14338 = vst [vmem:[#allocation381_spill] sm:$0xff] %v8688_v4  ;;  %v14361_v33 = vld [vmem:[#allocation52_spill] sm:$0xff] }
 0x157   :  { %14339 = vst [vmem:[#allocation382_spill] sm:$0xff] %v8692_v44  ;;  %14340 = vst [vmem:[#allocation383_spill] sm:$0xff] %v8696_v16  ;;  %v8764_v16 = vadd.f32 %v554_v24, %v8445_v22  ;;  %v14365_v44 = vld [vmem:[#allocation19_spill] sm:$0xff]  ;;  %v14373_v22 = vld [vmem:[#allocation22_spill] sm:$0xff] }
 0x158   :  { %14341 = vst [vmem:[#allocation384_spill] sm:$0xff] %v8700_v49  ;;  %14345 = vst [vmem:[#allocation13_spill] sm:$0xff] %v8708_v3  ;;  %v14363_v3 = vld [vmem:[#allocation333_spill] sm:$0xff]  ;;  %v8767_v4 = vmul.f32 %v14365_v44, %v1532_v31  ;;  %v8783_v24 = vmul.f32 %v14373_v22, %v2946_v47  ;;  %v4360_v44 = vld [vmem:[#allocation2 + $0x1e0] sm:$0xf0] }
 0x159   :  { %14346 = vst [vmem:[#allocation35_spill] sm:$0xff] %v8712_v10  ;;  %14349 = vst [vmem:[#allocation385_spill] sm:$0xff] %v8720_v58  ;;  %v8758_v10 = vmul.f32 %v14223_v17, %v1532_v31  ;;  %v8761_v49 = vadd.f32 %v487_v26, %v14363_v3  ;;  %v14371_v17 = vld [vmem:[#allocation49_spill] sm:$0xff]  ;;  %v8810_v3 = vmul.f32 %v14127_v11, %v4360_v44 }
 0x15a   :  { %14350 = vst [vmem:[#allocation386_spill] sm:$0xff] %v8724_v20  ;;  %14351 = vst [vmem:[#allocation387_spill] sm:$0xff] %v8727_v36  ;;  %v8752_v20 = vadd.f32 %v420_v59, %v14358_v40  ;;  %v14367_v40 = vld [vmem:[#allocation132_spill] sm:$0xff]  ;;  %v8778_v6 = vmul.f32 %v14371_v17, %v1532_v31  ;;  %v14378_v26 = vld [vmem:[#allocation133_spill] sm:$0xff]  ;;  %v488_v11 = vmul.f32 %v14197_v0, %v306_v43 }
 0x15b   :  { %14352 = vst [vmem:[#allocation388_spill] sm:$0xff] %v8730_v53  ;;  %14353 = vst [vmem:[#allocation389_spill] sm:$0xff] %v8734_v39  ;;  %v14360_v39 = vrot.slane %v14359_v12, 1  ;;  %v8770_v59 = vmul.f32 %v14367_v40, %v1532_v31  ;;  %v650_v40 = vadd.f32 %v622_v9, %v8570_v48  ;;  %v14375_v12 = vrot.slane %v8433_v41, 1  ;;  %v694_v53 = vld [vmem:[#allocation2 + $0x20] sm:$0xfe] }
 0x15c   :  { %14354 = vst [vmem:[#allocation390_spill] sm:$0xff] %v8738_v51  ;;  %14355 = vst [vmem:[#allocation391_spill] sm:$0xff] %v8745_v60  ;;  %v1346_v51 = vmul.f32 %v14361_v33, %v693_v32  ;;  %v8795_v60 = vmul.f32 %v14378_v26, %v2946_v47 }
 0x15d   :  { %14356 = vst [vmem:[#allocation392_spill] sm:$0xff] %v8748_v45  ;;  %v1152_v58 = vadd.f32 %v14360_v39, %v999_v8  ;;  %14362 = vst [vmem:[#allocation331_spill] sm:$0xff] %v8758_v10  ;;  %v14369_v39 = vld [vmem:[#allocation47_spill] sm:$0xff]  ;;  %v8798_v45 = vmul.f32 %v14269_v25, %v2946_v47 }
 0x15e   :  { %14364 = vst [vmem:[#allocation306_spill] sm:$0xff] %v8761_v49  ;;  %14366 = vst [vmem:[#allocation333_spill] sm:$0xff] %v8767_v4  ;;  %v8775_v32 = vmul.f32 %v14369_v39, %v1532_v31  ;;  %v1402_v8 = vrot.slane %v1346_v51, 1  ;;  %v14376_v39 = vld [vmem:[#allocation39_spill] sm:$0xff]  ;;  %v8806_v51 = vmul.f32 %v14233_v61, %v4360_v44  ;;  %v8813_v31 = vmul.f32 %v14275_v56, %v4360_v44 }
 0x15f   :  { %14368 = vst [vmem:[#allocation393_spill] sm:$0xff] %v8770_v59  ;;  %14372 = vst [vmem:[#allocation395_spill] sm:$0xff] %v8778_v6  ;;  %v1305_v36 = vadd.f32 %v14375_v12, %v1152_v58  ;;  %v8790_v49 = vmul.f32 %v14376_v39, %v2946_v47  ;;  %v14381_v58 = vld [vmem:[#allocation43_spill] sm:$0xff]  ;;  %v14386_v59 = vld [vmem:[#allocation30_spill] sm:$0xff]  ;;  %v421_v56 = vmul.f32 %v14066_v7, %v306_v43 }
 0x160   :  { %14370 = vst [vmem:[#allocation394_spill] sm:$0xff] %v8775_v32  ;;  %14374 = vst [vmem:[#allocation396_spill] sm:$0xff] %v8783_v24  ;;  %v8803_v9 = vmul.f32 %v14381_v58, %v2946_v47  ;;  %v14387_v4 = vrot.slane %v14386_v59, 1  ;;  %v8819_v47 = vmul.f32 %v14277_v14, %v4360_v44  ;;  %v14389_v6 = vld [vmem:[#allocation97_spill] sm:$0xff]  ;;  %v8837_v12 = vmul.f32 %v14198_v46, %v306_v43  ;;  %v14393_v24 = vld [vmem:[#allocation6_spill] sm:$0xff] }
 0x161   :  { %14377 = vst [vmem:[#allocation397_spill] sm:$0xff] %v8790_v49  ;;  %14379 = vst [vmem:[#allocation398_spill] sm:$0xff] %v8795_v60  ;;  %v1458_v32 = vadd.f32 %v1402_v8, %v1305_v36  ;;  %v8822_v10 = vmul.f32 %v14389_v6, %v4360_v44  ;;  %v555_v36 = vmul.f32 %v14070_v62, %v306_v43  ;;  %v14394_v41 = vrot.slane %v14393_v24, 1  ;;  %v1535_v49 = vld [vmem:[#allocation2 + $0x20] sm:$0xfc]  ;;  %v14398_v8 = vld [vmem:[#allocation297_spill] sm:$0xff] }
 0x162   :  { %14380 = vst [vmem:[#allocation399_spill] sm:$0xff] %v8798_v45  ;;  %14382 = vst [vmem:[#allocation400_spill] sm:$0xff] %v8803_v9  ;;  %v847_v48 = vadd.f32 %v14387_v4, %v650_v40  ;;  %v8832_v40 = vmul.f32 %v14199_v35, %v694_v53  ;;  %v14395_v4 = vld [vmem:[#allocation61_spill] sm:$0xff]  ;;  %v8845_v9 = vmul.f32 %v13970_v29, %v694_v53  ;;  %v307_v62 = vld [vmem:[#allocation2 + $0x278] sm:$0x7f] }
 0x163   :  { %14383 = vst [vmem:[#allocation401_spill] sm:$0xff] %v8806_v51  ;;  %14384 = vst [vmem:[#allocation402_spill] sm:$0xff] %v8810_v3  ;;  %v1812_v51 = vadd.f32 %v14395_v4, %v1458_v32  ;;  %v8848_v44 = vadd.f32 %v421_v56, %v8513_v52  ;;  %v8851_v43 = vadd.f32 %v488_v11, %v14398_v8  ;;  %v14402_v59 = vld [vmem:[#allocation349_spill] sm:$0xff]  ;;  %v14403_v4 = vld [vmem:[#allocation119_spill] sm:$0xff] }
 0x164   :  { %14385 = vst [vmem:[#allocation403_spill] sm:$0xff] %v8813_v31  ;;  %14388 = vst [vmem:[#allocation30_spill] sm:$0xff] %v8819_v47  ;;  %v1000_v45 = vadd.f32 %v14394_v41, %v847_v48  ;;  %v14400_v31 = vld [vmem:[#allocation117_spill] sm:$0xff]  ;;  %v2949_v48 = vld [vmem:[#allocation2 + $0x20] sm:$0xf8]  ;;  %v623_v41 = vmul.f32 %v14303_v18, %v307_v62  ;;  %v8858_v60 = vadd.f32 %v555_v36, %v14402_v59 }
 0x165   :  { %14390 = vst [vmem:[#allocation404_spill] sm:$0xff] %v8822_v10  ;;  %14391 = vst [vmem:[#allocation405_spill] sm:$0xff] %v8832_v40  ;;  %v8854_v24 = vmul.f32 %v14400_v31, %v694_v53  ;;  %v8862_v10 = vmul.f32 %v14403_v4, %v694_v53  ;;  %v14404_v47 = vld [vmem:[#allocation145_spill] sm:$0xff]  ;;  %v14405_v52 = vld [vmem:[#allocation316_spill] sm:$0xff]  ;;  %v8868_v8 = vmul.f32 %v14203_v42, %v1535_v49 }
 0x166   :  { %14392 = vst [vmem:[#allocation406_spill] sm:$0xff] %v8837_v12  ;;  %14396 = vst [vmem:[#allocation6_spill] sm:$0xff] %v8845_v9  ;;  %v1347_v56 = vmul.f32 %v14404_v47, %v694_v53  ;;  %v14406_v3 = vrot.slane %v14405_v52, 1  ;;  %v14412_v36 = vld [vmem:[#allocation44_spill] sm:$0xff]  ;;  %v8881_v40 = vmul.f32 %v14294_v1, %v1535_v49  ;;  %v8884_v53 = vmul.f32 %v14207_v57, %v2949_v48 }
 0x167   :  { %14397 = vst [vmem:[#allocation61_spill] sm:$0xff] %v8848_v44  ;;  %14399 = vst [vmem:[#allocation297_spill] sm:$0xff] %v8851_v43  ;;  %v14408_v44 = vld [vmem:[#allocation18_spill] sm:$0xff]  ;;  %v14410_v43 = vld [vmem:[#allocation123_spill] sm:$0xff]  ;;  %v8878_v32 = vmul.f32 %v14412_v36, %v1535_v49  ;;  %v8891_v52 = vmul.f32 %v14299_v21, %v2949_v48  ;;  %v651_v59 = vadd.f32 %v623_v41, %v8764_v16 }
 0x168   :  { %14401 = vst [vmem:[#allocation407_spill] sm:$0xff] %v8854_v24  ;;  %v1153_v11 = vadd.f32 %v14406_v3, %v1000_v45  ;;  %14407 = vst [vmem:[#allocation349_spill] sm:$0xff] %v8868_v8  ;;  %v8871_v12 = vmul.f32 %v14408_v44, %v1535_v49  ;;  %v8874_v18 = vmul.f32 %v14410_v43, %v1535_v49  ;;  %v4363_v43 = vld [vmem:[#allocation2 + $0x20] sm:$0xf0]  ;;  %v1403_v36 = vrot.slane %v1347_v56, 1  ;;  %v14444_v8 = vld [vmem:[#allocation144_spill] sm:$0xff] }
 0x169   :  { %14413 = vst [vmem:[#allocation408_spill] sm:$0xff] %v8878_v32  ;;  %14414 = vst [vmem:[#allocation409_spill] sm:$0xff] %v8881_v40  ;;  %v8888_v3 = vmul.f32 %v14297_v5, %v2949_v48  ;;  %v8896_v49 = vmul.f32 %v14301_v55, %v2949_v48  ;;  %v8899_v57 = vmul.f32 %v14304_v28, %v2949_v48  ;;  %v14420_v45 = vrot.slane %v8547_v30, 1  ;;  %v14423_v21 = vld [vmem:[#allocation31_spill] sm:$0xff]  ;;  %v14425_v40 = vld [vmem:[#allocation88_spill] sm:$0xff] }
 0x16a   :  { %14409 = vst [vmem:[#allocation316_spill] sm:$0xff] %v8871_v12  ;;  %14411 = vst [vmem:[#allocation18_spill] sm:$0xff] %v8874_v18  ;;  %v8910_v9 = vmul.f32 %v14306_v15, %v4363_v43  ;;  %v14424_v5 = vrot.slane %v14423_v21, 1  ;;  %v8922_v56 = vmul.f32 %v14425_v40, %v4363_v43  ;;  %v8928_v30 = vmul.f32 %v14311_v54, %v4363_v43 }
 0x16b   :  { %14415 = vst [vmem:[#allocation410_spill] sm:$0xff] %v8884_v53  ;;  %14416 = vst [vmem:[#allocation411_spill] sm:$0xff] %v8888_v3  ;;  %v1306_v24 = vadd.f32 %v14420_v45, %v1153_v11  ;;  %v8915_v11 = vmul.f32 %v14091_v2, %v4363_v43  ;;  %v695_v45 = vld [vmem:[#allocation2 + $0x278] sm:$0xfe]  ;;  %v14427_v53 = vld [vmem:[#allocation161_spill] sm:$0xff]  ;;  %v422_v21 = vmul.f32 %v14342_v63, %v307_v62 }
 0x16c   :  { %14417 = vst [vmem:[#allocation412_spill] sm:$0xff] %v8891_v52  ;;  %14418 = vst [vmem:[#allocation413_spill] sm:$0xff] %v8896_v49  ;;  %v848_v1 = vadd.f32 %v14424_v5, %v651_v59  ;;  %v8925_v32 = vmul.f32 %v14427_v53, %v4363_v43  ;;  %v14430_v52 = vld [vmem:[#allocation66_spill] sm:$0xff]  ;;  %v489_v59 = vmul.f32 %v14347_v13, %v307_v62 }
 0x16d   :  { %14419 = vst [vmem:[#allocation414_spill] sm:$0xff] %v8899_v57  ;;  %14421 = vst [vmem:[#allocation415_spill] sm:$0xff] %v8910_v9  ;;  %v1459_v48 = vadd.f32 %v1403_v36, %v1306_v24  ;;  %v8931_v3 = vadd.f32 %v14430_v52, %v1812_v51  ;;  %v556_v41 = vmul.f32 %v14348_v23, %v307_v62  ;;  %v14435_v51 = vld [vmem:[#allocation14_spill] sm:$0xff] }
 0x16e   :  { %14422 = vst [vmem:[#allocation416_spill] sm:$0xff] %v8915_v11  ;;  %14426 = vst [vmem:[#allocation31_spill] sm:$0xff] %v8922_v56  ;;  %v8938_v16 = vmul.f32 %v14219_v34, %v695_v45  ;;  %v8942_v24 = vmul.f32 %v14218_v27, %v307_v62  ;;  %v8945_v43 = vmul.f32 %v13780_v50, %v695_v45  ;;  %v14436_v36 = vrot.slane %v14435_v51, 1  ;;  %v1536_v57 = vld [vmem:[#allocation2 + $0x278] sm:$0xfc] }
 0x16f   :  { %14428 = vst [vmem:[#allocation417_spill] sm:$0xff] %v8925_v32  ;;  %14429 = vst [vmem:[#allocation418_spill] sm:$0xff] %v8928_v30  ;;  %v8952_v49 = vmul.f32 %v13998_v37, %v695_v45  ;;  %v14439_v11 = vld [vmem:[#allocation62_spill] sm:$0xff]  ;;  %v8962_v12 = vadd.f32 %v422_v21, %v8742_v19  ;;  %v308_v51 = vld [vmem:[#allocation2 + $0x80] sm:$0x7f] }
 0x170   :  { %14431 = vst [vmem:[#allocation66_spill] sm:$0xff] %v8931_v3  ;;  %14432 = vst [vmem:[#allocation419_spill] sm:$0xff] %v8938_v16  ;;  %v1001_v52 = vadd.f32 %v14436_v36, %v848_v1  ;;  %v8955_v3 = vmul.f32 %v14098_v38, %v695_v45  ;;  %v8959_v18 = vadd.f32 %v14439_v11, %v1459_v48  ;;  %v14443_v9 = vld [vmem:[#allocation306_spill] sm:$0xff]  ;;  %v14445_v11 = vld [vmem:[#allocation335_spill] sm:$0xff] }
 0x171   :  { %14433 = vst [vmem:[#allocation420_spill] sm:$0xff] %v8942_v24  ;;  %14434 = vst [vmem:[#allocation421_spill] sm:$0xff] %v8945_v43  ;;  %v1348_v1 = vmul.f32 %v14361_v33, %v695_v45  ;;  %v8966_v36 = vadd.f32 %v489_v59, %v8752_v20  ;;  %v8969_v5 = vadd.f32 %v556_v41, %v14443_v9  ;;  %v2950_v56 = vld [vmem:[#allocation2 + $0x278] sm:$0xf8]  ;;  %v14446_v30 = vrot.slane %v14445_v11, 1  ;;  %v14447_v21 = vld [vmem:[#allocation17_spill] sm:$0xff] }
 0x172   :  { %14437 = vst [vmem:[#allocation14_spill] sm:$0xff] %v8952_v49  ;;  %14438 = vst [vmem:[#allocation422_spill] sm:$0xff] %v8955_v3  ;;  %v624_v62 = vmul.f32 %v14444_v8, %v308_v51  ;;  %v14449_v45 = vld [vmem:[#allocation19_spill] sm:$0xff]  ;;  %v14451_v41 = vld [vmem:[#allocation132_spill] sm:$0xff]  ;;  %v8997_v11 = vmul.f32 %v14376_v39, %v2950_v56  ;;  %v9000_v20 = vmul.f32 %v14378_v26, %v2950_v56 }
 0x173   :  { %14440 = vst [vmem:[#allocation62_spill] sm:$0xff] %v8959_v18  ;;  %14441 = vst [vmem:[#allocation423_spill] sm:$0xff] %v8962_v12  ;;  %v1154_v19 = vadd.f32 %v14446_v30, %v1001_v52  ;;  %v8977_v18 = vmul.f32 %v14447_v21, %v1536_v57  ;;  %v8980_v12 = vmul.f32 %v14449_v45, %v1536_v57  ;;  %v14453_v32 = vld [vmem:[#allocation47_spill] sm:$0xff]  ;;  %v4364_v48 = vld [vmem:[#allocation2 + $0x278] sm:$0xf0]  ;;  %v1404_v43 = vrot.slane %v1348_v1, 1 }
 0x174   :  { %14442 = vst [vmem:[#allocation424_spill] sm:$0xff] %v8966_v36  ;;  %v8985_v59 = vmul.f32 %v14451_v41, %v1536_v57  ;;  %v8988_v16 = vmul.f32 %v14453_v32, %v1536_v57  ;;  %v8991_v30 = vmul.f32 %v14371_v17, %v1536_v57  ;;  %v8994_v52 = vmul.f32 %v14373_v22, %v2950_v56  ;;  %v14461_v24 = vld [vmem:[#allocation392_spill] sm:$0xff]  ;;  %v14464_v17 = vld [vmem:[#allocation93_spill] sm:$0xff] }
 0x175   :  { %14448 = vst [vmem:[#allocation306_spill] sm:$0xff] %v8977_v18  ;;  %14450 = vst [vmem:[#allocation335_spill] sm:$0xff] %v8980_v12  ;;  %v9003_v9 = vmul.f32 %v14269_v25, %v2950_v56  ;;  %v9006_v49 = vmul.f32 %v14381_v58, %v2950_v56  ;;  %v652_v1 = vadd.f32 %v624_v62, %v8858_v60  ;;  %v14462_v57 = vrot.slane %v14461_v24, 1  ;;  %v14466_v56 = vld [vmem:[#allocation136_spill] sm:$0xff]  ;;  %v696_v60 = vld [vmem:[#allocation2 + $0x80] sm:$0xfe] }
 0x176   :  { %14452 = vst [vmem:[#allocation19_spill] sm:$0xff] %v8985_v59  ;;  %14454 = vst [vmem:[#allocation425_spill] sm:$0xff] %v8988_v16  ;;  %v9014_v39 = vmul.f32 %v14233_v61, %v4364_v48  ;;  %v9019_v32 = vmul.f32 %v14464_v17, %v4364_v48  ;;  %v9022_v58 = vmul.f32 %v14466_v56, %v4364_v48  ;;  %v14469_v3 = vld [vmem:[#allocation8_spill] sm:$0xff]  ;;  %v14478_v62 = vld [vmem:[#allocation315_spill] sm:$0xff] }
 0x177   :  { %14455 = vst [vmem:[#allocation426_spill] sm:$0xff] %v8991_v30  ;;  %14456 = vst [vmem:[#allocation427_spill] sm:$0xff] %v8994_v52  ;;  %v1307_v36 = vadd.f32 %v14462_v57, %v1154_v19  ;;  %v9028_v57 = vmul.f32 %v14277_v14, %v4364_v48  ;;  %v14470_v16 = vrot.slane %v14469_v3, 1  ;;  %v9037_v24 = vmul.f32 %v14389_v6, %v4364_v48  ;;  %v1539_v3 = vld [vmem:[#allocation2 + $0x80] sm:$0xfc]  ;;  %v14493_v30 = vld [vmem:[#allocation21_spill] sm:$0xff] }
 0x178   :  { %14457 = vst [vmem:[#allocation428_spill] sm:$0xff] %v8997_v11  ;;  %14458 = vst [vmem:[#allocation429_spill] sm:$0xff] %v9000_v20  ;;  %v9040_v19 = vmul.f32 %v14199_v35, %v696_v60  ;;  %v9045_v25 = vmul.f32 %v13970_v29, %v696_v60  ;;  %v9048_v22 = vmul.f32 %v14400_v31, %v696_v60  ;;  %v14479_v18 = vrot.slane %v14478_v62, 1  ;;  %v309_v20 = vld [vmem:[#allocation2 + $0xa8] sm:$0x7f] }
 0x179   :  { %14459 = vst [vmem:[#allocation430_spill] sm:$0xff] %v9003_v9  ;;  %14460 = vst [vmem:[#allocation431_spill] sm:$0xff] %v9006_v49  ;;  %v849_v59 = vadd.f32 %v14470_v16, %v652_v1  ;;  %v1460_v12 = vadd.f32 %v1404_v43, %v1307_v36  ;;  %v9052_v43 = vmul.f32 %v14198_v46, %v308_v51  ;;  %v14477_v1 = vld [vmem:[#allocation129_spill] sm:$0xff]  ;;  %v2953_v9 = vld [vmem:[#allocation2 + $0x80] sm:$0xf8] }
 0x17a   :  { %14463 = vst [vmem:[#allocation392_spill] sm:$0xff] %v9014_v39  ;;  %14465 = vst [vmem:[#allocation432_spill] sm:$0xff] %v9019_v32  ;;  %v9055_v36 = vmul.f32 %v14066_v7, %v308_v51  ;;  %v9058_v35 = vmul.f32 %v14403_v4, %v696_v60  ;;  %v9061_v48 = vmul.f32 %v14197_v0, %v308_v51  ;;  %v14487_v39 = vld [vmem:[#allocation44_spill] sm:$0xff]  ;;  %v4367_v52 = vld [vmem:[#allocation2 + $0x80] sm:$0xf0] }
 0x17b   :  { %14467 = vst [vmem:[#allocation433_spill] sm:$0xff] %v9022_v58  ;;  %14468 = vst [vmem:[#allocation434_spill] sm:$0xff] %v9028_v57  ;;  %v9064_v26 = vmul.f32 %v14477_v1, %v308_v51  ;;  %v1002_v58 = vadd.f32 %v14479_v18, %v849_v59  ;;  %v1349_v16 = vmul.f32 %v14404_v47, %v696_v60  ;;  %v14480_v57 = vld [vmem:[#allocation63_spill] sm:$0xff]  ;;  %v14484_v59 = vld [vmem:[#allocation150_spill] sm:$0xff] }
 0x17c   :  { %14471 = vst [vmem:[#allocation8_spill] sm:$0xff] %v9037_v24  ;;  %14472 = vst [vmem:[#allocation435_spill] sm:$0xff] %v9040_v19  ;;  %v9071_v32 = vadd.f32 %v14480_v57, %v1460_v12  ;;  %v9075_v49 = vmul.f32 %v14203_v42, %v1539_v3  ;;  %v9080_v18 = vmul.f32 %v14408_v44, %v1539_v3  ;;  %v14485_v12 = vld [vmem:[#allocation123_spill] sm:$0xff]  ;;  %v14489_v19 = vld [vmem:[#allocation94_spill] sm:$0xff] }
 0x17d   :  { %14473 = vst [vmem:[#allocation436_spill] sm:$0xff] %v9045_v25  ;;  %14474 = vst [vmem:[#allocation437_spill] sm:$0xff] %v9048_v22  ;;  %v625_v60 = vmul.f32 %v14484_v59, %v309_v20  ;;  %v9085_v57 = vmul.f32 %v14485_v12, %v1539_v3  ;;  %v9088_v46 = vmul.f32 %v14487_v39, %v1539_v3  ;;  %v14491_v51 = vld [vmem:[#allocation348_spill] sm:$0xff]  ;;  %v1405_v22 = vrot.slane %v1349_v16, 1 }
 0x17e   :  { %14475 = vst [vmem:[#allocation438_spill] sm:$0xff] %v9052_v43  ;;  %14476 = vst [vmem:[#allocation439_spill] sm:$0xff] %v9058_v35  ;;  %v9091_v24 = vmul.f32 %v14489_v19, %v1539_v3  ;;  %v14492_v25 = vrot.slane %v14491_v51, 1  ;;  %v14495_v42 = vld [vmem:[#allocation36_spill] sm:$0xff]  ;;  %v14497_v35 = vld [vmem:[#allocation118_spill] sm:$0xff]  ;;  %v9106_v39 = vmul.f32 %v14301_v55, %v2953_v9  ;;  %v9109_v3 = vmul.f32 %v14304_v28, %v2953_v9 }
 0x17f   :  { %14481 = vst [vmem:[#allocation315_spill] sm:$0xff] %v9071_v32  ;;  %14482 = vst [vmem:[#allocation63_spill] sm:$0xff] %v9075_v49  ;;  %v9096_v32 = vmul.f32 %v14493_v30, %v2953_v9  ;;  %v9099_v43 = vmul.f32 %v14495_v42, %v2953_v9  ;;  %v9103_v12 = vmul.f32 %v14497_v35, %v2953_v9  ;;  %v14504_v9 = vrot.slane %v8862_v10, 1  ;;  %v1540_v10 = vld [vmem:[#allocation2 + $0xa8] sm:$0xfc] }
 0x180   :  { %14483 = vst [vmem:[#allocation440_spill] sm:$0xff] %v9080_v18  ;;  %14486 = vst [vmem:[#allocation441_spill] sm:$0xff] %v9085_v57  ;;  %v1155_v11 = vadd.f32 %v14492_v25, %v1002_v58  ;;  %v9113_v58 = vmul.f32 %v14306_v15, %v4367_v52  ;;  %v9116_v16 = vmul.f32 %v14091_v2, %v4367_v52  ;;  %v14507_v18 = vld [vmem:[#allocation10_spill] sm:$0xff] }
 0x181   :  { %14488 = vst [vmem:[#allocation442_spill] sm:$0xff] %v9088_v46  ;;  %14490 = vst [vmem:[#allocation443_spill] sm:$0xff] %v9091_v24  ;;  %v653_v51 = vadd.f32 %v625_v60, %v8969_v5  ;;  %v9123_v55 = vmul.f32 %v14425_v40, %v4367_v52  ;;  %v9130_v2 = vmul.f32 %v14427_v53, %v4367_v52  ;;  %v697_v5 = vld [vmem:[#allocation2 + $0xa8] sm:$0xfe]  ;;  %v14508_v15 = vrot.slane %v14507_v18, 1 }
 0x182   :  { %14494 = vst [vmem:[#allocation348_spill] sm:$0xff] %v9096_v32  ;;  %14496 = vst [vmem:[#allocation444_spill] sm:$0xff] %v9099_v43  ;;  %v1308_v25 = vadd.f32 %v14504_v9, %v1155_v11  ;;  %v9136_v62 = vmul.f32 %v14311_v54, %v4367_v52  ;;  %v9141_v9 = vmul.f32 %v14218_v27, %v309_v20 }
 0x183   :  { %14498 = vst [vmem:[#allocation445_spill] sm:$0xff] %v9103_v12  ;;  %14499 = vst [vmem:[#allocation446_spill] sm:$0xff] %v9106_v39  ;;  %v850_v43 = vadd.f32 %v14508_v15, %v653_v51  ;;  %v9147_v60 = vmul.f32 %v14219_v34, %v697_v5  ;;  %v9150_v49 = vmul.f32 %v13780_v50, %v697_v5  ;;  %v14520_v12 = vld [vmem:[#allocation47_spill] sm:$0xff] }
 0x184   :  { %14500 = vst [vmem:[#allocation447_spill] sm:$0xff] %v9109_v3  ;;  %14501 = vst [vmem:[#allocation448_spill] sm:$0xff] %v9113_v58  ;;  %v9153_v52 = vmul.f32 %v13998_v37, %v697_v5  ;;  %v9155_v30 = vadd.f32 %v1405_v22, %v1308_v25  ;;  %v9159_v11 = vmul.f32 %v14098_v38, %v697_v5  ;;  %v310_v22 = vld [vmem:[#allocation2 + $0x268] sm:$0x7f]  ;;  %v14514_v25 = vld [vmem:[#allocation334_spill] sm:$0xff] }
 0x185   :  { %14502 = vst [vmem:[#allocation449_spill] sm:$0xff] %v9116_v16  ;;  %14503 = vst [vmem:[#allocation450_spill] sm:$0xff] %v9123_v55  ;;  %v9162_v15 = vmul.f32 %v14361_v33, %v697_v5  ;;  %v9166_v18 = vmul.f32 %v14342_v63, %v309_v20  ;;  %v9169_v51 = vmul.f32 %v14347_v13, %v309_v20  ;;  %v14515_v55 = vrot.slane %v14514_v25, 1  ;;  %v2954_v16 = vld [vmem:[#allocation2 + $0xa8] sm:$0xf8]  ;;  %v14517_v5 = vld [vmem:[#allocation297_spill] sm:$0xff] }
 0x186   :  { %14505 = vst [vmem:[#allocation451_spill] sm:$0xff] %v9130_v2  ;;  %14506 = vst [vmem:[#allocation452_spill] sm:$0xff] %v9136_v62  ;;  %v558_v32 = vmul.f32 %v14348_v23, %v309_v20  ;;  %v9175_v2 = vmul.f32 %v14447_v21, %v1540_v10  ;;  %v585_v58 = vadd.f32 %v9064_v26, %v14517_v5  ;;  %v4368_v5 = vld [vmem:[#allocation2 + $0xa8] sm:$0xf0]  ;;  %v14524_v3 = vld [vmem:[#allocation22_spill] sm:$0xff] }
 0x187   :  { %14509 = vst [vmem:[#allocation10_spill] sm:$0xff] %v9147_v60  ;;  %14510 = vst [vmem:[#allocation453_spill] sm:$0xff] %v9150_v49  ;;  %v1003_v27 = vadd.f32 %v14515_v55, %v850_v43  ;;  %v626_v34 = vmul.f32 %v14444_v8, %v310_v22  ;;  %v9184_v20 = vmul.f32 %v14449_v45, %v1540_v10  ;;  %v1406_v43 = vrot.slane %v9162_v15, 1  ;;  %v14522_v8 = vld [vmem:[#allocation49_spill] sm:$0xff]  ;;  %v14526_v39 = vld [vmem:[#allocation39_spill] sm:$0xff] }
 0x188   :  { %14511 = vst [vmem:[#allocation454_spill] sm:$0xff] %v9153_v52  ;;  %14512 = vst [vmem:[#allocation455_spill] sm:$0xff] %v9155_v30  ;;  %v9189_v25 = vmul.f32 %v14451_v41, %v1540_v10  ;;  %v9192_v26 = vmul.f32 %v14520_v12, %v1540_v10  ;;  %v9195_v62 = vmul.f32 %v14522_v8, %v1540_v10  ;;  %v14528_v60 = vld [vmem:[#allocation133_spill] sm:$0xff]  ;;  %v14530_v15 = vld [vmem:[#allocation391_spill] sm:$0xff] }
 0x189   :  { %14513 = vst [vmem:[#allocation456_spill] sm:$0xff] %v9159_v11  ;;  %14516 = vst [vmem:[#allocation334_spill] sm:$0xff] %v9175_v2  ;;  %v9198_v49 = vmul.f32 %v14524_v3, %v2954_v16  ;;  %v9201_v52 = vmul.f32 %v14526_v39, %v2954_v16  ;;  %v9204_v55 = vmul.f32 %v14528_v60, %v2954_v16  ;;  %v14531_v24 = vrot.slane %v14530_v15, 1  ;;  %v14532_v30 = vld [vmem:[#allocation40_spill] sm:$0xff]  ;;  %v14534_v8 = vld [vmem:[#allocation43_spill] sm:$0xff] }
 0x18a   :  { %14518 = vst [vmem:[#allocation297_spill] sm:$0xff] %v9184_v20  ;;  %14519 = vst [vmem:[#allocation457_spill] sm:$0xff] %v9189_v25  ;;  %v9210_v21 = vmul.f32 %v14532_v30, %v2954_v16  ;;  %v654_v11 = vadd.f32 %v626_v34, %v585_v58  ;;  %v9214_v3 = vmul.f32 %v14534_v8, %v2954_v16  ;;  %v14543_v25 = vld [vmem:[#allocation314_spill] sm:$0xff]  ;;  %v14549_v10 = vld [vmem:[#allocation347_spill] sm:$0xff] }
 0x18b   :  { %14521 = vst [vmem:[#allocation458_spill] sm:$0xff] %v9192_v26  ;;  %14523 = vst [vmem:[#allocation459_spill] sm:$0xff] %v9195_v62  ;;  %v1156_v46 = vadd.f32 %v14531_v24, %v1003_v27  ;;  %v9217_v39 = vmul.f32 %v14233_v61, %v4368_v5  ;;  %v9220_v60 = vmul.f32 %v14464_v17, %v4368_v5  ;;  %v14540_v61 = vld [vmem:[#allocation422_spill] sm:$0xff]  ;;  %v698_v26 = vld [vmem:[#allocation2 + $0x268] sm:$0xfe] }
 0x18c   :  { %14525 = vst [vmem:[#allocation460_spill] sm:$0xff] %v9198_v49  ;;  %14527 = vst [vmem:[#allocation461_spill] sm:$0xff] %v9201_v52  ;;  %v9225_v27 = vmul.f32 %v14466_v56, %v4368_v5  ;;  %v9228_v58 = vmul.f32 %v14277_v14, %v4368_v5  ;;  %v14541_v20 = vrot.slane %v14540_v61, 1  ;;  %v9238_v24 = vmul.f32 %v14389_v6, %v4368_v5  ;;  %v311_v61 = vld [vmem:[#allocation2 + $0x118] sm:$0x7f] }
 0x18d   :  { %14529 = vst [vmem:[#allocation462_spill] sm:$0xff] %v9204_v55  ;;  %14533 = vst [vmem:[#allocation391_spill] sm:$0xff] %v9210_v21  ;;  %v14544_v14 = vrot.slane %v14543_v25, 1  ;;  %v425_v57 = vmul.f32 %v14066_v7, %v310_v22  ;;  %v492_v15 = vmul.f32 %v14197_v0, %v310_v22  ;;  %v1543_v21 = vld [vmem:[#allocation2 + $0x268] sm:$0xfc]  ;;  %v14546_v25 = vld [vmem:[#allocation61_spill] sm:$0xff]  ;;  %v9255_v16 = vmul.f32 %v13970_v29, %v698_v26 }
 0x18e   :  { %14535 = vst [vmem:[#allocation463_spill] sm:$0xff] %v9214_v3  ;;  %14536 = vst [vmem:[#allocation464_spill] sm:$0xff] %v9217_v39  ;;  %v1309_v2 = vadd.f32 %v14541_v20, %v1156_v46  ;;  %v14545_v20 = vld [vmem:[#allocation406_spill] sm:$0xff]  ;;  %v9258_v7 = vmul.f32 %v14400_v31, %v698_v26  ;;  %v14550_v46 = vrot.slane %v14549_v10, 1  ;;  %v1351_v29 = vmul.f32 %v14404_v47, %v698_v26  ;;  %v2957_v31 = vld [vmem:[#allocation2 + $0x268] sm:$0xf8] }
 0x18f   :  { %14537 = vst [vmem:[#allocation465_spill] sm:$0xff] %v9220_v60  ;;  %14538 = vst [vmem:[#allocation466_spill] sm:$0xff] %v9225_v27  ;;  %v851_v56 = vadd.f32 %v14544_v14, %v654_v11  ;;  %v451_v5 = vadd.f32 %v9055_v36, %v14545_v20  ;;  %v518_v14 = vadd.f32 %v9061_v48, %v14546_v25  ;;  %v14552_v20 = vld [vmem:[#allocation424_spill] sm:$0xff]  ;;  %v14561_v47 = vld [vmem:[#allocation407_spill] sm:$0xff] }
 0x190   :  { %14539 = vst [vmem:[#allocation467_spill] sm:$0xff] %v9228_v58  ;;  %14542 = vst [vmem:[#allocation422_spill] sm:$0xff] %v9238_v24  ;;  %v559_v11 = vmul.f32 %v14477_v1, %v310_v22  ;;  %v9263_v36 = vmul.f32 %v14403_v4, %v698_v26  ;;  %v586_v0 = vadd.f32 %v558_v32, %v14552_v20  ;;  %v14553_v1 = vld [vmem:[#allocation438_spill] sm:$0xff]  ;;  %v14556_v4 = vld [vmem:[#allocation44_spill] sm:$0xff] }
 0x191   :  { %14547 = vst [vmem:[#allocation314_spill] sm:$0xff] %v9255_v16  ;;  %14548 = vst [vmem:[#allocation406_spill] sm:$0xff] %v9258_v7  ;;  %v1004_v34 = vadd.f32 %v14550_v46, %v851_v56  ;;  %v627_v58 = vmul.f32 %v14484_v59, %v311_v61  ;;  %v9267_v48 = vadd.f32 %v1406_v43, %v1309_v2  ;;  %v14555_v56 = vld [vmem:[#allocation123_spill] sm:$0xff]  ;;  %v4371_v24 = vld [vmem:[#allocation2 + $0x268] sm:$0xf0] }
 0x192   :  { %14551 = vst [vmem:[#allocation61_spill] sm:$0xff] %v9263_v36  ;;  %v9272_v25 = vmul.f32 %v14408_v44, %v1543_v21  ;;  %v9275_v10 = vadd.f32 %v425_v57, %v14553_v1  ;;  %v9278_v46 = vmul.f32 %v14555_v56, %v1543_v21  ;;  %v9281_v32 = vmul.f32 %v14556_v4, %v1543_v21  ;;  %v14568_v26 = vld [vmem:[#allocation92_spill] sm:$0xff]  ;;  %v699_v22 = vld [vmem:[#allocation2 + $0x118] sm:$0xfe]  ;;  %v14614_v39 = vld [vmem:[#allocation381_spill] sm:$0xff] }
 0x193   :  { %v9284_v2 = vmul.f32 %v14489_v19, %v1543_v21  ;;  %v9286_v43 = vadd.f32 %v492_v15, %v451_v5  ;;  %v9288_v20 = vadd.f32 %v559_v11, %v518_v14  ;;  %v14562_v1 = vrot.slane %v14561_v47, 1  ;;  %v14565_v14 = vld [vmem:[#allocation95_spill] sm:$0xff]  ;;  %v14575_v16 = vld [vmem:[#allocation332_spill] sm:$0xff]  ;;  %v14625_v55 = vld [vmem:[#allocation386_spill] sm:$0xff] }
 0x194   :  { %14554 = vst [vmem:[#allocation347_spill] sm:$0xff] %v9275_v10  ;;  %14557 = vst [vmem:[#allocation424_spill] sm:$0xff] %v9281_v32  ;;  %v9296_v59 = vmul.f32 %v14495_v42, %v2957_v31  ;;  %v655_v27 = vadd.f32 %v627_v58, %v586_v0  ;;  %v1407_v21 = vrot.slane %v1351_v29, 1  ;;  %v9300_v5 = vmul.f32 %v14497_v35, %v2957_v31  ;;  %v14573_v15 = vld [vmem:[#allocation439_spill] sm:$0xff]  ;;  %v14699_v32 = vld [vmem:[#allocation164_spill] sm:$0xff] }
 0x195   :  { %14558 = vst [vmem:[#allocation438_spill] sm:$0xff] %v9284_v2  ;;  %14559 = vst [vmem:[#allocation468_spill] sm:$0xff] %v9286_v43  ;;  %v1157_v57 = vadd.f32 %v14562_v1, %v1004_v34  ;;  %v9303_v11 = vmul.f32 %v14565_v14, %v2957_v31  ;;  %v9309_v1 = vmul.f32 %v14304_v28, %v2957_v31  ;;  %v14574_v47 = vrot.slane %v14573_v15, 1  ;;  %v14578_v15 = vld [vmem:[#allocation423_spill] sm:$0xff]  ;;  %v14695_v2 = vld [vmem:[#allocation193_spill] sm:$0xff] }
 0x196   :  { %14560 = vst [vmem:[#allocation469_spill] sm:$0xff] %v9288_v20  ;;  %14563 = vst [vmem:[#allocation407_spill] sm:$0xff] %v9296_v59  ;;  %v9312_v0 = vmul.f32 %v14568_v26, %v4371_v24  ;;  %v9315_v58 = vmul.f32 %v14425_v40, %v4371_v24  ;;  %v9318_v29 = vmul.f32 %v14427_v53, %v4371_v24  ;;  %v14576_v36 = vrot.slane %v14575_v16, 1  ;;  %v14577_v53 = vld [vmem:[#allocation420_spill] sm:$0xff]  ;;  %v2958_v20 = vld [vmem:[#allocation2 + $0x118] sm:$0xf8] }
 0x197   :  { %14564 = vst [vmem:[#allocation470_spill] sm:$0xff] %v9300_v5  ;;  %14566 = vst [vmem:[#allocation471_spill] sm:$0xff] %v9303_v11  ;;  %v9321_v10 = vmul.f32 %v14311_v54, %v4371_v24  ;;  %v1310_v7 = vadd.f32 %v14574_v47, %v1157_v57  ;;  %v426_v31 = vmul.f32 %v14342_v63, %v311_v61  ;;  %v9429_v26 = vld [vmem:[#allocation2 + $0x1b0] sm:$0x1]  ;;  %v14620_v3 = vld [vmem:[#allocation383_spill] sm:$0xff]  ;;  %v1725_v35 = vrot.slane %v14625_v55, 2 }
 0x198   :  { %14567 = vst [vmem:[#allocation472_spill] sm:$0xff] %v9309_v1  ;;  %14569 = vst [vmem:[#allocation473_spill] sm:$0xff] %v9312_v0  ;;  %v852_v43 = vadd.f32 %v14576_v36, %v655_v27  ;;  %v452_v60 = vadd.f32 %v9166_v18, %v14577_v53  ;;  %v493_v24 = vmul.f32 %v14347_v13, %v311_v61  ;;  %v1544_v27 = vld [vmem:[#allocation2 + $0x118] sm:$0xfc]  ;;  %v1710_v28 = vrot.slane %v14620_v3, 2  ;;  %v14622_v11 = vld [vmem:[#allocation13_spill] sm:$0xff] }
 0x199   :  { %14570 = vst [vmem:[#allocation474_spill] sm:$0xff] %v9315_v58  ;;  %14571 = vst [vmem:[#allocation475_spill] sm:$0xff] %v9318_v29  ;;  %v519_v57 = vadd.f32 %v9169_v51, %v14578_v15  ;;  %v560_v47 = vmul.f32 %v14348_v23, %v311_v61  ;;  %v9339_v63 = vmul.f32 %v13780_v50, %v699_v22  ;;  %v14581_v51 = vld [vmem:[#allocation388_spill] sm:$0xff]  ;;  %v9415_v58 = vld [vmem:[#allocation2 + $0x280] sm:$0x1]  ;;  %v1716_v14 = vrot.slane %v14622_v11, 2 }
 0x19a   :  { %14572 = vst [vmem:[#allocation476_spill] sm:$0xff] %v9321_v10  ;;  %v9345_v18 = vadd.f32 %v1407_v21, %v1310_v7  ;;  %v9348_v54 = vadd.f32 %v426_v31, %v9141_v9  ;;  %v14582_v15 = vrot.slane %v14581_v51, 1  ;;  %v9353_v50 = vmul.f32 %v13998_v37, %v699_v22  ;;  %v4372_v21 = vld [vmem:[#allocation2 + $0x118] sm:$0xf0]  ;;  %v14605_v23 = vld [vmem:[#allocation96_spill] sm:$0xff]  ;;  %14608 = vst [vmem:[#allocation491_spill] sm:$0xff] %v9415_v58 }
 0x19b   :  { %14579 = vst [vmem:[#allocation439_spill] sm:$0xff] %v9339_v63  ;;  %v9355_v34 = vadd.f32 %v493_v24, %v452_v60  ;;  %v9358_v36 = vmul.f32 %v14098_v38, %v699_v22  ;;  %v1352_v40 = vmul.f32 %v14361_v33, %v699_v22  ;;  %v9362_v7 = vmul.f32 %v14449_v45, %v1544_v27  ;;  %v14588_v60 = vld [vmem:[#allocation49_spill] sm:$0xff]  ;;  %v14595_v31 = vld [vmem:[#allocation14_spill] sm:$0xff]  ;;  %v14630_v11 = vld [vmem:[#allocation192_spill] sm:$0xff] }
 0x19c   :  { %14580 = vst [vmem:[#allocation332_spill] sm:$0xff] %v9348_v54  ;;  %v1005_v61 = vadd.f32 %v14582_v15, %v852_v43  ;;  %14583 = vst [vmem:[#allocation420_spill] sm:$0xff] %v9353_v50  ;;  %v9364_v9 = vadd.f32 %v560_v47, %v519_v57  ;;  %v9368_v43 = vmul.f32 %v14451_v41, %v1544_v27  ;;  %v14590_v15 = vld [vmem:[#allocation39_spill] sm:$0xff]  ;;  %v14592_v22 = vld [vmem:[#allocation133_spill] sm:$0xff]  ;;  %v14596_v10 = vrot.slane %v14595_v31, 1 }
 0x19d   :  { %14584 = vst [vmem:[#allocation423_spill] sm:$0xff] %v9355_v34  ;;  %14585 = vst [vmem:[#allocation388_spill] sm:$0xff] %v9358_v36  ;;  %v9371_v51 = vmul.f32 %v14520_v12, %v1544_v27  ;;  %v9374_v24 = vmul.f32 %v14588_v60, %v1544_v27  ;;  %v9377_v53 = vmul.f32 %v14590_v15, %v2958_v20  ;;  %v9394_v34 = vld [vmem:[#allocation2 + $0x2b8] sm:$0x1]  ;;  %v9396_v54 = vld [vmem:[#allocation2 + $0x190] sm:$0x1] }
 0x19e   :  { %14586 = vst [vmem:[#allocation477_spill] sm:$0xff] %v9364_v9  ;;  %v9380_v16 = vmul.f32 %v14592_v22, %v2958_v20  ;;  %v9383_v57 = vmul.f32 %v14532_v30, %v2958_v20  ;;  %v1158_v63 = vadd.f32 %v14596_v10, %v1005_v61  ;;  %v9389_v9 = vmul.f32 %v14534_v8, %v2958_v20  ;;  %v9398_v33 = vld [vmem:[#allocation2 + $0x150] sm:$0x1]  ;;  %v14602_v50 = vld [vmem:[#allocation136_spill] sm:$0xff]  ;;  %v14615_v47 = vld [vmem:[#allocation7_spill] sm:$0xff] }
 0x19f   :  { %14587 = vst [vmem:[#allocation478_spill] sm:$0xff] %v9371_v51  ;;  %14589 = vst [vmem:[#allocation479_spill] sm:$0xff] %v9374_v24  ;;  %v9392_v27 = vmul.f32 %v14464_v17, %v4372_v21  ;;  %v1408_v37 = vrot.slane %v1352_v40, 1  ;;  %v9403_v31 = vmul.f32 %v14602_v50, %v4372_v21  ;;  %v9405_v10 = vld [vmem:[#allocation2 + $0x210] sm:$0x1]  ;;  %v9410_v13 = vmul.f32 %v14605_v23, %v4372_v21  ;;  %v14611_v61 = vld [vmem:[#allocation456_spill] sm:$0xff] }
 0x1a0   :  { %14591 = vst [vmem:[#allocation480_spill] sm:$0xff] %v9377_v53  ;;  %14593 = vst [vmem:[#allocation481_spill] sm:$0xff] %v9380_v16  ;;  %v9413_v29 = vmul.f32 %v14389_v6, %v4372_v21  ;;  %v9417_v40 = vld [vmem:[#allocation2 + $0x100] sm:$0x1]  ;;  %v14612_v23 = vrot.slane %v14611_v61, 1  ;;  %v1704_v17 = vrot.slane %v14614_v39, 2  ;;  %v1614_v36 = vmul.f32 %v14615_v47, %v9394_v34 }
 0x1a1   :  { %14594 = vst [vmem:[#allocation482_spill] sm:$0xff] %v9383_v57  ;;  %14597 = vst [vmem:[#allocation14_spill] sm:$0xff] %v9389_v9  ;;  %v9423_v50 = vld [vmem:[#allocation2 + $0x200] sm:$0x1]  ;;  %v14616_v20 = vld [vmem:[#allocation17_spill] sm:$0xff]  ;;  %v1618_v61 = vmul.f32 %v14615_v47, %v9398_v33  ;;  %v1622_v39 = vmul.f32 %v14615_v47, %v9415_v58  ;;  %v14631_v52 = vrot.slane %v14630_v11, 2 }
 0x1a2   :  { %14598 = vst [vmem:[#allocation483_spill] sm:$0xff] %v9392_v27  ;;  %14599 = vst [vmem:[#allocation484_spill] sm:$0xff] %v9394_v34  ;;  %v1311_v0 = vadd.f32 %v14612_v23, %v1158_v63  ;;  %v1615_v1 = vmul.f32 %v14616_v20, %v9396_v54  ;;  %v1619_v6 = vmul.f32 %v14616_v20, %v9405_v10  ;;  %v14617_v27 = vld [vmem:[#allocation382_spill] sm:$0xff]  ;;  %v14621_v8 = vld [vmem:[#allocation384_spill] sm:$0xff]  ;;  %v14696_v62 = vrot.slane %v14695_v2, 2 }
 0x1a3   :  { %14600 = vst [vmem:[#allocation485_spill] sm:$0xff] %v9396_v54  ;;  %14601 = vst [vmem:[#allocation486_spill] sm:$0xff] %v9398_v33  ;;  %v1623_v38 = vmul.f32 %v14616_v20, %v9417_v40  ;;  %v1626_v21 = vmul.f32 %v14615_v47, %v9423_v50  ;;  %v1707_v9 = vrot.slane %v14617_v27, 2  ;;  %v1713_v57 = vrot.slane %v14621_v8, 2  ;;  %v14623_v30 = vld [vmem:[#allocation35_spill] sm:$0xff]  ;;  %v14624_v5 = vld [vmem:[#allocation385_spill] sm:$0xff] }
 0x1a4   :  { %14603 = vst [vmem:[#allocation487_spill] sm:$0xff] %v9403_v31  ;;  %14604 = vst [vmem:[#allocation488_spill] sm:$0xff] %v9405_v10  ;;  %v1627_v31 = vmul.f32 %v14616_v20, %v9429_v26  ;;  %v1464_v23 = vadd.f32 %v1408_v37, %v1311_v0  ;;  %v1719_v16 = vrot.slane %v14623_v30, 2  ;;  %v1722_v47 = vrot.slane %v14624_v5, 2  ;;  %v14626_v20 = vld [vmem:[#allocation389_spill] sm:$0xff]  ;;  %v14627_v27 = vld [vmem:[#allocation390_spill] sm:$0xff] }
 0x1a5   :  { %14606 = vst [vmem:[#allocation489_spill] sm:$0xff] %v9410_v13  ;;  %14607 = vst [vmem:[#allocation490_spill] sm:$0xff] %v9413_v29  ;;  %v14618_v13 = vld [vmem:[#allocation166_spill] sm:$0xff]  ;;  %v1740_v22 = vrot.slane %v14626_v20, 2  ;;  %v1743_v37 = vrot.slane %v14627_v27, 2  ;;  %v1746_v0 = vrot.slane %v1614_v36, 2  ;;  %v9469_v30 = vsel %vm1684_vm0, %v14631_v52, %v1710_v28 }
 0x1a6   :  { %14609 = vst [vmem:[#allocation492_spill] sm:$0xff] %v9417_v40  ;;  %14610 = vst [vmem:[#allocation493_spill] sm:$0xff] %v9423_v50  ;;  %v14619_v63 = vrot.slane %v14618_v13, 2  ;;  %v1749_v13 = vrot.slane %v1615_v1, 2  ;;  %v14628_v53 = vld [vmem:[#allocation174_spill] sm:$0xff]  ;;  %v1755_v8 = vrot.slane %v1619_v6, 2 }
 0x1a7   :  { %14613 = vst [vmem:[#allocation456_spill] sm:$0xff] %v9429_v26  ;;  %v1758_v59 = vrot.slane %v1622_v39, 2  ;;  %14632 = vst [vmem:[#allocation381_spill] sm:$0xff] %v9469_v30  ;;  %v14633_v5 = vld [vmem:[#allocation200_spill] sm:$0xff]  ;;  %v1761_v27 = vrot.slane %v1623_v38, 2  ;;  %v1764_v36 = vrot.slane %v1626_v21, 2 }
 0x1a8   :  { %v1705_v29 = vsel %vm1684_vm0, %v14619_v63, %v1704_v17  ;;  %v14629_v17 = vrot.slane %v14628_v53, 2  ;;  %v1752_v63 = vrot.slane %v1618_v61, 2  ;;  %v14634_v55 = vrot.slane %v14633_v5, 2  ;;  %v14636_v1 = vld [vmem:[#allocation219_spill] sm:$0xff]  ;;  %v14642_v39 = vld [vmem:[#allocation250_spill] sm:$0xff] }
 0x1a9   :  { %v14637_v42 = vrot.slane %v14636_v1, 2  ;;  %v14643_v28 = vrot.slane %v14642_v39, 2  ;;  %v14648_v21 = vld [vmem:[#allocation298_spill] sm:$0xff]  ;;  %v14693_v15 = vld [vmem:[#allocation23_spill] sm:$0xff] }
 0x1aa   :  { %v1708_v3 = vsel %vm1684_vm0, %v14629_v17, %v1707_v9  ;;  %v9474_v20 = vsel %vm1684_vm0, %v14634_v55, %v1713_v57  ;;  %v14639_v9 = vld [vmem:[#allocation232_spill] sm:$0xff]  ;;  %v14645_v17 = vld [vmem:[#allocation223_spill] sm:$0xff]  ;;  %v14649_v11 = vrot.slane %v14648_v21, 2  ;;  %v14694_v49 = vrot.slane %v14693_v15, 2 }
 0x1ab   :  { %14635 = vst [vmem:[#allocation7_spill] sm:$0xff] %v9474_v20  ;;  %v9479_v53 = vsel %vm1684_vm0, %v14637_v42, %v1716_v14  ;;  %v14640_v6 = vrot.slane %v14639_v9, 2  ;;  %v9489_v52 = vsel %vm1684_vm0, %v14643_v28, %v1722_v47  ;;  %v14646_v57 = vrot.slane %v14645_v17, 2  ;;  %v14650_v14 = vld [vmem:[#allocation307_spill] sm:$0xff]  ;;  %v14656_v28 = vld [vmem:[#allocation350_spill] sm:$0xff] }
 0x1ac   :  { %14638 = vst [vmem:[#allocation17_spill] sm:$0xff] %v9479_v53  ;;  %14644 = vst [vmem:[#allocation166_spill] sm:$0xff] %v9489_v52  ;;  %v1741_v42 = vsel %vm1684_vm0, %v14649_v11, %v1740_v22  ;;  %v14651_v5 = vrot.slane %v14650_v14, 2  ;;  %v14657_v17 = vrot.slane %v14656_v28, 2  ;;  %v14662_v11 = vld [vmem:[#allocation349_spill] sm:$0xff]  ;;  %v1881_v53 = vmul.f32 %v14449_v45, %v9405_v10  ;;  %v14697_v60 = vld [vmem:[#allocation151_spill] sm:$0xff] }
 0x1ad   :  { %v9484_v61 = vsel %vm1684_vm0, %v14640_v6, %v1719_v16  ;;  %v9494_v38 = vsel %vm1684_vm0, %v14646_v57, %v1725_v35  ;;  %v14652_v16 = vld [vmem:[#allocation317_spill] sm:$0xff]  ;;  %v14654_v6 = vld [vmem:[#allocation336_spill] sm:$0xff]  ;;  %v14659_v57 = vld [vmem:[#allocation331_spill] sm:$0xff]  ;;  %v14698_v51 = vrot.slane %v14697_v60, 2 }
 0x1ae   :  { %14641 = vst [vmem:[#allocation382_spill] sm:$0xff] %v9484_v61  ;;  %14647 = vst [vmem:[#allocation383_spill] sm:$0xff] %v9494_v38  ;;  %v1744_v55 = vsel %vm1684_vm0, %v14651_v5, %v1743_v37  ;;  %v14653_v1 = vrot.slane %v14652_v16, 2  ;;  %v14655_v47 = vrot.slane %v14654_v6, 2  ;;  %v9511_v35 = vsel %vm1684_vm0, %v14657_v17, %v1752_v63  ;;  %v14665_v5 = vld [vmem:[#allocation306_spill] sm:$0xff]  ;;  %v14705_v60 = vld [vmem:[#allocation251_spill] sm:$0xff] }
 0x1af   :  { %14658 = vst [vmem:[#allocation384_spill] sm:$0xff] %v9511_v35  ;;  %v14660_v21 = vrot.slane %v14659_v57, 2  ;;  %v14663_v37 = vrot.slane %v14662_v11, 2  ;;  %v14666_v16 = vrot.slane %v14665_v5, 2  ;;  %v9539_v57 = vld [vmem:[#allocation2 + $0x148] sm:$0x1]  ;;  %v1885_v61 = vmul.f32 %v14449_v45, %v9417_v40 }
 0x1b0   :  { %v1747_v9 = vsel %vm1684_vm0, %v14653_v1, %v1746_v0  ;;  %v1750_v39 = vsel %vm1684_vm0, %v14655_v47, %v1749_v13  ;;  %v1767_v0 = vrot.slane %v1627_v31, 2  ;;  %v14668_v1 = vld [vmem:[#allocation63_spill] sm:$0xff]  ;;  %v14671_v47 = vld [vmem:[#allocation196_spill] sm:$0xff]  ;;  %14673 = vst [vmem:[#allocation389_spill] sm:$0xff] %v9539_v57  ;;  %v14706_v4 = vrot.slane %v14705_v60, 2 }
 0x1b1   :  { %v9516_v22 = vsel %vm1684_vm0, %v14660_v21, %v1755_v8  ;;  %v9521_v14 = vsel %vm1684_vm0, %v14663_v37, %v1758_v59  ;;  %v9526_v13 = vsel %vm1684_vm0, %v14666_v16, %v1761_v27  ;;  %v14669_v6 = vrot.slane %v14668_v1, 2  ;;  %v14672_v8 = vld [vmem:[#allocation302_spill] sm:$0xff]  ;;  %v9541_v59 = vld [vmem:[#allocation2 + $0x68] sm:$0x1]  ;;  %v14675_v31 = vld [vmem:[#allocation455_spill] sm:$0xff] }
 0x1b2   :  { %14661 = vst [vmem:[#allocation13_spill] sm:$0xff] %v9516_v22  ;;  %14664 = vst [vmem:[#allocation35_spill] sm:$0xff] %v9521_v14  ;;  %v9534_v28 = vadd.f32 %v1705_v29, %v14671_v47  ;;  %v9537_v17 = vadd.f32 %v1708_v3, %v14672_v8  ;;  %v9544_v21 = vadd.f32 %v1741_v42, %v14675_v31  ;;  %v14677_v37 = vld [vmem:[#allocation370_spill] sm:$0xff]  ;;  %v14678_v5 = vld [vmem:[#allocation371_spill] sm:$0xff] }
 0x1b3   :  { %14667 = vst [vmem:[#allocation385_spill] sm:$0xff] %v9526_v13  ;;  %v9531_v63 = vsel %vm1684_vm0, %v14669_v6, %v1764_v36  ;;  %14674 = vst [vmem:[#allocation390_spill] sm:$0xff] %v9541_v59  ;;  %v9547_v27 = vadd.f32 %v1744_v55, %v9267_v48  ;;  %v9550_v11 = vadd.f32 %v1747_v9, %v9345_v18  ;;  %v14676_v36 = vld [vmem:[#allocation369_spill] sm:$0xff]  ;;  %v14679_v1 = vld [vmem:[#allocation374_spill] sm:$0xff] }
 0x1b4   :  { %14670 = vst [vmem:[#allocation386_spill] sm:$0xff] %v9531_v63  ;;  %v1848_v29 = vmul.f32 %v14408_v44, %v14676_v36  ;;  %v1849_v3 = vmul.f32 %v14449_v45, %v14677_v37  ;;  %v1852_v16 = vmul.f32 %v14408_v44, %v14678_v5  ;;  %v1853_v6 = vmul.f32 %v14449_v45, %v14679_v1  ;;  %v14680_v42 = vld [vmem:[#allocation375_spill] sm:$0xff]  ;;  %v14681_v48 = vld [vmem:[#allocation334_spill] sm:$0xff]  ;;  %v14684_v8 = vld [vmem:[#allocation376_spill] sm:$0xff] }
 0x1b5   :  { %v1856_v47 = vmul.f32 %v14408_v44, %v14680_v42  ;;  %v14682_v55 = vrot.slane %v14681_v48, 2  ;;  %v9567_v9 = vadd.f32 %v1750_v39, %v1464_v23  ;;  %v1857_v31 = vmul.f32 %v14449_v45, %v14684_v8  ;;  %v14685_v36 = vld [vmem:[#allocation377_spill] sm:$0xff]  ;;  %v14686_v5 = vld [vmem:[#allocation378_spill] sm:$0xff]  ;;  %v14687_v48 = vld [vmem:[#allocation379_spill] sm:$0xff] }
 0x1b6   :  { %v1860_v37 = vmul.f32 %v14408_v44, %v14685_v36  ;;  %v1861_v63 = vmul.f32 %v14449_v45, %v14686_v5  ;;  %v1864_v1 = vmul.f32 %v14408_v44, %v9539_v57  ;;  %v1865_v42 = vmul.f32 %v14449_v45, %v9541_v59  ;;  %v9581_v23 = vld [vmem:[#allocation2 + $0x208] sm:$0x1] }
 0x1b7   :  { %v9565_v18 = vsel %vm1684_vm0, %v14682_v55, %v1767_v0  ;;  %v1872_v0 = vmul.f32 %v14408_v44, %v14687_v48  ;;  %14688 = vst [vmem:[#allocation192_spill] sm:$0xff] %v9581_v23  ;;  %v14689_v39 = vld [vmem:[#allocation380_spill] sm:$0xff]  ;;  %v1876_v8 = vmul.f32 %v14408_v44, %v9394_v34  ;;  %v1877_v36 = vmul.f32 %v14449_v45, %v9396_v54 }
 0x1b8   :  { %14683 = vst [vmem:[#allocation174_spill] sm:$0xff] %v9565_v18  ;;  %v1873_v55 = vmul.f32 %v14449_v45, %v14689_v39  ;;  %v1963_v5 = vrot.slane %v1848_v29, 2  ;;  %v9589_v18 = vld [vmem:[#allocation2 + $0x90] sm:$0x1]  ;;  %v1966_v13 = vrot.slane %v1849_v3, 2  ;;  %v1969_v14 = vrot.slane %v1852_v16, 2 }
 0x1b9   :  { %14690 = vst [vmem:[#allocation200_spill] sm:$0xff] %v9589_v18  ;;  %v1972_v52 = vrot.slane %v1853_v6, 2  ;;  %v1975_v22 = vrot.slane %v1856_v47, 2  ;;  %v1880_v48 = vmul.f32 %v14408_v44, %v9398_v33  ;;  %v1884_v39 = vmul.f32 %v14408_v44, %v9415_v58  ;;  %v14691_v47 = vld [vmem:[#allocation167_spill] sm:$0xff] }
 0x1ba   :  { %v1978_v38 = vrot.slane %v1857_v31, 2  ;;  %v1888_v29 = vmul.f32 %v14408_v44, %v9423_v50  ;;  %v1889_v3 = vmul.f32 %v14449_v45, %v9429_v26  ;;  %v1892_v16 = vmul.f32 %v14408_v44, %v9581_v23 }
 0x1bb   :  { %v1893_v6 = vmul.f32 %v14449_v45, %v9589_v18  ;;  %v14692_v35 = vrot.slane %v14691_v47, 2  ;;  %v1981_v31 = vrot.slane %v1860_v37, 2  ;;  %v1984_v30 = vrot.slane %v1861_v63, 2 }
 0x1bc   :  { %v1967_v24 = vsel %vm1684_vm0, %v14694_v49, %v1966_v13  ;;  %v1970_v19 = vsel %vm1684_vm0, %v14696_v62, %v1969_v14  ;;  %v1973_v44 = vsel %vm1684_vm0, %v14698_v51, %v1972_v52  ;;  %v14700_v45 = vrot.slane %v14699_v32, 2  ;;  %v14708_v32 = vld [vmem:[#allocation198_spill] sm:$0xff] }
 0x1bd   :  { %v1964_v20 = vsel %vm1684_vm0, %v14692_v35, %v1963_v5  ;;  %v14702_v35 = vld [vmem:[#allocation58_spill] sm:$0xff]  ;;  %v1987_v15 = vrot.slane %v1864_v1, 2  ;;  %v1990_v49 = vrot.slane %v1865_v42, 2  ;;  %v1999_v13 = vrot.slane %v1872_v0, 2 }
 0x1be   :  { %v9622_v47 = vsel %vm1684_vm0, %v14700_v45, %v1975_v22  ;;  %v14703_v37 = vrot.slane %v14702_v35, 2  ;;  %v2002_v2 = vrot.slane %v1873_v55, 2  ;;  %v2005_v5 = vrot.slane %v1876_v8, 2  ;;  %v14711_v55 = vld [vmem:[#allocation275_spill] sm:$0xff] }
 0x1bf   :  { %14701 = vst [vmem:[#allocation219_spill] sm:$0xff] %v9622_v47  ;;  %v2008_v62 = vrot.slane %v1877_v36, 2  ;;  %v2011_v14 = vrot.slane %v1880_v48, 2  ;;  %v9632_v51 = vsel %vm1684_vm0, %v14706_v4, %v1981_v31  ;;  %v14709_v52 = vrot.slane %v14708_v32, 2  ;;  %v14714_v48 = vld [vmem:[#allocation286_spill] sm:$0xff]  ;;  %v14717_v31 = vld [vmem:[#allocation299_spill] sm:$0xff] }
 0x1c0   :  { %v9627_v63 = vsel %vm1684_vm0, %v14703_v37, %v1978_v38  ;;  %14707 = vst [vmem:[#allocation250_spill] sm:$0xff] %v9632_v51  ;;  %v2014_v45 = vrot.slane %v1881_v53, 2  ;;  %v2017_v38 = vrot.slane %v1884_v39, 2  ;;  %v2020_v35 = vrot.slane %v1885_v61, 2  ;;  %v14719_v39 = vld [vmem:[#allocation308_spill] sm:$0xff] }
 0x1c1   :  { %14704 = vst [vmem:[#allocation232_spill] sm:$0xff] %v9627_v63  ;;  %v9637_v22 = vsel %vm1684_vm0, %v14709_v52, %v1984_v30  ;;  %v2023_v1 = vrot.slane %v1888_v29, 2  ;;  %v2026_v42 = vrot.slane %v1889_v3, 2  ;;  %v2029_v0 = vrot.slane %v1892_v16, 2  ;;  %v14721_v3 = vld [vmem:[#allocation318_spill] sm:$0xff]  ;;  %v14755_v63 = vld [vmem:[#allocation175_spill] sm:$0xff] }
 0x1c2   :  { %14710 = vst [vmem:[#allocation223_spill] sm:$0xff] %v9637_v22  ;;  %v14712_v8 = vrot.slane %v14711_v55, 2  ;;  %v14715_v37 = vrot.slane %v14714_v48, 2  ;;  %v14718_v60 = vrot.slane %v14717_v31, 2  ;;  %v2032_v53 = vrot.slane %v1893_v6, 2 }
 0x1c3   :  { %v14720_v61 = vrot.slane %v14719_v39, 2  ;;  %v14722_v16 = vrot.slane %v14721_v3, 2  ;;  %v14732_v39 = vld [vmem:[#allocation173_spill] sm:$0xff]  ;;  %v14734_v3 = vld [vmem:[#allocation82_spill] sm:$0xff]  ;;  %v14756_v47 = vrot.slane %v14755_v63, 2 }
 0x1c4   :  { %v9642_v36 = vsel %vm1684_vm0, %v14712_v8, %v1987_v15  ;;  %v9647_v4 = vsel %vm1684_vm0, %v14715_v37, %v1990_v49  ;;  %v2000_v30 = vsel %vm1684_vm0, %v14718_v60, %v1999_v13  ;;  %v14723_v15 = vld [vmem:[#allocation337_spill] sm:$0xff]  ;;  %v14725_v8 = vld [vmem:[#allocation351_spill] sm:$0xff]  ;;  %v14729_v13 = vld [vmem:[#allocation316_spill] sm:$0xff] }
 0x1c5   :  { %14713 = vst [vmem:[#allocation298_spill] sm:$0xff] %v9642_v36  ;;  %14716 = vst [vmem:[#allocation307_spill] sm:$0xff] %v9647_v4  ;;  %v2003_v29 = vsel %vm1684_vm0, %v14720_v61, %v2002_v2  ;;  %v2006_v32 = vsel %vm1684_vm0, %v14722_v16, %v2005_v5  ;;  %v14724_v52 = vrot.slane %v14723_v15, 2  ;;  %v14726_v49 = vrot.slane %v14725_v8, 2  ;;  %v14727_v37 = vld [vmem:[#allocation333_spill] sm:$0xff]  ;;  %v14733_v61 = vld [vmem:[#allocation154_spill] sm:$0xff] }
 0x1c6   :  { %v14728_v31 = vrot.slane %v14727_v37, 2  ;;  %v14730_v60 = vrot.slane %v14729_v13, 2  ;;  %v9674_v5 = vadd.f32 %v14733_v61, %v14732_v39  ;;  %v14735_v16 = vld [vmem:[#allocation155_spill] sm:$0xff]  ;;  %v14739_v8 = vld [vmem:[#allocation440_spill] sm:$0xff]  ;;  %v14745_v13 = vrot.slane %v9272_v25, 2  ;;  %v14751_v25 = vld [vmem:[#allocation62_spill] sm:$0xff] }
 0x1c7   :  { %v2009_v55 = vsel %vm1684_vm0, %v14724_v52, %v2008_v62  ;;  %v2012_v48 = vsel %vm1684_vm0, %v14726_v49, %v2011_v14  ;;  %v9678_v62 = vadd.f32 %v14735_v16, %v14734_v3  ;;  %v14736_v15 = vld [vmem:[#allocation335_spill] sm:$0xff]  ;;  %v14747_v39 = vrot.slane %v9362_v7, 2  ;;  %v14749_v61 = vld [vmem:[#allocation152_spill] sm:$0xff] }
 0x1c8   :  { %v2015_v6 = vsel %vm1684_vm0, %v14728_v31, %v2014_v45  ;;  %v9670_v2 = vsel %vm1684_vm0, %v14730_v60, %v2017_v38  ;;  %v14737_v52 = vrot.slane %v14736_v15, 2  ;;  %v14740_v45 = vrot.slane %v14739_v8, 2  ;;  %v14742_v38 = vld [vmem:[#allocation297_spill] sm:$0xff]  ;;  %v9744_v8 = vld [vmem:[#allocation2 + $0x220] sm:$0x1] }
 0x1c9   :  { %14731 = vst [vmem:[#allocation317_spill] sm:$0xff] %v9670_v2  ;;  %v14743_v37 = vrot.slane %v14742_v38, 2  ;;  %v9698_v60 = vsel %vm1684_vm0, %v14745_v13, %v2029_v0  ;;  %v9706_v3 = vadd.f32 %v1964_v20, %v14749_v61  ;;  %v9712_v15 = vadd.f32 %v1970_v19, %v9534_v28  ;;  %v9733_v28 = vld [vmem:[#allocation2 + $0x2a8] sm:$0x1] }
 0x1ca   :  { %v9683_v14 = vsel %vm1684_vm0, %v14737_v52, %v2020_v35  ;;  %v9688_v49 = vsel %vm1684_vm0, %v14740_v45, %v2023_v1  ;;  %14746 = vst [vmem:[#allocation349_spill] sm:$0xff] %v9698_v60  ;;  %v9703_v35 = vsel %vm1684_vm0, %v14747_v39, %v2032_v53  ;;  %v14750_v1 = vld [vmem:[#allocation189_spill] sm:$0xff]  ;;  %v9718_v0 = vadd.f32 %v2000_v30, %v14751_v25  ;;  %v14752_v52 = vld [vmem:[#allocation315_spill] sm:$0xff] }
 0x1cb   :  { %14738 = vst [vmem:[#allocation336_spill] sm:$0xff] %v9683_v14  ;;  %14741 = vst [vmem:[#allocation350_spill] sm:$0xff] %v9688_v49  ;;  %v9693_v31 = vsel %vm1684_vm0, %v14743_v37, %v2026_v42  ;;  %v9709_v16 = vadd.f32 %v1967_v24, %v14750_v1  ;;  %v9715_v42 = vadd.f32 %v1973_v44, %v9537_v17  ;;  %v9723_v53 = vld [vmem:[#allocation2 + $0x120] sm:$0x1]  ;;  %v9763_v37 = vld [vmem:[#allocation2 + $0x248] sm:$0x1] }
 0x1cc   :  { %14744 = vst [vmem:[#allocation331_spill] sm:$0xff] %v9693_v31  ;;  %14748 = vst [vmem:[#allocation306_spill] sm:$0xff] %v9703_v35  ;;  %v9721_v7 = vadd.f32 %v2003_v29, %v14752_v52  ;;  %v2109_v20 = vmul.f32 %v9723_v53, %v14555_v56  ;;  %v9728_v24 = vadd.f32 %v2006_v32, %v9544_v21  ;;  %v9737_v44 = vld [vmem:[#allocation2 + $0x60] sm:$0x1]  ;;  %v6091_v1 = vld [vmem:[#allocation2 + $0x1b8] sm:$0x1] }
 0x1cd   :  { %v9731_v19 = vadd.f32 %v2009_v55, %v9547_v27  ;;  %v2110_v17 = vmul.f32 %v9733_v28, %v14451_v41  ;;  %v2113_v30 = vmul.f32 %v9737_v44, %v14555_v56  ;;  %v9742_v29 = vadd.f32 %v2012_v48, %v9550_v11  ;;  %v9748_v27 = vld [vmem:[#allocation2 + $0x1a8] sm:$0x1]  ;;  %v9752_v55 = vld [vmem:[#allocation2 + $0x218] sm:$0x1] }
 0x1ce   :  { %v2114_v21 = vmul.f32 %v9744_v8, %v14451_v41  ;;  %v2117_v32 = vmul.f32 %v9748_v27, %v14555_v56  ;;  %v2118_v45 = vmul.f32 %v9752_v55, %v14451_v41  ;;  %v9757_v38 = vadd.f32 %v2015_v6, %v9567_v9  ;;  %v9759_v11 = vld [vmem:[#allocation2 + $0x1f8] sm:$0x1] }
 0x1cf   :  { %v2121_v48 = vmul.f32 %v9759_v11, %v14555_v56  ;;  %v2122_v13 = vmul.f32 %v9763_v37, %v14451_v41  ;;  %v2125_v39 = vmul.f32 %v14555_v56, %v9539_v57  ;;  %v2126_v61 = vmul.f32 %v14451_v41, %v9541_v59  ;;  %v6092_v6 = vld [vmem:[#allocation2 + $0x158] sm:$0x1] }
 0x1d0   :  { %v2133_v9 = vmul.f32 %v6091_v1, %v14555_v56  ;;  %v2134_v25 = vmul.f32 %v6092_v6, %v14451_v41  ;;  %v2222_v52 = vrot.slane %v2109_v20, 2  ;;  %v2137_v35 = vmul.f32 %v14555_v56, %v9394_v34 }
 0x1d1   :  { %v2138_v60 = vmul.f32 %v14451_v41, %v9396_v54  ;;  %v2225_v31 = vrot.slane %v2110_v17, 2  ;;  %v2228_v49 = vrot.slane %v2113_v30, 2  ;;  %v2141_v14 = vmul.f32 %v14555_v56, %v9398_v33  ;;  %v14759_v54 = vld [vmem:[#allocation201_spill] sm:$0xff] }
 0x1d2   :  { %v2231_v36 = vrot.slane %v2114_v21, 2  ;;  %v2234_v51 = vrot.slane %v2117_v32, 2  ;;  %v2237_v2 = vrot.slane %v2118_v45, 2  ;;  %v2142_v1 = vmul.f32 %v14451_v41, %v9405_v10  ;;  %v14753_v32 = vld [vmem:[#allocation169_spill] sm:$0xff] }
 0x1d3   :  { %v2145_v20 = vmul.f32 %v14555_v56, %v9415_v58  ;;  %v2146_v6 = vmul.f32 %v14451_v41, %v9417_v40  ;;  %v2149_v4 = vmul.f32 %v14555_v56, %v9423_v50  ;;  %v2150_v17 = vmul.f32 %v14451_v41, %v9429_v26  ;;  %v14757_v58 = vld [vmem:[#allocation194_spill] sm:$0xff] }
 0x1d4   :  { %v2153_v30 = vmul.f32 %v14555_v56, %v9581_v23  ;;  %v2154_v21 = vmul.f32 %v14451_v41, %v9589_v18  ;;  %v14754_v45 = vrot.slane %v14753_v32, 2  ;;  %v2226_v40 = vsel %vm1684_vm0, %v14756_v47, %v2225_v31  ;;  %v14761_v23 = vld [vmem:[#allocation220_spill] sm:$0xff]  ;;  %v14763_v18 = vld [vmem:[#allocation234_spill] sm:$0xff] }
 0x1d5   :  { %v14758_v10 = vrot.slane %v14757_v58, 2  ;;  %v2240_v33 = vrot.slane %v2121_v48, 2  ;;  %v2243_v26 = vrot.slane %v2122_v13, 2  ;;  %v14760_v34 = vrot.slane %v14759_v54, 2  ;;  %v14765_v54 = vld [vmem:[#allocation252_spill] sm:$0xff] }
 0x1d6   :  { %v2223_v22 = vsel %vm1684_vm0, %v14754_v45, %v2222_v52  ;;  %v14762_v41 = vrot.slane %v14761_v23, 2  ;;  %v14764_v52 = vrot.slane %v14763_v18, 2  ;;  %v2246_v45 = vrot.slane %v2125_v39, 2  ;;  %v14768_v23 = vld [vmem:[#allocation262_spill] sm:$0xff] }
 0x1d7   :  { %v2229_v50 = vsel %vm1684_vm0, %v14758_v10, %v2228_v49  ;;  %v2232_v56 = vsel %vm1684_vm0, %v14760_v34, %v2231_v36  ;;  %v2249_v47 = vrot.slane %v2126_v61, 2  ;;  %v2258_v31 = vrot.slane %v2133_v9, 2  ;;  %v14774_v9 = vld [vmem:[#allocation287_spill] sm:$0xff] }
 0x1d8   :  { %v2235_v32 = vsel %vm1684_vm0, %v14762_v41, %v2234_v51  ;;  %v2238_v63 = vsel %vm1684_vm0, %v14764_v52, %v2237_v2  ;;  %v2261_v58 = vrot.slane %v2134_v25, 2  ;;  %v2264_v59 = vrot.slane %v2137_v35, 2  ;;  %v14771_v2 = vld [vmem:[#allocation276_spill] sm:$0xff]  ;;  %v14781_v52 = vld [vmem:[#allocation319_spill] sm:$0xff] }
 0x1d9   :  { %v2267_v10 = vrot.slane %v2138_v60, 2  ;;  %v2270_v49 = vrot.slane %v2141_v14, 2  ;;  %v2273_v48 = vrot.slane %v2142_v1, 2  ;;  %v2276_v13 = vrot.slane %v2145_v20, 2  ;;  %v14779_v20 = vld [vmem:[#allocation309_spill] sm:$0xff] }
 0x1da   :  { %v14766_v57 = vrot.slane %v14765_v54, 2  ;;  %v14769_v41 = vrot.slane %v14768_v23, 2  ;;  %v2279_v51 = vrot.slane %v2146_v6, 2  ;;  %v2282_v36 = vrot.slane %v2149_v4, 2  ;;  %v14785_v23 = vld [vmem:[#allocation352_spill] sm:$0xff] }
 0x1db   :  { %v14772_v39 = vrot.slane %v14771_v2, 2  ;;  %v2285_v14 = vrot.slane %v2150_v17, 2  ;;  %v2288_v60 = vrot.slane %v2153_v30, 2  ;;  %v2291_v61 = vrot.slane %v2154_v21, 2  ;;  %v14783_v17 = vld [vmem:[#allocation338_spill] sm:$0xff]  ;;  %v14787_v2 = vld [vmem:[#allocation393_spill] sm:$0xff] }
 0x1dc   :  { %v9814_v34 = vsel %vm1684_vm0, %v14766_v57, %v2240_v33  ;;  %v9819_v18 = vsel %vm1684_vm0, %v14769_v41, %v2243_v26  ;;  %v14775_v25 = vrot.slane %v14774_v9, 2  ;;  %v14777_v57 = vld [vmem:[#allocation300_spill] sm:$0xff]  ;;  %v14780_v6 = vrot.slane %v14779_v20, 2  ;;  %v14789_v9 = vld [vmem:[#allocation18_spill] sm:$0xff]  ;;  %v14793_v20 = vld [vmem:[#allocation441_spill] sm:$0xff] }
 0x1dd   :  { %14767 = vst [vmem:[#allocation63_spill] sm:$0xff] %v9814_v34  ;;  %14770 = vst [vmem:[#allocation196_spill] sm:$0xff] %v9819_v18  ;;  %v9824_v35 = vsel %vm1684_vm0, %v14772_v39, %v2246_v45  ;;  %v14778_v1 = vrot.slane %v14777_v57, 2  ;;  %v14782_v54 = vrot.slane %v14781_v52, 2  ;;  %v14784_v30 = vrot.slane %v14783_v17, 2  ;;  %v14791_v57 = vld [vmem:[#allocation19_spill] sm:$0xff] }
 0x1de   :  { %14773 = vst [vmem:[#allocation302_spill] sm:$0xff] %v9824_v35  ;;  %v9829_v33 = vsel %vm1684_vm0, %v14775_v25, %v2249_v47  ;;  %v2262_v4 = vsel %vm1684_vm0, %v14780_v6, %v2261_v58  ;;  %v14786_v41 = vrot.slane %v14785_v23, 2  ;;  %v14788_v39 = vrot.slane %v14787_v2, 2  ;;  %v14796_v52 = vld [vmem:[#allocation83_spill] sm:$0xff]  ;;  %v14827_v35 = vld [vmem:[#allocation202_spill] sm:$0xff] }
 0x1df   :  { %14776 = vst [vmem:[#allocation455_spill] sm:$0xff] %v9829_v33  ;;  %v2259_v26 = vsel %vm1684_vm0, %v14778_v1, %v2258_v31  ;;  %v2265_v45 = vsel %vm1684_vm0, %v14782_v54, %v2264_v59  ;;  %v2268_v21 = vsel %vm1684_vm0, %v14784_v30, %v2267_v10  ;;  %v14790_v25 = vrot.slane %v14789_v9, 2  ;;  %v14797_v54 = vld [vmem:[#allocation156_spill] sm:$0xff] }
 0x1e0   :  { %v2271_v47 = vsel %vm1684_vm0, %v14786_v41, %v2270_v49  ;;  %v2274_v31 = vsel %vm1684_vm0, %v14788_v39, %v2273_v48  ;;  %v14792_v1 = vrot.slane %v14791_v57, 2  ;;  %v14794_v6 = vrot.slane %v14793_v20, 2  ;;  %v14799_v48 = vld [vmem:[#allocation457_spill] sm:$0xff]  ;;  %v14820_v20 = vld [vmem:[#allocation492_spill] sm:$0xff] }
 0x1e1   :  { %v2277_v58 = vsel %vm1684_vm0, %v14790_v25, %v2276_v13  ;;  %v9862_v49 = vadd.f32 %v14797_v54, %v14796_v52  ;;  %v9865_v17 = vadd.f32 %v2223_v22, %v9674_v5  ;;  %v14800_v30 = vrot.slane %v14799_v48, 2  ;;  %v14818_v25 = vld [vmem:[#allocation488_spill] sm:$0xff]  ;;  %v14821_v52 = vld [vmem:[#allocation493_spill] sm:$0xff] }
 0x1e2   :  { %v2280_v59 = vsel %vm1684_vm0, %v14792_v1, %v2279_v51  ;;  %v9858_v10 = vsel %vm1684_vm0, %v14794_v6, %v2282_v36  ;;  %v14802_v23 = vrot.slane %v9278_v46, 2  ;;  %v14804_v36 = vrot.slane %v9368_v43, 2  ;;  %v14819_v1 = vld [vmem:[#allocation491_spill] sm:$0xff]  ;;  %v14822_v48 = vld [vmem:[#allocation456_spill] sm:$0xff] }
 0x1e3   :  { %14795 = vst [vmem:[#allocation369_spill] sm:$0xff] %v9858_v10  ;;  %14798 = vst [vmem:[#allocation370_spill] sm:$0xff] %v9865_v17  ;;  %v9870_v13 = vsel %vm1684_vm0, %v14800_v30, %v2285_v14  ;;  %v9883_v2 = vadd.f32 %v2226_v40, %v9678_v62  ;;  %v9886_v22 = vadd.f32 %v2229_v50, %v9706_v3  ;;  %v14828_v33 = vrot.slane %v14827_v35, 2 }
 0x1e4   :  { %14801 = vst [vmem:[#allocation371_spill] sm:$0xff] %v9870_v13  ;;  %v9875_v51 = vsel %vm1684_vm0, %v14802_v23, %v2288_v60  ;;  %v9880_v41 = vsel %vm1684_vm0, %v14804_v36, %v2291_v61  ;;  %v9889_v5 = vadd.f32 %v2232_v56, %v9709_v16  ;;  %v9892_v14 = vadd.f32 %v2235_v32, %v9712_v15  ;;  %v14807_v60 = vld [vmem:[#allocation65_spill] sm:$0xff]  ;;  %v14808_v61 = vld [vmem:[#allocation66_spill] sm:$0xff]  ;;  %v14823_v23 = vld [vmem:[#allocation192_spill] sm:$0xff] }
 0x1e5   :  { %14803 = vst [vmem:[#allocation374_spill] sm:$0xff] %v9875_v51  ;;  %14805 = vst [vmem:[#allocation375_spill] sm:$0xff] %v9880_v41  ;;  %v9895_v46 = vadd.f32 %v2238_v63, %v9715_v42  ;;  %v9898_v43 = vadd.f32 %v2259_v26, %v14807_v60  ;;  %v9901_v39 = vadd.f32 %v2262_v4, %v14808_v61  ;;  %v14813_v32 = vld [vmem:[#allocation389_spill] sm:$0xff]  ;;  %v14814_v63 = vld [vmem:[#allocation390_spill] sm:$0xff] }
 0x1e6   :  { %14806 = vst [vmem:[#allocation334_spill] sm:$0xff] %v9886_v22  ;;  %v9904_v40 = vadd.f32 %v2265_v45, %v9718_v0  ;;  %v2371_v50 = vmul.f32 %v9733_v28, %v14520_v12  ;;  %v9909_v56 = vadd.f32 %v2268_v21, %v9721_v7  ;;  %v9912_v62 = vadd.f32 %v2271_v47, %v9728_v24  ;;  %v14810_v0 = vld [vmem:[#allocation44_spill] sm:$0xff]  ;;  %v14816_v21 = vld [vmem:[#allocation485_spill] sm:$0xff] }
 0x1e7   :  { %v9915_v3 = vadd.f32 %v2274_v31, %v9731_v19  ;;  %v2375_v16 = vmul.f32 %v9744_v8, %v14520_v12  ;;  %v9920_v15 = vadd.f32 %v2277_v58, %v9742_v29  ;;  %v9923_v42 = vadd.f32 %v2280_v59, %v9757_v38  ;;  %v14817_v31 = vld [vmem:[#allocation486_spill] sm:$0xff]  ;;  %v14824_v60 = vld [vmem:[#allocation200_spill] sm:$0xff] }
 0x1e8   :  { %v9927_v28 = vmul.f32 %v9723_v53, %v14810_v0  ;;  %v9931_v7 = vmul.f32 %v9737_v44, %v14810_v0  ;;  %v2378_v24 = vmul.f32 %v9748_v27, %v14810_v0  ;;  %v2379_v19 = vmul.f32 %v9752_v55, %v14520_v12  ;;  %v14815_v44 = vld [vmem:[#allocation484_spill] sm:$0xff] }
 0x1e9   :  { %14809 = vst [vmem:[#allocation376_spill] sm:$0xff] %v9923_v42  ;;  %v2382_v29 = vmul.f32 %v9759_v11, %v14810_v0  ;;  %v2383_v38 = vmul.f32 %v9763_v37, %v14520_v12  ;;  %v2386_v53 = vmul.f32 %v14810_v0, %v14813_v32  ;;  %v2387_v26 = vmul.f32 %v14520_v12, %v14814_v63 }
 0x1ea   :  { %14811 = vst [vmem:[#allocation377_spill] sm:$0xff] %v9927_v28  ;;  %14812 = vst [vmem:[#allocation378_spill] sm:$0xff] %v9931_v7  ;;  %v2398_v4 = vmul.f32 %v14810_v0, %v14815_v44  ;;  %v2484_v45 = vrot.slane %v2371_v50, 2  ;;  %v2399_v47 = vmul.f32 %v14520_v12, %v14816_v21  ;;  %v2402_v9 = vmul.f32 %v14810_v0, %v14817_v31  ;;  %v14825_v44 = vld [vmem:[#allocation176_spill] sm:$0xff]  ;;  %v14829_v50 = vld [vmem:[#allocation221_spill] sm:$0xff] }
 0x1eb   :  { %v2403_v58 = vmul.f32 %v14520_v12, %v14818_v25  ;;  %v2490_v57 = vrot.slane %v2375_v16, 2  ;;  %v2406_v59 = vmul.f32 %v14810_v0, %v14819_v1  ;;  %v2407_v6 = vmul.f32 %v14520_v12, %v14820_v20 }
 0x1ec   :  { %v2410_v54 = vmul.f32 %v14810_v0, %v14821_v52  ;;  %v2411_v30 = vmul.f32 %v14520_v12, %v14822_v48  ;;  %v2414_v36 = vmul.f32 %v14810_v0, %v14823_v23  ;;  %v2415_v61 = vmul.f32 %v14520_v12, %v14824_v60 }
 0x1ed   :  { %v2493_v16 = vrot.slane %v2378_v24, 2  ;;  %v14826_v21 = vrot.slane %v14825_v44, 2  ;;  %v2496_v13 = vrot.slane %v2379_v19, 2  ;;  %v2499_v41 = vrot.slane %v2382_v29, 2 }
 0x1ee   :  { %v2502_v10 = vrot.slane %v2383_v38, 2  ;;  %v2491_v18 = vsel %vm1684_vm0, %v14828_v33, %v2490_v57  ;;  %v2505_v34 = vrot.slane %v2386_v53, 2  ;;  %v2508_v22 = vrot.slane %v2387_v26, 2  ;;  %v14832_v38 = vld [vmem:[#allocation235_spill] sm:$0xff]  ;;  %v14834_v33 = vld [vmem:[#allocation190_spill] sm:$0xff] }
 0x1ef   :  { %v2485_v51 = vsel %vm1684_vm0, %v14826_v21, %v2484_v45  ;;  %v2523_v0 = vrot.slane %v2398_v4, 2  ;;  %v2526_v17 = vrot.slane %v2399_v47, 2  ;;  %v2529_v28 = vrot.slane %v2402_v9, 2  ;;  %v14836_v4 = vld [vmem:[#allocation263_spill] sm:$0xff]  ;;  %v14838_v57 = vld [vmem:[#allocation218_spill] sm:$0xff] }
 0x1f0   :  { %v2532_v12 = vrot.slane %v2403_v58, 2  ;;  %v2535_v42 = vrot.slane %v2406_v59, 2  ;;  %v14830_v24 = vrot.slane %v14829_v50, 2  ;;  %v2538_v45 = vrot.slane %v2407_v6, 2  ;;  %v14841_v6 = vld [vmem:[#allocation288_spill] sm:$0xff] }
 0x1f1   :  { %v2541_v19 = vrot.slane %v2410_v54, 2  ;;  %v2544_v29 = vrot.slane %v2411_v30, 2  ;;  %v14833_v21 = vrot.slane %v14832_v38, 2  ;;  %v14835_v53 = vrot.slane %v14834_v33, 2  ;;  %v14846_v38 = vld [vmem:[#allocation339_spill] sm:$0xff] }
 0x1f2   :  { %v9975_v44 = vsel %vm1684_vm0, %v14830_v24, %v2493_v16  ;;  %v14837_v47 = vrot.slane %v14836_v4, 2  ;;  %v2547_v58 = vrot.slane %v2414_v36, 2  ;;  %v14839_v59 = vrot.slane %v14838_v57, 2  ;;  %v14848_v36 = vld [vmem:[#allocation353_spill] sm:$0xff]  ;;  %v14852_v57 = vld [vmem:[#allocation408_spill] sm:$0xff] }
 0x1f3   :  { %14831 = vst [vmem:[#allocation379_spill] sm:$0xff] %v9975_v44  ;;  %v2497_v35 = vsel %vm1684_vm0, %v14833_v21, %v2496_v13  ;;  %v2500_v26 = vsel %vm1684_vm0, %v14835_v53, %v2499_v41  ;;  %v14842_v54 = vrot.slane %v14841_v6, 2  ;;  %v14844_v13 = vld [vmem:[#allocation320_spill] sm:$0xff]  ;;  %v2550_v41 = vrot.slane %v2415_v61, 2  ;;  %v14854_v6 = vld [vmem:[#allocation425_spill] sm:$0xff]  ;;  %v14856_v61 = vld [vmem:[#allocation442_spill] sm:$0xff] }
 0x1f4   :  { %v2503_v9 = vsel %vm1684_vm0, %v14837_v47, %v2502_v10  ;;  %v9989_v50 = vsel %vm1684_vm0, %v14839_v59, %v2505_v34  ;;  %v14845_v16 = vrot.slane %v14844_v13, 2  ;;  %v14847_v21 = vrot.slane %v14846_v38, 2  ;;  %v14850_v34 = vld [vmem:[#allocation394_spill] sm:$0xff] }
 0x1f5   :  { %14840 = vst [vmem:[#allocation380_spill] sm:$0xff] %v9989_v50  ;;  %v9994_v30 = vsel %vm1684_vm0, %v14842_v54, %v2508_v22  ;;  %v14849_v33 = vrot.slane %v14848_v36, 2  ;;  %v14851_v4 = vrot.slane %v14850_v34, 2  ;;  %v14853_v22 = vrot.slane %v14852_v57, 2  ;;  %v14860_v36 = vld [vmem:[#allocation424_spill] sm:$0xff]  ;;  %v14905_v50 = vld [vmem:[#allocation177_spill] sm:$0xff] }
 0x1f6   :  { %14843 = vst [vmem:[#allocation167_spill] sm:$0xff] %v9994_v30  ;;  %v2524_v24 = vsel %vm1684_vm0, %v14845_v16, %v2523_v0  ;;  %v2527_v10 = vsel %vm1684_vm0, %v14847_v21, %v2526_v17  ;;  %v14855_v54 = vrot.slane %v14854_v6, 2  ;;  %v14857_v13 = vrot.slane %v14856_v61, 2  ;;  %v14858_v16 = vld [vmem:[#allocation458_spill] sm:$0xff] }
 0x1f7   :  { %v2530_v53 = vsel %vm1684_vm0, %v14849_v33, %v2529_v28  ;;  %v2533_v47 = vsel %vm1684_vm0, %v14851_v4, %v2532_v12  ;;  %v2536_v59 = vsel %vm1684_vm0, %v14853_v22, %v2535_v42  ;;  %v14859_v38 = vrot.slane %v14858_v16, 2  ;;  %v14863_v4 = vld [vmem:[#allocation478_spill] sm:$0xff] }
 0x1f8   :  { %v2539_v0 = vsel %vm1684_vm0, %v14855_v54, %v2538_v45  ;;  %v2542_v17 = vsel %vm1684_vm0, %v14857_v13, %v2541_v19  ;;  %v2593_v21 = vadd.f32 %v2485_v51, %v9862_v49  ;;  %v14861_v12 = vrot.slane %v14860_v36, 2  ;;  %v14873_v13 = vld [vmem:[#allocation236_spill] sm:$0xff] }
 0x1f9   :  { %v2545_v28 = vsel %vm1684_vm0, %v14859_v38, %v2544_v29  ;;  %v2595_v42 = vadd.f32 %v2491_v18, %v9883_v2  ;;  %v2597_v34 = vadd.f32 %v2497_v35, %v9889_v5  ;;  %v2598_v45 = vadd.f32 %v2500_v26, %v9892_v14  ;;  %v14866_v14 = vld [vmem:[#allocation49_spill] sm:$0xff]  ;;  %v14875_v38 = vld [vmem:[#allocation264_spill] sm:$0xff] }
 0x1fa   :  { %v10024_v33 = vsel %vm1684_vm0, %v14861_v12, %v2547_v58  ;;  %v14864_v57 = vrot.slane %v14863_v4, 2  ;;  %v2599_v29 = vadd.f32 %v2503_v9, %v9895_v46  ;;  %v2606_v49 = vadd.f32 %v2524_v24, %v9898_v43  ;;  %v14877_v12 = vld [vmem:[#allocation277_spill] sm:$0xff] }
 0x1fb   :  { %14862 = vst [vmem:[#allocation23_spill] sm:$0xff] %v10024_v33  ;;  %v2607_v51 = vadd.f32 %v2527_v10, %v9901_v39  ;;  %v10038_v58 = vadd.f32 %v2530_v53, %v9904_v40  ;;  %v10041_v18 = vadd.f32 %v2533_v47, %v9909_v56  ;;  %v10044_v2 = vadd.f32 %v2536_v59, %v9912_v62  ;;  %v14867_v39 = vld [vmem:[#allocation94_spill] sm:$0xff]  ;;  %v14870_v53 = vld [vmem:[#allocation376_spill] sm:$0xff] }
 0x1fc   :  { %v10032_v19 = vsel %vm1684_vm0, %v14864_v57, %v2550_v41  ;;  %v10047_v5 = vadd.f32 %v2539_v0, %v9915_v3  ;;  %v2636_v35 = vmul.f32 %v9744_v8, %v14866_v14  ;;  %v2640_v46 = vmul.f32 %v9752_v55, %v14866_v14 }
 0x1fd   :  { %14865 = vst [vmem:[#allocation193_spill] sm:$0xff] %v10032_v19  ;;  %v2644_v43 = vmul.f32 %v9763_v37, %v14866_v14  ;;  %v2647_v40 = vmul.f32 %v14867_v39, %v14813_v32  ;;  %v2648_v56 = vmul.f32 %v14866_v14, %v14814_v63  ;;  %v2663_v62 = vmul.f32 %v14867_v39, %v14817_v31 }
 0x1fe   :  { %v2664_v3 = vmul.f32 %v14866_v14, %v14818_v25  ;;  %v2667_v8 = vmul.f32 %v14867_v39, %v14819_v1  ;;  %v10066_v55 = vadd.f32 %v2542_v17, %v9920_v15  ;;  %v10070_v37 = vmul.f32 %v9748_v27, %v14867_v39 }
 0x1ff   :  { %v2668_v32 = vmul.f32 %v14866_v14, %v14820_v20  ;;  %v2671_v63 = vmul.f32 %v14867_v39, %v14821_v52  ;;  %v10078_v31 = vmul.f32 %v9759_v11, %v14867_v39  ;;  %v2672_v25 = vmul.f32 %v14866_v14, %v14822_v48 }
 0x200   :  { %14868 = vst [vmem:[#allocation151_spill] sm:$0xff] %v10070_v37  ;;  %v2675_v15 = vmul.f32 %v14867_v39, %v14823_v23  ;;  %v2676_v27 = vmul.f32 %v14866_v14, %v14824_v60  ;;  %v2749_v1 = vrot.slane %v2636_v35, 2  ;;  %v2755_v26 = vrot.slane %v2640_v46, 2  ;;  %v14871_v60 = vld [vmem:[#allocation203_spill] sm:$0xff]  ;;  %v14879_v35 = vld [vmem:[#allocation289_spill] sm:$0xff] }
 0x201   :  { %14869 = vst [vmem:[#allocation164_spill] sm:$0xff] %v10078_v31  ;;  %v2761_v9 = vrot.slane %v2644_v43, 2  ;;  %v2764_v20 = vrot.slane %v2647_v40, 2  ;;  %v2767_v24 = vrot.slane %v2648_v56, 2  ;;  %v2788_v41 = vrot.slane %v2663_v62, 2  ;;  %v14881_v40 = vld [vmem:[#allocation354_spill] sm:$0xff] }
 0x202   :  { %v2791_v52 = vrot.slane %v2664_v3, 2  ;;  %v2794_v10 = vrot.slane %v2667_v8, 2  ;;  %v2613_v11 = vadd.f32 %v2545_v28, %v14870_v53  ;;  %v2797_v22 = vrot.slane %v2668_v32, 2  ;;  %v14883_v3 = vld [vmem:[#allocation395_spill] sm:$0xff] }
 0x203   :  { %v2800_v48 = vrot.slane %v2671_v63, 2  ;;  %v2803_v23 = vrot.slane %v2672_v25, 2  ;;  %v2806_v6 = vrot.slane %v2675_v15, 2  ;;  %v2809_v54 = vrot.slane %v2676_v27, 2  ;;  %v14885_v63 = vld [vmem:[#allocation409_spill] sm:$0xff]  ;;  %v14887_v27 = vld [vmem:[#allocation426_spill] sm:$0xff] }
 0x204   :  { %v14872_v0 = vrot.slane %v14871_v60, 2  ;;  %v14874_v17 = vrot.slane %v14873_v13, 2  ;;  %v14876_v36 = vrot.slane %v14875_v38, 2  ;;  %v14878_v4 = vrot.slane %v14877_v12, 2 }
 0x205   :  { %v14880_v46 = vrot.slane %v14879_v35, 2  ;;  %v14882_v56 = vrot.slane %v14881_v40, 2  ;;  %v14884_v8 = vrot.slane %v14883_v3, 2  ;;  %v14886_v25 = vrot.slane %v14885_v63, 2  ;;  %v10154_v40 = vld [vmem:[#allocation2 + $0x158] sm:$0x3] }
 0x206   :  { %v2750_v61 = vsel %vm1684_vm0, %v14872_v0, %v2749_v1  ;;  %v2756_v16 = vsel %vm1684_vm0, %v14874_v17, %v2755_v26  ;;  %v2762_v28 = vsel %vm1684_vm0, %v14876_v36, %v2761_v9  ;;  %v2765_v57 = vsel %vm1684_vm0, %v14878_v4, %v2764_v20  ;;  %v14889_v9 = vld [vmem:[#allocation443_spill] sm:$0xff]  ;;  %v10125_v0 = vld [vmem:[#allocation2 + $0x1a8] sm:$0x3]  ;;  %v14893_v17 = vld [vmem:[#allocation438_spill] sm:$0xff] }
 0x207   :  { %v2768_v43 = vsel %vm1684_vm0, %v14880_v46, %v2767_v24  ;;  %v2789_v62 = vsel %vm1684_vm0, %v14882_v56, %v2788_v41  ;;  %v2792_v32 = vsel %vm1684_vm0, %v14884_v8, %v2791_v52  ;;  %v2795_v15 = vsel %vm1684_vm0, %v14886_v25, %v2794_v10  ;;  %v10123_v41 = vld [vmem:[#allocation2 + $0x2a8] sm:$0x3]  ;;  %v14891_v52 = vld [vmem:[#allocation459_spill] sm:$0xff]  ;;  %v10188_v63 = vld [vmem:[#allocation2 + $0x1b0] sm:$0x3] }
 0x208   :  { %v14888_v1 = vrot.slane %v14887_v27, 2  ;;  %v14890_v20 = vrot.slane %v14889_v9, 2  ;;  %v10119_v53 = vadd.f32 %v2750_v61, %v2593_v21  ;;  %v10121_v60 = vadd.f32 %v2756_v16, %v2595_v42  ;;  %v14895_v36 = vld [vmem:[#allocation479_spill] sm:$0xff]  ;;  %v10138_v42 = vld [vmem:[#allocation2 + $0x218] sm:$0x3]  ;;  %14901 = vst [vmem:[#allocation198_spill] sm:$0xff] %v10188_v63 }
 0x209   :  { %v14892_v13 = vrot.slane %v14891_v52, 2  ;;  %v14894_v38 = vrot.slane %v14893_v17, 2  ;;  %v14896_v12 = vrot.slane %v14895_v36, 2  ;;  %v10136_v21 = vadd.f32 %v2762_v28, %v2597_v34  ;;  %v10140_v61 = vld [vmem:[#allocation2 + $0x1f8] sm:$0x3] }
 0x20a   :  { %v2798_v26 = vsel %vm1684_vm0, %v14888_v1, %v2797_v22  ;;  %v2801_v24 = vsel %vm1684_vm0, %v14890_v20, %v2800_v48  ;;  %v10142_v16 = vld [vmem:[#allocation2 + $0x248] sm:$0x3]  ;;  %v10144_v4 = vadd.f32 %v2765_v57, %v2598_v45  ;;  %v10146_v35 = vadd.f32 %v2768_v43, %v2599_v29  ;;  %v10156_v34 = vld [vmem:[#allocation2 + $0x2b8] sm:$0x3]  ;;  %v10164_v45 = vld [vmem:[#allocation2 + $0x190] sm:$0x3] }
 0x20b   :  { %v2804_v10 = vsel %vm1684_vm0, %v14892_v13, %v2803_v23  ;;  %v2807_v22 = vsel %vm1684_vm0, %v14894_v38, %v2806_v6  ;;  %v2810_v48 = vsel %vm1684_vm0, %v14896_v12, %v2809_v54  ;;  %v10148_v23 = vadd.f32 %v2789_v62, %v2606_v49  ;;  %v10152_v6 = vld [vmem:[#allocation2 + $0x1b8] sm:$0x3]  ;;  %v10166_v29 = vld [vmem:[#allocation2 + $0x280] sm:$0x3]  ;;  %v14899_v57 = vld [vmem:[#allocation21_spill] sm:$0xff] }
 0x20c   :  { %14897 = vst [vmem:[#allocation58_spill] sm:$0xff] %v10144_v4  ;;  %v10150_v46 = vadd.f32 %v2792_v32, %v2607_v51  ;;  %v10159_v54 = vadd.f32 %v2795_v15, %v10038_v58  ;;  %v10162_v28 = vadd.f32 %v2798_v26, %v10041_v18  ;;  %v14898_v49 = vld [vmem:[#allocation22_spill] sm:$0xff]  ;;  %v3008_v43 = vmul.f32 %v14899_v57, %v10125_v0  ;;  %v10178_v58 = vld [vmem:[#allocation2 + $0x220] sm:$0x3]  ;;  %v10203_v20 = vld [vmem:[#allocation2 + $0x150] sm:$0x3] }
 0x20d   :  { %v3001_v51 = vmul.f32 %v14898_v49, %v10123_v41  ;;  %v10173_v56 = vadd.f32 %v2801_v24, %v10044_v2  ;;  %v10176_v62 = vadd.f32 %v2804_v10, %v10047_v5  ;;  %v10180_v18 = vld [vmem:[#allocation2 + $0x100] sm:$0x3]  ;;  %v3009_v3 = vmul.f32 %v14898_v49, %v10138_v42  ;;  %v10205_v24 = vld [vmem:[#allocation2 + $0x210] sm:$0x3] }
 0x20e   :  { %v3012_v8 = vmul.f32 %v14899_v57, %v10140_v61  ;;  %v10186_v32 = vld [vmem:[#allocation2 + $0x200] sm:$0x3]  ;;  %v3013_v2 = vmul.f32 %v14898_v49, %v10142_v16  ;;  %v3024_v5 = vmul.f32 %v14899_v57, %v10152_v6  ;;  %v3025_v25 = vmul.f32 %v14898_v49, %v10154_v40 }
 0x20f   :  { %14900 = vst [vmem:[#allocation251_spill] sm:$0xff] %v10186_v32  ;;  %v3028_v15 = vmul.f32 %v14899_v57, %v10156_v34  ;;  %v2877_v27 = vadd.f32 %v2807_v22, %v10066_v55  ;;  %v2878_v1 = vadd.f32 %v2810_v48, %v2613_v11  ;;  %v3029_v26 = vmul.f32 %v14898_v49, %v10164_v45 }
 0x210   :  { %v3036_v9 = vmul.f32 %v14899_v57, %v10166_v29  ;;  %v10209_v52 = vmul.f32 %v14898_v49, %v10178_v58  ;;  %v3037_v13 = vmul.f32 %v14898_v49, %v10180_v18  ;;  %v3121_v10 = vrot.slane %v3001_v51, 3 }
 0x211   :  { %v3130_v55 = vrot.slane %v3008_v43, 3  ;;  %v3040_v11 = vmul.f32 %v14899_v57, %v10186_v32  ;;  %v3041_v17 = vmul.f32 %v14898_v49, %v10188_v63  ;;  %v3133_v38 = vrot.slane %v3009_v3, 3 }
 0x212   :  { %14902 = vst [vmem:[#allocation275_spill] sm:$0xff] %v10209_v52  ;;  %v3136_v22 = vrot.slane %v3012_v8, 3  ;;  %v3139_v36 = vrot.slane %v3013_v2, 3  ;;  %v3154_v12 = vrot.slane %v3024_v5, 3  ;;  %v3157_v48 = vrot.slane %v3025_v25, 3  ;;  %v14907_v8 = vld [vmem:[#allocation225_spill] sm:$0xff] }
 0x213   :  { %v3160_v59 = vrot.slane %v3028_v15, 3  ;;  %v10219_v47 = vmul.f32 %v14899_v57, %v10203_v20  ;;  %v10223_v51 = vmul.f32 %v14898_v49, %v10205_v24  ;;  %v3163_v43 = vrot.slane %v3029_v26, 3  ;;  %v14910_v15 = vld [vmem:[#allocation237_spill] sm:$0xff]  ;;  %v14913_v49 = vld [vmem:[#allocation254_spill] sm:$0xff] }
 0x214   :  { %v3172_v4 = vrot.slane %v3036_v9, 3  ;;  %v14906_v33 = vrot.slane %v14905_v50, 3  ;;  %v14908_v2 = vrot.slane %v14907_v8, 3  ;;  %v3175_v25 = vrot.slane %v3037_v13, 3  ;;  %v14952_v57 = vld [vmem:[#allocation178_spill] sm:$0xff] }
 0x215   :  { %14903 = vst [vmem:[#allocation286_spill] sm:$0xff] %v10219_v47  ;;  %14904 = vst [vmem:[#allocation299_spill] sm:$0xff] %v10223_v51  ;;  %v14911_v30 = vrot.slane %v14910_v15, 3  ;;  %v14914_v26 = vrot.slane %v14913_v49, 3  ;;  %v3178_v50 = vrot.slane %v3040_v11, 3  ;;  %v14921_v15 = vld [vmem:[#allocation310_spill] sm:$0xff] }
 0x216   :  { %v3122_v19 = vsel %vm3098_vm1, %v14906_v33, %v3121_v10  ;;  %v10232_v5 = vsel %vm3098_vm1, %v14908_v2, %v3130_v55  ;;  %v3181_v33 = vrot.slane %v3041_v17, 3  ;;  %v14916_v10 = vld [vmem:[#allocation265_spill] sm:$0xff]  ;;  %v14953_v31 = vrot.slane %v14952_v57, 3 }
 0x217   :  { %14909 = vst [vmem:[#allocation308_spill] sm:$0xff] %v10232_v5  ;;  %v10237_v14 = vsel %vm3098_vm1, %v14911_v30, %v3133_v38  ;;  %v10242_v9 = vsel %vm3098_vm1, %v14914_v26, %v3136_v22  ;;  %v14917_v3 = vrot.slane %v14916_v10, 3  ;;  %v14919_v55 = vld [vmem:[#allocation301_spill] sm:$0xff]  ;;  %v14922_v5 = vrot.slane %v14921_v15, 3  ;;  %v14925_v26 = vld [vmem:[#allocation340_spill] sm:$0xff] }
 0x218   :  { %14912 = vst [vmem:[#allocation318_spill] sm:$0xff] %v10237_v14  ;;  %14915 = vst [vmem:[#allocation337_spill] sm:$0xff] %v10242_v9  ;;  %v14920_v2 = vrot.slane %v14919_v55, 3  ;;  %v14923_v38 = vld [vmem:[#allocation321_spill] sm:$0xff]  ;;  %v14926_v11 = vrot.slane %v14925_v26, 3 }
 0x219   :  { %v10247_v8 = vsel %vm3098_vm1, %v14917_v3, %v3139_v36  ;;  %v3158_v30 = vsel %vm3098_vm1, %v14922_v5, %v3157_v48  ;;  %v14924_v49 = vrot.slane %v14923_v38, 3  ;;  %v14927_v3 = vld [vmem:[#allocation410_spill] sm:$0xff]  ;;  %v14954_v51 = vld [vmem:[#allocation205_spill] sm:$0xff] }
 0x21a   :  { %14918 = vst [vmem:[#allocation351_spill] sm:$0xff] %v10247_v8  ;;  %v3155_v13 = vsel %vm3098_vm1, %v14920_v2, %v3154_v12  ;;  %v3164_v17 = vsel %vm3098_vm1, %v14926_v11, %v3163_v43  ;;  %v14928_v55 = vrot.slane %v14927_v3, 3  ;;  %v14930_v2 = vld [vmem:[#allocation427_spill] sm:$0xff]  ;;  %v14934_v43 = vld [vmem:[#allocation68_spill] sm:$0xff]  ;;  %v14955_v47 = vrot.slane %v14954_v51, 3 }
 0x21b   :  { %v3161_v22 = vsel %vm3098_vm1, %v14924_v49, %v3160_v59  ;;  %v14931_v15 = vrot.slane %v14930_v2, 3  ;;  %v14933_v59 = vld [vmem:[#allocation67_spill] sm:$0xff]  ;;  %v10279_v38 = vadd.f32 %v14934_v43, %v10121_v60  ;;  %v14935_v49 = vld [vmem:[#allocation157_spill] sm:$0xff]  ;;  %v14936_v11 = vld [vmem:[#allocation348_spill] sm:$0xff] }
 0x21c   :  { %v10266_v12 = vsel %vm3098_vm1, %v14928_v55, %v3172_v4  ;;  %v10275_v5 = vadd.f32 %v14933_v59, %v10119_v53  ;;  %v10283_v26 = vadd.f32 %v14935_v49, %v10136_v21  ;;  %v14937_v4 = vrot.slane %v14936_v11, 3  ;;  %v14939_v55 = vld [vmem:[#allocation460_spill] sm:$0xff]  ;;  %v14942_v60 = vld [vmem:[#allocation69_spill] sm:$0xff]  ;;  %v14944_v43 = vld [vmem:[#allocation70_spill] sm:$0xff] }
 0x21d   :  { %14929 = vst [vmem:[#allocation333_spill] sm:$0xff] %v10266_v12  ;;  %v10271_v48 = vsel %vm3098_vm1, %v14931_v15, %v3175_v25  ;;  %v14940_v25 = vrot.slane %v14939_v55, 3  ;;  %v10296_v53 = vadd.f32 %v3122_v19, %v10146_v35  ;;  %v10300_v15 = vadd.f32 %v14942_v60, %v10148_v23  ;;  %v10302_v59 = vld [vmem:[#allocation2 + $0x148] sm:$0x3]  ;;  %v14945_v49 = vld [vmem:[#allocation71_spill] sm:$0xff] }
 0x21e   :  { %14932 = vst [vmem:[#allocation316_spill] sm:$0xff] %v10271_v48  ;;  %v10288_v3 = vsel %vm3098_vm1, %v14937_v4, %v3178_v50  ;;  %v10304_v21 = vld [vmem:[#allocation2 + $0x68] sm:$0x3]  ;;  %v10308_v50 = vadd.f32 %v14944_v43, %v10150_v46  ;;  %v10312_v11 = vadd.f32 %v14945_v49, %v10159_v54  ;;  %v14947_v35 = vld [vmem:[#allocation39_spill] sm:$0xff]  ;;  %v10321_v4 = vadd.f32 %v3155_v13, %v10173_v56 }
 0x21f   :  { %14938 = vst [vmem:[#allocation173_spill] sm:$0xff] %v10288_v3  ;;  %v10293_v2 = vsel %vm3098_vm1, %v14940_v25, %v3181_v33  ;;  %14943 = vst [vmem:[#allocation82_spill] sm:$0xff] %v10300_v15  ;;  %v14946_v33 = vld [vmem:[#allocation72_spill] sm:$0xff]  ;;  %v3263_v23 = vmul.f32 %v14947_v35, %v10123_v41  ;;  %v10324_v55 = vadd.f32 %v3158_v30, %v10176_v62 }
 0x220   :  { %14941 = vst [vmem:[#allocation154_spill] sm:$0xff] %v10293_v2  ;;  %v10316_v19 = vadd.f32 %v14946_v33, %v10162_v28  ;;  %v3267_v46 = vmul.f32 %v14947_v35, %v10178_v58  ;;  %v3271_v54 = vmul.f32 %v14947_v35, %v10138_v42  ;;  %v10330_v25 = vadd.f32 %v3161_v22, %v2877_v27  ;;  %v14948_v28 = vld [vmem:[#allocation36_spill] sm:$0xff]  ;;  %v10350_v22 = vld [vmem:[#allocation2 + $0x90] sm:$0x3] }
 0x221   :  { %v10332_v60 = vadd.f32 %v3164_v17, %v2878_v1  ;;  %v10336_v43 = vmul.f32 %v14948_v28, %v10125_v0  ;;  %v3274_v56 = vmul.f32 %v14948_v28, %v10140_v61  ;;  %v3275_v62 = vmul.f32 %v14947_v35, %v10142_v16  ;;  %v10348_v1 = vld [vmem:[#allocation2 + $0x208] sm:$0x3]  ;;  %14951 = vst [vmem:[#allocation440_spill] sm:$0xff] %v10350_v22 }
 0x222   :  { %v3278_v13 = vmul.f32 %v14948_v28, %v10302_v59  ;;  %v3279_v30 = vmul.f32 %v14947_v35, %v10304_v21  ;;  %v3286_v27 = vmul.f32 %v14948_v28, %v10152_v6  ;;  %14950 = vst [vmem:[#allocation335_spill] sm:$0xff] %v10348_v1  ;;  %v3287_v17 = vmul.f32 %v14947_v35, %v10154_v40 }
 0x223   :  { %14949 = vst [vmem:[#allocation155_spill] sm:$0xff] %v10336_v43  ;;  %v3290_v49 = vmul.f32 %v14948_v28, %v10156_v34  ;;  %v3291_v33 = vmul.f32 %v14947_v35, %v10164_v45  ;;  %v3380_v36 = vrot.slane %v3263_v23, 3  ;;  %v3294_v10 = vmul.f32 %v14948_v28, %v10203_v20 }
 0x224   :  { %v3295_v15 = vmul.f32 %v14947_v35, %v10205_v24  ;;  %v3386_v3 = vrot.slane %v3267_v46, 3  ;;  %v3392_v12 = vrot.slane %v3271_v54, 3  ;;  %v3298_v9 = vmul.f32 %v14948_v28, %v10166_v29 }
 0x225   :  { %v3299_v2 = vmul.f32 %v14947_v35, %v10180_v18  ;;  %v3302_v48 = vmul.f32 %v14948_v28, %v10186_v32  ;;  %v3303_v23 = vmul.f32 %v14947_v35, %v10188_v63  ;;  %v3306_v8 = vmul.f32 %v14948_v28, %v10348_v1  ;;  %v14956_v63 = vld [vmem:[#allocation238_spill] sm:$0xff]  ;;  %v14959_v1 = vld [vmem:[#allocation255_spill] sm:$0xff] }
 0x226   :  { %v3307_v14 = vmul.f32 %v14947_v35, %v10350_v22  ;;  %v3395_v54 = vrot.slane %v3274_v56, 3  ;;  %v3381_v37 = vsel %vm3098_vm1, %v14953_v31, %v3380_v36  ;;  %v3398_v44 = vrot.slane %v3275_v62, 3 }
 0x227   :  { %v3401_v7 = vrot.slane %v3278_v13, 3  ;;  %v3404_v39 = vrot.slane %v3279_v30, 3  ;;  %v3387_v52 = vsel %vm3098_vm1, %v14955_v47, %v3386_v3  ;;  %v14957_v32 = vrot.slane %v14956_v63, 3  ;;  %v14962_v47 = vld [vmem:[#allocation266_spill] sm:$0xff] }
 0x228   :  { %v3413_v35 = vrot.slane %v3286_v27, 3  ;;  %v3416_v22 = vrot.slane %v3287_v17, 3  ;;  %v3419_v46 = vrot.slane %v3290_v49, 3  ;;  %v3422_v56 = vrot.slane %v3291_v33, 3  ;;  %v14971_v17 = vld [vmem:[#allocation303_spill] sm:$0xff] }
 0x229   :  { %v10384_v28 = vsel %vm3098_vm1, %v14957_v32, %v3392_v12  ;;  %v3425_v43 = vrot.slane %v3294_v10, 3  ;;  %v3428_v57 = vrot.slane %v3295_v15, 3  ;;  %v14960_v31 = vrot.slane %v14959_v1, 3  ;;  %v14965_v32 = vld [vmem:[#allocation278_spill] sm:$0xff] }
 0x22a   :  { %14958 = vst [vmem:[#allocation297_spill] sm:$0xff] %v10384_v28  ;;  %v3431_v62 = vrot.slane %v3298_v9, 3  ;;  %v3434_v51 = vrot.slane %v3299_v2, 3  ;;  %v3437_v13 = vrot.slane %v3302_v48, 3  ;;  %v14963_v3 = vrot.slane %v14962_v47, 3  ;;  %v14968_v10 = vld [vmem:[#allocation290_spill] sm:$0xff] }
 0x22b   :  { %v10389_v36 = vsel %vm3098_vm1, %v14960_v31, %v3395_v54  ;;  %v14966_v12 = vrot.slane %v14965_v32, 3  ;;  %v14969_v15 = vrot.slane %v14968_v10, 3  ;;  %v3440_v1 = vrot.slane %v3303_v23, 3  ;;  %v14973_v2 = vld [vmem:[#allocation311_spill] sm:$0xff]  ;;  %v14975_v31 = vld [vmem:[#allocation322_spill] sm:$0xff] }
 0x22c   :  { %14961 = vst [vmem:[#allocation152_spill] sm:$0xff] %v10389_v36  ;;  %v10394_v63 = vsel %vm3098_vm1, %v14963_v3, %v3398_v44  ;;  %v14972_v9 = vrot.slane %v14971_v17, 3  ;;  %v14974_v49 = vrot.slane %v14973_v2, 3  ;;  %v3443_v33 = vrot.slane %v3306_v8, 3  ;;  %v14977_v3 = vld [vmem:[#allocation341_spill] sm:$0xff]  ;;  %v14986_v8 = vld [vmem:[#allocation428_spill] sm:$0xff] }
 0x22d   :  { %14964 = vst [vmem:[#allocation189_spill] sm:$0xff] %v10394_v63  ;;  %v10399_v30 = vsel %vm3098_vm1, %v14966_v12, %v3401_v7  ;;  %v10404_v27 = vsel %vm3098_vm1, %v14969_v15, %v3404_v39  ;;  %v3446_v54 = vrot.slane %v3307_v14, 3  ;;  %v14976_v47 = vrot.slane %v14975_v31, 3  ;;  %v14979_v12 = vld [vmem:[#allocation356_spill] sm:$0xff]  ;;  %v14981_v15 = vld [vmem:[#allocation397_spill] sm:$0xff]  ;;  %v15015_v36 = vld [vmem:[#allocation206_spill] sm:$0xff] }
 0x22e   :  { %14967 = vst [vmem:[#allocation62_spill] sm:$0xff] %v10399_v30  ;;  %14970 = vst [vmem:[#allocation315_spill] sm:$0xff] %v10404_v27  ;;  %v3414_v48 = vsel %vm3098_vm1, %v14972_v9, %v3413_v35  ;;  %v3417_v44 = vsel %vm3098_vm1, %v14974_v49, %v3416_v22  ;;  %v14978_v32 = vrot.slane %v14977_v3, 3  ;;  %v14980_v23 = vrot.slane %v14979_v12, 3  ;;  %v14983_v9 = vld [vmem:[#allocation411_spill] sm:$0xff]  ;;  %v14989_v49 = vld [vmem:[#allocation444_spill] sm:$0xff] }
 0x22f   :  { %v3420_v7 = vsel %vm3098_vm1, %v14976_v47, %v3419_v46  ;;  %v14982_v35 = vrot.slane %v14981_v15, 3  ;;  %v14984_v22 = vrot.slane %v14983_v9, 3  ;;  %v14987_v2 = vrot.slane %v14986_v8, 3 }
 0x230   :  { %v3423_v39 = vsel %vm3098_vm1, %v14978_v32, %v3422_v56  ;;  %v3426_v10 = vsel %vm3098_vm1, %v14980_v23, %v3425_v43  ;;  %v14990_v56 = vrot.slane %v14989_v49, 3  ;;  %v14992_v43 = vld [vmem:[#allocation73_spill] sm:$0xff]  ;;  %v10456_v23 = vadd.f32 %v3387_v52, %v10296_v53 }
 0x231   :  { %v3429_v17 = vsel %vm3098_vm1, %v14982_v35, %v3428_v57  ;;  %v10427_v14 = vsel %vm3098_vm1, %v14984_v22, %v3431_v62  ;;  %v10432_v46 = vsel %vm3098_vm1, %v14987_v2, %v3434_v51  ;;  %v10441_v47 = vadd.f32 %v14992_v43, %v10275_v5  ;;  %v14993_v57 = vld [vmem:[#allocation461_spill] sm:$0xff]  ;;  %v14996_v62 = vld [vmem:[#allocation158_spill] sm:$0xff]  ;;  %v15000_v35 = vld [vmem:[#allocation480_spill] sm:$0xff] }
 0x232   :  { %14985 = vst [vmem:[#allocation169_spill] sm:$0xff] %v10427_v14  ;;  %14988 = vst [vmem:[#allocation175_spill] sm:$0xff] %v10432_v46  ;;  %v10437_v31 = vsel %vm3098_vm1, %v14990_v56, %v3437_v13  ;;  %v14994_v3 = vrot.slane %v14993_v57, 3  ;;  %v10450_v12 = vadd.f32 %v14996_v62, %v10279_v38  ;;  %v10453_v51 = vadd.f32 %v3381_v37, %v10283_v26  ;;  %v14997_v13 = vld [vmem:[#allocation407_spill] sm:$0xff]  ;;  %v15003_v22 = vld [vmem:[#allocation76_spill] sm:$0xff] }
 0x233   :  { %14991 = vst [vmem:[#allocation194_spill] sm:$0xff] %v10437_v31  ;;  %v14998_v15 = vrot.slane %v14997_v13, 3  ;;  %v15001_v9 = vrot.slane %v15000_v35, 3  ;;  %v10470_v38 = vadd.f32 %v15003_v22, %v10308_v50  ;;  %v15004_v37 = vld [vmem:[#allocation133_spill] sm:$0xff]  ;;  %v10475_v52 = vadd.f32 %v3414_v48, %v10312_v11  ;;  %v15006_v11 = vld [vmem:[#allocation118_spill] sm:$0xff]  ;;  %v15009_v57 = vld [vmem:[#allocation251_spill] sm:$0xff] }
 0x234   :  { %v10446_v32 = vsel %vm3098_vm1, %v14994_v3, %v3440_v1  ;;  %v3524_v26 = vmul.f32 %v15004_v37, %v10123_v41  ;;  %v10478_v53 = vadd.f32 %v3417_v44, %v10316_v19  ;;  %v10486_v8 = vadd.f32 %v3423_v39, %v10324_v55  ;;  %v15010_v62 = vld [vmem:[#allocation198_spill] sm:$0xff] }
 0x235   :  { %14995 = vst [vmem:[#allocation201_spill] sm:$0xff] %v10446_v32  ;;  %v10461_v5 = vsel %vm3098_vm1, %v14998_v15, %v3443_v33  ;;  %v10466_v1 = vsel %vm3098_vm1, %v15001_v9, %v3446_v54  ;;  %15005 = vst [vmem:[#allocation252_spill] sm:$0xff] %v10475_v52  ;;  %v10481_v33 = vadd.f32 %v3420_v7, %v10321_v4  ;;  %v15011_v15 = vld [vmem:[#allocation335_spill] sm:$0xff]  ;;  %v15012_v9 = vld [vmem:[#allocation440_spill] sm:$0xff] }
 0x236   :  { %14999 = vst [vmem:[#allocation220_spill] sm:$0xff] %v10461_v5  ;;  %15002 = vst [vmem:[#allocation234_spill] sm:$0xff] %v10466_v1  ;;  %v3528_v54 = vmul.f32 %v15004_v37, %v10178_v58  ;;  %v10489_v50 = vadd.f32 %v3426_v10, %v10330_v25  ;;  %v10492_v2 = vadd.f32 %v3429_v17, %v10332_v60  ;;  %v3639_v39 = vrot.slane %v3524_v26, 3 }
 0x237   :  { %v10496_v48 = vmul.f32 %v15006_v11, %v10125_v0  ;;  %v3532_v19 = vmul.f32 %v15004_v37, %v10138_v42  ;;  %v10502_v4 = vmul.f32 %v15006_v11, %v10140_v61  ;;  %v3536_v55 = vmul.f32 %v15004_v37, %v10142_v16 }
 0x238   :  { %v3539_v25 = vmul.f32 %v15006_v11, %v10302_v59  ;;  %v3540_v60 = vmul.f32 %v15004_v37, %v10304_v21  ;;  %v3547_v44 = vmul.f32 %v15006_v11, %v10152_v6  ;;  %v3548_v7 = vmul.f32 %v15004_v37, %v10154_v40 }
 0x239   :  { %15007 = vst [vmem:[#allocation262_spill] sm:$0xff] %v10496_v48  ;;  %15008 = vst [vmem:[#allocation276_spill] sm:$0xff] %v10502_v4  ;;  %v3551_v10 = vmul.f32 %v15006_v11, %v10156_v34  ;;  %v3552_v17 = vmul.f32 %v15004_v37, %v10164_v45  ;;  %v3555_v49 = vmul.f32 %v15006_v11, %v10203_v20  ;;  %v3645_v56 = vrot.slane %v3528_v54, 3  ;;  %v15013_v54 = vld [vmem:[#allocation179_spill] sm:$0xff] }
 0x23a   :  { %v3556_v43 = vmul.f32 %v15004_v37, %v10205_v24  ;;  %v3559_v6 = vmul.f32 %v15006_v11, %v10166_v29  ;;  %v3560_v40 = vmul.f32 %v15004_v37, %v10180_v18  ;;  %v3563_v3 = vmul.f32 %v15006_v11, %v15009_v57 }
 0x23b   :  { %v3564_v13 = vmul.f32 %v15004_v37, %v15010_v62  ;;  %v3567_v35 = vmul.f32 %v15006_v11, %v15011_v15  ;;  %v3568_v22 = vmul.f32 %v15004_v37, %v15012_v9  ;;  %v15014_v52 = vrot.slane %v15013_v54, 3 }
 0x23c   :  { %v3651_v30 = vrot.slane %v3532_v19, 3  ;;  %v3657_v14 = vrot.slane %v3536_v55, 3  ;;  %v15016_v1 = vrot.slane %v15015_v36, 3  ;;  %v3660_v32 = vrot.slane %v3539_v25, 3  ;;  %v15019_v55 = vld [vmem:[#allocation267_spill] sm:$0xff] }
 0x23d   :  { %v3640_v5 = vsel %vm3098_vm1, %v15014_v52, %v3639_v39  ;;  %v3663_v28 = vrot.slane %v3540_v60, 3  ;;  %v3672_v27 = vrot.slane %v3547_v44, 3  ;;  %v3675_v63 = vrot.slane %v3548_v7, 3  ;;  %v15017_v52 = vld [vmem:[#allocation199_spill] sm:$0xff] }
 0x23e   :  { %v3646_v46 = vsel %vm3098_vm1, %v15016_v1, %v3645_v56  ;;  %v3678_v11 = vrot.slane %v3551_v10, 3  ;;  %v3681_v37 = vrot.slane %v3552_v17, 3  ;;  %v3684_v9 = vrot.slane %v3555_v49, 3  ;;  %v15022_v60 = vld [vmem:[#allocation279_spill] sm:$0xff]  ;;  %v15028_v56 = vld [vmem:[#allocation37_spill] sm:$0xff] }
 0x23f   :  { %v3687_v26 = vrot.slane %v3556_v43, 3  ;;  %v3690_v48 = vrot.slane %v3559_v6, 3  ;;  %v3693_v54 = vrot.slane %v3560_v40, 3  ;;  %v3696_v15 = vrot.slane %v3563_v3, 3  ;;  %v15025_v10 = vld [vmem:[#allocation291_spill] sm:$0xff] }
 0x240   :  { %v15018_v19 = vrot.slane %v15017_v52, 3  ;;  %v15020_v31 = vrot.slane %v15019_v55, 3  ;;  %v3699_v1 = vrot.slane %v3564_v13, 3  ;;  %v3702_v25 = vrot.slane %v3567_v35, 3  ;;  %v15033_v3 = vld [vmem:[#allocation323_spill] sm:$0xff]  ;;  %v15036_v35 = vld [vmem:[#allocation342_spill] sm:$0xff] }
 0x241   :  { %v15023_v44 = vrot.slane %v15022_v60, 3  ;;  %v15026_v17 = vrot.slane %v15025_v10, 3  ;;  %v15029_v43 = vrot.slane %v15028_v56, 3  ;;  %v3705_v6 = vrot.slane %v3568_v22, 3  ;;  %v15042_v10 = vld [vmem:[#allocation412_spill] sm:$0xff]  ;;  %v15044_v56 = vld [vmem:[#allocation429_spill] sm:$0xff] }
 0x242   :  { %v3652_v39 = vsel %vm3098_vm1, %v15018_v19, %v3651_v30  ;;  %v10548_v36 = vsel %vm3098_vm1, %v15020_v31, %v3657_v14  ;;  %v15031_v14 = vld [vmem:[#allocation38_spill] sm:$0xff]  ;;  %v15034_v13 = vrot.slane %v15033_v3, 3  ;;  %v15037_v52 = vrot.slane %v15036_v35, 3  ;;  %v15038_v19 = vld [vmem:[#allocation357_spill] sm:$0xff] }
 0x243   :  { %15021 = vst [vmem:[#allocation287_spill] sm:$0xff] %v10548_v36  ;;  %v10553_v7 = vsel %vm3098_vm1, %v15023_v44, %v3660_v32  ;;  %v10558_v49 = vsel %vm3098_vm1, %v15026_v17, %v3663_v28  ;;  %v10563_v30 = vsel %vm3098_vm1, %v15029_v43, %v3672_v27  ;;  %v15032_v31 = vrot.slane %v15031_v14, 3  ;;  %v15040_v27 = vld [vmem:[#allocation398_spill] sm:$0xff]  ;;  %v15046_v14 = vld [vmem:[#allocation445_spill] sm:$0xff] }
 0x244   :  { %15024 = vst [vmem:[#allocation300_spill] sm:$0xff] %v10553_v7  ;;  %15027 = vst [vmem:[#allocation309_spill] sm:$0xff] %v10558_v49  ;;  %v10571_v32 = vsel %vm3098_vm1, %v15034_v13, %v3678_v11  ;;  %v3682_v28 = vsel %vm3098_vm1, %v15037_v52, %v3681_v37  ;;  %v15039_v55 = vrot.slane %v15038_v19, 3  ;;  %v15041_v44 = vrot.slane %v15040_v27, 3  ;;  %v15049_v3 = vld [vmem:[#allocation462_spill] sm:$0xff] }
 0x245   :  { %15030 = vst [vmem:[#allocation319_spill] sm:$0xff] %v10563_v30  ;;  %v3676_v40 = vsel %vm3098_vm1, %v15032_v31, %v3675_v63  ;;  %15035 = vst [vmem:[#allocation338_spill] sm:$0xff] %v10571_v32  ;;  %v15043_v17 = vrot.slane %v15042_v10, 3  ;;  %v15045_v43 = vrot.slane %v15044_v56, 3  ;;  %v15047_v31 = vrot.slane %v15046_v14, 3  ;;  %v15052_v35 = vld [vmem:[#allocation470_spill] sm:$0xff] }
 0x246   :  { %v3685_v60 = vsel %vm3098_vm1, %v15039_v55, %v3684_v9  ;;  %v3688_v22 = vsel %vm3098_vm1, %v15041_v44, %v3687_v26  ;;  %v15050_v13 = vrot.slane %v15049_v3, 3  ;;  %v15053_v26 = vrot.slane %v15052_v35, 3  ;;  %v15056_v55 = vld [vmem:[#allocation481_spill] sm:$0xff] }
 0x247   :  { %v3691_v63 = vsel %vm3098_vm1, %v15043_v17, %v3690_v48  ;;  %v3694_v11 = vsel %vm3098_vm1, %v15045_v43, %v3693_v54  ;;  %v10591_v37 = vsel %vm3098_vm1, %v15047_v31, %v3696_v15  ;;  %v15055_v48 = vld [vmem:[#allocation159_spill] sm:$0xff]  ;;  %v3744_v54 = vadd.f32 %v3640_v5, %v10450_v12 }
 0x248   :  { %15048 = vst [vmem:[#allocation352_spill] sm:$0xff] %v10591_v37  ;;  %v10596_v9 = vsel %vm3098_vm1, %v15050_v13, %v3699_v1  ;;  %v10601_v52 = vsel %vm3098_vm1, %v15053_v26, %v3702_v25  ;;  %v3742_v19 = vadd.f32 %v15055_v48, %v10441_v47  ;;  %v15057_v27 = vrot.slane %v15056_v55, 3  ;;  %v15066_v37 = vld [vmem:[#allocation180_spill] sm:$0xff] }
 0x249   :  { %15051 = vst [vmem:[#allocation393_spill] sm:$0xff] %v10596_v9  ;;  %15054 = vst [vmem:[#allocation18_spill] sm:$0xff] %v10601_v52  ;;  %v3746_v44 = vadd.f32 %v3646_v46, %v10453_v51  ;;  %v3748_v1 = vadd.f32 %v3652_v39, %v10456_v23  ;;  %v10614_v10 = vadd.f32 %v3676_v40, %v10470_v38  ;;  %v15059_v46 = vld [vmem:[#allocation40_spill] sm:$0xff]  ;;  %v15060_v38 = vld [vmem:[#allocation95_spill] sm:$0xff] }
 0x24a   :  { %v10609_v15 = vsel %vm3098_vm1, %v15057_v27, %v3705_v6  ;;  %v10617_v25 = vadd.f32 %v3682_v28, %v10478_v53  ;;  %v10620_v17 = vadd.f32 %v3685_v60, %v10481_v33  ;;  %v10623_v47 = vadd.f32 %v3688_v22, %v10486_v8  ;;  %v15064_v22 = vld [vmem:[#allocation335_spill] sm:$0xff] }
 0x24b   :  { %15058 = vst [vmem:[#allocation19_spill] sm:$0xff] %v10609_v15  ;;  %v10626_v12 = vadd.f32 %v3691_v63, %v10489_v50  ;;  %v10629_v5 = vadd.f32 %v3694_v11, %v10492_v2  ;;  %v3785_v51 = vmul.f32 %v15059_v46, %v10123_v41  ;;  %v3789_v23 = vmul.f32 %v15059_v46, %v10178_v58  ;;  %v15065_v63 = vld [vmem:[#allocation440_spill] sm:$0xff] }
 0x24c   :  { %v10637_v53 = vmul.f32 %v15060_v38, %v10125_v0  ;;  %v3793_v33 = vmul.f32 %v15059_v46, %v10138_v42  ;;  %v10643_v8 = vmul.f32 %v15060_v38, %v10140_v61  ;;  %v3797_v50 = vmul.f32 %v15059_v46, %v10142_v16 }
 0x24d   :  { %v10649_v41 = vmul.f32 %v15060_v38, %v10302_v59  ;;  %v3801_v2 = vmul.f32 %v15059_v46, %v10304_v21  ;;  %v3812_v0 = vmul.f32 %v15060_v38, %v10156_v34  ;;  %v3813_v39 = vmul.f32 %v15059_v46, %v10164_v45 }
 0x24e   :  { %15061 = vst [vmem:[#allocation441_spill] sm:$0xff] %v10637_v53  ;;  %15062 = vst [vmem:[#allocation83_spill] sm:$0xff] %v10643_v8  ;;  %v3816_v61 = vmul.f32 %v15060_v38, %v10203_v20  ;;  %v3817_v6 = vmul.f32 %v15059_v46, %v10205_v24  ;;  %v3820_v40 = vmul.f32 %v15060_v38, %v10166_v29  ;;  %v3898_v43 = vrot.slane %v3785_v51, 3  ;;  %v15136_v8 = vld [vmem:[#allocation241_spill] sm:$0xff] }
 0x24f   :  { %15063 = vst [vmem:[#allocation156_spill] sm:$0xff] %v10649_v41  ;;  %v3821_v28 = vmul.f32 %v15059_v46, %v10180_v18  ;;  %v3824_v60 = vmul.f32 %v15060_v38, %v15009_v57  ;;  %v3825_v34 = vmul.f32 %v15059_v46, %v15010_v62  ;;  %v3828_v45 = vmul.f32 %v15060_v38, %v15064_v22 }
 0x250   :  { %v3829_v56 = vmul.f32 %v15059_v46, %v15065_v63  ;;  %v3904_v11 = vrot.slane %v3789_v23, 3  ;;  %v3910_v14 = vrot.slane %v3793_v33, 3  ;;  %v3916_v3 = vrot.slane %v3797_v50, 3  ;;  %v15068_v33 = vld [vmem:[#allocation207_spill] sm:$0xff] }
 0x251   :  { %v3922_v13 = vrot.slane %v3801_v2, 3  ;;  %v3937_v35 = vrot.slane %v3812_v0, 3  ;;  %v3940_v26 = vrot.slane %v3813_v39, 3  ;;  %v3943_v48 = vrot.slane %v3816_v61, 3  ;;  %v15070_v2 = vld [vmem:[#allocation239_spill] sm:$0xff]  ;;  %v15072_v61 = vld [vmem:[#allocation268_spill] sm:$0xff] }
 0x252   :  { %v3946_v55 = vrot.slane %v3817_v6, 3  ;;  %v3949_v27 = vrot.slane %v3820_v40, 3  ;;  %v3952_v32 = vrot.slane %v3821_v28, 3  ;;  %v3955_v30 = vrot.slane %v3824_v60, 3  ;;  %v15074_v28 = vld [vmem:[#allocation292_spill] sm:$0xff] }
 0x253   :  { %v3958_v53 = vrot.slane %v3825_v34, 3  ;;  %v3961_v4 = vrot.slane %v3828_v45, 3  ;;  %v3964_v52 = vrot.slane %v3829_v56, 3  ;;  %v15067_v51 = vrot.slane %v15066_v37, 3  ;;  %v15077_v37 = vld [vmem:[#allocation324_spill] sm:$0xff] }
 0x254   :  { %v15069_v31 = vrot.slane %v15068_v33, 3  ;;  %v15071_v0 = vrot.slane %v15070_v2, 3  ;;  %v15073_v6 = vrot.slane %v15072_v61, 3  ;;  %v15075_v60 = vrot.slane %v15074_v28, 3  ;;  %v15089_v28 = vld [vmem:[#allocation430_spill] sm:$0xff] }
 0x255   :  { %v3899_v23 = vsel %vm3098_vm1, %v15067_v51, %v3898_v43  ;;  %v15078_v45 = vrot.slane %v15077_v37, 3  ;;  %v15080_v43 = vld [vmem:[#allocation343_spill] sm:$0xff]  ;;  %v15082_v51 = vld [vmem:[#allocation358_spill] sm:$0xff] }
 0x256   :  { %v3905_v50 = vsel %vm3098_vm1, %v15069_v31, %v3904_v11  ;;  %v3911_v39 = vsel %vm3098_vm1, %v15071_v0, %v3910_v14  ;;  %v3917_v40 = vsel %vm3098_vm1, %v15073_v6, %v3916_v3  ;;  %v10690_v34 = vsel %vm3098_vm1, %v15075_v60, %v3922_v13  ;;  %v15085_v3 = vld [vmem:[#allocation399_spill] sm:$0xff]  ;;  %v15087_v13 = vld [vmem:[#allocation413_spill] sm:$0xff]  ;;  %v15091_v37 = vld [vmem:[#allocation446_spill] sm:$0xff] }
 0x257   :  { %15076 = vst [vmem:[#allocation457_spill] sm:$0xff] %v10690_v34  ;;  %v10695_v56 = vsel %vm3098_vm1, %v15078_v45, %v3937_v35  ;;  %v15081_v11 = vrot.slane %v15080_v43, 3  ;;  %v15083_v14 = vrot.slane %v15082_v51, 3  ;;  %v15086_v2 = vrot.slane %v15085_v3, 3  ;;  %v15093_v43 = vld [vmem:[#allocation391_spill] sm:$0xff]  ;;  %v15098_v3 = vld [vmem:[#allocation482_spill] sm:$0xff] }
 0x258   :  { %15079 = vst [vmem:[#allocation65_spill] sm:$0xff] %v10695_v56  ;;  %v15088_v61 = vrot.slane %v15087_v13, 3  ;;  %v15090_v35 = vrot.slane %v15089_v28, 3  ;;  %v15092_v45 = vrot.slane %v15091_v37, 3  ;;  %v15095_v51 = vld [vmem:[#allocation471_spill] sm:$0xff]  ;;  %v4007_v13 = vadd.f32 %v3899_v23, %v3742_v19  ;;  %v15134_v56 = vld [vmem:[#allocation181_spill] sm:$0xff] }
 0x259   :  { %v3941_v31 = vsel %vm3098_vm1, %v15081_v11, %v3940_v26  ;;  %v10703_v33 = vsel %vm3098_vm1, %v15083_v14, %v3943_v48  ;;  %v3947_v0 = vsel %vm3098_vm1, %v15086_v2, %v3946_v55  ;;  %v15094_v11 = vrot.slane %v15093_v43, 3 }
 0x25a   :  { %15084 = vst [vmem:[#allocation66_spill] sm:$0xff] %v10703_v33  ;;  %v3950_v6 = vsel %vm3098_vm1, %v15088_v61, %v3949_v27  ;;  %v3953_v60 = vsel %vm3098_vm1, %v15090_v35, %v3952_v32  ;;  %v3956_v26 = vsel %vm3098_vm1, %v15092_v45, %v3955_v30  ;;  %v15096_v14 = vrot.slane %v15095_v51, 3  ;;  %v15101_v30 = vld [vmem:[#allocation43_spill] sm:$0xff] }
 0x25b   :  { %v3959_v48 = vsel %vm3098_vm1, %v15094_v11, %v3958_v53  ;;  %v15099_v2 = vrot.slane %v15098_v3, 3  ;;  %v4009_v32 = vadd.f32 %v3905_v50, %v3744_v54  ;;  %v4011_v61 = vadd.f32 %v3911_v39, %v3746_v44  ;;  %v15102_v54 = vld [vmem:[#allocation216_spill] sm:$0xff]  ;;  %v15109_v3 = vld [vmem:[#allocation231_spill] sm:$0xff] }
 0x25c   :  { %v10723_v55 = vsel %vm3098_vm1, %v15096_v14, %v3961_v4  ;;  %v4013_v28 = vadd.f32 %v3917_v40, %v3748_v1  ;;  %v4050_v35 = vmul.f32 %v15101_v30, %v10178_v58  ;;  %v4054_v53 = vmul.f32 %v15101_v30, %v10138_v42  ;;  %v15107_v14 = vld [vmem:[#allocation240_spill] sm:$0xff] }
 0x25d   :  { %15097 = vst [vmem:[#allocation389_spill] sm:$0xff] %v10723_v55  ;;  %v10728_v27 = vsel %vm3098_vm1, %v15099_v2, %v3964_v52  ;;  %v4058_v37 = vmul.f32 %v15101_v30, %v10142_v16  ;;  %v4062_v4 = vmul.f32 %v15101_v30, %v10304_v21  ;;  %v4078_v52 = vmul.f32 %v15101_v30, %v10205_v24 }
 0x25e   :  { %15100 = vst [vmem:[#allocation390_spill] sm:$0xff] %v10728_v27  ;;  %v4021_v19 = vadd.f32 %v3941_v31, %v10614_v10  ;;  %v4081_v44 = vmul.f32 %v15102_v54, %v10166_v29  ;;  %v4082_v58 = vmul.f32 %v15101_v30, %v10180_v18  ;;  %v4085_v42 = vmul.f32 %v15102_v54, %v15009_v57  ;;  %v15173_v27 = vld [vmem:[#allocation182_spill] sm:$0xff] }
 0x25f   :  { %v4023_v1 = vadd.f32 %v3947_v0, %v10617_v25  ;;  %v4024_v16 = vadd.f32 %v3950_v6, %v10620_v17  ;;  %v4086_v21 = vmul.f32 %v15101_v30, %v15010_v62  ;;  %v4089_v24 = vmul.f32 %v15102_v54, %v15064_v22  ;;  %v15105_v6 = vld [vmem:[#allocation208_spill] sm:$0xff] }
 0x260   :  { %v10755_v10 = vmul.f32 %v15102_v54, %v10302_v59  ;;  %v10759_v29 = vmul.f32 %v15102_v54, %v10203_v20  ;;  %v4090_v18 = vmul.f32 %v15101_v30, %v15065_v63  ;;  %v4163_v57 = vrot.slane %v4050_v35, 3  ;;  %v15113_v35 = vld [vmem:[#allocation400_spill] sm:$0xff] }
 0x261   :  { %v4169_v25 = vrot.slane %v4054_v53, 3  ;;  %v4175_v17 = vrot.slane %v4058_v37, 3  ;;  %v4181_v23 = vrot.slane %v4062_v4, 3  ;;  %v4205_v50 = vrot.slane %v4078_v52, 3  ;;  %v10783_v4 = vld [vmem:[#allocation2 + $0x2a8] sm:$0x7] }
 0x262   :  { %15103 = vst [vmem:[#allocation484_spill] sm:$0xff] %v10755_v10  ;;  %15104 = vst [vmem:[#allocation485_spill] sm:$0xff] %v10759_v29  ;;  %v4025_v62 = vadd.f32 %v3953_v60, %v10623_v47  ;;  %v4208_v39 = vrot.slane %v4081_v44, 3  ;;  %v4211_v22 = vrot.slane %v4082_v58, 3  ;;  %v4214_v40 = vrot.slane %v4085_v42, 3  ;;  %v15115_v44 = vld [vmem:[#allocation414_spill] sm:$0xff] }
 0x263   :  { %v4026_v59 = vadd.f32 %v3956_v26, %v10626_v12  ;;  %v4027_v31 = vadd.f32 %v3959_v48, %v10629_v5  ;;  %v4217_v0 = vrot.slane %v4086_v21, 3  ;;  %v4220_v20 = vrot.slane %v4089_v24, 3  ;;  %v15111_v5 = vld [vmem:[#allocation16_spill] sm:$0xff]  ;;  %v10785_v52 = vld [vmem:[#allocation2 + $0x218] sm:$0x7]  ;;  %v15118_v21 = vld [vmem:[#allocation431_spill] sm:$0xff] }
 0x264   :  { %v15106_v45 = vrot.slane %v15105_v6, 3  ;;  %v4223_v51 = vrot.slane %v4090_v18, 3  ;;  %v15108_v47 = vrot.slane %v15107_v14, 3  ;;  %v15110_v2 = vrot.slane %v15109_v3, 3  ;;  %v10802_v6 = vld [vmem:[#allocation2 + $0x1b8] sm:$0x7] }
 0x265   :  { %v15112_v26 = vrot.slane %v15111_v5, 3  ;;  %v15114_v53 = vrot.slane %v15113_v35, 3  ;;  %v15116_v58 = vrot.slane %v15115_v44, 3  ;;  %v15119_v24 = vrot.slane %v15118_v21, 3 }
 0x266   :  { %v4164_v63 = vsel %vm3098_vm1, %v15106_v45, %v4163_v57  ;;  %v4170_v60 = vsel %vm3098_vm1, %v15108_v47, %v4169_v25  ;;  %v4176_v12 = vsel %vm3098_vm1, %v15110_v2, %v4175_v17  ;;  %v15120_v57 = vld [vmem:[#allocation447_spill] sm:$0xff]  ;;  %v15135_v41 = vrot.slane %v15134_v56, 4  ;;  %v15142_v56 = vld [vmem:[#allocation42_spill] sm:$0xff] }
 0x267   :  { %v4182_v48 = vsel %vm3098_vm1, %v15112_v26, %v4181_v23  ;;  %v4206_v37 = vsel %vm3098_vm1, %v15114_v53, %v4205_v50  ;;  %v10790_v42 = vsel %vm3098_vm1, %v15116_v58, %v4208_v39  ;;  %v4212_v18 = vsel %vm3098_vm1, %v15119_v24, %v4211_v22  ;;  %v10800_v50 = vld [vmem:[#allocation2 + $0x248] sm:$0x7]  ;;  %v15122_v45 = vld [vmem:[#allocation463_spill] sm:$0xff]  ;;  %v10812_v26 = vld [vmem:[#allocation2 + $0x158] sm:$0x7] }
 0x268   :  { %15117 = vst [vmem:[#allocation486_spill] sm:$0xff] %v10790_v42  ;;  %v15121_v25 = vrot.slane %v15120_v57, 3  ;;  %v10798_v23 = vadd.f32 %v4164_v63, %v4007_v13  ;;  %v15123_v14 = vrot.slane %v15122_v45, 3  ;;  %v15124_v39 = vld [vmem:[#allocation472_spill] sm:$0xff]  ;;  %v4274_v5 = vadd.f32 %v4170_v60, %v4009_v32  ;;  %v10816_v13 = vld [vmem:[#allocation2 + $0x190] sm:$0x7] }
 0x269   :  { %v15125_v3 = vrot.slane %v15124_v39, 3  ;;  %v10810_v22 = vadd.f32 %v4176_v12, %v4011_v61  ;;  %v15126_v63 = vld [vmem:[#allocation14_spill] sm:$0xff]  ;;  %v4278_v44 = vadd.f32 %v4182_v48, %v4013_v28  ;;  %v10821_v58 = vld [vmem:[#allocation2 + $0x220] sm:$0x7]  ;;  %v4286_v60 = vadd.f32 %v4206_v37, %v4021_v19 }
 0x26a   :  { %v4215_v17 = vsel %vm3098_vm1, %v15121_v25, %v4214_v40  ;;  %v4218_v47 = vsel %vm3098_vm1, %v15123_v14, %v4217_v0  ;;  %v10814_v40 = vld [vmem:[#allocation2 + $0x2b8] sm:$0x7]  ;;  %v15127_v35 = vrot.slane %v15126_v63, 3  ;;  %v10823_v0 = vld [vmem:[#allocation2 + $0x280] sm:$0x7]  ;;  %v4288_v12 = vadd.f32 %v4212_v18, %v4023_v1 }
 0x26b   :  { %v4221_v2 = vsel %vm3098_vm1, %v15125_v3, %v4220_v20  ;;  %v15128_v20 = vld [vmem:[#allocation75_spill] sm:$0xff]  ;;  %v10829_v21 = vadd.f32 %v4215_v17, %v4024_v16  ;;  %v4325_v24 = vld [vmem:[#allocation2 + $0x1f8] sm:$0x7]  ;;  %v10839_v25 = vld [vmem:[#allocation2 + $0x1b0] sm:$0x7]  ;;  %v4290_v37 = vadd.f32 %v4218_v47, %v4025_v62  ;;  %v15137_v55 = vrot.slane %v15136_v8, 4 }
 0x26c   :  { %v4224_v53 = vsel %vm3098_vm1, %v15127_v35, %v4223_v51  ;;  %v4415_v32 = vmul.f32 %v15128_v20, %v10783_v4  ;;  %v4423_v61 = vmul.f32 %v15128_v20, %v10785_v52  ;;  %v10831_v57 = vld [vmem:[#allocation2 + $0x100] sm:$0x7]  ;;  %v4427_v28 = vmul.f32 %v15128_v20, %v10800_v50  ;;  %v10835_v51 = vld [vmem:[#allocation2 + $0x150] sm:$0x7]  ;;  %v15130_v45 = vld [vmem:[#allocation90_spill] sm:$0xff] }
 0x26d   :  { %15129 = vst [vmem:[#allocation488_spill] sm:$0xff] %v10829_v21  ;;  %v10837_v48 = vld [vmem:[#allocation2 + $0x200] sm:$0x7]  ;;  %v4438_v14 = vmul.f32 %v15130_v45, %v10802_v6  ;;  %v4439_v19 = vmul.f32 %v15128_v20, %v10812_v26  ;;  %v4442_v1 = vmul.f32 %v15130_v45, %v10814_v40  ;;  %v4443_v16 = vmul.f32 %v15128_v20, %v10816_v13  ;;  %v10855_v3 = vld [vmem:[#allocation2 + $0x210] sm:$0x7] }
 0x26e   :  { %v4291_v18 = vadd.f32 %v4221_v2, %v4026_v59  ;;  %v10851_v17 = vmul.f32 %v15128_v20, %v10821_v58  ;;  %v4450_v39 = vmul.f32 %v15130_v45, %v10823_v0  ;;  %v10858_v63 = vmul.f32 %v15130_v45, %v4325_v24  ;;  %v15145_v8 = vld [vmem:[#allocation45_spill] sm:$0xff] }
 0x26f   :  { %v4451_v35 = vmul.f32 %v15128_v20, %v10831_v57  ;;  %v4535_v11 = vrot.slane %v4415_v32, 4  ;;  %v4547_v43 = vrot.slane %v4423_v61, 4  ;;  %v10864_v62 = vmul.f32 %v15130_v45, %v10835_v51 }
 0x270   :  { %15131 = vst [vmem:[#allocation491_spill] sm:$0xff] %v10858_v63  ;;  %v4454_v59 = vmul.f32 %v15130_v45, %v10837_v48  ;;  %v4455_v47 = vmul.f32 %v15128_v20, %v10839_v25  ;;  %v4553_v2 = vrot.slane %v4427_v28, 4  ;;  %v4568_v7 = vrot.slane %v4438_v14, 4  ;;  %v15149_v14 = vld [vmem:[#allocation344_spill] sm:$0xff] }
 0x271   :  { %15132 = vst [vmem:[#allocation492_spill] sm:$0xff] %v10864_v62  ;;  %v4571_v21 = vrot.slane %v4439_v19, 4  ;;  %v4574_v42 = vrot.slane %v4442_v1, 4  ;;  %v4577_v29 = vrot.slane %v4443_v16, 4  ;;  %v4292_v10 = vadd.f32 %v4224_v53, %v4027_v31  ;;  %v15139_v31 = vld [vmem:[#allocation269_spill] sm:$0xff] }
 0x272   :  { %v10872_v32 = vmul.f32 %v15128_v20, %v10855_v3  ;;  %v4586_v33 = vrot.slane %v4450_v39, 4  ;;  %v4536_v45 = vsel %vm4512_vm2, %v15135_v41, %v4535_v11  ;;  %v10881_v28 = vsel %vm4512_vm2, %v15137_v55, %v4547_v43  ;;  %v15147_v11 = vld [vmem:[#allocation325_spill] sm:$0xff] }
 0x273   :  { %15138 = vst [vmem:[#allocation456_spill] sm:$0xff] %v10881_v28  ;;  %v4589_v19 = vrot.slane %v4451_v35, 4  ;;  %v15140_v53 = vrot.slane %v15139_v31, 4  ;;  %v4592_v16 = vrot.slane %v4454_v59, 4  ;;  %v4595_v39 = vrot.slane %v4455_v47, 4  ;;  %v15151_v47 = vld [vmem:[#allocation415_spill] sm:$0xff] }
 0x274   :  { %15133 = vst [vmem:[#allocation493_spill] sm:$0xff] %v10872_v32  ;;  %v15143_v61 = vrot.slane %v15142_v56, 4  ;;  %v15146_v55 = vrot.slane %v15145_v8, 4  ;;  %v15148_v35 = vrot.slane %v15147_v11, 4  ;;  %v15152_v1 = vrot.slane %v15151_v47, 4  ;;  %v15159_v11 = vld [vmem:[#allocation162_spill] sm:$0xff] }
 0x275   :  { %v10887_v20 = vsel %vm4512_vm2, %v15140_v53, %v4553_v2  ;;  %v15150_v2 = vrot.slane %v15149_v14, 4 }
 0x276   :  { %15141 = vst [vmem:[#allocation192_spill] sm:$0xff] %v10887_v20  ;;  %v10893_v41 = vsel %vm4512_vm2, %v15143_v61, %v4568_v7  ;;  %v4572_v43 = vsel %vm4512_vm2, %v15146_v55, %v4571_v21  ;;  %v4575_v31 = vsel %vm4512_vm2, %v15148_v35, %v4574_v42  ;;  %v10908_v56 = vsel %vm4512_vm2, %v15152_v1, %v4586_v33  ;;  %v15154_v7 = vld [vmem:[#allocation99_spill] sm:$0xff]  ;;  %v15155_v21 = vld [vmem:[#allocation100_spill] sm:$0xff]  ;;  %v15160_v1 = vld [vmem:[#allocation93_spill] sm:$0xff] }
 0x277   :  { %15144 = vst [vmem:[#allocation200_spill] sm:$0xff] %v10893_v41  ;;  %v4578_v53 = vsel %vm4512_vm2, %v15150_v2, %v4577_v29  ;;  %15153 = vst [vmem:[#allocation176_spill] sm:$0xff] %v10908_v56  ;;  %v10912_v61 = vadd.f32 %v15154_v7, %v10798_v23  ;;  %v10915_v8 = vadd.f32 %v15155_v21, %v4274_v5  ;;  %v10917_v55 = vld [vmem:[#allocation2 + $0x148] sm:$0x7]  ;;  %v15174_v20 = vrot.slane %v15173_v27, 4 }
 0x278   :  { %v15156_v42 = vld [vmem:[#allocation392_spill] sm:$0xff]  ;;  %v10926_v35 = vadd.f32 %v15159_v11, %v10810_v22  ;;  %v10928_v33 = vadd.f32 %v4536_v45, %v4278_v44  ;;  %v4677_v23 = vmul.f32 %v15160_v1, %v10783_v4  ;;  %v15168_v44 = vld [vmem:[#allocation105_spill] sm:$0xff]  ;;  %v10950_v11 = vadd.f32 %v4572_v43, %v4290_v37 }
 0x279   :  { %v15157_v14 = vrot.slane %v15156_v42, 4  ;;  %v10932_v2 = vld [vmem:[#allocation2 + $0x68] sm:$0x7]  ;;  %v10948_v45 = vadd.f32 %v15168_v44, %v4288_v12  ;;  %v10952_v59 = vadd.f32 %v4575_v31, %v4291_v18  ;;  %v10954_v41 = vadd.f32 %v4578_v53, %v4292_v10  ;;  %v10971_v10 = vld [vmem:[#allocation2 + $0x90] sm:$0x7] }
 0x27a   :  { %v15161_v5 = vld [vmem:[#allocation448_spill] sm:$0xff]  ;;  %v4693_v18 = vmul.f32 %v15160_v1, %v10932_v2  ;;  %v4794_v31 = vrot.slane %v4677_v23, 4  ;;  %v4717_v63 = vmul.f32 %v15160_v1, %v10839_v25  ;;  %v4721_v56 = vmul.f32 %v15160_v1, %v10971_v10 }
 0x27b   :  { %v10922_v29 = vsel %vm4512_vm2, %v15157_v14, %v4589_v19  ;;  %v15162_v47 = vrot.slane %v15161_v5, 4  ;;  %v15164_v21 = vld [vmem:[#allocation464_spill] sm:$0xff]  ;;  %v15167_v14 = vld [vmem:[#allocation102_spill] sm:$0xff]  ;;  %15169 = vst [vmem:[#allocation190_spill] sm:$0xff] %v10952_v59  ;;  %v4685_v5 = vmul.f32 %v15160_v1, %v10785_v52  ;;  %v4713_v59 = vmul.f32 %v15160_v1, %v10831_v57 }
 0x27c   :  { %15158 = vst [vmem:[#allocation202_spill] sm:$0xff] %v10922_v29  ;;  %v15165_v42 = vrot.slane %v15164_v21, 4  ;;  %v10945_v22 = vadd.f32 %v15167_v14, %v4286_v60  ;;  %v4689_v60 = vmul.f32 %v15160_v1, %v10800_v50  ;;  %v10969_v37 = vld [vmem:[#allocation2 + $0x208] sm:$0x7]  ;;  %v4705_v21 = vmul.f32 %v15160_v1, %v10816_v13 }
 0x27d   :  { %v10937_v7 = vsel %vm4512_vm2, %v15162_v47, %v4592_v16  ;;  %v4681_v16 = vmul.f32 %v15160_v1, %v10821_v58  ;;  %v4709_v14 = vmul.f32 %v15160_v1, %v10855_v3  ;;  %v4806_v29 = vrot.slane %v4685_v5, 4 }
 0x27e   :  { %15163 = vst [vmem:[#allocation221_spill] sm:$0xff] %v10937_v7  ;;  %v10942_v19 = vsel %vm4512_vm2, %v15165_v42, %v4595_v39  ;;  %v15170_v39 = vld [vmem:[#allocation92_spill] sm:$0xff]  ;;  %v4795_v28 = vsel %vm4512_vm2, %v15174_v20, %v4794_v31  ;;  %v4812_v15 = vrot.slane %v4689_v60, 4  ;;  %v4818_v36 = vrot.slane %v4693_v18, 4  ;;  %v15177_v31 = vld [vmem:[#allocation242_spill] sm:$0xff] }
 0x27f   :  { %15166 = vst [vmem:[#allocation235_spill] sm:$0xff] %v10942_v19  ;;  %v10961_v47 = vmul.f32 %v15170_v39, %v4325_v24  ;;  %v10967_v12 = vmul.f32 %v15170_v39, %v10917_v55  ;;  %v4700_v43 = vmul.f32 %v15170_v39, %v10802_v6  ;;  %v4701_v24 = vmul.f32 %v15160_v1, %v10812_v26  ;;  %v15175_v1 = vld [vmem:[#allocation210_spill] sm:$0xff] }
 0x280   :  { %v4704_v53 = vmul.f32 %v15170_v39, %v10814_v40  ;;  %v4708_v42 = vmul.f32 %v15170_v39, %v10835_v51  ;;  %v4712_v44 = vmul.f32 %v15170_v39, %v10823_v0  ;;  %v4716_v23 = vmul.f32 %v15170_v39, %v10837_v48  ;;  %v15180_v18 = vld [vmem:[#allocation270_spill] sm:$0xff] }
 0x281   :  { %15171 = vst [vmem:[#allocation263_spill] sm:$0xff] %v10961_v47  ;;  %15172 = vst [vmem:[#allocation218_spill] sm:$0xff] %v10967_v12  ;;  %v4720_v7 = vmul.f32 %v15170_v39, %v10969_v37  ;;  %v4800_v19 = vrot.slane %v4681_v16, 4  ;;  %v4827_v49 = vrot.slane %v4700_v43, 4  ;;  %v4830_v30 = vrot.slane %v4701_v24, 4 }
 0x282   :  { %v4833_v46 = vrot.slane %v4704_v53, 4  ;;  %v4836_v54 = vrot.slane %v4705_v21, 4  ;;  %v4839_v39 = vrot.slane %v4708_v42, 4  ;;  %v4842_v38 = vrot.slane %v4709_v14, 4  ;;  %v15183_v42 = vld [vmem:[#allocation294_spill] sm:$0xff] }
 0x283   :  { %v4845_v32 = vrot.slane %v4712_v44, 4  ;;  %v15176_v16 = vrot.slane %v15175_v1, 4  ;;  %v4848_v27 = vrot.slane %v4713_v59, 4  ;;  %v4851_v62 = vrot.slane %v4716_v23, 4  ;;  %v15186_v59 = vld [vmem:[#allocation304_spill] sm:$0xff]  ;;  %v15191_v1 = vld [vmem:[#allocation326_spill] sm:$0xff] }
 0x284   :  { %v4854_v20 = vrot.slane %v4717_v63, 4  ;;  %v15178_v9 = vrot.slane %v15177_v31, 4  ;;  %v15181_v43 = vrot.slane %v15180_v18, 4  ;;  %v4857_v53 = vrot.slane %v4720_v7, 4  ;;  %v15189_v23 = vld [vmem:[#allocation312_spill] sm:$0xff] }
 0x285   :  { %v4801_v5 = vsel %vm4512_vm2, %v15176_v16, %v4800_v19  ;;  %v4860_v21 = vrot.slane %v4721_v56, 4  ;;  %v15184_v14 = vrot.slane %v15183_v42, 4  ;;  %v15187_v19 = vrot.slane %v15186_v59, 4  ;;  %v15194_v56 = vld [vmem:[#allocation28_spill] sm:$0xff] }
 0x286   :  { %v11010_v60 = vsel %vm4512_vm2, %v15178_v9, %v4806_v29  ;;  %v11015_v24 = vsel %vm4512_vm2, %v15181_v43, %v4812_v15  ;;  %v15190_v9 = vrot.slane %v15189_v23, 4  ;;  %v15192_v16 = vrot.slane %v15191_v1, 4  ;;  %v15201_v59 = vld [vmem:[#allocation416_spill] sm:$0xff] }
 0x287   :  { %15179 = vst [vmem:[#allocation288_spill] sm:$0xff] %v11010_v60  ;;  %15182 = vst [vmem:[#allocation320_spill] sm:$0xff] %v11015_v24  ;;  %v11020_v44 = vsel %vm4512_vm2, %v15184_v14, %v4818_v36  ;;  %v11025_v63 = vsel %vm4512_vm2, %v15187_v19, %v4827_v49  ;;  %v15195_v7 = vrot.slane %v15194_v56, 4  ;;  %v15196_v36 = vld [vmem:[#allocation361_spill] sm:$0xff]  ;;  %v15199_v49 = vld [vmem:[#allocation402_spill] sm:$0xff] }
 0x288   :  { %15185 = vst [vmem:[#allocation339_spill] sm:$0xff] %v11020_v44  ;;  %15188 = vst [vmem:[#allocation353_spill] sm:$0xff] %v11025_v63  ;;  %v4831_v29 = vsel %vm4512_vm2, %v15190_v9, %v4830_v30  ;;  %v11033_v15 = vsel %vm4512_vm2, %v15192_v16, %v4833_v46  ;;  %v15197_v18 = vrot.slane %v15196_v36, 4  ;;  %v15200_v42 = vrot.slane %v15199_v49, 4  ;;  %v15204_v46 = vld [vmem:[#allocation432_spill] sm:$0xff]  ;;  %v15229_v63 = vld [vmem:[#allocation183_spill] sm:$0xff] }
 0x289   :  { %15193 = vst [vmem:[#allocation394_spill] sm:$0xff] %v11033_v15  ;;  %v4837_v31 = vsel %vm4512_vm2, %v15195_v7, %v4836_v54  ;;  %v15202_v30 = vrot.slane %v15201_v59, 4  ;;  %v15205_v23 = vrot.slane %v15204_v46, 4  ;;  %v15207_v54 = vld [vmem:[#allocation449_spill] sm:$0xff]  ;;  %v4895_v46 = vadd.f32 %v4795_v28, %v10926_v35  ;;  %v15223_v35 = vld [vmem:[#allocation88_spill] sm:$0xff] }
 0x28a   :  { %v11041_v43 = vsel %vm4512_vm2, %v15197_v18, %v4839_v39  ;;  %v4843_v14 = vsel %vm4512_vm2, %v15200_v42, %v4842_v38  ;;  %v15208_v1 = vrot.slane %v15207_v54, 4  ;;  %v15210_v39 = vld [vmem:[#allocation465_spill] sm:$0xff]  ;;  %v15213_v38 = vld [vmem:[#allocation106_spill] sm:$0xff]  ;;  %v4907_v54 = vadd.f32 %v4831_v29, %v10948_v45  ;;  %v15464_v44 = vld [vmem:[#allocation108_spill] sm:$0xff] }
 0x28b   :  { %15198 = vst [vmem:[#allocation408_spill] sm:$0xff] %v11041_v43  ;;  %v11049_v19 = vsel %vm4512_vm2, %v15202_v30, %v4845_v32  ;;  %v11054_v9 = vsel %vm4512_vm2, %v15205_v23, %v4848_v27  ;;  %v15211_v56 = vrot.slane %v15210_v39, 4  ;;  %v4891_v36 = vadd.f32 %v15213_v38, %v10912_v61  ;;  %v15214_v32 = vld [vmem:[#allocation473_spill] sm:$0xff]  ;;  %v15217_v27 = vld [vmem:[#allocation483_spill] sm:$0xff]  ;;  %v15221_v23 = vld [vmem:[#allocation110_spill] sm:$0xff] }
 0x28c   :  { %15203 = vst [vmem:[#allocation425_spill] sm:$0xff] %v11049_v19  ;;  %15206 = vst [vmem:[#allocation442_spill] sm:$0xff] %v11054_v9  ;;  %v11059_v16 = vsel %vm4512_vm2, %v15208_v1, %v4851_v62  ;;  %v15215_v18 = vrot.slane %v15214_v32, 4  ;;  %v15218_v42 = vrot.slane %v15217_v27, 4  ;;  %v15220_v62 = vld [vmem:[#allocation163_spill] sm:$0xff]  ;;  %v4905_v61 = vadd.f32 %v15221_v23, %v10945_v22  ;;  %v15470_v60 = vld [vmem:[#allocation197_spill] sm:$0xff] }
 0x28d   :  { %15209 = vst [vmem:[#allocation458_spill] sm:$0xff] %v11059_v16  ;;  %v11064_v7 = vsel %vm4512_vm2, %v15211_v56, %v4854_v20  ;;  %v4893_v30 = vadd.f32 %v15220_v62, %v10915_v8  ;;  %v4897_v20 = vadd.f32 %v4801_v5, %v10928_v33  ;;  %v4909_v39 = vadd.f32 %v4837_v31, %v10950_v11 }
 0x28e   :  { %15212 = vst [vmem:[#allocation424_spill] sm:$0xff] %v11064_v7  ;;  %v11071_v49 = vsel %vm4512_vm2, %v15215_v18, %v4857_v53  ;;  %v11076_v59 = vsel %vm4512_vm2, %v15218_v42, %v4860_v21  ;;  %v15222_v53 = vld [vmem:[#allocation136_spill] sm:$0xff]  ;;  %v4911_v21 = vadd.f32 %v4843_v14, %v10954_v41  ;;  %v11097_v33 = vmul.f32 %v15223_v35, %v10917_v55 }
 0x28f   :  { %15216 = vst [vmem:[#allocation478_spill] sm:$0xff] %v11071_v49  ;;  %15219 = vst [vmem:[#allocation376_spill] sm:$0xff] %v11076_v59  ;;  %v4938_v1 = vmul.f32 %v15222_v53, %v10783_v4  ;;  %v4942_v56 = vmul.f32 %v15222_v53, %v10821_v58  ;;  %v4946_v28 = vmul.f32 %v15222_v53, %v10785_v52  ;;  %v15230_v12 = vrot.slane %v15229_v63, 4  ;;  %v15231_v49 = vld [vmem:[#allocation211_spill] sm:$0xff] }
 0x290   :  { %v4950_v8 = vmul.f32 %v15222_v53, %v10800_v50  ;;  %15224 = vst [vmem:[#allocation203_spill] sm:$0xff] %v11097_v33  ;;  %v4954_v22 = vmul.f32 %v15222_v53, %v10932_v2  ;;  %v4962_v45 = vmul.f32 %v15222_v53, %v10812_v26  ;;  %v11105_v41 = vmul.f32 %v15223_v35, %v10802_v6  ;;  %v15235_v33 = vld [vmem:[#allocation271_spill] sm:$0xff] }
 0x291   :  { %v11109_v11 = vmul.f32 %v15223_v35, %v10814_v40  ;;  %v4966_v5 = vmul.f32 %v15222_v53, %v10816_v13  ;;  %v11115_v55 = vmul.f32 %v15223_v35, %v10835_v51  ;;  %v4970_v29 = vmul.f32 %v15222_v53, %v10855_v3  ;;  %v15238_v63 = vld [vmem:[#allocation295_spill] sm:$0xff] }
 0x292   :  { %15225 = vst [vmem:[#allocation236_spill] sm:$0xff] %v11105_v41  ;;  %v4974_v26 = vmul.f32 %v15222_v53, %v10831_v57  ;;  %v4977_v6 = vmul.f32 %v15223_v35, %v10837_v48  ;;  %v5053_v31 = vrot.slane %v4938_v1, 4  ;;  %v4978_v14 = vmul.f32 %v15222_v53, %v10839_v25 }
 0x293   :  { %15226 = vst [vmem:[#allocation264_spill] sm:$0xff] %v11109_v11  ;;  %15227 = vst [vmem:[#allocation277_spill] sm:$0xff] %v11115_v55  ;;  %v4981_v38 = vmul.f32 %v15223_v35, %v10969_v37  ;;  %v5059_v32 = vrot.slane %v4942_v56, 4  ;;  %v5065_v18 = vrot.slane %v4946_v28, 4  ;;  %v4982_v27 = vmul.f32 %v15222_v53, %v10971_v10 }
 0x294   :  { %v5071_v42 = vrot.slane %v4950_v8, 4  ;;  %v5077_v62 = vrot.slane %v4954_v22, 4  ;;  %v5089_v23 = vrot.slane %v4962_v45, 4  ;;  %v11131_v34 = vmul.f32 %v15223_v35, %v10823_v0  ;;  %v15233_v45 = vld [vmem:[#allocation243_spill] sm:$0xff] }
 0x295   :  { %v5095_v15 = vrot.slane %v4966_v5, 4  ;;  %v5054_v56 = vsel %vm4512_vm2, %v15230_v12, %v5053_v31  ;;  %v5101_v28 = vrot.slane %v4970_v29, 4  ;;  %v5107_v47 = vrot.slane %v4974_v26, 4  ;;  %v15241_v26 = vld [vmem:[#allocation313_spill] sm:$0xff] }
 0x296   :  { %15228 = vst [vmem:[#allocation289_spill] sm:$0xff] %v11131_v34  ;;  %v5110_v19 = vrot.slane %v4977_v6, 4  ;;  %v15232_v8 = vrot.slane %v15231_v49, 4  ;;  %v15234_v16 = vrot.slane %v15233_v45, 4  ;;  %v5113_v9 = vrot.slane %v4978_v14, 4 }
 0x297   :  { %v5116_v1 = vrot.slane %v4981_v38, 4  ;;  %v15236_v43 = vrot.slane %v15235_v33, 4  ;;  %v15239_v12 = vrot.slane %v15238_v63, 4  ;;  %v15242_v49 = vrot.slane %v15241_v26, 4  ;;  %v15252_v26 = vld [vmem:[#allocation168_spill] sm:$0xff] }
 0x298   :  { %v5060_v22 = vsel %vm4512_vm2, %v15232_v8, %v5059_v32  ;;  %v5066_v59 = vsel %vm4512_vm2, %v15234_v16, %v5065_v18  ;;  %v5119_v31 = vrot.slane %v4982_v27, 4  ;;  %v15243_v16 = vld [vmem:[#allocation345_spill] sm:$0xff]  ;;  %v15245_v18 = vld [vmem:[#allocation403_spill] sm:$0xff] }
 0x299   :  { %v11147_v5 = vsel %vm4512_vm2, %v15236_v43, %v5071_v42  ;;  %v11152_v29 = vsel %vm4512_vm2, %v15239_v12, %v5077_v62  ;;  %v5090_v6 = vsel %vm4512_vm2, %v15242_v49, %v5089_v23  ;;  %v15244_v14 = vrot.slane %v15243_v16, 4  ;;  %v15247_v8 = vld [vmem:[#allocation433_spill] sm:$0xff]  ;;  %v15249_v23 = vld [vmem:[#allocation450_spill] sm:$0xff] }
 0x29a   :  { %15237 = vst [vmem:[#allocation354_spill] sm:$0xff] %v11147_v5  ;;  %15240 = vst [vmem:[#allocation395_spill] sm:$0xff] %v11152_v29  ;;  %v15246_v42 = vrot.slane %v15245_v18, 4  ;;  %v15248_v45 = vrot.slane %v15247_v8, 4  ;;  %v15250_v27 = vrot.slane %v15249_v23, 4  ;;  %v5156_v49 = vadd.f32 %v15252_v26, %v4891_v36  ;;  %v15256_v43 = vld [vmem:[#allocation474_spill] sm:$0xff] }
 0x29b   :  { %v5096_v38 = vsel %vm4512_vm2, %v15244_v14, %v5095_v15  ;;  %v15253_v15 = vld [vmem:[#allocation466_spill] sm:$0xff]  ;;  %v15257_v18 = vrot.slane %v15256_v43, 4  ;;  %v5160_v36 = vadd.f32 %v5060_v22, %v4895_v46  ;;  %v5162_v43 = vadd.f32 %v5066_v59, %v4897_v20  ;;  %v15263_v22 = vld [vmem:[#allocation161_spill] sm:$0xff] }
 0x29c   :  { %v5102_v62 = vsel %vm4512_vm2, %v15246_v42, %v5101_v28  ;;  %v5108_v63 = vsel %vm4512_vm2, %v15248_v45, %v5107_v47  ;;  %v11172_v12 = vsel %vm4512_vm2, %v15250_v27, %v5110_v19  ;;  %v15254_v16 = vrot.slane %v15253_v15, 4  ;;  %v15259_v47 = vld [vmem:[#allocation96_spill] sm:$0xff]  ;;  %v15260_v45 = vld [vmem:[#allocation487_spill] sm:$0xff]  ;;  %v15463_v29 = vld [vmem:[#allocation133_spill] sm:$0xff] }
 0x29d   :  { %15251 = vst [vmem:[#allocation409_spill] sm:$0xff] %v11172_v12  ;;  %v11183_v28 = vsel %vm4512_vm2, %v15257_v18, %v5116_v1  ;;  %v5158_v42 = vadd.f32 %v5054_v56, %v4893_v30  ;;  %v5199_v8 = vmul.f32 %v15259_v47, %v10783_v4  ;;  %v15261_v23 = vrot.slane %v15260_v45, 4  ;;  %v15269_v45 = vld [vmem:[#allocation184_spill] sm:$0xff] }
 0x29e   :  { %v11178_v14 = vsel %vm4512_vm2, %v15254_v16, %v5113_v9  ;;  %15258 = vst [vmem:[#allocation443_spill] sm:$0xff] %v11183_v28  ;;  %v5203_v27 = vmul.f32 %v15259_v47, %v10821_v58  ;;  %v5207_v9 = vmul.f32 %v15259_v47, %v10785_v52  ;;  %v5170_v26 = vadd.f32 %v5090_v6, %v4905_v61  ;;  %v15273_v12 = vld [vmem:[#allocation244_spill] sm:$0xff] }
 0x29f   :  { %15255 = vst [vmem:[#allocation426_spill] sm:$0xff] %v11178_v14  ;;  %v11190_v19 = vsel %vm4512_vm2, %v15261_v23, %v5119_v31  ;;  %v5211_v30 = vmul.f32 %v15259_v47, %v10800_v50  ;;  %v5215_v4 = vmul.f32 %v15259_v47, %v10932_v2  ;;  %v5172_v1 = vadd.f32 %v5096_v38, %v4907_v54  ;;  %v15268_v38 = vld [vmem:[#allocation97_spill] sm:$0xff] }
 0x2a0   :  { %15262 = vst [vmem:[#allocation459_spill] sm:$0xff] %v11190_v19  ;;  %v5174_v56 = vadd.f32 %v5102_v62, %v4909_v39  ;;  %v5176_v15 = vadd.f32 %v5108_v63, %v4911_v21  ;;  %v5227_v46 = vmul.f32 %v15259_v47, %v10816_v13  ;;  %v11204_v31 = vmul.f32 %v15263_v22, %v10814_v40 }
 0x2a1   :  { %v11208_v59 = vmul.f32 %v15263_v22, %v10835_v51  ;;  %v5231_v20 = vmul.f32 %v15259_v47, %v10855_v3  ;;  %v5312_v61 = vrot.slane %v5199_v8, 4  ;;  %v11214_v54 = vmul.f32 %v15263_v22, %v10823_v0 }
 0x2a2   :  { %15264 = vst [vmem:[#allocation438_spill] sm:$0xff] %v11204_v31  ;;  %v5235_v39 = vmul.f32 %v15259_v47, %v10831_v57  ;;  %v5318_v13 = vrot.slane %v5203_v27, 4  ;;  %v5324_v21 = vrot.slane %v5207_v9, 4  ;;  %v11220_v40 = vmul.f32 %v15263_v22, %v10837_v48  ;;  %v15393_v31 = vld [vmem:[#allocation20_spill] sm:$0xff] }
 0x2a3   :  { %15265 = vst [vmem:[#allocation479_spill] sm:$0xff] %v11208_v59  ;;  %15266 = vst [vmem:[#allocation22_spill] sm:$0xff] %v11214_v54  ;;  %v5330_v6 = vrot.slane %v5211_v30, 4  ;;  %v5336_v51 = vrot.slane %v5215_v4, 4  ;;  %v5468_v62 = vmul.f32 %v15268_v38, %v10785_v52  ;;  %v5239_v63 = vmul.f32 %v15259_v47, %v10839_v25  ;;  %v15271_v4 = vld [vmem:[#allocation212_spill] sm:$0xff]  ;;  %v15391_v54 = vld [vmem:[#allocation41_spill] sm:$0xff] }
 0x2a4   :  { %15267 = vst [vmem:[#allocation177_spill] sm:$0xff] %v11220_v40  ;;  %v11228_v16 = vmul.f32 %v15263_v22, %v10969_v37  ;;  %v11232_v18 = vmul.f32 %v15259_v47, %v10971_v10  ;;  %v5354_v8 = vrot.slane %v5227_v46, 4  ;;  %v15270_v23 = vrot.slane %v15269_v45, 4  ;;  %v15275_v45 = vld [vmem:[#allocation272_spill] sm:$0xff]  ;;  %v2887_v40 = vld [vmem:[#allocation2 + $0x10] sm:$0x3] }
 0x2a5   :  { %v5360_v30 = vrot.slane %v5231_v20, 4  ;;  %v5464_v52 = vmul.f32 %v15268_v38, %v10821_v58  ;;  %v15272_v33 = vrot.slane %v15271_v4, 4  ;;  %v15274_v34 = vrot.slane %v15273_v12, 4 }
 0x2a6   :  { %v5313_v27 = vsel %vm4512_vm2, %v15270_v23, %v5312_v61  ;;  %v5366_v11 = vrot.slane %v5235_v39, 4  ;;  %v15276_v41 = vrot.slane %v15275_v45, 4  ;;  %v15277_v23 = vld [vmem:[#allocation261_spill] sm:$0xff]  ;;  %v5472_v58 = vmul.f32 %v15268_v38, %v10800_v50  ;;  %v15282_v45 = vld [vmem:[#allocation30_spill] sm:$0xff] }
 0x2a7   :  { %v5319_v32 = vsel %vm4512_vm2, %v15272_v33, %v5318_v13  ;;  %v5325_v55 = vsel %vm4512_vm2, %v15274_v34, %v5324_v21  ;;  %v15278_v20 = vrot.slane %v15277_v23, 4  ;;  %v5583_v33 = vrot.slane %v5468_v62, 4  ;;  %v15280_v13 = vld [vmem:[#allocation346_spill] sm:$0xff]  ;;  %v15291_v21 = vld [vmem:[#allocation213_spill] sm:$0xff] }
 0x2a8   :  { %v5331_v61 = vsel %vm4512_vm2, %v15276_v41, %v5330_v6  ;;  %v15281_v12 = vrot.slane %v15280_v13, 4  ;;  %v5372_v39 = vrot.slane %v5239_v63, 4  ;;  %v5423_v4 = vadd.f32 %v5319_v32, %v5158_v42 }
 0x2a9   :  { %v11253_v9 = vsel %vm4512_vm2, %v15278_v20, %v5336_v51  ;;  %v15283_v46 = vrot.slane %v15282_v45, 4  ;;  %v5375_v6 = vrot.slane %v11228_v16, 4  ;;  %v5378_v51 = vrot.slane %v11232_v18, 4  ;;  %v15284_v20 = vld [vmem:[#allocation434_spill] sm:$0xff]  ;;  %v15288_v45 = vld [vmem:[#allocation467_spill] sm:$0xff] }
 0x2aa   :  { %15279 = vst [vmem:[#allocation225_spill] sm:$0xff] %v11253_v9  ;;  %v5355_v34 = vsel %vm4512_vm2, %v15281_v12, %v5354_v8  ;;  %v5577_v23 = vrot.slane %v5464_v52, 4  ;;  %v15285_v50 = vrot.slane %v15284_v20, 4  ;;  %v5421_v13 = vadd.f32 %v5313_v27, %v5156_v49  ;;  %v15344_v16 = vld [vmem:[#allocation286_spill] sm:$0xff] }
 0x2ab   :  { %v5361_v41 = vsel %vm4512_vm2, %v15283_v46, %v5360_v30  ;;  %v5476_v8 = vmul.f32 %v15268_v38, %v10932_v2  ;;  %v5492_v32 = vmul.f32 %v15268_v38, %v10855_v3  ;;  %v5496_v42 = vmul.f32 %v15268_v38, %v10831_v57  ;;  %v15286_v30 = vld [vmem:[#allocation245_spill] sm:$0xff] }
 0x2ac   :  { %v5367_v62 = vsel %vm4512_vm2, %v15285_v50, %v5366_v11  ;;  %v5500_v63 = vmul.f32 %v15268_v38, %v10839_v25  ;;  %v15287_v46 = vrot.slane %v15286_v30, 4  ;;  %v5589_v12 = vrot.slane %v5472_v58, 4  ;;  %v117_v58 = vld [vmem:[%s12909_s0 + $0x60] sm:$0x7f] }
 0x2ad   :  { %v15289_v11 = vrot.slane %v15288_v45, 4  ;;  %v5425_v27 = vadd.f32 %v5325_v55, %v5160_v36  ;;  %v5504_v2 = vmul.f32 %v15268_v38, %v10971_v10  ;;  %v5427_v20 = vadd.f32 %v5331_v61, %v5162_v43  ;;  %v118_v55 = vld [vmem:[%s12909_s0 + $0x68] sm:$0x7f]  ;;  %v131_v43 = vld [vmem:[%s12909_s0 + $0xd0] sm:$0x7f] }
 0x2ae   :  { %v5584_v52 = vsel %vm4512_vm2, %v15287_v46, %v5583_v33  ;;  %v5435_v57 = vadd.f32 %v5355_v34, %v5170_v26  ;;  %v5437_v50 = vadd.f32 %v5361_v41, %v5172_v1  ;;  %v15292_v25 = vrot.slane %v15291_v21, 4  ;;  %v132_v26 = vld [vmem:[%s12909_s0 + $0xd8] sm:$0x7f]  ;;  %v15294_v1 = vld [vmem:[#allocation160_spill] sm:$0xff] }
 0x2af   :  { %v5373_v49 = vsel %vm4512_vm2, %v15289_v11, %v5372_v39  ;;  %v11285_v3 = vadd.f32 %v5584_v52, %v5423_v4  ;;  %v5439_v36 = vadd.f32 %v5367_v62, %v5174_v56  ;;  %v5595_v10 = vrot.slane %v5476_v8, 4  ;;  %v15296_v52 = vld [vmem:[#allocation249_spill] sm:$0xff] }
 0x2b0   :  { %v5578_v30 = vsel %vm4512_vm2, %v15292_v25, %v5577_v23  ;;  %v5441_v33 = vadd.f32 %v5373_v49, %v5176_v15  ;;  %v15295_v61 = vrot.slane %v15294_v1, 4  ;;  %v5619_v21 = vrot.slane %v5492_v32, 4 }
 0x2b1   :  { %15290 = vst [vmem:[#allocation237_spill] sm:$0xff] %v11285_v3  ;;  %v11296_v39 = vadd.f32 %v5578_v30, %v5421_v13  ;;  %v5625_v4 = vrot.slane %v5496_v42, 4  ;;  %v5631_v41 = vrot.slane %v5500_v63, 4  ;;  %v5637_v56 = vrot.slane %v5504_v2, 4  ;;  %v15302_v2 = vld [vmem:[#allocation404_spill] sm:$0xff] }
 0x2b2   :  { %v5590_v34 = vsel %vm4512_vm2, %v15295_v61, %v5589_v12  ;;  %v5783_v15 = vmul.f32 %v11285_v3, %v11285_v3  ;;  %v173_v23 = vrot.slane %v117_v58, 6  ;;  %v5748_v62 = vsel %vm5713_vm3, %v11285_v3, 0.0  ;;  %v15300_v12 = vld [vmem:[#allocation296_spill] sm:$0xff]  ;;  %v15376_v3 = vld [vmem:[#allocation94_spill] sm:$0xff] }
 0x2b3   :  { %15293 = vst [vmem:[#allocation254_spill] sm:$0xff] %v11296_v39  ;;  %v174_v13 = vrot.slane %v118_v55, 6  ;;  %v187_v8 = vrot.slane %v131_v43, 6  ;;  %v188_v46 = vrot.slane %v132_v26, 6  ;;  %v11313_v45 = vmul.f32 %v15296_v52, %v10823_v0  ;;  %v15304_v30 = vld [vmem:[#allocation8_spill] sm:$0xff]  ;;  %v15306_v55 = vld [vmem:[#allocation422_spill] sm:$0xff] }
 0x2b4   :  { %v11317_v32 = vmul.f32 %v15296_v52, %v10837_v48  ;;  %v11319_v42 = vadd.f32 %v5590_v34, %v5425_v27  ;;  %v5781_v63 = vmul.f32 %v11296_v39, %v11296_v39  ;;  %242 = vst [vmem:[#allocation2 + $0x180] sm:$0xfc] %v173_v23  ;;  %244 = vst [vmem:[#allocation2 + $0x1c0] sm:$0x1] %v173_v23  ;;  %v15301_v11 = vrot.slane %v15300_v12, 4  ;;  %v15309_v34 = vld [vmem:[#allocation490_spill] sm:$0xff] }
 0x2b5   :  { %15297 = vst [vmem:[#allocation265_spill] sm:$0xff] %v11313_v45  ;;  %v15303_v25 = vrot.slane %v15302_v2, 4  ;;  %v15305_v58 = vrot.slane %v15304_v30, 4  ;;  %v5747_v27 = vsel %vm5713_vm3, %v11296_v39, 0.0  ;;  %243 = vst [vmem:[#allocation2 + $0x2a0] sm:$0xfc] %v174_v13 }
 0x2b6   :  { %15298 = vst [vmem:[#allocation301_spill] sm:$0xff] %v11317_v32  ;;  %15299 = vst [vmem:[#allocation310_spill] sm:$0xff] %v11319_v42  ;;  %v5596_v49 = vsel %vm4512_vm2, %v15301_v11, %v5595_v10  ;;  %v15307_v43 = vrot.slane %v15306_v55, 4  ;;  %v5749_v1 = vadd.f32 %v5748_v62, %v5747_v27  ;;  %v5842_v61 = vsel %vm5713_vm3, %v5783_v15, 0.0  ;;  %v15315_v15 = vld [vmem:[#allocation475_spill] sm:$0xff]  ;;  %v15323_v27 = vld [vmem:[#allocation32_spill] sm:$0xff] }
 0x2b7   :  { %v5620_v0 = vsel %vm4512_vm2, %v15303_v25, %v5619_v21  ;;  %v5626_v48 = vsel %vm4512_vm2, %v15305_v58, %v5625_v4  ;;  %245 = vst [vmem:[#allocation2 + $0x1d0] sm:$0x1] %v174_v13  ;;  %270 = vst [vmem:[#allocation2 + $0xb0] sm:$0xfc] %v187_v8  ;;  %v11337_v26 = vadd.f32 %v5596_v49, %v5427_v20  ;;  %v15310_v21 = vrot.slane %v15309_v34, 4  ;;  %v15322_v58 = vld [vmem:[#allocation144_spill] sm:$0xff] }
 0x2b8   :  { %272 = vst [vmem:[#allocation2 + $0x38] sm:$0x1] %v187_v8  ;;  %271 = vst [vmem:[#allocation2 + $0x140] sm:$0xfc] %v188_v46  ;;  %v5632_v10 = vsel %vm4512_vm2, %v15307_v43, %v5631_v41  ;;  %v11343_v23 = vadd.f32 %v5620_v0, %v5435_v57  ;;  %v11345_v13 = vadd.f32 %v5626_v48, %v5437_v50  ;;  %v5841_v41 = vsel %vm5713_vm3, %v5781_v63, 0.0  ;;  %v15324_v55 = vld [vmem:[#allocation148_spill] sm:$0xff] }
 0x2b9   :  { %273 = vst [vmem:[#allocation2 + $0x130] sm:$0x1] %v188_v46  ;;  %15308 = vst [vmem:[#allocation321_spill] sm:$0xff] %v11337_v26  ;;  %v5638_v4 = vsel %vm4512_vm2, %v15310_v21, %v5637_v56  ;;  %v11347_v8 = vadd.f32 %v5632_v10, %v5439_v36  ;;  %v5785_v20 = vmul.f32 %v11319_v42, %v11319_v42  ;;  %v15316_v62 = vrot.slane %v15315_v15, 4  ;;  %v15319_v56 = vld [vmem:[#allocation489_spill] sm:$0xff]  ;;  %v15384_v32 = vld [vmem:[#allocation48_spill] sm:$0xff] }
 0x2ba   :  { %15311 = vst [vmem:[#allocation340_spill] sm:$0xff] %v11343_v23  ;;  %15312 = vst [vmem:[#allocation410_spill] sm:$0xff] %v11345_v13  ;;  %v11350_v12 = vadd.f32 %v5638_v4, %v5441_v33  ;;  %v11364_v50 = vmul.f32 %v15296_v52, %v10969_v37  ;;  %v5750_v36 = vsel %vm5713_vm3, %v11319_v42, 0.0  ;;  %v5843_v33 = vadd.f32 %v5842_v61, %v5841_v41 }
 0x2bb   :  { %15313 = vst [vmem:[#allocation427_spill] sm:$0xff] %v11347_v8  ;;  %v11360_v57 = vsel %vm4512_vm2, %v15316_v62, %v5375_v6  ;;  %v15320_v11 = vrot.slane %v15319_v56, 4  ;;  %v5751_v49 = vadd.f32 %v5750_v36, %v5749_v1  ;;  %v5787_v37 = vmul.f32 %v11337_v26, %v11337_v26  ;;  %v11385_v0 = vld [vmem:[#allocation2 + $0x180] sm:$0x7f]  ;;  %v15333_v56 = vld [vmem:[#allocation274_spill] sm:$0xff] }
 0x2bc   :  { %15314 = vst [vmem:[#allocation67_spill] sm:$0xff] %v11350_v12  ;;  %15317 = vst [vmem:[#allocation68_spill] sm:$0xff] %v11360_v57  ;;  %v5795_v2 = vmul.f32 %v11343_v23, %v11343_v23  ;;  %v5797_v25 = vmul.f32 %v11345_v13, %v11345_v13  ;;  %v5799_v18 = vmul.f32 %v11347_v8, %v11347_v8  ;;  %v5844_v30 = vsel %vm5713_vm3, %v5785_v20, 0.0  ;;  %v15389_v57 = vld [vmem:[#allocation195_spill] sm:$0xff] }
 0x2bd   :  { %15318 = vst [vmem:[#allocation157_spill] sm:$0xff] %v11364_v50  ;;  %v11373_v63 = vsel %vm4512_vm2, %v15320_v11, %v5378_v51  ;;  %v5801_v51 = vmul.f32 %v11350_v12, %v11350_v12  ;;  %v614_v48 = vmul.f32 %v15322_v58, %v11385_v0  ;;  %v15325_v43 = vrot.slane %v15324_v55, 1  ;;  %v15382_v50 = vld [vmem:[#allocation50_spill] sm:$0xff] }
 0x2be   :  { %15321 = vst [vmem:[#allocation348_spill] sm:$0xff] %v11373_v63  ;;  %v5752_v61 = vsel %vm5713_vm3, %v11337_v26, 0.0  ;;  %v11400_v34 = vsel %vm5713_vm3, %v11343_v23, 0.0  ;;  %v5845_v21 = vadd.f32 %v5844_v30, %v5843_v33  ;;  %v11406_v20 = vsel %vm5713_vm3, %v11345_v13, 0.0  ;;  %v11480_v26 = vld [vmem:[#allocation2 + $0x2a0] sm:$0x7f] }
 0x2bf   :  { %v1137_v10 = vadd.f32 %v15325_v43, %v15323_v27  ;;  %15326 = vst [vmem:[#allocation460_spill] sm:$0xff] %v11400_v34  ;;  %v11402_v4 = vadd.f32 %v5752_v61, %v5751_v49  ;;  %15328 = vst [vmem:[#allocation70_spill] sm:$0xff] %v11406_v20  ;;  %v11410_v41 = vsel %vm5713_vm3, %v11347_v8, 0.0  ;;  %v11414_v15 = vsel %vm5713_vm3, %v11350_v12, 0.0  ;;  %v15336_v27 = vld [vmem:[#allocation275_spill] sm:$0xff]  ;;  %v15338_v43 = vld [vmem:[#allocation204_spill] sm:$0xff] }
 0x2c0   :  { %15329 = vst [vmem:[#allocation71_spill] sm:$0xff] %v11410_v41  ;;  %15330 = vst [vmem:[#allocation72_spill] sm:$0xff] %v11414_v15  ;;  %v5846_v62 = vsel %vm5713_vm3, %v5787_v37, 0.0  ;;  %v11418_v36 = vsel %vm5713_vm3, %v5795_v2, 0.0  ;;  %v11421_v33 = vsel %vm5713_vm3, %v5797_v25, 0.0  ;;  %v642_v11 = vadd.f32 %v614_v48, %v15333_v56  ;;  %v15341_v2 = vld [vmem:[#allocation165_spill] sm:$0xff] }
 0x2c1   :  { %15327 = vst [vmem:[#allocation69_spill] sm:$0xff] %v11402_v4  ;;  %15331 = vst [vmem:[#allocation39_spill] sm:$0xff] %v11418_v36  ;;  %v11425_v49 = vsel %vm5713_vm3, %v5799_v18, 0.0  ;;  %v11428_v30 = vsel %vm5713_vm3, %v5801_v51, 0.0  ;;  %v15337_v55 = vrot.slane %v15336_v27, 3  ;;  %v15339_v61 = vrot.slane %v15338_v43, 3 }
 0x2c2   :  { %15332 = vst [vmem:[#allocation178_spill] sm:$0xff] %v11421_v33  ;;  %15334 = vst [vmem:[#allocation205_spill] sm:$0xff] %v11425_v49  ;;  %v15342_v1 = vrot.slane %v15341_v2, 1  ;;  %v11439_v25 = vadd.f32 %v5846_v62, %v5845_v21  ;;  %v15345_v48 = vrot.slane %v15344_v16, 3  ;;  %v15346_v56 = vld [vmem:[#allocation355_spill] sm:$0xff]  ;;  %v15351_v27 = vld [vmem:[#allocation396_spill] sm:$0xff] }
 0x2c3   :  { %15335 = vst [vmem:[#allocation238_spill] sm:$0xff] %v11428_v30  ;;  %v11435_v37 = vsel %vm3098_vm1, %v15339_v61, %v15337_v55  ;;  %v15347_v18 = vrot.slane %v15346_v56, 3  ;;  %v15349_v51 = vld [vmem:[#allocation299_spill] sm:$0xff]  ;;  %v15352_v8 = vrot.slane %v15351_v27, 3  ;;  %v15354_v55 = vrot.slane %v10851_v17, 4  ;;  %v15355_v61 = vld [vmem:[#allocation209_spill] sm:$0xff] }
 0x2c4   :  { %15340 = vst [vmem:[#allocation255_spill] sm:$0xff] %v11435_v37  ;;  %v1290_v6 = vadd.f32 %v15342_v1, %v1137_v10  ;;  %15343 = vst [vmem:[#allocation266_spill] sm:$0xff] %v11439_v25  ;;  %v15350_v12 = vrot.slane %v15349_v51, 3  ;;  %v15356_v10 = vrot.slane %v15355_v61, 4  ;;  %v15358_v16 = vld [vmem:[#allocation492_spill] sm:$0xff]  ;;  %v15363_v56 = vld [vmem:[#allocation493_spill] sm:$0xff] }
 0x2c5   :  { %v11446_v46 = vsel %vm3098_vm1, %v15347_v18, %v15345_v48  ;;  %v15359_v21 = vrot.slane %v15358_v16, 4  ;;  %v15360_v62 = vld [vmem:[#allocation360_spill] sm:$0xff]  ;;  %v15364_v18 = vrot.slane %v15363_v56, 4  ;;  %v15365_v51 = vld [vmem:[#allocation401_spill] sm:$0xff]  ;;  %v15368_v17 = vld [vmem:[#allocation170_spill] sm:$0xff]  ;;  %v15390_v45 = vrot.slane %v15389_v57, 2 }
 0x2c6   :  { %15348 = vst [vmem:[#allocation278_spill] sm:$0xff] %v11446_v46  ;;  %v11453_v43 = vsel %vm3098_vm1, %v15352_v8, %v15350_v12  ;;  %v11460_v1 = vsel %vm4512_vm2, %v15356_v10, %v15354_v55  ;;  %v15361_v2 = vrot.slane %v15360_v62, 4  ;;  %v15366_v27 = vrot.slane %v15365_v51, 4  ;;  %v15369_v61 = vld [vmem:[#allocation377_spill] sm:$0xff]  ;;  %v15370_v10 = vld [vmem:[#allocation127_spill] sm:$0xff]  ;;  %v15372_v62 = vld [vmem:[#allocation46_spill] sm:$0xff] }
 0x2c7   :  { %15353 = vst [vmem:[#allocation290_spill] sm:$0xff] %v11453_v43  ;;  %15357 = vst [vmem:[#allocation303_spill] sm:$0xff] %v11460_v1  ;;  %v2480_v12 = vrot.slane %v15368_v17, 2  ;;  %v2481_v13 = vrot.slane %v15369_v61, 2  ;;  %v2885_v55 = vld [vmem:[#allocation2 + $0x2b0] sm:$0xf8] }
 0x2c8   :  { %v11467_v48 = vsel %vm4512_vm2, %v15361_v2, %v15359_v21  ;;  %v11474_v8 = vsel %vm4512_vm2, %v15366_v27, %v15364_v18  ;;  %v15371_v23 = vrot.slane %v15370_v10, 1  ;;  %v15373_v21 = vrot.slane %v15372_v62, 2  ;;  %v15374_v2 = vld [vmem:[#allocation12_spill] sm:$0xff]  ;;  %v6093_v51 = vld [vmem:[#allocation2 + $0x240] sm:$0xfc]  ;;  %v15379_v61 = vld [vmem:[#allocation150_spill] sm:$0xff] }
 0x2c9   :  { %15362 = vst [vmem:[#allocation311_spill] sm:$0xff] %v11467_v48  ;;  %15367 = vst [vmem:[#allocation322_spill] sm:$0xff] %v11474_v8  ;;  %v15375_v42 = vrot.slane %v15374_v2, 2  ;;  %v11488_v18 = vmul.f32 %v6093_v51, %v15376_v3  ;;  %v6094_v27 = vld [vmem:[#allocation2 + $0x60] sm:$0x1]  ;;  %v615_v10 = vmul.f32 %v15379_v61, %v11480_v26  ;;  %v15383_v62 = vrot.slane %v15382_v50, 2 }
 0x2ca   :  { %v839_v16 = vadd.f32 %v15371_v23, %v642_v11  ;;  %v11491_v17 = vmul.f32 %v6094_v27, %v15376_v3  ;;  %v15380_v23 = vld [vmem:[#allocation11_spill] sm:$0xff]  ;;  %v15385_v2 = vrot.slane %v15384_v32, 2  ;;  %v15392_v59 = vrot.slane %v15391_v54, 2  ;;  %v15396_v50 = vld [vmem:[#allocation370_spill] sm:$0xff]  ;;  %v15403_v57 = vld [vmem:[#allocation224_spill] sm:$0xff] }
 0x2cb   :  { %v1687_v56 = vsel %vm1684_vm0, %v15375_v42, %v15373_v21  ;;  %15377 = vst [vmem:[#allocation341_spill] sm:$0xff] %v11488_v18  ;;  %v15381_v11 = vrot.slane %v15380_v23, 1  ;;  %v15387_v21 = vld [vmem:[#allocation378_spill] sm:$0xff]  ;;  %v15394_v30 = vrot.slane %v15393_v31, 2  ;;  %v15404_v49 = vrot.slane %v15403_v57, 2  ;;  %v15406_v15 = vld [vmem:[#allocation293_spill] sm:$0xff] }
 0x2cc   :  { %15378 = vst [vmem:[#allocation356_spill] sm:$0xff] %v11491_v17  ;;  %v11502_v42 = vsel %vm1684_vm0, %v15385_v2, %v15383_v62  ;;  %v15388_v51 = vrot.slane %v15387_v21, 2  ;;  %v15398_v32 = vld [vmem:[#allocation334_spill] sm:$0xff]  ;;  %v15401_v2 = vld [vmem:[#allocation151_spill] sm:$0xff]  ;;  %v2889_v54 = vld [vmem:[#allocation2 + $0x30] sm:$0xf8] }
 0x2cd   :  { %v1443_v39 = vadd.f32 %v15381_v11, %v1290_v6  ;;  %15386 = vst [vmem:[#allocation397_spill] sm:$0xff] %v11502_v42  ;;  %v11514_v6 = vsel %vm1684_vm0, %v15394_v30, %v15392_v59  ;;  %v15399_v11 = vld [vmem:[#allocation379_spill] sm:$0xff]  ;;  %v15402_v21 = vrot.slane %v15401_v2, 2  ;;  %v643_v59 = vadd.f32 %v615_v10, %v15406_v15  ;;  %v2893_v2 = vld [vmem:[#allocation2 + $0x128] sm:$0xf8]  ;;  %v15413_v57 = vld [vmem:[#allocation21_spill] sm:$0xff] }
 0x2ce   :  { %v2488_v27 = vsel %vm1684_vm0, %v15390_v45, %v15388_v51  ;;  %15395 = vst [vmem:[#allocation411_spill] sm:$0xff] %v11514_v6  ;;  %v11521_v62 = vadd.f32 %v15399_v11, %v15398_v32  ;;  %v2891_v51 = vld [vmem:[#allocation2 + $0xf8] sm:$0x3]  ;;  %v678_v31 = vld [vmem:[#allocation2 + $0x180] sm:$0xfe]  ;;  %v11532_v30 = vsel %vm1684_vm0, %v2480_v12, %v2481_v13  ;;  %v15435_v41 = vld [vmem:[#allocation9_spill] sm:$0xff] }
 0x2cf   :  { %v11517_v23 = vadd.f32 %v2488_v27, %v15396_v50  ;;  %v11528_v45 = vsel %vm1684_vm0, %v15404_v49, %v15402_v21  ;;  %15407 = vst [vmem:[#allocation461_spill] sm:$0xff] %v11532_v30  ;;  %v15408_v27 = vld [vmem:[#allocation164_spill] sm:$0xff]  ;;  %v1503_v10 = vld [vmem:[#allocation2 + $0x180] sm:$0xfc]  ;;  %v15434_v30 = vld [vmem:[#allocation153_spill] sm:$0xff]  ;;  %v15436_v28 = vrot.slane %v15435_v41, 1 }
 0x2d0   :  { %15400 = vst [vmem:[#allocation444_spill] sm:$0xff] %v11521_v62  ;;  %15405 = vst [vmem:[#allocation73_spill] sm:$0xff] %v11528_v45  ;;  %v15409_v50 = vrot.slane %v15408_v27, 2  ;;  %v11542_v62 = vmul.f32 %v15413_v57, %v2885_v55  ;;  %v15415_v49 = vld [vmem:[#allocation116_spill] sm:$0xff]  ;;  %v15416_v45 = vld [vmem:[#allocation15_spill] sm:$0xff]  ;;  %v11556_v55 = vmul.f32 %v15413_v57, %v2889_v54 }
 0x2d1   :  { %15397 = vst [vmem:[#allocation428_spill] sm:$0xff] %v11517_v23  ;;  %v15410_v23 = vld [vmem:[#allocation253_spill] sm:$0xff]  ;;  %v480_v21 = vmul.f32 %v15415_v49, %v11385_v0  ;;  %v15417_v6 = vrot.slane %v15416_v45, 1  ;;  %v2917_v27 = vld [vmem:[#allocation2 + $0x180] sm:$0xf8]  ;;  %v15442_v20 = vld [vmem:[#allocation216_spill] sm:$0xff] }
 0x2d2   :  { %v15411_v32 = vrot.slane %v15410_v23, 2  ;;  %15414 = vst [vmem:[#allocation407_spill] sm:$0xff] %v11542_v62  ;;  %v11550_v23 = vadd.f32 %v1687_v56, %v1443_v39  ;;  %15420 = vst [vmem:[#allocation251_spill] sm:$0xff] %v11556_v55  ;;  %v15422_v45 = vld [vmem:[#allocation129_spill] sm:$0xff]  ;;  %v15424_v13 = vld [vmem:[#allocation119_spill] sm:$0xff]  ;;  %v11570_v56 = vmul.f32 %v15413_v57, %v2893_v2  ;;  %v11585_v2 = vmul.f32 %v15376_v3, %v1503_v10 }
 0x2d3   :  { %v992_v15 = vadd.f32 %v15417_v6, %v839_v16  ;;  %v547_v16 = vmul.f32 %v15422_v45, %v11385_v0  ;;  %v15423_v6 = vld [vmem:[#allocation117_spill] sm:$0xff]  ;;  %v11567_v12 = vmul.f32 %v15424_v13, %v678_v31  ;;  %v4331_v39 = vld [vmem:[#allocation2 + $0x180] sm:$0xf0]  ;;  %v2895_v62 = vld [vmem:[#allocation2] sm:$0x3]  ;;  %v508_v33 = vadd.f32 %v480_v21, %v15434_v30 }
 0x2d4   :  { %v11539_v11 = vsel %vm1684_vm0, %v15411_v32, %v15409_v50  ;;  %15418 = vst [vmem:[#allocation480_spill] sm:$0xff] %v11550_v23  ;;  %v11553_v50 = vmul.f32 %v15413_v57, %v2887_v40  ;;  %v11559_v32 = vmul.f32 %v15413_v57, %v2891_v51  ;;  %15426 = vst [vmem:[#allocation206_spill] sm:$0xff] %v11570_v56  ;;  %v15427_v40 = vld [vmem:[#allocation145_spill] sm:$0xff]  ;;  %v15428_v54 = vld [vmem:[#allocation123_spill] sm:$0xff] }
 0x2d5   :  { %15412 = vst [vmem:[#allocation158_spill] sm:$0xff] %v11539_v11  ;;  %v11564_v11 = vmul.f32 %v15423_v6, %v678_v31  ;;  %15425 = vst [vmem:[#allocation179_spill] sm:$0xff] %v11567_v12  ;;  %v1339_v18 = vmul.f32 %v15427_v40, %v678_v31  ;;  %v11574_v17 = vmul.f32 %v15428_v54, %v1503_v10  ;;  %v15430_v51 = vld [vmem:[#allocation44_spill] sm:$0xff]  ;;  %v15432_v55 = vld [vmem:[#allocation33_spill] sm:$0xff] }
 0x2d6   :  { %15419 = vst [vmem:[#allocation76_spill] sm:$0xff] %v11553_v50  ;;  %15421 = vst [vmem:[#allocation198_spill] sm:$0xff] %v11559_v32  ;;  %v11577_v32 = vmul.f32 %v15430_v51, %v1503_v10  ;;  %v15433_v0 = vrot.slane %v15432_v55, 1  ;;  %v1145_v42 = vadd.f32 %v15436_v28, %v992_v15  ;;  %v15438_v56 = vld [vmem:[#allocation118_spill] sm:$0xff]  ;;  %v15440_v23 = vld [vmem:[#allocation95_spill] sm:$0xff]  ;;  %v11594_v48 = vmul.f32 %v15442_v20, %v2917_v27 }
 0x2d7   :  { %15429 = vst [vmem:[#allocation199_spill] sm:$0xff] %v11574_v17  ;;  %15437 = vst [vmem:[#allocation279_spill] sm:$0xff] %v11585_v2  ;;  %v11588_v31 = vmul.f32 %v15438_v56, %v2917_v27  ;;  %v11591_v36 = vmul.f32 %v15440_v23, %v2917_v27  ;;  %v11600_v30 = vmul.f32 %v15263_v22, %v4331_v39  ;;  %v15446_v41 = vld [vmem:[#allocation273_spill] sm:$0xff]  ;;  %v1395_v55 = vrot.slane %v1339_v18, 1  ;;  %v679_v34 = vld [vmem:[#allocation2 + $0x2a0] sm:$0xfe] }
 0x2d8   :  { %15431 = vst [vmem:[#allocation267_spill] sm:$0xff] %v11577_v32  ;;  %v840_v50 = vadd.f32 %v15433_v0, %v643_v59  ;;  %15443 = vst [vmem:[#allocation38_spill] sm:$0xff] %v11594_v48  ;;  %v11597_v59 = vmul.f32 %v15223_v35, %v4331_v39  ;;  %v575_v28 = vadd.f32 %v547_v16, %v15446_v41  ;;  %v15448_v63 = vld [vmem:[#allocation230_spill] sm:$0xff]  ;;  %v15450_v39 = vld [vmem:[#allocation233_spill] sm:$0xff] }
 0x2d9   :  { %15439 = vst [vmem:[#allocation291_spill] sm:$0xff] %v11588_v31  ;;  %15441 = vst [vmem:[#allocation37_spill] sm:$0xff] %v11591_v36  ;;  %v11606_v10 = vmul.f32 %v15413_v57, %v2895_v62  ;;  %v15449_v25 = vrot.slane %v15448_v63, 1  ;;  %v15451_v14 = vrot.slane %v15450_v39, 1  ;;  %v15452_v15 = vld [vmem:[#allocation137_spill] sm:$0xff]  ;;  %v15455_v39 = vld [vmem:[#allocation128_spill] sm:$0xff] }
 0x2da   :  { %15444 = vst [vmem:[#allocation323_spill] sm:$0xff] %v11597_v59  ;;  %15445 = vst [vmem:[#allocation342_spill] sm:$0xff] %v11600_v30  ;;  %v577_v21 = vadd.f32 %v15452_v15, %v508_v33  ;;  %v1504_v62 = vld [vmem:[#allocation2 + $0x2a0] sm:$0xfc]  ;;  %v11626_v41 = vmul.f32 %v15455_v39, %v679_v34  ;;  %v312_v16 = vld [vmem:[#allocation2 + $0xb0] sm:$0x7f] }
 0x2db   :  { %15447 = vst [vmem:[#allocation357_spill] sm:$0xff] %v11606_v10  ;;  %v993_v4 = vadd.f32 %v15449_v25, %v840_v50  ;;  %v1298_v19 = vadd.f32 %v15451_v14, %v1145_v42  ;;  %v2918_v63 = vld [vmem:[#allocation2 + $0x2a0] sm:$0xf8]  ;;  %v15453_v25 = vld [vmem:[#allocation124_spill] sm:$0xff]  ;;  %v15454_v14 = vld [vmem:[#allocation134_spill] sm:$0xff]  ;;  %v628_v36 = vmul.f32 %v15322_v58, %v312_v16 }
 0x2dc   :  { %v481_v50 = vmul.f32 %v15453_v25, %v11480_v26  ;;  %v548_v42 = vmul.f32 %v15454_v14, %v11480_v26  ;;  %v15456_v33 = vld [vmem:[#allocation135_spill] sm:$0xff]  ;;  %v15457_v0 = vld [vmem:[#allocation172_spill] sm:$0xff]  ;;  %v15462_v8 = vld [vmem:[#allocation49_spill] sm:$0xff]  ;;  %v11645_v5 = vmul.f32 %v15463_v29, %v2918_v63 }
 0x2dd   :  { %v11629_v15 = vmul.f32 %v15456_v33, %v679_v34  ;;  %v4332_v18 = vld [vmem:[#allocation2 + $0x2a0] sm:$0xf0]  ;;  %v15458_v48 = vrot.slane %v15457_v0, 1  ;;  %v15459_v59 = vld [vmem:[#allocation52_spill] sm:$0xff]  ;;  %v1451_v7 = vadd.f32 %v1395_v55, %v1298_v19  ;;  %v11642_v31 = vmul.f32 %v15462_v8, %v1504_v62  ;;  %v15471_v43 = vld [vmem:[#allocation285_spill] sm:$0xff] }
 0x2de   :  { %v1340_v10 = vmul.f32 %v15459_v59, %v679_v34  ;;  %v15460_v30 = vld [vmem:[#allocation132_spill] sm:$0xff]  ;;  %v15461_v26 = vld [vmem:[#allocation47_spill] sm:$0xff]  ;;  %v644_v0 = vadd.f32 %v15464_v44, %v575_v28  ;;  %v11655_v58 = vmul.f32 %v15222_v53, %v4332_v18  ;;  %v576_v1 = vadd.f32 %v548_v42, %v15470_v60  ;;  %v15473_v37 = vld [vmem:[#allocation469_spill] sm:$0xff] }
 0x2df   :  { %v1146_v27 = vadd.f32 %v15458_v48, %v993_v4  ;;  %v11635_v57 = vmul.f32 %v15460_v30, %v1504_v62  ;;  %v11639_v9 = vmul.f32 %v15461_v26, %v1504_v62  ;;  %v15465_v4 = vld [vmem:[#allocation40_spill] sm:$0xff]  ;;  %v15466_v34 = vld [vmem:[#allocation43_spill] sm:$0xff]  ;;  %v15472_v2 = vrot.slane %v15471_v43, 1  ;;  %v15474_v17 = vld [vmem:[#allocation381_spill] sm:$0xff] }
 0x2e0   :  { %v11649_v48 = vmul.f32 %v15465_v4, %v2918_v63  ;;  %v11652_v24 = vmul.f32 %v15466_v34, %v2918_v63  ;;  %15468 = vst [vmem:[#allocation412_spill] sm:$0xff] %v11655_v58  ;;  %v15469_v19 = vld [vmem:[#allocation171_spill] sm:$0xff]  ;;  %v1396_v28 = vrot.slane %v1340_v10, 1  ;;  %v656_v63 = vadd.f32 %v628_v36, %v15473_v37  ;;  %v700_v42 = vld [vmem:[#allocation2 + $0xb0] sm:$0xfe] }
 0x2e1   :  { %v509_v55 = vadd.f32 %v481_v50, %v15469_v19  ;;  %v1299_v44 = vadd.f32 %v15472_v2, %v1146_v27  ;;  %v1805_v12 = vadd.f32 %v15474_v17, %v1451_v7  ;;  %v11673_v2 = vmul.f32 %v15259_v47, %v4332_v18  ;;  %v15477_v7 = vld [vmem:[#allocation140_spill] sm:$0xff]  ;;  %v1547_v27 = vld [vmem:[#allocation2 + $0xb0] sm:$0xfc]  ;;  %v313_v60 = vld [vmem:[#allocation2 + $0x140] sm:$0x7f] }
 0x2e2   :  { %15467 = vst [vmem:[#allocation398_spill] sm:$0xff] %v11652_v24  ;;  %v11676_v36 = vmul.f32 %v15268_v38, %v4332_v18  ;;  %v494_v17 = vmul.f32 %v15415_v49, %v312_v16  ;;  %v561_v10 = vmul.f32 %v15422_v45, %v312_v16  ;;  %v15478_v19 = vld [vmem:[#allocation34_spill] sm:$0xff]  ;;  %v11684_v43 = vmul.f32 %v15423_v6, %v700_v42  ;;  %v15481_v58 = vld [vmem:[#allocation185_spill] sm:$0xff] }
 0x2e3   :  { %15475 = vst [vmem:[#allocation429_spill] sm:$0xff] %v11673_v2  ;;  %v578_v37 = vadd.f32 %v15477_v7, %v509_v55  ;;  %v1452_v50 = vadd.f32 %v1396_v28, %v1299_v44  ;;  %v15479_v53 = vrot.slane %v15478_v19, 1  ;;  %v11687_v32 = vmul.f32 %v15424_v13, %v700_v42  ;;  %v15480_v18 = vld [vmem:[#allocation54_spill] sm:$0xff]  ;;  %v15482_v7 = vld [vmem:[#allocation217_spill] sm:$0xff]  ;;  %v15484_v44 = vld [vmem:[#allocation219_spill] sm:$0xff] }
 0x2e4   :  { %15476 = vst [vmem:[#allocation445_spill] sm:$0xff] %v11676_v36  ;;  %v645_v62 = vadd.f32 %v15480_v18, %v576_v1  ;;  %v646_v55 = vadd.f32 %v15481_v58, %v577_v21  ;;  %v15483_v49 = vrot.slane %v15482_v7, 1  ;;  %v1353_v45 = vmul.f32 %v15427_v40, %v700_v42  ;;  %v15485_v1 = vld [vmem:[#allocation347_spill] sm:$0xff]  ;;  %v15486_v21 = vld [vmem:[#allocation468_spill] sm:$0xff]  ;;  %v15488_v42 = vld [vmem:[#allocation6_spill] sm:$0xff] }
 0x2e5   :  { %v853_v46 = vadd.f32 %v15479_v53, %v656_v63  ;;  %v11696_v28 = vadd.f32 %v15484_v44, %v1805_v12  ;;  %v11699_v53 = vmul.f32 %v15428_v54, %v1547_v27  ;;  %v495_v13 = vmul.f32 %v15453_v25, %v313_v60  ;;  %v15487_v19 = vld [vmem:[#allocation7_spill] sm:$0xff]  ;;  %v2961_v44 = vld [vmem:[#allocation2 + $0xb0] sm:$0xf8] }
 0x2e6   :  { %v841_v24 = vadd.f32 %v15483_v49, %v644_v0  ;;  %v522_v63 = vadd.f32 %v494_v17, %v15485_v1  ;;  %v589_v58 = vadd.f32 %v561_v10, %v15486_v21  ;;  %v562_v0 = vmul.f32 %v15454_v14, %v313_v60  ;;  %v4375_v25 = vld [vmem:[#allocation2 + $0xb0] sm:$0xf0]  ;;  %v15493_v21 = vld [vmem:[#allocation332_spill] sm:$0xff] }
 0x2e7   :  { %v1806_v40 = vadd.f32 %v15487_v19, %v1452_v50  ;;  %v15489_v18 = vrot.slane %v15488_v42, 1  ;;  %v1409_v16 = vrot.slane %v1353_v45, 1  ;;  %v15490_v2 = vld [vmem:[#allocation53_spill] sm:$0xff]  ;;  %v629_v10 = vmul.f32 %v15379_v61, %v313_v60  ;;  %v15496_v61 = vld [vmem:[#allocation423_spill] sm:$0xff] }
 0x2e8   :  { %v647_v6 = vadd.f32 %v15490_v2, %v578_v37  ;;  %v15491_v36 = vld [vmem:[#allocation229_spill] sm:$0xff]  ;;  %v11717_v50 = vmul.f32 %v15430_v51, %v1547_v27  ;;  %v523_v19 = vadd.f32 %v495_v13, %v15493_v21  ;;  %v11724_v45 = vmul.f32 %v15438_v56, %v2961_v44  ;;  %v15501_v13 = vld [vmem:[#allocation138_spill] sm:$0xff] }
 0x2e9   :  { %v1006_v7 = vadd.f32 %v15489_v18, %v853_v46  ;;  %v15492_v17 = vrot.slane %v15491_v36, 1  ;;  %v11720_v46 = vmul.f32 %v15376_v3, %v1547_v27  ;;  %v11727_v2 = vmul.f32 %v15440_v23, %v2961_v44  ;;  %v15497_v36 = vld [vmem:[#allocation437_spill] sm:$0xff] }
 0x2ea   :  { %v590_v60 = vadd.f32 %v562_v0, %v15496_v61  ;;  %v15498_v37 = vrot.slane %v15497_v36, 1  ;;  %v11736_v18 = vmul.f32 %v15223_v35, %v4375_v25  ;;  %v11739_v27 = vmul.f32 %v15263_v22, %v4375_v25  ;;  %v15503_v14 = vld [vmem:[#allocation477_spill] sm:$0xff]  ;;  %v15506_v0 = vld [vmem:[#allocation260_spill] sm:$0xff] }
 0x2eb   :  { %v842_v1 = vadd.f32 %v15492_v17, %v645_v62  ;;  %15494 = vst [vmem:[#allocation462_spill] sm:$0xff] %v11727_v2  ;;  %v11730_v62 = vmul.f32 %v15442_v20, %v2961_v44  ;;  %v591_v17 = vadd.f32 %v15501_v13, %v522_v63  ;;  %v11743_v21 = vmul.f32 %v15296_v52, %v4375_v25  ;;  %v15504_v44 = vld [vmem:[#allocation259_spill] sm:$0xff]  ;;  %v15508_v35 = vld [vmem:[#allocation120_spill] sm:$0xff]  ;;  %v15509_v23 = vld [vmem:[#allocation141_spill] sm:$0xff] }
 0x2ec   :  { %v1159_v42 = vadd.f32 %v15498_v37, %v1006_v7  ;;  %15499 = vst [vmem:[#allocation159_spill] sm:$0xff] %v11736_v18  ;;  %15500 = vst [vmem:[#allocation481_spill] sm:$0xff] %v11739_v27  ;;  %v657_v49 = vadd.f32 %v629_v10, %v15503_v14  ;;  %v15505_v12 = vrot.slane %v15504_v44, 1  ;;  %v15507_v61 = vrot.slane %v15506_v0, 1  ;;  %v15510_v14 = vld [vmem:[#allocation55_spill] sm:$0xff]  ;;  %v15514_v7 = vld [vmem:[#allocation228_spill] sm:$0xff] }
 0x2ed   :  { %15495 = vst [vmem:[#allocation470_spill] sm:$0xff] %v11730_v62  ;;  %15502 = vst [vmem:[#allocation335_spill] sm:$0xff] %v11743_v21  ;;  %v658_v22 = vadd.f32 %v15508_v35, %v589_v58  ;;  %v592_v56 = vadd.f32 %v15509_v23, %v523_v19  ;;  %v659_v13 = vadd.f32 %v15510_v14, %v590_v60  ;;  %v701_v0 = vld [vmem:[#allocation2 + $0x140] sm:$0xfe]  ;;  %v15515_v35 = vrot.slane %v15514_v7, 1  ;;  %v15518_v60 = vld [vmem:[#allocation284_spill] sm:$0xff] }
 0x2ee   :  { %v844_v20 = vadd.f32 %v15505_v12, %v647_v6  ;;  %v995_v36 = vadd.f32 %v15507_v61, %v842_v1  ;;  %v15511_v6 = vld [vmem:[#allocation61_spill] sm:$0xff]  ;;  %v15513_v61 = vld [vmem:[#allocation186_spill] sm:$0xff]  ;;  %v15516_v25 = vld [vmem:[#allocation387_spill] sm:$0xff]  ;;  %v15519_v14 = vrot.slane %v15518_v60, 1 }
 0x2ef   :  { %v15512_v12 = vrot.slane %v15511_v6, 1  ;;  %v660_v37 = vadd.f32 %v15513_v61, %v591_v17  ;;  %v15517_v63 = vrot.slane %v15516_v25, 1  ;;  %v1548_v52 = vld [vmem:[#allocation2 + $0x140] sm:$0xfc]  ;;  %v15522_v18 = vld [vmem:[#allocation405_spill] sm:$0xff]  ;;  %v15526_v23 = vld [vmem:[#allocation248_spill] sm:$0xff] }
 0x2f0   :  { %v997_v58 = vadd.f32 %v15515_v35, %v844_v20  ;;  %v1148_v6 = vadd.f32 %v15519_v14, %v995_v36  ;;  %v15523_v62 = vrot.slane %v15522_v18, 1  ;;  %v15524_v61 = vld [vmem:[#allocation139_spill] sm:$0xff]  ;;  %v15525_v20 = vrot.slane %v11626_v41, 1  ;;  %v15532_v18 = vld [vmem:[#allocation232_spill] sm:$0xff]  ;;  %v15573_v27 = vld [vmem:[#allocation130_spill] sm:$0xff] }
 0x2f1   :  { %v1312_v44 = vadd.f32 %v15512_v12, %v1159_v42  ;;  %v854_v10 = vadd.f32 %v15517_v63, %v657_v49  ;;  %v15520_v42 = vld [vmem:[#allocation59_spill] sm:$0xff]  ;;  %v661_v7 = vadd.f32 %v15524_v61, %v592_v56  ;;  %v15527_v19 = vrot.slane %v15526_v23, 1 }
 0x2f2   :  { %v15521_v12 = vrot.slane %v15520_v42, 1  ;;  %v855_v17 = vadd.f32 %v15523_v62, %v658_v22  ;;  %v1150_v35 = vadd.f32 %v15525_v20, %v997_v58  ;;  %v1052_v49 = vmul.f32 %v15455_v39, %v701_v0  ;;  %v15528_v25 = vld [vmem:[#allocation419_spill] sm:$0xff]  ;;  %v15536_v42 = vld [vmem:[#allocation142_spill] sm:$0xff] }
 0x2f3   :  { %v994_v21 = vadd.f32 %v15527_v19, %v841_v24  ;;  %v1203_v63 = vmul.f32 %v15456_v33, %v701_v0  ;;  %v15529_v36 = vrot.slane %v15528_v25, 1  ;;  %v1465_v14 = vadd.f32 %v1409_v16, %v1312_v44  ;;  %v15530_v56 = vld [vmem:[#allocation435_spill] sm:$0xff]  ;;  %v15533_v24 = vld [vmem:[#allocation421_spill] sm:$0xff]  ;;  %v15543_v25 = vld [vmem:[#allocation436_spill] sm:$0xff] }
 0x2f4   :  { %v843_v1 = vadd.f32 %v15521_v12, %v646_v55  ;;  %v1354_v55 = vmul.f32 %v15459_v59, %v701_v0  ;;  %v11785_v22 = vmul.f32 %v15460_v30, %v1548_v52  ;;  %v15531_v62 = vrot.slane %v15530_v56, 1  ;;  %v15538_v59 = vld [vmem:[#allocation63_spill] sm:$0xff] }
 0x2f5   :  { %v856_v60 = vadd.f32 %v15529_v36, %v659_v13  ;;  %v11790_v58 = vadd.f32 %v15532_v18, %v1806_v40  ;;  %v15534_v23 = vrot.slane %v15533_v24, 1  ;;  %v15535_v33 = vrot.slane %v11629_v15, 1  ;;  %v15539_v0 = vld [vmem:[#allocation215_spill] sm:$0xff]  ;;  %v15547_v24 = vld [vmem:[#allocation384_spill] sm:$0xff] }
 0x2f6   :  { %v857_v41 = vadd.f32 %v15531_v62, %v660_v37  ;;  %v15537_v13 = vrot.slane %v15536_v42, 1  ;;  %v11800_v44 = vadd.f32 %v15538_v59, %v11696_v28  ;;  %v15540_v12 = vrot.slane %v15539_v0, 1  ;;  %v15541_v37 = vld [vmem:[#allocation10_spill] sm:$0xff] }
 0x2f7   :  { %v1007_v39 = vadd.f32 %v15534_v23, %v854_v10  ;;  %v1301_v19 = vadd.f32 %v15535_v33, %v1148_v6  ;;  %v15542_v20 = vrot.slane %v15541_v37, 1  ;;  %v15544_v36 = vrot.slane %v15543_v25, 1  ;;  %v15545_v6 = vld [vmem:[#allocation453_spill] sm:$0xff]  ;;  %v15548_v42 = vld [vmem:[#allocation314_spill] sm:$0xff] }
 0x2f8   :  { %v1303_v16 = vadd.f32 %v15537_v13, %v1150_v35  ;;  %v996_v61 = vadd.f32 %v15540_v12, %v843_v1  ;;  %v1108_v10 = vrot.slane %v1052_v49, 1  ;;  %v1259_v62 = vrot.slane %v1203_v63, 1  ;;  %v2962_v1 = vld [vmem:[#allocation2 + $0x140] sm:$0xf8]  ;;  %v15550_v59 = vld [vmem:[#allocation454_spill] sm:$0xff] }
 0x2f9   :  { %v858_v40 = vadd.f32 %v15542_v20, %v661_v7  ;;  %v1008_v56 = vadd.f32 %v15544_v36, %v855_v17  ;;  %v11809_v15 = vmul.f32 %v15461_v26, %v1548_v52  ;;  %v15546_v35 = vrot.slane %v15545_v6, 1  ;;  %v4376_v49 = vld [vmem:[#allocation2 + $0x140] sm:$0xf0]  ;;  %v15552_v63 = vld [vmem:[#allocation222_spill] sm:$0xff]  ;;  %v15554_v20 = vld [vmem:[#allocation57_spill] sm:$0xff] }
 0x2fa   :  { %v1819_v28 = vadd.f32 %v15547_v24, %v1465_v14  ;;  %v1410_v23 = vrot.slane %v1354_v55, 1  ;;  %v15549_v13 = vrot.slane %v15548_v42, 1  ;;  %v15551_v0 = vrot.slane %v15550_v59, 1  ;;  %v1506_v55 = vld [vmem:[#allocation2 + $0x1d0] sm:$0x1]  ;;  %v15558_v24 = vld [vmem:[#allocation439_spill] sm:$0xff] }
 0x2fb   :  { %v1009_v18 = vadd.f32 %v15546_v35, %v856_v60  ;;  %v15553_v12 = vrot.slane %v15552_v63, 1  ;;  %v15555_v25 = vrot.slane %v15554_v20, 1  ;;  %v15556_v60 = vld [vmem:[#allocation114_spill] sm:$0xff]  ;;  %v11826_v35 = vmul.f32 %v15462_v8, %v1548_v52 }
 0x2fc   :  { %v1010_v7 = vadd.f32 %v15549_v13, %v857_v41  ;;  %v1160_v17 = vadd.f32 %v15551_v0, %v1007_v39  ;;  %v15557_v6 = vrot.slane %v15556_v60, 1  ;;  %v15559_v42 = vrot.slane %v15558_v24, 1  ;;  %v15561_v59 = vld [vmem:[#allocation406_spill] sm:$0xff] }
 0x2fd   :  { %v1147_v37 = vadd.f32 %v15553_v12, %v994_v21  ;;  %v1454_v36 = vadd.f32 %v15555_v25, %v1301_v19  ;;  %v15560_v13 = vrot.slane %v11564_v11, 1  ;;  %v15562_v0 = vrot.slane %v15561_v59, 1  ;;  %v15563_v12 = vld [vmem:[#allocation420_spill] sm:$0xff]  ;;  %v15571_v21 = vld [vmem:[#allocation382_spill] sm:$0xff] }
 0x2fe   :  { %v1456_v14 = vadd.f32 %v15557_v6, %v1303_v16  ;;  %v1011_v41 = vadd.f32 %v15559_v42, %v858_v40  ;;  %v11836_v19 = vmul.f32 %v15463_v29, %v2962_v1  ;;  %v11839_v16 = vmul.f32 %v15465_v4, %v2962_v1  ;;  %v15565_v40 = vld [vmem:[#allocation136_spill] sm:$0xff] }
 0x2ff   :  { %v1149_v39 = vadd.f32 %v15560_v13, %v996_v61  ;;  %v1161_v63 = vadd.f32 %v15562_v0, %v1008_v56  ;;  %v15564_v52 = vrot.slane %v15563_v12, 1  ;;  %v11844_v25 = vmul.f32 %v15466_v34, %v2962_v1  ;;  %v15567_v6 = vld [vmem:[#allocation388_spill] sm:$0xff]  ;;  %v15569_v13 = vld [vmem:[#allocation179_spill] sm:$0xff] }
 0x300   :  { %v11847_v11 = vmul.f32 %v15565_v40, %v4376_v49  ;;  %v15566_v61 = vrot.slane %v11684_v43, 1  ;;  %v2130_v60 = vmul.f32 %v15460_v30, %v1506_v55  ;;  %v15568_v24 = vrot.slane %v15567_v6, 1 }
 0x301   :  { %v1162_v20 = vadd.f32 %v15564_v52, %v1009_v18  ;;  %v15570_v59 = vrot.slane %v15569_v13, 1  ;;  %v1808_v12 = vadd.f32 %v15571_v21, %v1454_v36  ;;  %v15572_v18 = vld [vmem:[#allocation383_spill] sm:$0xff]  ;;  %v11859_v1 = vmul.f32 %v15259_v47, %v4376_v49 }
 0x302   :  { %v1163_v56 = vadd.f32 %v15566_v61, %v1010_v7  ;;  %v1313_v42 = vadd.f32 %v15568_v24, %v1160_v17  ;;  %v1810_v52 = vadd.f32 %v15572_v18, %v1456_v14  ;;  %v1164_v33 = vadd.f32 %v1108_v10, %v1011_v41  ;;  %v15577_v24 = vld [vmem:[#allocation131_spill] sm:$0xff] }
 0x303   :  { %v1300_v0 = vadd.f32 %v15570_v59, %v1147_v37  ;;  %v15574_v2 = vrot.slane %v15573_v27, 1  ;;  %v15575_v7 = vrot.slane %v11687_v32, 1  ;;  %v11868_v37 = vmul.f32 %v15268_v38, %v4376_v49  ;;  %v15581_v13 = vld [vmem:[#allocation223_spill] sm:$0xff]  ;;  %v15587_v38 = vld [vmem:[#allocation109_spill] sm:$0xff] }
 0x304   :  { %v1315_v36 = vadd.f32 %v1259_v62, %v1162_v20  ;;  %v15578_v10 = vrot.slane %v15577_v24, 1  ;;  %v2255_v27 = vrot.slane %v2130_v60, 2  ;;  %v2073_v59 = vadd.f32 %v15581_v13, %v1808_v12  ;;  %v15582_v18 = vld [vmem:[#allocation307_spill] sm:$0xff]  ;;  %v15591_v24 = vld [vmem:[#allocation317_spill] sm:$0xff]  ;;  %v15595_v13 = vld [vmem:[#allocation196_spill] sm:$0xff] }
 0x305   :  { %v1302_v43 = vadd.f32 %v15574_v2, %v1149_v39  ;;  %v1314_v61 = vadd.f32 %v15575_v7, %v1161_v63  ;;  %15576 = vst [vmem:[#allocation440_spill] sm:$0xff] %v11868_v37  ;;  %v1466_v2 = vadd.f32 %v1410_v23, %v1313_v42  ;;  %v15579_v39 = vld [vmem:[#allocation103_spill] sm:$0xff]  ;;  %v2075_v7 = vadd.f32 %v15582_v18, %v1810_v52  ;;  %v15601_v42 = vld [vmem:[#allocation166_spill] sm:$0xff] }
 0x306   :  { %v1316_v41 = vadd.f32 %v15578_v10, %v1163_v56  ;;  %v15580_v32 = vrot.slane %v15579_v39, 1  ;;  %v15583_v17 = vld [vmem:[#allocation143_spill] sm:$0xff]  ;;  %v15588_v21 = vrot.slane %v15587_v38, 1  ;;  %v2391_v56 = vmul.f32 %v15461_v26, %v1506_v55  ;;  %v1550_v38 = vld [vmem:[#allocation2 + $0x130] sm:$0x1] }
 0x307   :  { %v15584_v49 = vrot.slane %v15583_v17, 1  ;;  %v15585_v62 = vld [vmem:[#allocation187_spill] sm:$0xff]  ;;  %v2084_v17 = vadd.f32 %v15591_v24, %v1819_v28  ;;  %v2336_v18 = vadd.f32 %v15595_v13, %v11790_v58 }
 0x308   :  { %v1453_v63 = vadd.f32 %v15580_v32, %v1300_v0  ;;  %v15586_v20 = vrot.slane %v15585_v62, 1  ;;  %v1467_v47 = vadd.f32 %v15588_v21, %v1314_v61  ;;  %v15589_v0 = vld [vmem:[#allocation125_spill] sm:$0xff]  ;;  %v15594_v61 = vrot.slane %v11635_v57, 2  ;;  %v15602_v57 = vld [vmem:[#allocation35_spill] sm:$0xff] }
 0x309   :  { %v1317_v6 = vadd.f32 %v15584_v49, %v1164_v33  ;;  %v15590_v12 = vrot.slane %v15589_v0, 1  ;;  %v15592_v33 = vld [vmem:[#allocation188_spill] sm:$0xff]  ;;  %v2514_v32 = vrot.slane %v2391_v56, 2  ;;  %v1549_v49 = vld [vmem:[#allocation2 + $0x38] sm:$0x1]  ;;  %v15596_v62 = vld [vmem:[#allocation17_spill] sm:$0xff] }
 0x30a   :  { %v1455_v14 = vadd.f32 %v15586_v20, %v1302_v43  ;;  %v15593_v10 = vrot.slane %v15592_v33, 1  ;;  %v11893_v43 = vld [vmem:[#allocation2 + $0x1c0] sm:$0x1]  ;;  %v2256_v21 = vsel %vm1684_vm0, %v15594_v61, %v2255_v27  ;;  %v1807_v20 = vadd.f32 %v15596_v62, %v1453_v63  ;;  %v15603_v27 = vld [vmem:[#allocation385_spill] sm:$0xff] }
 0x30b   :  { %v1468_v52 = vadd.f32 %v15590_v12, %v1315_v36  ;;  %v15597_v36 = vld [vmem:[#allocation455_spill] sm:$0xff]  ;;  %v2340_v28 = vadd.f32 %v2256_v21, %v2075_v7  ;;  %v15598_v12 = vld [vmem:[#allocation13_spill] sm:$0xff]  ;;  %v1821_v23 = vadd.f32 %v15602_v57, %v1467_v47  ;;  %v2129_v58 = vmul.f32 %v15428_v54, %v11893_v43  ;;  %v15606_v47 = vld [vmem:[#allocation250_spill] sm:$0xff] }
 0x30c   :  { %v1469_v39 = vadd.f32 %v15593_v10, %v1316_v41  ;;  %v2338_v0 = vadd.f32 %v15597_v36, %v2073_v59  ;;  %v1820_v24 = vadd.f32 %v15598_v12, %v1466_v2  ;;  %v15599_v41 = vld [vmem:[#allocation126_spill] sm:$0xff]  ;;  %v1809_v60 = vadd.f32 %v15601_v42, %v1455_v14  ;;  %v15607_v13 = vld [vmem:[#allocation191_spill] sm:$0xff] }
 0x30d   :  { %v15600_v33 = vrot.slane %v15599_v41, 1  ;;  %v1822_v56 = vadd.f32 %v15603_v27, %v1468_v52  ;;  %v2158_v61 = vmul.f32 %v15460_v30, %v1550_v38  ;;  %v2652_v63 = vmul.f32 %v15462_v8, %v1506_v55  ;;  %v15604_v59 = vld [vmem:[#allocation386_spill] sm:$0xff]  ;;  %v15611_v57 = vld [vmem:[#allocation167_spill] sm:$0xff] }
 0x30e   :  { %v1823_v7 = vadd.f32 %v15604_v59, %v1469_v39  ;;  %v2157_v2 = vmul.f32 %v15428_v54, %v1549_v49  ;;  %v2419_v21 = vmul.f32 %v15461_v26, %v1550_v38  ;;  %v2072_v42 = vadd.f32 %v15606_v47, %v1807_v20  ;;  %v15608_v12 = vld [vmem:[#allocation174_spill] sm:$0xff]  ;;  %v15613_v59 = vld [vmem:[#allocation331_spill] sm:$0xff] }
 0x30f   :  { %v1470_v10 = vadd.f32 %v15600_v33, %v1317_v6  ;;  %v15605_v6 = vrot.slane %v11639_v9, 2  ;;  %v2605_v62 = vadd.f32 %v15607_v13, %v2340_v28  ;;  %v2773_v36 = vrot.slane %v2652_v63, 2  ;;  %v15609_v41 = vld [vmem:[#allocation298_spill] sm:$0xff]  ;;  %v15610_v33 = vld [vmem:[#allocation336_spill] sm:$0xff]  ;;  %v15617_v47 = vld [vmem:[#allocation91_spill] sm:$0xff] }
 0x310   :  { %v2074_v55 = vadd.f32 %v15609_v41, %v1809_v60  ;;  %v2085_v39 = vadd.f32 %v15610_v33, %v1820_v24  ;;  %v2601_v54 = vadd.f32 %v15611_v57, %v2336_v18  ;;  %v15612_v27 = vld [vmem:[#allocation350_spill] sm:$0xff]  ;;  %v2087_v9 = vadd.f32 %v15613_v59, %v1822_v56  ;;  %v15624_v41 = vld [vmem:[#allocation375_spill] sm:$0xff] }
 0x311   :  { %v2515_v14 = vsel %vm1684_vm0, %v15605_v6, %v2514_v32  ;;  %v1824_v30 = vadd.f32 %v15608_v12, %v1470_v10  ;;  %v2086_v26 = vadd.f32 %v15612_v27, %v1821_v23  ;;  %v2252_v37 = vrot.slane %v2129_v58, 2  ;;  %v15614_v6 = vld [vmem:[#allocation349_spill] sm:$0xff]  ;;  %v15618_v13 = vld [vmem:[#allocation306_spill] sm:$0xff]  ;;  %v15620_v12 = vld [vmem:[#allocation199_spill] sm:$0xff] }
 0x312   :  { %v2603_v52 = vadd.f32 %v2515_v14, %v2338_v0  ;;  %v2297_v32 = vrot.slane %v2158_v61, 2  ;;  %v2088_v20 = vadd.f32 %v15614_v6, %v1823_v7  ;;  %v2294_v0 = vrot.slane %v2157_v2, 2  ;;  %v15616_v14 = vld [vmem:[#allocation26_spill] sm:$0xff]  ;;  %v15625_v33 = vld [vmem:[#allocation371_spill] sm:$0xff]  ;;  %v2920_v27 = vld [vmem:[#allocation2 + $0x1d0] sm:$0x3] }
 0x313   :  { %v2418_v28 = vmul.f32 %v15430_v51, %v1549_v49  ;;  %v2556_v63 = vrot.slane %v2419_v21, 2  ;;  %v2680_v10 = vmul.f32 %v15462_v8, %v1550_v38  ;;  %v15615_v60 = vrot.slane %v11642_v31, 2  ;;  %v15619_v58 = vld [vmem:[#allocation302_spill] sm:$0xff] }
 0x314   :  { %v2868_v18 = vadd.f32 %v15616_v14, %v2603_v52  ;;  %v2870_v23 = vadd.f32 %v15617_v47, %v2605_v62  ;;  %v2089_v56 = vadd.f32 %v15618_v13, %v1824_v30  ;;  %v2337_v61 = vadd.f32 %v15619_v58, %v2072_v42  ;;  %v15631_v14 = vld [vmem:[#allocation255_spill] sm:$0xff] }
 0x315   :  { %v2774_v24 = vsel %vm1684_vm0, %v15615_v60, %v2773_v36  ;;  %v2390_v7 = vmul.f32 %v15430_v51, %v11893_v43  ;;  %v15621_v21 = vrot.slane %v15620_v12, 2  ;;  %v15622_v31 = vrot.slane %v11785_v22, 2  ;;  %v15623_v36 = vld [vmem:[#allocation369_spill] sm:$0xff] }
 0x316   :  { %v2866_v2 = vadd.f32 %v2774_v24, %v2601_v54  ;;  %v2349_v52 = vadd.f32 %v15623_v36, %v2084_v17  ;;  %v2352_v62 = vadd.f32 %v15624_v41, %v2087_v9  ;;  %v2350_v30 = vadd.f32 %v15625_v33, %v2085_v39  ;;  %v15629_v17 = vld [vmem:[#allocation351_spill] sm:$0xff]  ;;  %v15630_v9 = vld [vmem:[#allocation374_spill] sm:$0xff] }
 0x317   :  { %v2253_v8 = vsel %vm1684_vm0, %v15621_v21, %v2252_v37  ;;  %v2298_v38 = vsel %vm1684_vm0, %v15622_v31, %v2297_v32  ;;  %v2553_v57 = vrot.slane %v2418_v28, 2  ;;  %v15626_v42 = vrot.slane %v11809_v15, 2  ;;  %v15628_v32 = vld [vmem:[#allocation318_spill] sm:$0xff]  ;;  %v15640_v31 = vld [vmem:[#allocation297_spill] sm:$0xff] }
 0x318   :  { %v2679_v54 = vmul.f32 %v15376_v3, %v1549_v49  ;;  %v15627_v37 = vrot.slane %v11699_v53, 2  ;;  %v2815_v59 = vrot.slane %v2680_v10, 2  ;;  %v3222_v6 = vadd.f32 %v15628_v32, %v2868_v18  ;;  %v15633_v18 = vld [vmem:[#allocation193_spill] sm:$0xff] }
 0x319   :  { %v2557_v51 = vsel %vm1684_vm0, %v15626_v42, %v2556_v63  ;;  %v3224_v60 = vadd.f32 %v15629_v17, %v2870_v23  ;;  %v2351_v24 = vadd.f32 %v15630_v9, %v2086_v26  ;;  %v2354_v39 = vadd.f32 %v2298_v38, %v2089_v56  ;;  %v15643_v42 = vld [vmem:[#allocation23_spill] sm:$0xff]  ;;  %v2964_v17 = vld [vmem:[#allocation2 + $0x130] sm:$0x3] }
 0x31a   :  { %v2295_v22 = vsel %vm1684_vm0, %v15627_v37, %v2294_v0  ;;  %v2511_v28 = vrot.slane %v2390_v7, 2  ;;  %v3220_v15 = vadd.f32 %v15631_v14, %v2866_v2  ;;  %v2339_v47 = vadd.f32 %v2253_v8, %v2074_v55  ;;  %v15635_v7 = vld [vmem:[#allocation189_spill] sm:$0xff]  ;;  %v15636_v2 = vld [vmem:[#allocation315_spill] sm:$0xff] }
 0x31b   :  { %v2617_v63 = vadd.f32 %v2557_v51, %v2352_v62  ;;  %v2651_v49 = vmul.f32 %v15376_v3, %v11893_v43  ;;  %v3544_v53 = vmul.f32 %v15463_v29, %v2920_v27  ;;  %v2353_v13 = vadd.f32 %v2295_v22, %v2088_v20  ;;  %v15637_v3 = vld [vmem:[#allocation267_spill] sm:$0xff]  ;;  %v15639_v8 = vld [vmem:[#allocation25_spill] sm:$0xff] }
 0x31c   :  { %v15632_v0 = vrot.slane %v11717_v50, 2  ;;  %v2615_v23 = vadd.f32 %v15633_v18, %v2350_v30  ;;  %v2812_v58 = vrot.slane %v2679_v54, 2  ;;  %v15634_v26 = vrot.slane %v11826_v35, 2  ;;  %v15641_v62 = vld [vmem:[#allocation149_spill] sm:$0xff]  ;;  %v15642_v30 = vld [vmem:[#allocation98_spill] sm:$0xff]  ;;  %v15654_v18 = vld [vmem:[#allocation56_spill] sm:$0xff] }
 0x31d   :  { %v3487_v55 = vadd.f32 %v15635_v7, %v3222_v6  ;;  %v3489_v12 = vadd.f32 %v15636_v2, %v3224_v60  ;;  %v3669_v21 = vrot.slane %v3544_v53, 3  ;;  %v15638_v43 = vrot.slane %v15637_v3, 2  ;;  %v15646_v60 = vld [vmem:[#allocation309_spill] sm:$0xff]  ;;  %v15656_v7 = vld [vmem:[#allocation290_spill] sm:$0xff] }
 0x31e   :  { %v2554_v10 = vsel %vm1684_vm0, %v15632_v0, %v2553_v57  ;;  %v2816_v56 = vsel %vm1684_vm0, %v15634_v26, %v2815_v59  ;;  %v2619_v50 = vadd.f32 %v15639_v8, %v2354_v39  ;;  %v3485_v38 = vadd.f32 %v15640_v31, %v3220_v15  ;;  %v15648_v15 = vld [vmem:[#allocation51_spill] sm:$0xff]  ;;  %v15660_v31 = vld [vmem:[#allocation154_spill] sm:$0xff] }
 0x31f   :  { %v2512_v20 = vsel %vm1684_vm0, %v15638_v43, %v2511_v28  ;;  %v3805_v36 = vmul.f32 %v15465_v4, %v2920_v27  ;;  %v2604_v35 = vadd.f32 %v15641_v62, %v2339_v47  ;;  %v2770_v33 = vrot.slane %v2651_v49, 2  ;;  %v15647_v28 = vld [vmem:[#allocation380_spill] sm:$0xff]  ;;  %v15651_v49 = vld [vmem:[#allocation279_spill] sm:$0xff]  ;;  %v15659_v43 = vld [vmem:[#allocation77_spill] sm:$0xff] }
 0x320   :  { %v2602_v41 = vadd.f32 %v2512_v20, %v2337_v61  ;;  %v2882_v57 = vadd.f32 %v15642_v30, %v2617_v63  ;;  %v2614_v51 = vadd.f32 %v15643_v42, %v2349_v52  ;;  %v2616_v54 = vadd.f32 %v2554_v10, %v2351_v24  ;;  %v15649_v24 = vld [vmem:[#allocation64_spill] sm:$0xff]  ;;  %v15650_v63 = vld [vmem:[#allocation287_spill] sm:$0xff] }
 0x321   :  { %v2880_v37 = vadd.f32 %v2816_v56, %v2615_v23  ;;  %v15644_v22 = vrot.slane %v11645_v5, 3  ;;  %v15645_v32 = vrot.slane %v11720_v46, 2  ;;  %v3752_v61 = vadd.f32 %v15646_v60, %v3487_v55  ;;  %v15653_v0 = vld [vmem:[#allocation147_spill] sm:$0xff] }
 0x322   :  { %v3928_v39 = vrot.slane %v3805_v36, 3  ;;  %v2600_v14 = vadd.f32 %v15647_v28, %v11800_v44  ;;  %v2618_v52 = vadd.f32 %v15648_v15, %v2353_v13  ;;  %v2884_v47 = vadd.f32 %v15649_v24, %v2619_v50  ;;  %v12016_v60 = vld [vmem:[#allocation2 + $0x1c0] sm:$0x3] }
 0x323   :  { %v3670_v59 = vsel %vm3098_vm1, %v15644_v22, %v3669_v21  ;;  %v2813_v6 = vsel %vm1684_vm0, %v15645_v32, %v2812_v58  ;;  %v3750_v5 = vadd.f32 %v15650_v63, %v3485_v38  ;;  %v15652_v53 = vrot.slane %v15651_v49, 2  ;;  %v15655_v58 = vld [vmem:[#allocation316_spill] sm:$0xff]  ;;  %v15666_v22 = vld [vmem:[#allocation278_spill] sm:$0xff] }
 0x324   :  { %v3754_v9 = vadd.f32 %v3670_v59, %v3489_v12  ;;  %v2867_v10 = vadd.f32 %v15653_v0, %v2602_v41  ;;  %v2869_v23 = vadd.f32 %v15654_v18, %v2604_v35  ;;  %v3236_v26 = vadd.f32 %v15655_v58, %v2882_v57  ;;  %v15658_v12 = vld [vmem:[#allocation214_spill] sm:$0xff]  ;;  %v15661_v41 = vld [vmem:[#allocation457_spill] sm:$0xff]  ;;  %v15667_v59 = vld [vmem:[#allocation175_spill] sm:$0xff] }
 0x325   :  { %v2771_v46 = vsel %vm1684_vm0, %v15652_v53, %v2770_v33  ;;  %v2879_v56 = vadd.f32 %v2813_v6, %v2614_v51  ;;  %v3234_v55 = vadd.f32 %v15656_v7, %v2880_v37  ;;  %v3572_v44 = vmul.f32 %v15463_v29, %v2964_v17  ;;  %v15662_v29 = vld [vmem:[#allocation85_spill] sm:$0xff]  ;;  %v15663_v33 = vld [vmem:[#allocation308_spill] sm:$0xff]  ;;  %v15677_v58 = vld [vmem:[#allocation19_spill] sm:$0xff] }
 0x326   :  { %v15657_v13 = vrot.slane %v11649_v48, 3  ;;  %v2881_v21 = vadd.f32 %v15658_v12, %v2616_v54  ;;  %v4019_v20 = vadd.f32 %v15659_v43, %v3754_v9  ;;  %v4066_v8 = vmul.f32 %v15466_v34, %v2920_v27  ;;  %v2963_v48 = vld [vmem:[#allocation2 + $0x38] sm:$0x3]  ;;  %v15664_v57 = vld [vmem:[#allocation201_spill] sm:$0xff]  ;;  %v15676_v18 = vld [vmem:[#allocation152_spill] sm:$0xff] }
 0x327   :  { %v12005_v50 = vadd.f32 %v2771_v46, %v2600_v14  ;;  %v3238_v38 = vadd.f32 %v15660_v31, %v2884_v47  ;;  %v3833_v36 = vmul.f32 %v15465_v4, %v2964_v17  ;;  %v4015_v62 = vadd.f32 %v15661_v41, %v3750_v5  ;;  %v15665_v54 = vld [vmem:[#allocation337_spill] sm:$0xff]  ;;  %v15669_v9 = vld [vmem:[#allocation398_spill] sm:$0xff]  ;;  %v15671_v14 = vld [vmem:[#allocation79_spill] sm:$0xff] }
 0x328   :  { %v3929_v2 = vsel %vm3098_vm1, %v15657_v13, %v3928_v39  ;;  %v2883_v35 = vadd.f32 %v15662_v29, %v2618_v52  ;;  %v3221_v30 = vadd.f32 %v15663_v33, %v2867_v10  ;;  %v3501_v42 = vadd.f32 %v15664_v57, %v3236_v26  ;;  %v15668_v4 = vld [vmem:[#allocation333_spill] sm:$0xff]  ;;  %v15672_v52 = vld [vmem:[#allocation80_spill] sm:$0xff]  ;;  %v15673_v47 = vld [vmem:[#allocation234_spill] sm:$0xff] }
 0x329   :  { %v4017_v3 = vadd.f32 %v3929_v2, %v3752_v61  ;;  %v4187_v51 = vrot.slane %v4066_v8, 3  ;;  %v3223_v37 = vadd.f32 %v15665_v54, %v2869_v23  ;;  %v3233_v27 = vadd.f32 %v15666_v22, %v2879_v56  ;;  %v15674_v5 = vld [vmem:[#allocation118_spill] sm:$0xff]  ;;  %v15675_v0 = vld [vmem:[#allocation173_spill] sm:$0xff]  ;;  %v15682_v8 = vld [vmem:[#allocation303_spill] sm:$0xff] }
 0x32a   :  { %v3499_v32 = vadd.f32 %v15667_v59, %v3234_v55  ;;  %v3711_v6 = vrot.slane %v3572_v44, 3  ;;  %v3235_v61 = vadd.f32 %v15668_v4, %v2881_v21  ;;  %v15670_v39 = vrot.slane %v15669_v9, 3  ;;  %v15678_v7 = vld [vmem:[#allocation169_spill] sm:$0xff]  ;;  %v15684_v41 = vld [vmem:[#allocation192_spill] sm:$0xff] }
 0x32b   :  { %v4282_v15 = vadd.f32 %v15671_v14, %v4017_v3  ;;  %v4284_v24 = vadd.f32 %v15672_v52, %v4019_v20  ;;  %v3503_v63 = vadd.f32 %v15673_v47, %v3238_v38  ;;  %v3571_v49 = vmul.f32 %v15674_v5, %v2963_v48  ;;  %v15680_v12 = vld [vmem:[#allocation393_spill] sm:$0xff]  ;;  %v15681_v3 = vld [vmem:[#allocation95_spill] sm:$0xff]  ;;  %v15683_v38 = vld [vmem:[#allocation456_spill] sm:$0xff] }
 0x32c   :  { %v4188_v28 = vsel %vm3098_vm1, %v15670_v39, %v4187_v51  ;;  %v3970_v53 = vrot.slane %v3833_v36, 3  ;;  %v3237_v10 = vadd.f32 %v15675_v0, %v2883_v35  ;;  %v12028_v23 = vadd.f32 %v15676_v18, %v3221_v30  ;;  %v4334_v20 = vld [vmem:[#allocation2 + $0x1d0] sm:$0x7]  ;;  %v15687_v30 = vld [vmem:[#allocation62_spill] sm:$0xff]  ;;  %v15689_v59 = vld [vmem:[#allocation352_spill] sm:$0xff] }
 0x32d   :  { %v4280_v46 = vadd.f32 %v4188_v28, %v4015_v62  ;;  %v3766_v26 = vadd.f32 %v15677_v58, %v3501_v42  ;;  %v4094_v56 = vmul.f32 %v15466_v34, %v2964_v17  ;;  %v3498_v55 = vadd.f32 %v15678_v7, %v3233_v27  ;;  %v15685_v17 = vld [vmem:[#allocation194_spill] sm:$0xff]  ;;  %v15688_v42 = vld [vmem:[#allocation220_spill] sm:$0xff]  ;;  %v15698_v58 = vld [vmem:[#allocation81_spill] sm:$0xff] }
 0x32e   :  { %v3543_v44 = vmul.f32 %v15674_v5, %v12016_v60  ;;  %v15679_v13 = vrot.slane %v11836_v19, 3  ;;  %v3764_v21 = vadd.f32 %v15680_v12, %v3499_v32  ;;  %v3832_v43 = vmul.f32 %v15681_v3, %v2963_v48  ;;  %v15691_v39 = vld [vmem:[#allocation288_spill] sm:$0xff]  ;;  %v15695_v47 = vld [vmem:[#allocation18_spill] sm:$0xff] }
 0x32f   :  { %v4634_v31 = vadd.f32 %v15682_v8, %v4280_v46  ;;  %v4636_v36 = vadd.f32 %v15683_v38, %v4282_v15  ;;  %v4638_v34 = vadd.f32 %v15684_v41, %v4284_v24  ;;  %v3500_v62 = vadd.f32 %v15685_v17, %v3235_v61  ;;  %v15692_v14 = vld [vmem:[#allocation320_spill] sm:$0xff]  ;;  %v15693_v15 = vld [vmem:[#allocation339_spill] sm:$0xff]  ;;  %v15705_v38 = vld [vmem:[#allocation354_spill] sm:$0xff] }
 0x330   :  { %v3712_v2 = vsel %vm3098_vm1, %v15679_v13, %v3711_v6  ;;  %v3708_v29 = vrot.slane %v3571_v49, 3  ;;  %v15686_v33 = vrot.slane %v11839_v16, 3  ;;  %v3488_v57 = vadd.f32 %v15687_v30, %v3223_v37  ;;  %v15690_v6 = vld [vmem:[#allocation390_spill] sm:$0xff]  ;;  %v15706_v41 = vld [vmem:[#allocation395_spill] sm:$0xff] }
 0x331   :  { %v3768_v35 = vadd.f32 %v3712_v2, %v3503_v63  ;;  %v3502_v51 = vadd.f32 %v15688_v42, %v3237_v10  ;;  %v4229_v22 = vrot.slane %v4094_v56, 3  ;;  %v3666_v27 = vrot.slane %v3543_v44, 3  ;;  %v15696_v49 = vld [vmem:[#allocation78_spill] sm:$0xff]  ;;  %v15699_v56 = vld [vmem:[#allocation96_spill] sm:$0xff] }
 0x332   :  { %v3971_v19 = vsel %vm3098_vm1, %v15686_v33, %v3970_v53  ;;  %v3763_v32 = vadd.f32 %v15689_v59, %v3498_v55  ;;  %v4029_v4 = vadd.f32 %v15690_v6, %v3764_v21  ;;  %v4958_v9 = vmul.f32 %v15565_v40, %v4334_v20  ;;  %v15701_v2 = vld [vmem:[#allocation412_spill] sm:$0xff]  ;;  %v15712_v6 = vld [vmem:[#allocation97_spill] sm:$0xff] }
 0x333   :  { %v4031_v54 = vadd.f32 %v3971_v19, %v3766_v26  ;;  %v3967_v61 = vrot.slane %v3832_v43, 3  ;;  %v4899_v28 = vadd.f32 %v15691_v39, %v4634_v31  ;;  %v4901_v16 = vadd.f32 %v15692_v14, %v4636_v36  ;;  %v15703_v43 = vld [vmem:[#allocation462_spill] sm:$0xff]  ;;  %v4378_v31 = vld [vmem:[#allocation2 + $0x130] sm:$0x7]  ;;  %v15709_v33 = vld [vmem:[#allocation84_spill] sm:$0xff] }
 0x334   :  { %v4903_v52 = vadd.f32 %v15693_v15, %v4638_v34  ;;  %v15694_v37 = vrot.slane %v11724_v45, 3  ;;  %v3765_v63 = vadd.f32 %v15695_v47, %v3500_v62  ;;  %v4033_v53 = vadd.f32 %v15696_v49, %v3768_v35  ;;  %v15700_v45 = vld [vmem:[#allocation216_spill] sm:$0xff]  ;;  %v15707_v62 = vld [vmem:[#allocation291_spill] sm:$0xff]  ;;  %v15714_v14 = vld [vmem:[#allocation429_spill] sm:$0xff] }
 0x335   :  { %v5083_v46 = vrot.slane %v4958_v9, 4  ;;  %v15697_v10 = vrot.slane %v11844_v25, 3  ;;  %v4296_v26 = vadd.f32 %v15698_v58, %v4031_v54  ;;  %v5219_v7 = vmul.f32 %v15699_v56, %v4334_v20  ;;  %v15716_v15 = vld [vmem:[#allocation389_spill] sm:$0xff]  ;;  %v15718_v47 = vld [vmem:[#allocation111_spill] sm:$0xff]  ;;  %v15719_v49 = vld [vmem:[#allocation246_spill] sm:$0xff] }
 0x336   :  { %v3709_v24 = vsel %vm3098_vm1, %v15694_v37, %v3708_v29  ;;  %v12067_v55 = vmul.f32 %v15681_v3, %v12016_v60  ;;  %v4093_v44 = vmul.f32 %v15700_v45, %v2963_v48  ;;  %v15702_v12 = vrot.slane %v15701_v2, 4  ;;  %v15717_v37 = vld [vmem:[#allocation225_spill] sm:$0xff]  ;;  %v15725_v2 = vld [vmem:[#allocation470_spill] sm:$0xff] }
 0x337   :  { %v3767_v0 = vadd.f32 %v3709_v24, %v3502_v51  ;;  %v4230_v18 = vsel %vm3098_vm1, %v15697_v10, %v4229_v22  ;;  %v15704_v8 = vrot.slane %v15703_v43, 3  ;;  %v5164_v36 = vadd.f32 %v15705_v38, %v4899_v28  ;;  %v15710_v51 = vld [vmem:[#allocation87_spill] sm:$0xff]  ;;  %v15711_v22 = vld [vmem:[#allocation202_spill] sm:$0xff]  ;;  %v15728_v38 = vld [vmem:[#allocation445_spill] sm:$0xff] }
 0x338   :  { %v4294_v13 = vadd.f32 %v4230_v18, %v4029_v4  ;;  %v5084_v21 = vsel %vm4512_vm2, %v15702_v12, %v5083_v46  ;;  %v5166_v34 = vadd.f32 %v15706_v41, %v4901_v16  ;;  %v15708_v29 = vrot.slane %v15707_v62, 3  ;;  %v15720_v46 = vld [vmem:[#allocation235_spill] sm:$0xff]  ;;  %v15727_v43 = vld [vmem:[#allocation442_spill] sm:$0xff] }
 0x339   :  { %v3968_v25 = vsel %vm3098_vm1, %v15704_v8, %v3967_v61  ;;  %v5168_v17 = vadd.f32 %v5084_v21, %v4903_v52  ;;  %v4298_v19 = vadd.f32 %v15709_v33, %v4033_v53  ;;  %v5342_v30 = vrot.slane %v5219_v7, 4  ;;  %v15713_v61 = vld [vmem:[#allocation322_spill] sm:$0xff]  ;;  %v15721_v18 = vld [vmem:[#allocation247_spill] sm:$0xff]  ;;  %v15722_v7 = vld [vmem:[#allocation424_spill] sm:$0xff] }
 0x33a   :  { %v3667_v35 = vsel %vm3098_vm1, %v15708_v29, %v3666_v27  ;;  %v4030_v48 = vadd.f32 %v3968_v25, %v3765_v63  ;;  %v4032_v54 = vadd.f32 %v15710_v51, %v3767_v0  ;;  %v4650_v59 = vadd.f32 %v15711_v22, %v4296_v26  ;;  %v4377_v26 = vld [vmem:[#allocation2 + $0x38] sm:$0x7]  ;;  %v15732_v29 = vld [vmem:[#allocation115_spill] sm:$0xff]  ;;  %v15736_v51 = vld [vmem:[#allocation88_spill] sm:$0xff] }
 0x33b   :  { %v3753_v42 = vadd.f32 %v3667_v35, %v3488_v57  ;;  %v5480_v4 = vmul.f32 %v15712_v6, %v4334_v20  ;;  %v4226_v9 = vrot.slane %v4093_v44, 3  ;;  %v4648_v39 = vadd.f32 %v15713_v61, %v4294_v13  ;;  %v15730_v41 = vld [vmem:[#allocation86_spill] sm:$0xff] }
 0x33c   :  { %v4986_v28 = vmul.f32 %v15565_v40, %v4378_v31  ;;  %v15715_v16 = vrot.slane %v15714_v14, 4  ;;  %v4028_v52 = vadd.f32 %v15716_v15, %v3763_v32  ;;  %v5429_v24 = vadd.f32 %v15717_v37, %v5164_v36  ;;  %v15723_v32 = vld [vmem:[#allocation113_spill] sm:$0xff] }
 0x33d   :  { %v5433_v63 = vadd.f32 %v15718_v47, %v5168_v17  ;;  %v4295_v53 = vadd.f32 %v15719_v49, %v4030_v48  ;;  %v4652_v20 = vadd.f32 %v15720_v46, %v4298_v19  ;;  %v5247_v0 = vmul.f32 %v15699_v56, %v4378_v31  ;;  %v15734_v48 = vld [vmem:[#allocation176_spill] sm:$0xff] }
 0x33e   :  { %v5343_v27 = vsel %vm4512_vm2, %v15715_v16, %v5342_v30  ;;  %v5601_v10 = vrot.slane %v5480_v4, 4  ;;  %v3925_v40 = vrot.slane %v12067_v55, 3  ;;  %v4297_v58 = vadd.f32 %v15721_v18, %v4032_v54  ;;  %v15735_v19 = vld [vmem:[#allocation376_spill] sm:$0xff] }
 0x33f   :  { %v5431_v57 = vadd.f32 %v5343_v27, %v5166_v34  ;;  %v4915_v44 = vadd.f32 %v15722_v7, %v4650_v59  ;;  %v15726_v12 = vrot.slane %v15725_v2, 3  ;;  %v4913_v8 = vadd.f32 %v15727_v43, %v4648_v39  ;;  %v15737_v59 = vld [vmem:[#allocation459_spill] sm:$0xff]  ;;  %v15738_v39 = vld [vmem:[#allocation221_spill] sm:$0xff]  ;;  %v15740_v27 = vld [vmem:[#allocation426_spill] sm:$0xff] }
 0x340   :  { %v5125_v25 = vrot.slane %v4986_v28, 4  ;;  %v15729_v56 = vrot.slane %v15728_v38, 4  ;;  %v4018_v34 = vadd.f32 %v15730_v41, %v3753_v42  ;;  %v12113_v35 = vadd.f32 %v15732_v29, %v5433_v63  ;;  %v12148_v7 = vld [vmem:[#allocation2 + $0x1c0] sm:$0x7]  ;;  %v15746_v43 = vld [vmem:[#allocation478_spill] sm:$0xff]  ;;  %v15748_v41 = vld [vmem:[#allocation112_spill] sm:$0xff] }
 0x341   :  { %v12100_v13 = vadd.f32 %v15723_v32, %v5431_v57  ;;  %v4227_v21 = vsel %vm3098_vm1, %v15726_v12, %v4226_v9  ;;  %v4649_v33 = vadd.f32 %v15734_v48, %v4295_v53  ;;  %v4917_v30 = vadd.f32 %v15735_v19, %v4652_v20  ;;  %v15743_v20 = vld [vmem:[#allocation266_spill] sm:$0xff]  ;;  %v15749_v48 = vld [vmem:[#allocation460_spill] sm:$0xff] }
 0x342   :  { %v5602_v36 = vsel %vm4512_vm2, %v15729_v56, %v5601_v10  ;;  %v4293_v17 = vadd.f32 %v4227_v21, %v4028_v52  ;;  %15733 = vst [vmem:[#allocation239_spill] sm:$0xff] %v12113_v35  ;;  %v4985_v54 = vmul.f32 %v15736_v51, %v4377_v26  ;;  %v5384_v22 = vrot.slane %v5247_v0, 4  ;;  %v15741_v52 = vld [vmem:[#allocation69_spill] sm:$0xff]  ;;  %v15745_v12 = vld [vmem:[#allocation458_spill] sm:$0xff]  ;;  %v15747_v56 = vld [vmem:[#allocation348_spill] sm:$0xff] }
 0x343   :  { %15724 = vst [vmem:[#allocation180_spill] sm:$0xff] %v12100_v13  ;;  %v12110_v62 = vadd.f32 %v5602_v36, %v5429_v24  ;;  %v5180_v4 = vadd.f32 %v15737_v59, %v4915_v44  ;;  %v5791_v61 = vmul.f32 %v12100_v13, %v12100_v13  ;;  %v4651_v28 = vadd.f32 %v15738_v39, %v4297_v58  ;;  %v15744_v44 = vld [vmem:[#allocation161_spill] sm:$0xff]  ;;  %v15751_v59 = vld [vmem:[#allocation159_spill] sm:$0xff]  ;;  %v15755_v39 = vld [vmem:[#allocation70_spill] sm:$0xff] }
 0x344   :  { %v15739_v14 = vrot.slane %v11847_v11, 4  ;;  %v5178_v15 = vadd.f32 %v15740_v27, %v4913_v8  ;;  %v5508_v24 = vmul.f32 %v15712_v6, %v4378_v31  ;;  %v5756_v57 = vsel %vm5713_vm3, %v12100_v13, 0.0  ;;  %v15757_v27 = vld [vmem:[#allocation480_spill] sm:$0xff] }
 0x345   :  { %15731 = vst [vmem:[#allocation207_spill] sm:$0xff] %v12110_v62  ;;  %v5754_v9 = vsel %vm5713_vm3, %v12110_v62, 0.0  ;;  %v5789_v42 = vmul.f32 %v12110_v62, %v12110_v62  ;;  %v5793_v47 = vmul.f32 %v12113_v35, %v12113_v35  ;;  %v15742_v53 = vrot.slane %v11859_v1, 4 }
 0x346   :  { %v5126_v16 = vsel %vm4512_vm2, %v15739_v14, %v5125_v25  ;;  %v5755_v37 = vadd.f32 %v5754_v9, %v15741_v52  ;;  %v5122_v10 = vrot.slane %v4985_v54, 4  ;;  %v5758_v31 = vsel %vm5713_vm3, %v12113_v35, 0.0  ;;  %v15753_v9 = vld [vmem:[#allocation121_spill] sm:$0xff]  ;;  %v15756_v14 = vld [vmem:[#allocation39_spill] sm:$0xff] }
 0x347   :  { %v5848_v63 = vsel %vm5713_vm3, %v5789_v42, 0.0  ;;  %v5182_v49 = vadd.f32 %v5126_v16, %v4917_v30  ;;  %v5385_v11 = vsel %vm4512_vm2, %v15742_v53, %v5384_v22  ;;  %v5850_v6 = vsel %vm5713_vm3, %v5791_v61, 0.0  ;;  %v15750_v30 = vld [vmem:[#allocation311_spill] sm:$0xff]  ;;  %v15762_v53 = vld [vmem:[#allocation37_spill] sm:$0xff] }
 0x348   :  { %v5757_v46 = vadd.f32 %v5756_v57, %v5755_v37  ;;  %v5849_v0 = vadd.f32 %v5848_v63, %v15743_v20  ;;  %v5445_v18 = vadd.f32 %v5385_v11, %v5180_v4  ;;  %v12146_v58 = vmul.f32 %v15700_v45, %v12016_v60  ;;  %v15764_v20 = vld [vmem:[#allocation249_spill] sm:$0xff] }
 0x349   :  { %v5246_v1 = vmul.f32 %v15744_v44, %v4377_v26  ;;  %v4914_v21 = vadd.f32 %v15745_v12, %v4649_v33  ;;  %v4916_v8 = vadd.f32 %v15746_v43, %v4651_v28  ;;  %v5643_v25 = vrot.slane %v5508_v24, 4  ;;  %v15770_v12 = vld [vmem:[#allocation481_spill] sm:$0xff]  ;;  %v15772_v43 = vld [vmem:[#allocation71_spill] sm:$0xff] }
 0x34a   :  { %v5759_v32 = vadd.f32 %v5758_v31, %v5757_v46  ;;  %v5851_v2 = vadd.f32 %v5850_v6, %v5849_v0  ;;  %v5852_v38 = vsel %vm5713_vm3, %v5793_v47, 0.0  ;;  %v5443_v36 = vadd.f32 %v15747_v56, %v5178_v15  ;;  %v15758_v15 = vld [vmem:[#allocation397_spill] sm:$0xff]  ;;  %v15760_v47 = vld [vmem:[#allocation440_spill] sm:$0xff]  ;;  %v15774_v56 = vld [vmem:[#allocation411_spill] sm:$0xff] }
 0x34b   :  { %v5447_v29 = vadd.f32 %v15748_v41, %v5182_v49  ;;  %v4647_v54 = vadd.f32 %v15750_v30, %v4293_v17  ;;  %v12160_v22 = vmul.f32 %v15736_v51, %v12148_v7  ;;  %v15752_v33 = vrot.slane %v15751_v59, 4  ;;  %v15759_v17 = vld [vmem:[#allocation443_spill] sm:$0xff]  ;;  %v15796_v6 = vld [vmem:[#allocation357_spill] sm:$0xff] }
 0x34c   :  { %v5761_v60 = vadd.f32 %v15749_v48, %v5759_v32  ;;  %v5853_v19 = vadd.f32 %v5852_v38, %v5851_v2  ;;  %v12166_v42 = vadd.f32 %v15753_v9, %v5445_v18  ;;  %v5381_v61 = vrot.slane %v5246_v1, 4  ;;  %v15766_v18 = vld [vmem:[#allocation122_spill] sm:$0xff]  ;;  %v15769_v2 = vld [vmem:[#allocation425_spill] sm:$0xff]  ;;  %v12210_v41 = vld [vmem:[#allocation2 + $0x160] sm:$0xf8] }
 0x34d   :  { %v5123_v4 = vsel %vm4512_vm2, %v15752_v33, %v5122_v10  ;;  %v2062_v52 = vadd.f32 %v15758_v15, %v15757_v27  ;;  %v5179_v37 = vadd.f32 %v15759_v17, %v4914_v21  ;;  %v12175_v57 = vmul.f32 %v15744_v44, %v12148_v7  ;;  %v15768_v1 = vld [vmem:[#allocation146_spill] sm:$0xff]  ;;  %v12219_v30 = vld [vmem:[#allocation2 + $0x120] sm:$0x3]  ;;  %v12228_v9 = vld [vmem:[#allocation2 + $0x240] sm:$0xf8] }
 0x34e   :  { %15754 = vst [vmem:[#allocation268_spill] sm:$0xff] %v12166_v42  ;;  %v5763_v28 = vadd.f32 %v15755_v39, %v5761_v60  ;;  %v5855_v16 = vadd.f32 %v15756_v14, %v5853_v19  ;;  %v5181_v24 = vadd.f32 %v5123_v4, %v4916_v8  ;;  %v15761_v63 = vrot.slane %v15760_v47, 4  ;;  %v15776_v60 = vld [vmem:[#allocation372_spill] sm:$0xff]  ;;  %v12235_v14 = vld [vmem:[#allocation2 + $0x60] sm:$0x3]  ;;  %v15780_v17 = vld [vmem:[#allocation205_spill] sm:$0xff] }
 0x34f   :  { %v15763_v11 = vrot.slane %v15762_v53, 3  ;;  %v12188_v0 = vmul.f32 %v15764_v20, %v4377_v26  ;;  %v12193_v31 = vadd.f32 %v15766_v18, %v5447_v29  ;;  %v12197_v32 = vadd.f32 %v15768_v1, %v4018_v34  ;;  %v15779_v15 = vld [vmem:[#allocation72_spill] sm:$0xff]  ;;  %v15784_v1 = vld [vmem:[#allocation251_spill] sm:$0xff] }
 0x350   :  { %v5644_v49 = vsel %vm4512_vm2, %v15761_v63, %v5643_v25  ;;  %v12200_v55 = vadd.f32 %v15769_v2, %v4647_v54  ;;  %v15771_v21 = vrot.slane %v15770_v12, 4  ;;  %v5765_v8 = vadd.f32 %v15772_v43, %v5763_v28  ;;  %v15773_v25 = vld [vmem:[#allocation178_spill] sm:$0xff] }
 0x351   :  { %v12185_v46 = vsel %vm3098_vm1, %v15763_v11, %v3925_v40  ;;  %v12190_v10 = vadd.f32 %v5644_v49, %v5443_v36  ;;  %15767 = vst [vmem:[#allocation324_spill] sm:$0xff] %v12193_v31  ;;  %v5805_v40 = vmul.f32 %v12166_v42, %v12166_v42  ;;  %v5857_v38 = vadd.f32 %v15773_v25, %v5855_v16  ;;  %v15778_v16 = vld [vmem:[#allocation21_spill] sm:$0xff]  ;;  %v15782_v49 = vld [vmem:[#allocation407_spill] sm:$0xff]  ;;  %v15783_v11 = vld [vmem:[#allocation76_spill] sm:$0xff] }
 0x352   :  { %v5382_v26 = vsel %vm4512_vm2, %v15771_v21, %v5381_v61  ;;  %v2327_v36 = vadd.f32 %v15774_v56, %v2062_v52  ;;  %v12217_v19 = vadd.f32 %v15776_v60, %v5181_v24  ;;  %v5770_v59 = vsel %vm5713_vm3, %v12166_v42, 0.0  ;;  %v15781_v24 = vld [vmem:[#allocation461_spill] sm:$0xff]  ;;  %v15786_v25 = vld [vmem:[#allocation356_spill] sm:$0xff]  ;;  %v15795_v54 = vld [vmem:[#allocation238_spill] sm:$0xff] }
 0x353   :  { %15765 = vst [vmem:[#allocation292_spill] sm:$0xff] %v12190_v10  ;;  %v12214_v48 = vadd.f32 %v5382_v26, %v5179_v37  ;;  %v5803_v33 = vmul.f32 %v12190_v10, %v12190_v10  ;;  %v5807_v4 = vmul.f32 %v12193_v31, %v12193_v31  ;;  %v5768_v61 = vsel %vm5713_vm3, %v12190_v10, 0.0  ;;  %v15788_v56 = vld [vmem:[#allocation341_spill] sm:$0xff] }
 0x354   :  { %15777 = vst [vmem:[#allocation358_spill] sm:$0xff] %v12217_v19  ;;  %v5772_v39 = vsel %vm5713_vm3, %v12193_v31, 0.0  ;;  %v5864_v28 = vsel %vm5713_vm3, %v5805_v40, 0.0  ;;  %v2998_v27 = vmul.f32 %v15778_v16, %v12210_v41  ;;  %v5767_v52 = vadd.f32 %v15779_v15, %v5765_v8  ;;  %v15785_v40 = vld [vmem:[#allocation198_spill] sm:$0xff]  ;;  %v15790_v15 = vld [vmem:[#allocation428_spill] sm:$0xff] }
 0x355   :  { %15775 = vst [vmem:[#allocation343_spill] sm:$0xff] %v12214_v48  ;;  %v5859_v37 = vadd.f32 %v15780_v17, %v5857_v38  ;;  %v2592_v47 = vadd.f32 %v15781_v24, %v2327_v36  ;;  %v3000_v63 = vmul.f32 %v15778_v16, %v12219_v30  ;;  %v3099_v53 = vrot.slane %v15782_v49, 3  ;;  %v15791_v17 = vld [vmem:[#allocation73_spill] sm:$0xff]  ;;  %v15792_v49 = vld [vmem:[#allocation444_spill] sm:$0xff] }
 0x356   :  { %v3100_v18 = vrot.slane %v15783_v11, 3  ;;  %v3105_v2 = vrot.slane %v15784_v1, 3  ;;  %v3106_v12 = vrot.slane %v15785_v40, 3  ;;  %v5862_v21 = vsel %vm5713_vm3, %v5803_v33, 0.0  ;;  %v15793_v11 = vld [vmem:[#allocation158_spill] sm:$0xff] }
 0x357   :  { %v5866_v26 = vsel %vm5713_vm3, %v5807_v4, 0.0  ;;  %v3002_v43 = vmul.f32 %v15778_v16, %v12228_v9  ;;  %v3004_v8 = vmul.f32 %v15778_v16, %v12235_v14  ;;  %v15787_v38 = vrot.slane %v15786_v25, 2  ;;  %v15794_v1 = vld [vmem:[#allocation206_spill] sm:$0xff] }
 0x358   :  { %v15789_v36 = vrot.slane %v15788_v56, 2  ;;  %v2859_v24 = vadd.f32 %v15791_v17, %v15790_v15  ;;  %v2861_v33 = vadd.f32 %v15793_v11, %v15792_v49  ;;  %v3111_v4 = vrot.slane %v15794_v1, 3  ;;  %v6095_v15 = vld [vmem:[#allocation2 + $0x30] sm:$0xf8]  ;;  %v15797_v17 = vld [vmem:[#allocation36_spill] sm:$0xff] }
 0x359   :  { %v5769_v40 = vadd.f32 %v5768_v61, %v5767_v52  ;;  %v5861_v29 = vadd.f32 %v15795_v54, %v5859_v37  ;;  %v3112_v16 = vrot.slane %v15796_v6, 3  ;;  %v3101_v25 = vsel %vm3098_vm1, %v3099_v53, %v3100_v18  ;;  %v6096_v49 = vld [vmem:[#allocation2 + $0xf8] sm:$0x3]  ;;  %v6097_v61 = vld [vmem:[#allocation2 + $0x128] sm:$0xf8] }
 0x35a   :  { %v2747_v60 = vsel %vm1684_vm0, %v15789_v36, %v15787_v38  ;;  %v3107_v56 = vsel %vm3098_vm1, %v3105_v2, %v3106_v12  ;;  %v3117_v31 = vrot.slane %v2998_v27, 3  ;;  %v3118_v38 = vrot.slane %v3000_v63, 3  ;;  %v6098_v52 = vld [vmem:[#allocation2] sm:$0x3] }
 0x35b   :  { %v2857_v34 = vadd.f32 %v2747_v60, %v2592_v47  ;;  %v3123_v36 = vrot.slane %v3002_v43, 3  ;;  %v3124_v42 = vrot.slane %v3004_v8, 3  ;;  %v3252_v10 = vmul.f32 %v6095_v15, %v15797_v17 }
 0x35c   :  { %v3254_v11 = vmul.f32 %v6096_v49, %v15797_v17  ;;  %v3256_v54 = vmul.f32 %v6097_v61, %v15797_v17  ;;  %v3258_v6 = vmul.f32 %v6098_v52, %v15797_v17  ;;  %v3260_v37 = vmul.f32 %v15797_v17, %v12210_v41 }
 0x35d   :  { %v3262_v27 = vmul.f32 %v15797_v17, %v12219_v30  ;;  %v5771_v47 = vadd.f32 %v5770_v59, %v5769_v40  ;;  %v5863_v63 = vadd.f32 %v5862_v21, %v5861_v29  ;;  %v3113_v53 = vsel %vm3098_vm1, %v3111_v4, %v3112_v16  ;;  %v15798_v40 = vld [vmem:[#allocation58_spill] sm:$0xff] }
 0x35e   :  { %v3211_v18 = vadd.f32 %v3101_v25, %v2857_v34  ;;  %v3119_v2 = vsel %vm3098_vm1, %v3117_v31, %v3118_v38  ;;  %v3213_v12 = vadd.f32 %v3107_v56, %v2859_v24  ;;  %v3264_v43 = vmul.f32 %v15797_v17, %v12228_v9 }
 0x35f   :  { %v3266_v8 = vmul.f32 %v15797_v17, %v12235_v14  ;;  %v3125_v60 = vsel %vm3098_vm1, %v3123_v36, %v3124_v42  ;;  %v3215_v1 = vadd.f32 %v3113_v53, %v2861_v33  ;;  %v3364_v15 = vrot.slane %v3252_v10, 3  ;;  %v15799_v17 = vld [vmem:[#allocation155_spill] sm:$0xff] }
 0x360   :  { %v3365_v49 = vrot.slane %v3254_v11, 3  ;;  %v3370_v35 = vrot.slane %v3256_v54, 3  ;;  %v3371_v59 = vrot.slane %v3258_v6, 3  ;;  %v3376_v29 = vrot.slane %v3260_v37, 3 }
 0x361   :  { %v3377_v21 = vrot.slane %v3262_v27, 3  ;;  %v5773_v4 = vadd.f32 %v5772_v39, %v5771_v47  ;;  %v5865_v34 = vadd.f32 %v5864_v28, %v5863_v63  ;;  %v3217_v31 = vadd.f32 %v3119_v2, %v15798_v40 }
 0x362   :  { %v3219_v24 = vadd.f32 %v3125_v60, %v12005_v50  ;;  %v3382_v16 = vrot.slane %v3264_v43, 3  ;;  %v3383_v25 = vrot.slane %v3266_v8, 3  ;;  %v3517_v56 = vmul.f32 %v6097_v61, %v15674_v5  ;;  %v15801_v61 = vld [vmem:[#allocation27_spill] sm:$0xff] }
 0x363   :  { %v3519_v38 = vmul.f32 %v6098_v52, %v15674_v5  ;;  %v3521_v42 = vmul.f32 %v15674_v5, %v12210_v41  ;;  %v3523_v10 = vmul.f32 %v15674_v5, %v12219_v30  ;;  %v3525_v39 = vmul.f32 %v15674_v5, %v12228_v9 }
 0x364   :  { %v3527_v28 = vmul.f32 %v15674_v5, %v12235_v14  ;;  %v3366_v50 = vsel %vm3098_vm1, %v3364_v15, %v3365_v49  ;;  %v3372_v33 = vsel %vm3098_vm1, %v3370_v35, %v3371_v59  ;;  %v3378_v36 = vsel %vm3098_vm1, %v3376_v29, %v3377_v21 }
 0x365   :  { %v15800_v11 = vrot.slane %v15799_v17, 3  ;;  %v15802_v54 = vrot.slane %v15801_v61, 3  ;;  %v5774_v6 = vrot.slane %v5773_v4, 4  ;;  %v12303_v37 = vadd.f32 %v5866_v26, %v5865_v34 }
 0x366   :  { %v3476_v27 = vadd.f32 %v3366_v50, %v3211_v18  ;;  %v3478_v47 = vadd.f32 %v3372_v33, %v3213_v12  ;;  %v3384_v63 = vsel %vm3098_vm1, %v3382_v16, %v3383_v25  ;;  %v3480_v5 = vadd.f32 %v3378_v36, %v3215_v1  ;;  %v15804_v18 = vld [vmem:[#allocation82_spill] sm:$0xff]  ;;  %v15815_v33 = vld [vmem:[#allocation441_spill] sm:$0xff] }
 0x367   :  { %v3390_v52 = vsel %vm3098_vm1, %v15802_v54, %v15800_v11  ;;  %15803 = vst [vmem:[#allocation399_spill] sm:$0xff] %v12303_v37  ;;  %v3629_v53 = vrot.slane %v3517_v56, 3  ;;  %v3630_v2 = vrot.slane %v3519_v38, 3  ;;  %v3635_v43 = vrot.slane %v3521_v42, 3  ;;  %v15805_v12 = vld [vmem:[#allocation74_spill] sm:$0xff]  ;;  %v15812_v38 = vld [vmem:[#allocation256_spill] sm:$0xff] }
 0x368   :  { %v3636_v35 = vrot.slane %v3523_v10, 3  ;;  %v3641_v8 = vrot.slane %v3525_v39, 3  ;;  %v3642_v60 = vrot.slane %v3527_v28, 3  ;;  %v3482_v15 = vadd.f32 %v3384_v63, %v3217_v31  ;;  %v15808_v16 = vld [vmem:[#allocation226_spill] sm:$0xff]  ;;  %v15814_v28 = vld [vmem:[#allocation227_spill] sm:$0xff] }
 0x369   :  { %v3484_v49 = vadd.f32 %v3390_v52, %v3219_v24  ;;  %v3782_v59 = vmul.f32 %v15681_v3, %v12210_v41  ;;  %v3784_v26 = vmul.f32 %v15681_v3, %v12219_v30  ;;  %v12310_v29 = vadd.f32 %v5774_v6, %v5773_v4  ;;  %v15806_v24 = vld [vmem:[#allocation262_spill] sm:$0xff]  ;;  %v15810_v4 = vld [vmem:[#allocation276_spill] sm:$0xff] }
 0x36a   :  { %v3490_v21 = vadd.f32 %v15805_v12, %v15804_v18  ;;  %v3786_v1 = vmul.f32 %v15681_v3, %v12228_v9  ;;  %v3788_v34 = vmul.f32 %v15681_v3, %v12235_v14  ;;  %v3631_v31 = vsel %vm3098_vm1, %v3629_v53, %v3630_v2  ;;  %v15817_v18 = vld [vmem:[#allocation319_spill] sm:$0xff] }
 0x36b   :  { %v15807_v41 = vrot.slane %v15806_v24, 3  ;;  %v15809_v25 = vrot.slane %v15808_v16, 3  ;;  %v15811_v56 = vrot.slane %v15810_v4, 3  ;;  %v15813_v42 = vrot.slane %v15812_v38, 3 }
 0x36c   :  { %v3637_v39 = vsel %vm3098_vm1, %v3635_v43, %v3636_v35  ;;  %v3643_v3 = vsel %vm3098_vm1, %v3641_v8, %v3642_v60  ;;  %v3906_v50 = vrot.slane %v15814_v28, 3  ;;  %v3907_v36 = vrot.slane %v15815_v33, 3  ;;  %v15816_v8 = vld [vmem:[#allocation300_spill] sm:$0xff]  ;;  %v4299_v33 = vld [vmem:[#allocation2 + $0x2b0] sm:$0xf0] }
 0x36d   :  { %v3649_v30 = vsel %vm3098_vm1, %v15809_v25, %v15807_v41  ;;  %v3655_v10 = vsel %vm3098_vm1, %v15813_v42, %v15811_v56  ;;  %v3741_v17 = vadd.f32 %v3631_v31, %v3476_v27  ;;  %v3894_v61 = vrot.slane %v3782_v59, 3  ;;  %v15818_v27 = vld [vmem:[#allocation252_spill] sm:$0xff]  ;;  %v15822_v31 = vld [vmem:[#allocation257_spill] sm:$0xff] }
 0x36e   :  { %v3747_v11 = vadd.f32 %v3649_v30, %v3482_v15  ;;  %v3895_v54 = vrot.slane %v3784_v26, 3  ;;  %v3900_v52 = vrot.slane %v3786_v1, 3  ;;  %v3901_v6 = vrot.slane %v3788_v34, 3  ;;  %v15819_v15 = vld [vmem:[#allocation338_spill] sm:$0xff]  ;;  %v15820_v1 = vld [vmem:[#allocation83_spill] sm:$0xff] }
 0x36f   :  { %v4047_v63 = vmul.f32 %v15700_v45, %v12228_v9  ;;  %v4049_v53 = vmul.f32 %v15700_v45, %v12235_v14  ;;  %v3743_v2 = vadd.f32 %v3637_v39, %v3478_v47  ;;  %v3745_v43 = vadd.f32 %v3643_v3, %v3480_v5  ;;  %v15824_v47 = vld [vmem:[#allocation156_spill] sm:$0xff] }
 0x370   :  { %v3749_v35 = vadd.f32 %v3655_v10, %v3484_v49  ;;  %v3751_v60 = vadd.f32 %v15816_v8, %v12028_v23  ;;  %v3755_v12 = vadd.f32 %v15817_v18, %v3490_v21  ;;  %v3757_v59 = vadd.f32 %v15819_v15, %v15818_v27  ;;  %v15826_v49 = vld [vmem:[#allocation280_spill] sm:$0xff]  ;;  %v6099_v21 = vld [vmem:[#allocation2 + $0xa0] sm:$0xf8]  ;;  %v15828_v18 = vld [vmem:[#allocation65_spill] sm:$0xff] }
 0x371   :  { %v3908_v26 = vsel %vm3098_vm1, %v3906_v50, %v3907_v36  ;;  %v15821_v34 = vrot.slane %v15820_v1, 3  ;;  %v15823_v9 = vrot.slane %v15822_v31, 3  ;;  %v3896_v14 = vsel %vm3098_vm1, %v3894_v61, %v3895_v54  ;;  %v6100_v25 = vld [vmem:[#allocation2 + $0x1a8] sm:$0x3]  ;;  %v6101_v56 = vld [vmem:[#allocation2 + $0x168] sm:$0xf8] }
 0x372   :  { %v15825_v5 = vrot.slane %v15824_v47, 3  ;;  %v15827_v41 = vrot.slane %v15826_v49, 3  ;;  %v4051_v16 = vmul.f32 %v6099_v21, %v15700_v45  ;;  %v4053_v30 = vmul.f32 %v6100_v25, %v15700_v45  ;;  %v4301_v36 = vld [vmem:[#allocation2 + $0x10] sm:$0x7]  ;;  %v4303_v61 = vld [vmem:[#allocation2 + $0x30] sm:$0xf0] }
 0x373   :  { %v3914_v24 = vsel %vm3098_vm1, %v15823_v9, %v15821_v34  ;;  %v3902_v4 = vsel %vm3098_vm1, %v3900_v52, %v3901_v6  ;;  %v4055_v38 = vmul.f32 %v6101_v56, %v15700_v45  ;;  %v4159_v42 = vrot.slane %v4047_v63, 3  ;;  %v6102_v15 = vld [vmem:[#allocation2 + $0x1f8] sm:$0x3]  ;;  %v12362_v1 = vld [vmem:[#allocation2 + $0x128] sm:$0xf0]  ;;  %v15832_v34 = vld [vmem:[#allocation281_spill] sm:$0xff] }
 0x374   :  { %v3920_v23 = vsel %vm3098_vm1, %v15827_v41, %v15825_v5  ;;  %v4160_v10 = vrot.slane %v4049_v53, 3  ;;  %v4006_v39 = vadd.f32 %v3896_v14, %v3741_v17  ;;  %v4008_v3 = vadd.f32 %v3902_v4, %v3743_v2  ;;  %v4305_v6 = vld [vmem:[#allocation2 + $0xf8] sm:$0x7]  ;;  %v12364_v63 = vld [vmem:[#allocation2] sm:$0x7] }
 0x375   :  { %v4010_v28 = vadd.f32 %v3908_v26, %v3745_v43  ;;  %v4012_v50 = vadd.f32 %v3914_v24, %v3747_v11  ;;  %v4014_v54 = vadd.f32 %v3920_v23, %v3749_v35  ;;  %v4016_v8 = vadd.f32 %v12185_v46, %v3751_v60  ;;  %v15829_v17 = vld [vmem:[#allocation66_spill] sm:$0xff]  ;;  %v15830_v43 = vld [vmem:[#allocation484_spill] sm:$0xff]  ;;  %v12372_v60 = vld [vmem:[#allocation2 + $0x160] sm:$0xf0] }
 0x376   :  { %v4020_v27 = vadd.f32 %v15828_v18, %v3755_v12  ;;  %v4057_v52 = vmul.f32 %v6102_v15, %v15700_v45  ;;  %v4022_v53 = vadd.f32 %v15829_v17, %v3757_v59  ;;  %v4165_v2 = vrot.slane %v4051_v16, 3  ;;  %v12374_v12 = vld [vmem:[#allocation2 + $0x120] sm:$0x7]  ;;  %v15834_v9 = vld [vmem:[#allocation90_spill] sm:$0xff]  ;;  %v12379_v59 = vld [vmem:[#allocation2 + $0x240] sm:$0xf0] }
 0x377   :  { %v4166_v11 = vrot.slane %v4053_v30, 3  ;;  %v15831_v26 = vrot.slane %v15830_v43, 3  ;;  %v15833_v35 = vrot.slane %v15832_v34, 3  ;;  %v4161_v45 = vsel %vm3098_vm1, %v4159_v42, %v4160_v10  ;;  %v12381_v47 = vld [vmem:[#allocation2 + $0x60] sm:$0x7]  ;;  %v15836_v25 = vld [vmem:[#allocation38_spill] sm:$0xff] }
 0x378   :  { %v4171_v31 = vrot.slane %v4055_v38, 3  ;;  %v4400_v24 = vmul.f32 %v15834_v9, %v4299_v33  ;;  %v4402_v14 = vmul.f32 %v15834_v9, %v4301_v36  ;;  %v4404_v5 = vmul.f32 %v15834_v9, %v4303_v61  ;;  %v15838_v10 = vld [vmem:[#allocation485_spill] sm:$0xff]  ;;  %v15840_v36 = vld [vmem:[#allocation359_spill] sm:$0xff] }
 0x379   :  { %v4179_v46 = vsel %vm3098_vm1, %v15833_v35, %v15831_v26  ;;  %v4406_v49 = vmul.f32 %v15834_v9, %v4305_v6  ;;  %v4408_v41 = vmul.f32 %v15834_v9, %v12362_v1  ;;  %v4410_v23 = vmul.f32 %v15834_v9, %v12364_v63  ;;  %v12404_v17 = vld [vmem:[#allocation2 + $0xa0] sm:$0xf0] }
 0x37a   :  { %v4172_v21 = vrot.slane %v4057_v52, 3  ;;  %v15835_v16 = vrot.slane %v12146_v58, 3  ;;  %v15837_v30 = vrot.slane %v15836_v25, 3  ;;  %v4412_v56 = vmul.f32 %v15834_v9, %v12372_v60 }
 0x37b   :  { %v4414_v38 = vmul.f32 %v15834_v9, %v12374_v12  ;;  %v4167_v42 = vsel %vm3098_vm1, %v4165_v2, %v4166_v11  ;;  %v15839_v33 = vrot.slane %v15838_v10, 3  ;;  %v15841_v18 = vrot.slane %v15840_v36, 3  ;;  %v15842_v36 = vld [vmem:[#allocation89_spill] sm:$0xff] }
 0x37c   :  { %v4185_v4 = vsel %vm3098_vm1, %v15837_v30, %v15835_v16  ;;  %v4271_v52 = vadd.f32 %v4161_v45, %v4006_v39  ;;  %v4277_v58 = vadd.f32 %v4179_v46, %v4012_v50  ;;  %v4416_v43 = vmul.f32 %v15834_v9, %v12379_v59  ;;  %v12410_v16 = vld [vmem:[#allocation2 + $0x1a8] sm:$0x7] }
 0x37d   :  { %v4203_v15 = vsel %vm3098_vm1, %v15841_v18, %v15839_v33  ;;  %v4418_v26 = vmul.f32 %v15834_v9, %v12381_v47  ;;  %v4513_v34 = vrot.slane %v4400_v24, 4  ;;  %v4514_v35 = vrot.slane %v4402_v14, 4 }
 0x37e   :  { %v4519_v2 = vrot.slane %v4404_v5, 4  ;;  %v4520_v11 = vrot.slane %v4406_v49, 4  ;;  %v4525_v25 = vrot.slane %v4408_v41, 4  ;;  %v4526_v30 = vrot.slane %v4410_v23, 4  ;;  %v15843_v41 = vld [vmem:[#allocation486_spill] sm:$0xff] }
 0x37f   :  { %v4279_v10 = vadd.f32 %v4185_v4, %v4014_v54  ;;  %v4420_v39 = vmul.f32 %v15834_v9, %v12404_v17  ;;  %v4531_v50 = vrot.slane %v4412_v56, 4  ;;  %v4532_v46 = vrot.slane %v4414_v38, 4 }
 0x380   :  { %v4173_v45 = vsel %vm3098_vm1, %v4171_v31, %v4172_v21  ;;  %v4273_v33 = vadd.f32 %v4167_v42, %v4008_v3  ;;  %v4281_v18 = vadd.f32 %v15842_v36, %v4016_v8  ;;  %v4285_v40 = vadd.f32 %v4203_v15, %v4020_v27  ;;  %v15844_v21 = vld [vmem:[#allocation92_spill] sm:$0xff] }
 0x381   :  { %v4275_v24 = vadd.f32 %v4173_v45, %v4010_v28  ;;  %v4422_v14 = vmul.f32 %v15834_v9, %v12410_v16  ;;  %v4537_v5 = vrot.slane %v4416_v43, 4  ;;  %v4538_v49 = vrot.slane %v4418_v26, 4  ;;  %v15845_v43 = vld [vmem:[#allocation491_spill] sm:$0xff] }
 0x382   :  { %v4287_v23 = vadd.f32 %v15843_v41, %v4022_v53  ;;  %v4515_v54 = vsel %vm4512_vm2, %v4513_v34, %v4514_v35  ;;  %v4521_v4 = vsel %vm4512_vm2, %v4519_v2, %v4520_v11  ;;  %v4527_v56 = vsel %vm4512_vm2, %v4525_v25, %v4526_v30 }
 0x383   :  { %v4533_v31 = vsel %vm4512_vm2, %v4531_v50, %v4532_v46  ;;  %v4543_v3 = vrot.slane %v4420_v39, 4  ;;  %v4666_v8 = vmul.f32 %v15844_v21, %v4303_v61  ;;  %v4668_v28 = vmul.f32 %v15844_v21, %v4305_v6  ;;  %v15847_v61 = vld [vmem:[#allocation24_spill] sm:$0xff] }
 0x384   :  { %v4670_v27 = vmul.f32 %v15844_v21, %v12362_v1  ;;  %v4672_v9 = vmul.f32 %v15844_v21, %v12364_v63  ;;  %v4674_v53 = vmul.f32 %v15844_v21, %v12372_v60  ;;  %v4676_v38 = vmul.f32 %v15844_v21, %v12374_v12 }
 0x385   :  { %v4539_v42 = vsel %vm4512_vm2, %v4537_v5, %v4538_v49  ;;  %v4544_v15 = vrot.slane %v4422_v14, 4  ;;  %v15846_v26 = vrot.slane %v15845_v43, 4  ;;  %v15848_v34 = vrot.slane %v15847_v61, 4  ;;  %v15850_v43 = vld [vmem:[#allocation104_spill] sm:$0xff] }
 0x386   :  { %v4625_v35 = vadd.f32 %v4515_v54, %v4271_v52  ;;  %v4627_v2 = vadd.f32 %v4521_v4, %v4273_v33  ;;  %v4629_v11 = vadd.f32 %v4527_v56, %v4275_v24  ;;  %v4678_v25 = vmul.f32 %v15844_v21, %v12379_v59  ;;  %v15849_v4 = vld [vmem:[#allocation101_spill] sm:$0xff]  ;;  %v15851_v61 = vld [vmem:[#allocation488_spill] sm:$0xff] }
 0x387   :  { %v4551_v6 = vsel %vm4512_vm2, %v15848_v34, %v15846_v26  ;;  %v4680_v30 = vmul.f32 %v15844_v21, %v12381_v47  ;;  %v4682_v39 = vmul.f32 %v15844_v21, %v12404_v17  ;;  %v4684_v50 = vmul.f32 %v15844_v21, %v12410_v16  ;;  %v15852_v34 = vld [vmem:[#allocation200_spill] sm:$0xff] }
 0x388   :  { %v4778_v46 = vrot.slane %v4666_v8, 4  ;;  %v4779_v45 = vrot.slane %v4668_v28, 4  ;;  %v4784_v36 = vrot.slane %v4670_v27, 4  ;;  %v4785_v14 = vrot.slane %v4672_v9, 4 }
 0x389   :  { %v4790_v5 = vrot.slane %v4674_v53, 4  ;;  %v4791_v52 = vrot.slane %v4676_v38, 4  ;;  %v4545_v33 = vsel %vm4512_vm2, %v4543_v3, %v4544_v15  ;;  %v4631_v24 = vadd.f32 %v4533_v31, %v4277_v58  ;;  %v15853_v31 = vld [vmem:[#allocation263_spill] sm:$0xff] }
 0x38a   :  { %v4633_v49 = vadd.f32 %v4539_v42, %v4279_v10  ;;  %v4637_v41 = vadd.f32 %v4551_v6, %v12197_v32  ;;  %v4635_v54 = vadd.f32 %v4545_v33, %v4281_v18  ;;  %v4639_v56 = vadd.f32 %v15849_v4, %v4285_v40  ;;  %v15855_v18 = vld [vmem:[#allocation258_spill] sm:$0xff] }
 0x38b   :  { %v4641_v26 = vadd.f32 %v15850_v43, %v4287_v23  ;;  %v4643_v21 = vadd.f32 %v15852_v34, %v15851_v61  ;;  %v4780_v8 = vsel %vm4512_vm2, %v4778_v46, %v4779_v45  ;;  %v4796_v28 = vrot.slane %v4678_v25, 4  ;;  %v15859_v46 = vld [vmem:[#allocation282_spill] sm:$0xff] }
 0x38c   :  { %v4797_v27 = vrot.slane %v4680_v30, 4  ;;  %v4802_v9 = vrot.slane %v4682_v39, 4  ;;  %v4786_v53 = vsel %vm4512_vm2, %v4784_v36, %v4785_v14  ;;  %v4792_v58 = vsel %vm4512_vm2, %v4790_v5, %v4791_v52  ;;  %v15857_v39 = vld [vmem:[#allocation218_spill] sm:$0xff]  ;;  %v12483_v14 = vld [vmem:[#allocation2 + $0x168] sm:$0xf0] }
 0x38d   :  { %v4803_v10 = vrot.slane %v4684_v50, 4  ;;  %v15854_v32 = vrot.slane %v15853_v31, 4  ;;  %v15856_v3 = vrot.slane %v15855_v18, 4  ;;  %v4931_v23 = vmul.f32 %v15736_v51, %v12362_v1  ;;  %v12487_v52 = vld [vmem:[#allocation2 + $0x1f8] sm:$0x7] }
 0x38e   :  { %v4933_v38 = vmul.f32 %v15736_v51, %v12364_v63  ;;  %v4935_v42 = vmul.f32 %v15736_v51, %v12372_v60  ;;  %v4937_v15 = vmul.f32 %v15736_v51, %v12374_v12  ;;  %v4939_v6 = vmul.f32 %v15736_v51, %v12379_v59 }
 0x38f   :  { %v4810_v40 = vsel %vm4512_vm2, %v15856_v3, %v15854_v32  ;;  %v4941_v25 = vmul.f32 %v15736_v51, %v12381_v47  ;;  %v4943_v30 = vmul.f32 %v15736_v51, %v12404_v17  ;;  %v4945_v1 = vmul.f32 %v15736_v51, %v12410_v16 }
 0x390   :  { %v4798_v63 = vsel %vm4512_vm2, %v4796_v28, %v4797_v27  ;;  %v15858_v50 = vrot.slane %v15857_v39, 4  ;;  %v15860_v45 = vrot.slane %v15859_v46, 4  ;;  %v4947_v5 = vmul.f32 %v12483_v14, %v15736_v51 }
 0x391   :  { %v4949_v33 = vmul.f32 %v12487_v52, %v15736_v51  ;;  %v4804_v4 = vsel %vm4512_vm2, %v4802_v9, %v4803_v10  ;;  %v4890_v43 = vadd.f32 %v4780_v8, %v4625_v35  ;;  %v4892_v61 = vadd.f32 %v4786_v53, %v4627_v2  ;;  %v15861_v51 = vld [vmem:[#allocation107_spill] sm:$0xff]  ;;  %v15862_v9 = vld [vmem:[#allocation353_spill] sm:$0xff]  ;;  %v15863_v2 = vld [vmem:[#allocation394_spill] sm:$0xff] }
 0x392   :  { %v4816_v36 = vsel %vm4512_vm2, %v15860_v45, %v15858_v50  ;;  %v4894_v34 = vadd.f32 %v4792_v58, %v4629_v11  ;;  %v5043_v28 = vrot.slane %v4931_v23, 4  ;;  %v5044_v27 = vrot.slane %v4933_v38, 4  ;;  %v15864_v8 = vld [vmem:[#allocation190_spill] sm:$0xff]  ;;  %v15865_v53 = vld [vmem:[#allocation408_spill] sm:$0xff]  ;;  %v15871_v38 = vld [vmem:[#allocation323_spill] sm:$0xff] }
 0x393   :  { %v5049_v31 = vrot.slane %v4935_v42, 4  ;;  %v5050_v32 = vrot.slane %v4937_v15, 4  ;;  %v5055_v18 = vrot.slane %v4939_v6, 4  ;;  %v5056_v3 = vrot.slane %v4941_v25, 4  ;;  %v15873_v25 = vld [vmem:[#allocation236_spill] sm:$0xff] }
 0x394   :  { %v5061_v39 = vrot.slane %v4943_v30, 4  ;;  %v5062_v50 = vrot.slane %v4945_v1, 4  ;;  %v4896_v46 = vadd.f32 %v4798_v63, %v4631_v24  ;;  %v4898_v45 = vadd.f32 %v4804_v4, %v4633_v49  ;;  %v15875_v1 = vld [vmem:[#allocation305_spill] sm:$0xff]  ;;  %v15877_v4 = vld [vmem:[#allocation264_spill] sm:$0xff] }
 0x395   :  { %v5067_v13 = vrot.slane %v4947_v5, 4  ;;  %v5068_v62 = vrot.slane %v4949_v33, 4  ;;  %v4900_v19 = vadd.f32 %v4810_v40, %v4635_v54  ;;  %v4902_v48 = vadd.f32 %v4816_v36, %v4637_v41  ;;  %v15866_v54 = vld [vmem:[#allocation203_spill] sm:$0xff] }
 0x396   :  { %v4904_v37 = vadd.f32 %v15861_v51, %v4639_v56  ;;  %v4906_v35 = vadd.f32 %v15862_v9, %v4641_v26  ;;  %v4908_v11 = vadd.f32 %v15863_v2, %v4643_v21  ;;  %v12497_v58 = vadd.f32 %v15865_v53, %v15864_v8  ;;  %v15868_v40 = vld [vmem:[#allocation283_spill] sm:$0xff] }
 0x397   :  { %v5045_v10 = vsel %vm4512_vm2, %v5043_v28, %v5044_v27  ;;  %v5051_v23 = vsel %vm4512_vm2, %v5049_v31, %v5050_v32  ;;  %v5057_v24 = vsel %vm4512_vm2, %v5055_v18, %v5056_v3  ;;  %v5063_v49 = vsel %vm4512_vm2, %v5061_v39, %v5062_v50  ;;  %v15879_v28 = vld [vmem:[#allocation327_spill] sm:$0xff]  ;;  %v15881_v32 = vld [vmem:[#allocation277_spill] sm:$0xff] }
 0x398   :  { %v15867_v41 = vrot.slane %v15866_v54, 4  ;;  %v15869_v56 = vrot.slane %v15868_v40, 4  ;;  %v15870_v21 = vrot.slane %v12160_v22, 4  ;;  %v15872_v42 = vrot.slane %v15871_v38, 4  ;;  %v15885_v39 = vld [vmem:[#allocation289_spill] sm:$0xff]  ;;  %v15887_v51 = vld [vmem:[#allocation31_spill] sm:$0xff] }
 0x399   :  { %v5069_v6 = vsel %vm4512_vm2, %v5067_v13, %v5068_v62  ;;  %v15874_v30 = vrot.slane %v15873_v25, 4  ;;  %v15876_v63 = vrot.slane %v15875_v1, 4  ;;  %v5196_v5 = vmul.f32 %v15744_v44, %v12372_v60  ;;  %v15883_v62 = vld [vmem:[#allocation362_spill] sm:$0xff]  ;;  %v6105_v1 = vld [vmem:[#allocation2 + $0x270] sm:$0xf0] }
 0x39a   :  { %v5075_v26 = vsel %vm4512_vm2, %v15869_v56, %v15867_v41  ;;  %v5081_v15 = vsel %vm4512_vm2, %v15872_v42, %v15870_v21  ;;  %v5198_v33 = vmul.f32 %v15744_v44, %v12374_v12  ;;  %v15878_v22 = vrot.slane %v15877_v4, 4  ;;  %v6106_v4 = vld [vmem:[#allocation2 + $0x148] sm:$0x7] }
 0x39b   :  { %v5087_v36 = vsel %vm4512_vm2, %v15876_v63, %v15874_v30  ;;  %v15880_v27 = vrot.slane %v15879_v28, 4  ;;  %v15882_v13 = vrot.slane %v15881_v32, 4  ;;  %v15884_v18 = vrot.slane %v15883_v62, 4 }
 0x39c   :  { %v15886_v50 = vrot.slane %v15885_v39, 4  ;;  %v15888_v9 = vrot.slane %v15887_v51, 4  ;;  %v5155_v2 = vadd.f32 %v5045_v10, %v4890_v43  ;;  %v5200_v12 = vmul.f32 %v15744_v44, %v12379_v59 }
 0x39d   :  { %v5093_v31 = vsel %vm4512_vm2, %v15880_v27, %v15878_v22  ;;  %v5099_v3 = vsel %vm4512_vm2, %v15884_v18, %v15882_v13  ;;  %v5202_v8 = vmul.f32 %v15744_v44, %v12381_v47  ;;  %v5204_v53 = vmul.f32 %v15744_v44, %v12404_v17 }
 0x39e   :  { %v5105_v60 = vsel %vm4512_vm2, %v15888_v9, %v15886_v50  ;;  %v5206_v54 = vmul.f32 %v15744_v44, %v12410_v16  ;;  %v5157_v41 = vadd.f32 %v5051_v23, %v4892_v61  ;;  %v5159_v40 = vadd.f32 %v5057_v24, %v4894_v34  ;;  %v15889_v50 = vld [vmem:[#allocation409_spill] sm:$0xff] }
 0x39f   :  { %v5161_v56 = vadd.f32 %v5063_v49, %v4896_v46  ;;  %v5163_v21 = vadd.f32 %v5069_v6, %v4898_v45  ;;  %v12546_v38 = vadd.f32 %v5075_v26, %v4900_v19  ;;  %v12548_v42 = vadd.f32 %v5081_v15, %v4902_v48 }
 0x3a0   :  { %v5308_v43 = vrot.slane %v5196_v5, 4  ;;  %v5309_v10 = vrot.slane %v5198_v33, 4  ;;  %v5208_v25 = vmul.f32 %v12483_v14, %v15744_v44  ;;  %v5210_v30 = vmul.f32 %v12487_v52, %v15744_v44 }
 0x3a1   :  { %v5212_v63 = vmul.f32 %v6105_v1, %v15744_v44  ;;  %v5214_v61 = vmul.f32 %v6106_v4, %v15744_v44  ;;  %v5314_v34 = vrot.slane %v5200_v12, 4  ;;  %v5315_v46 = vrot.slane %v5202_v8, 4 }
 0x3a2   :  { %v5320_v19 = vrot.slane %v5204_v53, 4  ;;  %v5321_v45 = vrot.slane %v5206_v54, 4  ;;  %v12556_v48 = vadd.f32 %v5087_v36, %v4904_v37  ;;  %v12558_v23 = vadd.f32 %v5093_v31, %v4906_v35 }
 0x3a3   :  { %v12560_v24 = vadd.f32 %v5099_v3, %v4908_v11  ;;  %v5461_v49 = vmul.f32 %v15764_v20, %v12379_v59  ;;  %v5310_v26 = vsel %vm4512_vm2, %v5308_v43, %v5309_v10  ;;  %v5463_v15 = vmul.f32 %v15764_v20, %v12381_v47 }
 0x3a4   :  { %v5465_v44 = vmul.f32 %v15764_v20, %v12404_v17  ;;  %v5467_v6 = vmul.f32 %v15764_v20, %v12410_v16  ;;  %v5326_v37 = vrot.slane %v5208_v25, 4  ;;  %v5327_v36 = vrot.slane %v5210_v30, 4 }
 0x3a5   :  { %v5469_v35 = vmul.f32 %v12483_v14, %v15764_v20  ;;  %v5471_v11 = vmul.f32 %v12487_v52, %v15764_v20  ;;  %v5316_v59 = vsel %vm4512_vm2, %v5314_v34, %v5315_v46  ;;  %v5322_v5 = vsel %vm4512_vm2, %v5320_v19, %v5321_v45  ;;  %v6107_v14 = vld [vmem:[#allocation2 + $0x180] sm:$0xf0]  ;;  %v15895_v45 = vld [vmem:[#allocation329_spill] sm:$0xff] }
 0x3a6   :  { %v5332_v33 = vrot.slane %v5212_v63, 4  ;;  %v5333_v47 = vrot.slane %v5214_v61, 4  ;;  %v5473_v22 = vmul.f32 %v6105_v1, %v15764_v20  ;;  %v5475_v17 = vmul.f32 %v6106_v4, %v15764_v20  ;;  %v6108_v63 = vld [vmem:[#allocation2 + $0x70] sm:$0xf0]  ;;  %v6109_v61 = vld [vmem:[#allocation2 + $0x150] sm:$0x7] }
 0x3a7   :  { %v5573_v28 = vrot.slane %v5461_v49, 4  ;;  %v5574_v16 = vrot.slane %v5463_v15, 4  ;;  %v5420_v27 = vadd.f32 %v5310_v26, %v5155_v2  ;;  %v5422_v31 = vadd.f32 %v5316_v59, %v5157_v41  ;;  %v15891_v2 = vld [vmem:[#allocation342_spill] sm:$0xff] }
 0x3a8   :  { %v5579_v32 = vrot.slane %v5465_v44, 4  ;;  %v5580_v13 = vrot.slane %v5467_v6, 4  ;;  %v5477_v62 = vmul.f32 %v6107_v14, %v15764_v20  ;;  %v5479_v52 = vmul.f32 %v15764_v20, %v12148_v7  ;;  %v15897_v44 = vld [vmem:[#allocation29_spill] sm:$0xff]  ;;  %v15899_v59 = vld [vmem:[#allocation438_spill] sm:$0xff] }
 0x3a9   :  { %v5585_v18 = vrot.slane %v5469_v35, 4  ;;  %v5586_v3 = vrot.slane %v5471_v11, 4  ;;  %v5175_v39 = vadd.f32 %v5105_v60, %v12497_v58  ;;  %v12585_v51 = vadd.f32 %v15889_v50, %v12200_v55 }
 0x3aa   :  { %v15890_v9 = vrot.slane %v12175_v57, 4  ;;  %v15892_v12 = vrot.slane %v15891_v2, 4  ;;  %v5424_v53 = vadd.f32 %v5322_v5, %v5159_v40  ;;  %v5328_v54 = vsel %vm4512_vm2, %v5326_v37, %v5327_v36  ;;  %v15898_v37 = vld [vmem:[#allocation373_spill] sm:$0xff] }
 0x3ab   :  { %v5575_v41 = vsel %vm4512_vm2, %v5573_v28, %v5574_v16  ;;  %v5591_v7 = vrot.slane %v5473_v22, 4  ;;  %v5592_v43 = vrot.slane %v5475_v17, 4  ;;  %v5334_v10 = vsel %vm4512_vm2, %v5332_v33, %v5333_v47  ;;  %v15901_v33 = vld [vmem:[#allocation328_spill] sm:$0xff] }
 0x3ac   :  { %v5340_v8 = vsel %vm4512_vm2, %v15892_v12, %v15890_v9  ;;  %v5426_v58 = vadd.f32 %v5328_v54, %v5161_v56  ;;  %v5581_v60 = vsel %vm4512_vm2, %v5579_v32, %v5580_v13  ;;  %v12596_v55 = vadd.f32 %v5575_v41, %v5420_v27  ;;  %v15893_v56 = vld [vmem:[#allocation330_spill] sm:$0xff]  ;;  %v15903_v13 = vld [vmem:[#allocation479_spill] sm:$0xff]  ;;  %v15909_v41 = vld [vmem:[#allocation417_spill] sm:$0xff] }
 0x3ad   :  { %v5587_v57 = vsel %vm4512_vm2, %v5585_v18, %v5586_v3  ;;  %v5597_v25 = vrot.slane %v5477_v62, 4  ;;  %v5598_v30 = vrot.slane %v5479_v52, 4  ;;  %v12599_v1 = vadd.f32 %v5581_v60, %v5422_v31  ;;  %v15905_v62 = vld [vmem:[#allocation363_spill] sm:$0xff]  ;;  %v15913_v60 = vld [vmem:[#allocation364_spill] sm:$0xff] }
 0x3ae   :  { %v5428_v40 = vadd.f32 %v5334_v10, %v5163_v21  ;;  %v5489_v4 = vmul.f32 %v6108_v63, %v15764_v20  ;;  %v5491_v34 = vmul.f32 %v6109_v61, %v15764_v20  ;;  %v12603_v46 = vadd.f32 %v5587_v57, %v5424_v53  ;;  %v15907_v53 = vld [vmem:[#allocation22_spill] sm:$0xff]  ;;  %v15911_v10 = vld [vmem:[#allocation365_spill] sm:$0xff] }
 0x3af   :  { %v15894_v19 = vrot.slane %v15893_v56, 4  ;;  %v15896_v49 = vrot.slane %v15895_v45, 4  ;;  %v5593_v15 = vsel %vm4512_vm2, %v5591_v7, %v5592_v43  ;;  %v5603_v6 = vrot.slane %v15897_v44, 4 }
 0x3b0   :  { %v5604_v21 = vrot.slane %v15898_v37, 4  ;;  %v5430_v36 = vadd.f32 %v5340_v8, %v12546_v38  ;;  %v12614_v35 = vadd.f32 %v5593_v15, %v5426_v58  ;;  %v5714_v20 = vsel %vm5713_vm3, %v12596_v55, 0.0 }
 0x3b1   :  { %v5346_v26 = vsel %vm4512_vm2, %v15896_v49, %v15894_v19  ;;  %v5715_v11 = vsel %vm5713_vm3, %v12599_v1, 0.0  ;;  %v15900_v5 = vrot.slane %v15899_v59, 4  ;;  %v15902_v47 = vrot.slane %v15901_v33, 4  ;;  %v15921_v59 = vld [vmem:[#allocation418_spill] sm:$0xff] }
 0x3b2   :  { %v5432_v17 = vadd.f32 %v5346_v26, %v12548_v42  ;;  %v5599_v28 = vsel %vm4512_vm2, %v5597_v25, %v5598_v30  ;;  %v5716_v16 = vadd.f32 %v5715_v11, %v5714_v20  ;;  %v5615_v38 = vrot.slane %v5489_v4, 4  ;;  %v15919_v20 = vld [vmem:[#allocation265_spill] sm:$0xff] }
 0x3b3   :  { %v5352_v22 = vsel %vm4512_vm2, %v15902_v47, %v15900_v5  ;;  %v5616_v27 = vrot.slane %v5491_v34, 4  ;;  %v12627_v31 = vadd.f32 %v5599_v28, %v5428_v40  ;;  %v5717_v32 = vsel %vm5713_vm3, %v12603_v46, 0.0  ;;  %v15915_v34 = vld [vmem:[#allocation177_spill] sm:$0xff] }
 0x3b4   :  { %v15904_v14 = vrot.slane %v15903_v13, 4  ;;  %v15906_v52 = vrot.slane %v15905_v62, 4  ;;  %v5434_v3 = vadd.f32 %v5352_v22, %v12556_v48  ;;  %v5605_v42 = vsel %vm4512_vm2, %v5603_v6, %v5604_v21  ;;  %v15926_v13 = vld [vmem:[#allocation452_spill] sm:$0xff] }
 0x3b5   :  { %v5718_v50 = vadd.f32 %v5717_v32, %v5716_v16  ;;  %v12638_v9 = vadd.f32 %v5605_v42, %v5430_v36  ;;  %v5719_v2 = vsel %vm5713_vm3, %v12614_v35, 0.0  ;;  %v5780_v12 = vmul.f32 %v12596_v55, %v12596_v55 }
 0x3b6   :  { %v5358_v18 = vsel %vm4512_vm2, %v15906_v52, %v15904_v14  ;;  %v5782_v8 = vmul.f32 %v12599_v1, %v12599_v1  ;;  %v15908_v54 = vrot.slane %v15907_v53, 4  ;;  %v15910_v7 = vrot.slane %v15909_v41, 4 }
 0x3b7   :  { %v5436_v43 = vadd.f32 %v5358_v18, %v12558_v23  ;;  %v15912_v58 = vrot.slane %v15911_v10, 4  ;;  %v15914_v57 = vrot.slane %v15913_v60, 4  ;;  %v5720_v30 = vadd.f32 %v5719_v2, %v5718_v50  ;;  %v15917_v23 = vld [vmem:[#allocation451_spill] sm:$0xff] }
 0x3b8   :  { %v5364_v48 = vsel %vm4512_vm2, %v15910_v7, %v15908_v54  ;;  %v5617_v40 = vsel %vm4512_vm2, %v5615_v38, %v5616_v27  ;;  %v5721_v4 = vsel %vm5713_vm3, %v12627_v31, 0.0  ;;  %v5784_v61 = vmul.f32 %v12603_v46, %v12603_v46  ;;  %v15924_v27 = vld [vmem:[#allocation301_spill] sm:$0xff]  ;;  %v15933_v7 = vld [vmem:[#allocation476_spill] sm:$0xff] }
 0x3b9   :  { %v5611_v25 = vsel %vm4512_vm2, %v15914_v57, %v15912_v58  ;;  %v15916_v56 = vrot.slane %v15915_v34, 4  ;;  %v15918_v19 = vrot.slane %v15917_v23, 4  ;;  %v5438_v49 = vadd.f32 %v5364_v48, %v12560_v24  ;;  %v15931_v54 = vld [vmem:[#allocation157_spill] sm:$0xff] }
 0x3ba   :  { %v12658_v63 = vadd.f32 %v5611_v25, %v5432_v17  ;;  %v12670_v26 = vadd.f32 %v5617_v40, %v5434_v3  ;;  %v5722_v15 = vadd.f32 %v5721_v4, %v5720_v30  ;;  %v5723_v44 = vsel %vm5713_vm3, %v12638_v9, 0.0  ;;  %v15935_v40 = vld [vmem:[#allocation399_spill] sm:$0xff] }
 0x3bb   :  { %v5370_v45 = vsel %vm4512_vm2, %v15918_v19, %v15916_v56  ;;  %v5786_v6 = vmul.f32 %v12614_v35, %v12614_v35  ;;  %v5808_v37 = vsel %vm5713_vm3, %v5780_v12, 0.0  ;;  %v5809_v21 = vsel %vm5713_vm3, %v5782_v8, 0.0  ;;  %v15929_v12 = vld [vmem:[#allocation335_spill] sm:$0xff] }
 0x3bc   :  { %v5440_v36 = vadd.f32 %v5370_v45, %v5175_v39  ;;  %v15920_v11 = vrot.slane %v15919_v20, 4  ;;  %v15922_v5 = vrot.slane %v15921_v59, 4  ;;  %v5724_v33 = vadd.f32 %v5723_v44, %v5722_v15  ;;  %v15923_v39 = vld [vmem:[#allocation68_spill] sm:$0xff] }
 0x3bd   :  { %v5810_v47 = vadd.f32 %v5809_v21, %v5808_v37  ;;  %v5725_v17 = vsel %vm5713_vm3, %v12658_v63, 0.0  ;;  %v5788_v28 = vmul.f32 %v12627_v31, %v12627_v31  ;;  %v5811_v16 = vsel %vm5713_vm3, %v5784_v61, 0.0  ;;  %v15937_v15 = vld [vmem:[#allocation60_spill] sm:$0xff] }
 0x3be   :  { %v5623_v24 = vsel %vm4512_vm2, %v15922_v5, %v15920_v11  ;;  %v5442_v38 = vadd.f32 %v15923_v39, %v12585_v51  ;;  %v15925_v32 = vrot.slane %v15924_v27, 4  ;;  %v15927_v14 = vrot.slane %v15926_v13, 4  ;;  %v15943_v11 = vld [vmem:[#allocation367_spill] sm:$0xff] }
 0x3bf   :  { %v12683_v22 = vadd.f32 %v5623_v24, %v5436_v43  ;;  %v5726_v52 = vadd.f32 %v5725_v17, %v5724_v33  ;;  %v5812_v18 = vadd.f32 %v5811_v16, %v5810_v47  ;;  %v5727_v42 = vsel %vm5713_vm3, %v12670_v26, 0.0  ;;  %v15945_v47 = vld [vmem:[#allocation343_spill] sm:$0xff] }
 0x3c0   :  { %v5629_v62 = vsel %vm4512_vm2, %v15927_v14, %v15925_v32  ;;  %v5790_v50 = vmul.f32 %v12638_v9, %v12638_v9  ;;  %v5813_v2 = vsel %vm5713_vm3, %v5786_v6, 0.0  ;;  %v15928_v51 = vrot.slane %v12188_v0, 4  ;;  %v15939_v6 = vld [vmem:[#allocation366_spill] sm:$0xff] }
 0x3c1   :  { %v12697_v3 = vadd.f32 %v5629_v62, %v5438_v49  ;;  %v15930_v8 = vrot.slane %v15929_v12, 4  ;;  %v15932_v41 = vrot.slane %v15931_v54, 4  ;;  %v15934_v48 = vrot.slane %v15933_v7, 4  ;;  %v15946_v14 = vld [vmem:[#allocation358_spill] sm:$0xff] }
 0x3c2   :  { %v5728_v10 = vadd.f32 %v5727_v42, %v5726_v52  ;;  %v5814_v58 = vadd.f32 %v5813_v2, %v5812_v18  ;;  %v5729_v57 = vsel %vm5713_vm3, %v12683_v22, 0.0  ;;  %v5792_v0 = vmul.f32 %v12658_v63, %v12658_v63 }
 0x3c3   :  { %v5641_v53 = vsel %vm4512_vm2, %v15930_v8, %v15928_v51  ;;  %v5635_v43 = vsel %vm4512_vm2, %v15934_v48, %v15932_v41  ;;  %v5815_v25 = vsel %vm5713_vm3, %v5788_v28, 0.0  ;;  %v5776_v30 = vrot.slane %v12310_v29, 2 }
 0x3c4   :  { %v12714_v60 = vadd.f32 %v5635_v43, %v5440_v36  ;;  %v15936_v4 = vrot.slane %v15935_v40, 4  ;;  %v5730_v34 = vadd.f32 %v5729_v57, %v5728_v10  ;;  %v5816_v56 = vadd.f32 %v5815_v25, %v5814_v58  ;;  %v15941_v36 = vld [vmem:[#allocation368_spill] sm:$0xff] }
 0x3c5   :  { %v12725_v23 = vadd.f32 %v5641_v53, %v5442_v38  ;;  %v5731_v19 = vsel %vm5713_vm3, %v12697_v3, 0.0  ;;  %v5794_v45 = vmul.f32 %v12670_v26, %v12670_v26  ;;  %v5817_v49 = vsel %vm5713_vm3, %v5790_v50, 0.0 }
 0x3c6   :  { %v5869_v61 = vadd.f32 %v15936_v4, %v15935_v40  ;;  %v15938_v44 = vrot.slane %v15937_v15, 4  ;;  %v15940_v37 = vrot.slane %v15939_v6, 4  ;;  %v15942_v20 = vrot.slane %v15941_v36, 4 }
 0x3c7   :  { %v15944_v59 = vrot.slane %v15943_v11, 4  ;;  %v5732_v24 = vadd.f32 %v5731_v19, %v5730_v34  ;;  %v5818_v33 = vadd.f32 %v5817_v49, %v5816_v56  ;;  %v5733_v28 = vsel %vm5713_vm3, %v12714_v60, 0.0 }
 0x3c8   :  { %v5647_v21 = vsel %vm4512_vm2, %v15940_v37, %v15938_v44  ;;  %v5796_v16 = vmul.f32 %v12683_v22, %v12683_v22  ;;  %v5819_v39 = vsel %vm5713_vm3, %v5792_v0, 0.0  ;;  %v5777_v38 = vadd.f32 %v5776_v30, %v12310_v29 }
 0x3c9   :  { %v5653_v5 = vsel %vm4512_vm2, %v15944_v59, %v15942_v20  ;;  %v12743_v17 = vadd.f32 %v5647_v21, %v15945_v47  ;;  %v5870_v27 = vrot.slane %v5869_v61, 2  ;;  %v5734_v32 = vadd.f32 %v5733_v28, %v5732_v24 }
 0x3ca   :  { %v5820_v13 = vadd.f32 %v5819_v39, %v5818_v33  ;;  %v12752_v62 = vadd.f32 %v5653_v5, %v15946_v14  ;;  %v5735_v52 = vsel %vm5713_vm3, %v12725_v23, 0.0  ;;  %v5798_v18 = vmul.f32 %v12697_v3, %v12697_v3 }
 0x3cb   :  { %v5821_v42 = vsel %vm5713_vm3, %v5794_v45, 0.0  ;;  %v5736_v50 = vadd.f32 %v5735_v52, %v5734_v32  ;;  %v5737_v51 = vsel %vm5713_vm3, %v12743_v17, 0.0  ;;  %v5800_v29 = vmul.f32 %v12714_v60, %v12714_v60 }
 0x3cc   :  { %v5822_v2 = vadd.f32 %v5821_v42, %v5820_v13  ;;  %v5823_v12 = vsel %vm5713_vm3, %v5796_v16, 0.0  ;;  %v5778_v8 = vrot.slane %v5777_v38, 1  ;;  %v5871_v53 = vadd.f32 %v5870_v27, %v5869_v61  ;;  %v5887_v42 = vld [vmem:[%s12910_s2] sm:$0x3] }
 0x3cd   :  { %v5738_v54 = vadd.f32 %v5737_v51, %v5736_v50  ;;  %v5739_v7 = vsel %vm5713_vm3, %v12752_v62, 0.0  ;;  %v5802_v48 = vmul.f32 %v12725_v23, %v12725_v23  ;;  %v5825_v43 = vsel %vm5713_vm3, %v5798_v18, 0.0  ;;  %v15947_v50 = vld [vmem:[#allocation5_spill] sm:$0xff] }
 0x3ce   :  { %v5824_v41 = vadd.f32 %v5823_v12, %v5822_v2  ;;  %v5804_v57 = vmul.f32 %v12743_v17, %v12743_v17  ;;  %v5827_v0 = vsel %vm5713_vm3, %v5800_v29, 0.0  ;;  %v5779_v25 = vadd.f32 %v5778_v8, %v5777_v38  ;;  %v15948_v8 = vld [vmem:[#allocation4_spill] sm:$0xff] }
 0x3cf   :  { %v5740_v10 = vadd.f32 %v5739_v7, %v5738_v54  ;;  %v5872_v30 = vrot.slane %v5871_v53, 1  ;;  %v5806_v61 = vmul.f32 %v12752_v62, %v12752_v62  ;;  %v5829_v34 = vsel %vm5713_vm3, %v5802_v48, 0.0 }
 0x3d0   :  { %v5826_v58 = vadd.f32 %v5825_v43, %v5824_v41  ;;  %v5831_v45 = vsel %vm5713_vm3, %v5804_v57, 0.0  ;;  %v5876_v15 = vmul.f32 0.010204081, %v5779_v25  ;;  %v5897_v2 = vrot.slane %v5887_v42, %v15947_v50  ;;  %v15949_v57 = vld [vmem:[#allocation3_spill] sm:$0xff] }
 0x3d1   :  { %v5741_v40 = vrot.slane %v5740_v10, 4  ;;  %v5873_v49 = vadd.f32 %v5872_v30, %v5871_v53  ;;  %v5833_v37 = vsel %vm5713_vm3, %v5806_v61, 0.0  ;;  %v6111_v29 = vmov 1966171168  }
 0x3d2   :  { %v5828_v4 = vadd.f32 %v5827_v0, %v5826_v58  ;;  %v5880_v11 = vmul.f32 %v5876_v15, %v5876_v15  ;;  %v5908_v12 = vunpack.c.l.s4 %v6111_v29  ;;  %v5893_v53 = vrot.slane %v5887_v42, %v15948_v8 }
 0x3d3   :  { %v5742_v56 = vadd.f32 %v5741_v40, %v5740_v10  ;;  %v5878_v20 = vmul.f32 0.010204081, %v5873_v49  ;;  %v15950_v40 = vld [vmem:[#allocation254_spill] sm:$0xff]  ;;  %v15953_v49 = vld [vmem:[#allocation321_spill] sm:$0xff] }
 0x3d4   :  { %v5830_v19 = vadd.f32 %v5829_v34, %v5828_v4  ;;  %v5909_v41 = vunpack.c.0.s8 %v5908_v12  ;;  %v15951_v34 = vld [vmem:[#allocation237_spill] sm:$0xff] }
 0x3d5   :  { %v5743_v44 = vrot.slane %v5742_v56, 2  ;;  %v5882_v47 = vsub.f32 %v5878_v20, %v5880_v11  ;;  %v15956_v20 = vld [vmem:[#allocation239_spill] sm:$0xff] }
 0x3d6   :  { %v5832_v6 = vadd.f32 %v5831_v45, %v5830_v19  ;;  %v5912_v0 = vsub.s32 %v5909_v41, %v15949_v57  ;;  %v15952_v19 = vld [vmem:[#allocation310_spill] sm:$0xff] }
 0x3d7   :  { %v5744_v21 = vadd.f32 %v5743_v44, %v5742_v56  ;;  %v5884_v38 = vadd.f32 1e-05, %v5882_v47 }
 0x3d8   :  { %v5834_v36 = vadd.f32 %v5833_v37, %v5832_v6  ;;  %v15954_v6 = vld [vmem:[#allocation207_spill] sm:$0xff] }
 0x3d9   :  { %v5745_v59 = vrot.slane %v5744_v21, 1  ;;  %6072 = vrsqrt.f32 %v5884_v38 }
 0x3da   :  { %v5835_v5 = vrot.slane %v5834_v36, 4 }
 0x3db   :  { %v5746_v24 = vadd.f32 %v5745_v59, %v5744_v21  ;;  %v15955_v21 = vld [vmem:[#allocation180_spill] sm:$0xff] }
 0x3dc   :  { %v5836_v33 = vadd.f32 %v5835_v5, %v5834_v36  ;;  %v15957_v59 = vld [vmem:[#allocation340_spill] sm:$0xff] }
 0x3dd   :  { %v5875_v39 = vmul.f32 0.010204081, %v5746_v24 }
 0x3de   :  { %v5837_v28 = vrot.slane %v5836_v33, 2 }
 0x3df   :  { %v5879_v13 = vmul.f32 %v5875_v39, %v5875_v39 }
 0x3e0   :  { %v5838_v16 = vadd.f32 %v5837_v28, %v5836_v33  ;;  %v15958_v33 = vld [vmem:[#allocation410_spill] sm:$0xff]  ;;  %v15959_v28 = vld [vmem:[#allocation427_spill] sm:$0xff] }
 0x3e2   :  { %v5839_v27 = vrot.slane %v5838_v16, 1 }
 0x3e4   :  { %v5840_v32 = vadd.f32 %v5839_v27, %v5838_v16 }
 0x3e6   :  { %v5877_v14 = vmul.f32 0.010204081, %v5840_v32  ;;  %v6073_v51 = vpop.eup %6072  ;;  %v15961_v32 = vld [vmem:[#allocation292_spill] sm:$0xff] }
 0x3e7   :  { %v5901_v54 = vmul.f32 %v6073_v51, %v5897_v2 }
 0x3e8   :  { %v5881_v52 = vsub.f32 %v5877_v14, %v5879_v13  ;;  %v15962_v14 = vld [vmem:[#allocation268_spill] sm:$0xff] }
 0x3e9   :  { %v5903_v43 = vmul.f32 %v5901_v54, %v5876_v15  ;;  %v5930_v10 = vrot.slane %v5901_v54, %v15948_v8  ;;  %v5888_v15 = vld [vmem:[%s12911_s3] sm:$0x3] }
 0x3ea   :  { %v5883_v18 = vadd.f32 1e-05, %v5881_v52 }
 0x3eb   :  { %v5932_v4 = vmul.f32 %v5930_v10, %v15950_v40  ;;  %v5934_v56 = vmul.f32 %v5930_v10, %v15951_v34  ;;  %v5936_v45 = vmul.f32 %v5930_v10, %v15952_v19  ;;  %v5938_v44 = vmul.f32 %v5930_v10, %v15953_v49 }
 0x3ec   :  { %6074 = vrsqrt.f32 %v5883_v18  ;;  %v5940_v37 = vmul.f32 %v5930_v10, %v15954_v6  ;;  %v5942_v36 = vmul.f32 %v5930_v10, %v15955_v21  ;;  %v5944_v11 = vmul.f32 %v5930_v10, %v15956_v20  ;;  %v15963_v18 = vld [vmem:[#allocation324_spill] sm:$0xff] }
 0x3ed   :  { %v5946_v5 = vmul.f32 %v5930_v10, %v15957_v59  ;;  %v5948_v47 = vmul.f32 %v5930_v10, %v15958_v33  ;;  %v5950_v16 = vmul.f32 %v5930_v10, %v15959_v28  ;;  %v5954_v13 = vmul.f32 %v5930_v10, %v15961_v32 }
 0x3ee   :  { %v12802_v52 = vmul.f32 %v5930_v10, %v15962_v14  ;;  %v12805_v42 = vmul.f32 %v5930_v10, %v15963_v18 }
 0x3f9   :  { %v6075_v7 = vpop.eup %6074 }
 0x3fa   :  { %v5900_v48 = vmul.f32 %v6075_v7, %v5893_v53 }
 0x3fc   :  { %v5902_v58 = vmul.f32 %v5900_v48, %v5875_v39  ;;  %v5926_v30 = vrot.slane %v5900_v48, %v15948_v8  ;;  %v15960_v39 = vld [vmem:[#allocation67_spill] sm:$0xff] }
 0x3fd   :  { %v5952_v38 = vmul.f32 %v5930_v10, %v15960_v39 }
 0x3fe   :  { %v5906_v25 = vcombine.low %v5902_v58, %v5903_v43  ;;  %v5931_v27 = vmul.f32 %v5926_v30, %v12596_v55  ;;  %v5933_v51 = vmul.f32 %v5926_v30, %v12599_v1  ;;  %v5935_v29 = vmul.f32 %v5926_v30, %v12603_v46 }
 0x3ff   :  { %v5937_v12 = vmul.f32 %v5926_v30, %v12614_v35  ;;  %v5939_v53 = vmul.f32 %v5926_v30, %v12627_v31  ;;  %v5941_v54 = vmul.f32 %v5926_v30, %v12638_v9  ;;  %v5943_v55 = vmul.f32 %v5926_v30, %v12658_v63 }
 0x400   :  { %v5913_v61 = vrot.slane %v5906_v25, %v5912_v0  ;;  %v5945_v41 = vmul.f32 %v5926_v30, %v12670_v26  ;;  %v5947_v43 = vmul.f32 %v5926_v30, %v12683_v22  ;;  %v5949_v1 = vmul.f32 %v5926_v30, %v12697_v3 }
 0x401   :  { %v5951_v46 = vmul.f32 %v5926_v30, %v12714_v60  ;;  %v5953_v35 = vmul.f32 %v5926_v30, %v12725_v23  ;;  %v5955_v31 = vmul.f32 %v5926_v30, %v12743_v17  ;;  %v5957_v9 = vmul.f32 %v5926_v30, %v12752_v62 }
 0x402   :  { %v5920_v24 = vrot.slane %v5913_v61, %v5912_v0 }
 0x404   :  { %v5922_v2 = vsub.f32 %v5888_v15, %v5920_v24 }
 0x406   :  { %v5963_v7 = vrot.slane %v5922_v2, %v15948_v8  ;;  %v5967_v48 = vrot.slane %v5922_v2, %v15947_v50 }
 0x408   :  { %v5970_v10 = vadd.f32 %v5963_v7, %v5931_v27  ;;  %v5971_v63 = vadd.f32 %v5967_v48, %v5932_v4  ;;  %v5972_v58 = vadd.f32 %v5963_v7, %v5933_v51  ;;  %v5973_v26 = vadd.f32 %v5967_v48, %v5934_v56 }
 0x409   :  { %v5974_v57 = vadd.f32 %v5963_v7, %v5935_v29  ;;  %v5975_v8 = vadd.f32 %v5967_v48, %v5936_v45  ;;  %v5976_v0 = vadd.f32 %v5963_v7, %v5937_v12  ;;  %v5977_v50 = vadd.f32 %v5967_v48, %v5938_v44 }
 0x40a   :  { %5998 = vst [vmem:[%s12912_s4] sm:$0x7f] %v5970_v10  ;;  %5999 = vst [vmem:[%s12912_s4 + $0x8] sm:$0x7f] %v5971_v63  ;;  %v5978_v22 = vadd.f32 %v5963_v7, %v5939_v53  ;;  %v5979_v3 = vadd.f32 %v5967_v48, %v5940_v37  ;;  %v5980_v60 = vadd.f32 %v5963_v7, %v5941_v54 }
 0x40b   :  { %6000 = vst [vmem:[%s12912_s4 + $0x10] sm:$0x7f] %v5972_v58  ;;  %6001 = vst [vmem:[%s12912_s4 + $0x18] sm:$0x7f] %v5973_v26  ;;  %v5981_v23 = vadd.f32 %v5967_v48, %v5942_v36  ;;  %v5982_v17 = vadd.f32 %v5963_v7, %v5943_v55  ;;  %v5983_v62 = vadd.f32 %v5967_v48, %v5944_v11 }
 0x40c   :  { %6002 = vst [vmem:[%s12912_s4 + $0x20] sm:$0x7f] %v5974_v57  ;;  %6003 = vst [vmem:[%s12912_s4 + $0x28] sm:$0x7f] %v5975_v8  ;;  %v5984_v25 = vadd.f32 %v5963_v7, %v5945_v41  ;;  %v5985_v30 = vadd.f32 %v5967_v48, %v5946_v5  ;;  %v5986_v40 = vadd.f32 %v5963_v7, %v5947_v43 }
 0x40d   :  { %6004 = vst [vmem:[%s12912_s4 + $0x30] sm:$0x7f] %v5976_v0  ;;  %6005 = vst [vmem:[%s12912_s4 + $0x38] sm:$0x7f] %v5977_v50  ;;  %v5987_v4 = vadd.f32 %v5967_v48, %v5948_v47  ;;  %v5988_v61 = vadd.f32 %v5963_v7, %v5949_v1  ;;  %v5989_v34 = vadd.f32 %v5967_v48, %v5950_v16 }
 0x40e   :  { %6006 = vst [vmem:[%s12912_s4 + $0x40] sm:$0x7f] %v5978_v22  ;;  %6007 = vst [vmem:[%s12912_s4 + $0x48] sm:$0x7f] %v5979_v3  ;;  %v5990_v56 = vadd.f32 %v5963_v7, %v5951_v46  ;;  %v5991_v19 = vadd.f32 %v5967_v48, %v5952_v38  ;;  %v5992_v45 = vadd.f32 %v5963_v7, %v5953_v35 }
 0x40f   :  { %6008 = vst [vmem:[%s12912_s4 + $0x50] sm:$0x7f] %v5980_v60  ;;  %6009 = vst [vmem:[%s12912_s4 + $0x58] sm:$0x7f] %v5981_v23  ;;  %v5993_v49 = vadd.f32 %v5967_v48, %v5954_v13  ;;  %v5994_v44 = vadd.f32 %v5963_v7, %v5955_v31  ;;  %v5995_v15 = vadd.f32 %v5967_v48, %v12802_v52 }
 0x410   :  { %6010 = vst [vmem:[%s12912_s4 + $0x60] sm:$0x7f] %v5982_v17  ;;  %6011 = vst [vmem:[%s12912_s4 + $0x68] sm:$0x7f] %v5983_v62  ;;  %v5996_v6 = vadd.f32 %v5963_v7, %v5957_v9  ;;  %v5997_v37 = vadd.f32 %v5967_v48, %v12805_v42 }
 0x411   :  { %6012 = vst [vmem:[%s12912_s4 + $0x70] sm:$0x7f] %v5984_v25  ;;  %6013 = vst [vmem:[%s12912_s4 + $0x78] sm:$0x7f] %v5985_v30 }
 0x412   :  { %6014 = vst [vmem:[%s12912_s4 + $0x80] sm:$0x7f] %v5986_v40  ;;  %6015 = vst [vmem:[%s12912_s4 + $0x88] sm:$0x7f] %v5987_v4 }
 0x413   :  { %6016 = vst [vmem:[%s12912_s4 + $0x90] sm:$0x7f] %v5988_v61  ;;  %6017 = vst [vmem:[%s12912_s4 + $0x98] sm:$0x7f] %v5989_v34 }
 0x414   :  { %6018 = vst [vmem:[%s12912_s4 + $0xa0] sm:$0x7f] %v5990_v56  ;;  %6019 = vst [vmem:[%s12912_s4 + $0xa8] sm:$0x7f] %v5991_v19 }
 0x415   :  { %6020 = vst [vmem:[%s12912_s4 + $0xb0] sm:$0x7f] %v5992_v45  ;;  %6021 = vst [vmem:[%s12912_s4 + $0xb8] sm:$0x7f] %v5993_v49 }
 0x416   :  { %6022 = vst [vmem:[%s12912_s4 + $0xc0] sm:$0x7f] %v5994_v44  ;;  %6023 = vst [vmem:[%s12912_s4 + $0xc8] sm:$0x7f] %v5995_v15 }
 0x417   :  { %6024 = vst [vmem:[%s12912_s4 + $0xd0] sm:$0x7f] %v5996_v6  ;;  %6025 = vst [vmem:[%s12912_s4 + $0xd8] sm:$0x7f] %v5997_v37 }

</bundles_post_ra>
